<compile_context>
chip_gen: v7x
topology: tpu7x:2x2x1
jax: 0.10.0
libtpu: 0.0.40
codegen_flags: <defaults>
</compile_context>

<pallas_src>
import jax
import jax.numpy as jnp
from jax.experimental import pallas as pl
from jax.experimental.pallas import tpu as pltpu

C = 64            # channels fixed by the module definition
EPS = 1e-5        # nn.BatchNorm2d default eps
BF16 = jnp.bfloat16


# ---------------------------------------------------------------------------
# in-kernel helpers
# ---------------------------------------------------------------------------
def _conv3x3_k576(src_ref, w_ref, H, W):
    """3x3 'SAME' conv from a zero-padded bf16 ref via ONE K=576 MXU matmul.

    src_ref : (1, H+2, W+2, C) bf16 ref with the zero halo already in place
    w_ref   : (9*C, C) bf16 ref, rows ordered (ky, kx, in_channel)
    returns : (H*W, C) f32
    """
    Cc = src_ref.shape[-1]
    taps = [src_ref[0, ky:ky + H, kx:kx + W, :]          # bf16, no casts
            for ky in range(3) for kx in range(3)]
    patch = jnp.concatenate(taps, axis=-1).reshape(H * W, 9 * Cc)
    return jnp.dot(patch, w_ref[...], preferred_element_type=jnp.float32)


def _partial_stats(y, count):
    """Per-image centered partials [mean, M2] over the pixel axis -> (2, C) f32."""
    m = jnp.sum(y, axis=0, keepdims=True) * (1.0 / count)
    d = y - m
    m2 = jnp.sum(d * d, axis=0, keepdims=True)
    return jnp.concatenate([m, m2], axis=0)


def _write_padded(pad_scr, interior_f32, H, W):
    """Write (H*W, C) f32 into the bf16 pad scratch with a zero 1-pixel halo.

    The halo is re-zeroed every grid step: the grid axis is "parallel", so the
    scratch is per-core on multi-core parts and a program_id()==0 guard would
    leave one core's halo uninitialized.  The halo is tiny, so this is cheap.
    """
    Cc = pad_scr.shape[-1]
    Hp, Wp = H + 2, W + 2
    zc = jnp.zeros((1, H, 1, Cc), pad_scr.dtype)
    body = interior_f32.reshape(1, H, W, Cc).astype(pad_scr.dtype)
    pad_scr[:, 1:H + 1, :, :] = jnp.concatenate([zc, body, zc], axis=2)
    zr = jnp.zeros((1, 1, Wp, Cc), pad_scr.dtype)
    pad_scr[:, 0:1, :, :] = zr
    pad_scr[:, Hp - 1:Hp, :, :] = zr


# ---------------------------------------------------------------------------
# pass 1: conv1 (in-kernel zero pad) + BN1 partial stats (one image / step)
# ---------------------------------------------------------------------------
def _conv1_kernel(x_ref, w_ref, y_ref, st_ref, pad_scr):
    _, H, W, Cc = x_ref.shape
    _write_padded(pad_scr, x_ref[...].reshape(H * W, Cc), H, W)
    y = _conv3x3_k576(pad_scr, w_ref, H, W)                 # (H*W, C) f32
    y_ref[...] = y.reshape(1, H, W, Cc).astype(y_ref.dtype)  # bf16 to HBM
    st_ref[...] = _partial_stats(y, H * W).reshape(1, 2, Cc)


# ---------------------------------------------------------------------------
# pass 2: BN1 + PReLU1 + conv2 + BN2 partial stats (one image / step)
# ---------------------------------------------------------------------------
def _bn_act_conv2_kernel(y1_ref, sc_ref, bi_ref, a_ref, w_ref,
                         y2_ref, st_ref, pad_scr):
    _, H, W, Cc = y1_ref.shape
    z = y1_ref[...].astype(jnp.float32).reshape(H * W, Cc) * sc_ref[...] \
        + bi_ref[...]
    h = jnp.where(z >= 0, z, a_ref[...] * z)
    _write_padded(pad_scr, h, H, W)
    y2 = _conv3x3_k576(pad_scr, w_ref, H, W)
    y2_ref[...] = y2.reshape(1, H, W, Cc).astype(y2_ref.dtype)  # bf16 to HBM
    st_ref[...] = _partial_stats(y2, H * W).reshape(1, 2, Cc)


# ---------------------------------------------------------------------------
# pass 3: BN2 + PReLU2 + residual, lane-dense (rows, 128) view
# ---------------------------------------------------------------------------
def _bn_act_residual_kernel(y2_ref, x_ref, sc_ref, bi_ref, a_ref, o_ref):
    z = y2_ref[...].astype(jnp.float32) * sc_ref[...] + bi_ref[...]
    h = jnp.where(z >= 0, z, a_ref[...] * z)
    o_ref[...] = h + x_ref[...]


# ---------------------------------------------------------------------------
# host-side helpers
# ---------------------------------------------------------------------------
def _pack_w(w):
    # PyTorch (O, I, 3, 3) -> (9*I, O) bf16, row order (ky, kx, in_channel),
    # matching the tap-concatenation order of the K=576 im2col patch.
    return jnp.transpose(w, (2, 3, 1, 0)).reshape(9 * C, C).astype(BF16)


def _stats_to_scale_shift(stats, gamma, beta, per_image_count):
    # stats: (N, 2, C) of per-image (mean, centered sum of squares).
    # Exact parallel-variance merge; biased variance (training-mode BN).
    means = stats[:, 0, :]
    m2 = stats[:, 1, :]
    n_img = stats.shape[0]
    mean = jnp.mean(means, axis=0)
    var = (jnp.sum(m2, axis=0)
           + per_image_count * jnp.sum((means - mean) ** 2, axis=0)) \
          / (n_img * per_image_count)
    scale = gamma * jax.lax.rsqrt(jnp.maximum(var, 0.0) + EPS)
    shift = beta - mean * scale
    return scale, shift


def _row_tile(m):
    for t in (4096, 2048, 1024, 512, 256, 128, 64, 32, 16, 8):
        if m % t == 0:
            return t
    return m


def _vmem_budget():
    # ~3/4 of physical VMEM: ~48 MiB on v7x (64 MiB/core), ~96 MiB on v5e/v6e.
    try:
        cap = int(pltpu.get_tpu_info().vmem_capacity_bytes)
    except Exception:
        cap = 64 * 1024 * 1024          # conservative fallback (v7x-sized)
    return (3 * cap) // 4


def _vmem_limit(n_bytes):
    return int(min(max(2 * n_bytes, 32 * 1024 * 1024), _vmem_budget()))


# ---------------------------------------------------------------------------
# wrapper
# ---------------------------------------------------------------------------
def generator_residual_block(x_nchw, p):
    """x_nchw: (N, 64, H, W) float32 -> (N, 64, H, W) float32."""
    N, Cc, H, W = x_nchw.shape
    assert Cc == C
    Hp, Wp = H + 2, W + 2
    f32 = jnp.float32

    # NCHW -> NHWC (channels on lanes); residual path stays f32.
    x = jnp.transpose(x_nchw, (0, 2, 3, 1)).astype(f32)

    w1, w2 = _pack_w(p['w1']), _pack_w(p['w2'])
    # conv biases b1/b2 are intentionally NOT used: they cancel exactly under
    # training-mode BatchNorm (mean subtraction), so dropping them is lossless.
    a1 = jnp.tile(p['a1'].reshape(1, 1).astype(f32), (1, C))

    vec_spec = pl.BlockSpec((1, C), lambda n: (0, 0))
    w_spec = pl.BlockSpec((9 * C, C), lambda n: (0, 0))

    # ---- pass 1: conv1 + per-image BN1 partial sums --------------------------
    p1_bytes = (2 * H * W * C * 4 + 2 * H * W * C * 2 + Hp * Wp * C * 2
                + 9 * C * C * 2 + H * W * C * (9 * 2 + 8))
    y1, st1 = pl.pallas_call(
        _conv1_kernel,
        grid=(N,),
        in_specs=[pl.BlockSpec((1, H, W, C), lambda n: (n, 0, 0, 0)), w_spec],
        out_specs=[pl.BlockSpec((1, H, W, C), lambda n: (n, 0, 0, 0)),
                   pl.BlockSpec((1, 2, C), lambda n: (n, 0, 0))],
        out_shape=(jax.ShapeDtypeStruct((N, H, W, C), BF16),
                   jax.ShapeDtypeStruct((N, 2, C), f32)),
        scratch_shapes=[pltpu.VMEM((1, Hp, Wp, C), BF16)],
        compiler_params=pltpu.CompilerParams(
            dimension_semantics=("parallel",),
            vmem_limit_bytes=_vmem_limit(p1_bytes)),
    )(x, w1)

    sc1, sh1 = _stats_to_scale_shift(st1, p['g1'], p['be1'], H * W)

    # ---- pass 2: BN1 + PReLU1 + conv2 + per-image BN2 partial sums -----------
    p2_bytes = (2 * H * W * C * 2 + 2 * H * W * C * 2 + Hp * Wp * C * 2
                + 9 * C * C * 2 + H * W * C * (9 * 2 + 12))
    y2, st2 = pl.pallas_call(
        _bn_act_conv2_kernel,
        grid=(N,),
        in_specs=[pl.BlockSpec((1, H, W, C), lambda n: (n, 0, 0, 0)),
                  vec_spec, vec_spec, vec_spec, w_spec],
        out_specs=[pl.BlockSpec((1, H, W, C), lambda n: (n, 0, 0, 0)),
                   pl.BlockSpec((1, 2, C), lambda n: (n, 0, 0))],
        out_shape=(jax.ShapeDtypeStruct((N, H, W, C), BF16),
                   jax.ShapeDtypeStruct((N, 2, C), f32)),
        scratch_shapes=[pltpu.VMEM((1, Hp, Wp, C), BF16)],
        compiler_params=pltpu.CompilerParams(
            dimension_semantics=("parallel",),
            vmem_limit_bytes=_vmem_limit(p2_bytes)),
    )(y1, sc1.reshape(1, C), sh1.reshape(1, C), a1, w2)

    sc2, sh2 = _stats_to_scale_shift(st2, p['g2'], p['be2'], H * W)

    # ---- pass 3: BN2 + PReLU2 + residual, lane-dense flat view ---------------
    nhw = N * H * W
    lanes = 2 * C if (nhw % 2 == 0) else C       # 128 lanes whenever possible
    rep = lanes // C
    m = nhw * C // lanes
    tm = _row_tile(m)
    p3_bytes = 2 * tm * lanes * (2 + 4 + 4)      # y2 bf16 + x f32 + out f32
    out_flat = pl.pallas_call(
        _bn_act_residual_kernel,
        grid=(m // tm,),
        in_specs=[pl.BlockSpec((tm, lanes), lambda i: (i, 0)),
                  pl.BlockSpec((tm, lanes), lambda i: (i, 0)),
                  pl.BlockSpec((1, lanes), lambda i: (0, 0)),
                  pl.BlockSpec((1, lanes), lambda i: (0, 0)),
                  pl.BlockSpec((1, lanes), lambda i: (0, 0))],
        out_specs=pl.BlockSpec((tm, lanes), lambda i: (i, 0)),
        out_shape=jax.ShapeDtypeStruct((m, lanes), f32),
        compiler_params=pltpu.CompilerParams(
            dimension_semantics=("parallel",),
            vmem_limit_bytes=_vmem_limit(p3_bytes)),
    )(y2.reshape(m, lanes), x.reshape(m, lanes),
      jnp.tile(sc2, rep).reshape(1, lanes),
      jnp.tile(sh2, rep).reshape(1, lanes),
      jnp.broadcast_to(p['a2'].astype(f32).reshape(1, 1), (1, lanes)))

    out = out_flat.reshape(N, H, W, C)
    return jnp.transpose(out, (0, 3, 1, 2))      # back to NCHW


# ---------------------------------------------------------------------------
# parameters + pure-JAX reference
# ---------------------------------------------------------------------------
def init_params(key):
    ks = jax.random.split(key, 8)
    return dict(
        w1=0.05 * jax.random.normal(ks[0], (C, C, 3, 3), jnp.float32),
        b1=0.05 * jax.random.normal(ks[1], (C,), jnp.float32),
        g1=1.0 + 0.1 * jax.random.normal(ks[2], (C,), jnp.float32),
        be1=0.1 * jax.random.normal(ks[3], (C,), jnp.float32),
        a1=jnp.array([0.25], jnp.float32),          # nn.PReLU() init
        w2=0.05 * jax.random.normal(ks[4], (C, C, 3, 3), jnp.float32),
        b2=0.05 * jax.random.normal(ks[5], (C,), jnp.float32),
        g2=1.0 + 0.1 * jax.random.normal(ks[6], (C,), jnp.float32),
        be2=0.1 * jax.random.normal(ks[7], (C,), jnp.float32),
        a2=jnp.array([0.25], jnp.float32),
    )


def ref_forward(x_nchw, p):
    """Pure-JAX f32 reference of the PyTorch forward (training-mode BN)."""
    x = jnp.transpose(x_nchw, (0, 2, 3, 1))

    def conv(y, w, b):
        whwio = jnp.transpose(w, (2, 3, 1, 0))
        out = jax.lax.conv_general_dilated(
            y, whwio, (1, 1), 'SAME',
            dimension_numbers=('NHWC', 'HWIO', 'NHWC'))
        return out + b.reshape(1, 1, 1, -1)

    def bn(y, g, be):
        m = jnp.mean(y, axis=(0, 1, 2), keepdims=True)
        v = jnp.mean((y - m) ** 2, axis=(0, 1, 2), keepdims=True)
        return (y - m) / jnp.sqrt(v + EPS) * g.reshape(1, 1, 1, -1) \
               + be.reshape(1, 1, 1, -1)

    def prelu(y, a):
        return jnp.where(y >= 0, y, a[0] * y)

    h = prelu(bn(conv(x, p['w1'], p['b1']), p['g1'], p['be1']), p['a1'])
    h = prelu(bn(conv(h, p['w2'], p['b2']), p['g2'], p['be2']), p['a2'])
    return jnp.transpose(h + x, (0, 3, 1, 2))


if __name__ == "__main__":
    key = jax.random.PRNGKey(0)
    kx_, kp_ = jax.random.split(key)
    x = jax.random.normal(kx_, (2, C, 16, 16), jnp.float32)   # NCHW like PyTorch
    params = init_params(kp_)

    fwd = jax.jit(generator_residual_block)
    y = jax.block_until_ready(fwd(x, params))

    y_ref = ref_forward(x, params)
    err = float(jnp.max(jnp.abs(y - y_ref)))
    # bf16 MXU operands + bf16 y1/y2 intermediates (f32 accumulation/stats)
    # bound the error to roughly the 1e-2 scale on O(1) outputs.
    assert err < 1e-1, f"mismatch vs reference: max abs diff = {err}"

    print("KERNEL_OK")
</pallas_src>

<mosaic_0001>
module attributes {stable_mosaic.version = 11 : i64} {
  func.func @_conv1_kernel(%arg0: i32, %arg1: memref<1x16x16x64xf32, #tpu.memory_space<vmem>>, %arg2: memref<576x64xbf16, #tpu.memory_space<vmem>>, %arg3: memref<1x16x16x64xbf16, #tpu.memory_space<vmem>>, %arg4: memref<1x2x64xf32, #tpu.memory_space<vmem>>, %arg5: memref<1x18x18x64xbf16, #tpu.memory_space<vmem>>) attributes {dimension_semantics = [#tpu.dimension_semantics<parallel>], iteration_bounds = array<i64: 2>, scalar_prefetch = 0 : i64, scratch_operands = 1 : i64, tpu.core_type = #tpu.core_type<tc>, window_params = [{transform_indices = @transform_0, window_bounds = array<i64: 1, 16, 16, 64>}, {pipeline_mode = #tpu.pipeline_mode<synchronous>, transform_indices = @transform_1, window_bounds = array<i64: 576, 64>}, {transform_indices = @transform_2, window_bounds = array<i64: 1, 16, 16, 64>}, {transform_indices = @transform_3, window_bounds = array<i64: 1, 2, 64>}]} {
    %c0 = arith.constant 0 : index
    %c0_0 = arith.constant 0 : index
    %c0_1 = arith.constant 0 : index
    %c0_2 = arith.constant 0 : index
    %0 = vector.load %arg1[%c0, %c0_0, %c0_1, %c0_2] : memref<1x16x16x64xf32, #tpu.memory_space<vmem>>, vector<1x16x16x64xf32>
    %1 = vector.shape_cast %0 : vector<1x16x16x64xf32> to vector<256x64xf32>
    %cst = arith.constant 0.000000e+00 : bf16
    %2 = vector.broadcast %cst : bf16 to vector<1x16x1x64xbf16>
    %3 = vector.shape_cast %1 : vector<256x64xf32> to vector<1x16x16x64xf32>
    %4 = arith.truncf %3 : vector<1x16x16x64xf32> to vector<1x16x16x64xbf16>
    %5 = tpu.concatenate %2, %4, %2 in 2 : vector<1x16x1x64xbf16>, vector<1x16x16x64xbf16>, vector<1x16x1x64xbf16> -> vector<1x16x18x64xbf16>
    %c0_3 = arith.constant 0 : index
    %c1 = arith.constant 1 : index
    %c0_4 = arith.constant 0 : index
    %c0_5 = arith.constant 0 : index
    %6 = vector.load %arg5[%c0_3, %c1, %c0_4, %c0_5] : memref<1x18x18x64xbf16, #tpu.memory_space<vmem>>, vector<1x16x18x64xbf16>
    tpu.vector_store %arg5[%c0_3, %c1, %c0_4, %c0_5], %5 {strides = array<i32>} : memref<1x18x18x64xbf16, #tpu.memory_space<vmem>>, vector<1x16x18x64xbf16>,
    %cst_6 = arith.constant 0.000000e+00 : bf16
    %7 = vector.broadcast %cst_6 : bf16 to vector<1x1x18x64xbf16>
    %c0_7 = arith.constant 0 : index
    %c0_8 = arith.constant 0 : index
    %c0_9 = arith.constant 0 : index
    %c0_10 = arith.constant 0 : index
    %8 = vector.load %arg5[%c0_7, %c0_8, %c0_9, %c0_10] : memref<1x18x18x64xbf16, #tpu.memory_space<vmem>>, vector<1x1x18x64xbf16>
    tpu.vector_store %arg5[%c0_7, %c0_8, %c0_9, %c0_10], %7 {strides = array<i32>} : memref<1x18x18x64xbf16, #tpu.memory_space<vmem>>, vector<1x1x18x64xbf16>,
    %c0_11 = arith.constant 0 : index
    %c17 = arith.constant 17 : index
    %c0_12 = arith.constant 0 : index
    %c0_13 = arith.constant 0 : index
    %9 = vector.load %arg5[%c0_11, %c17, %c0_12, %c0_13] : memref<1x18x18x64xbf16, #tpu.memory_space<vmem>>, vector<1x1x18x64xbf16>
    tpu.vector_store %arg5[%c0_11, %c17, %c0_12, %c0_13], %7 {strides = array<i32>} : memref<1x18x18x64xbf16, #tpu.memory_space<vmem>>, vector<1x1x18x64xbf16>,
    %c0_14 = arith.constant 0 : index
    %c0_15 = arith.constant 0 : index
    %c0_16 = arith.constant 0 : index
    %c0_17 = arith.constant 0 : index
    %10 = vector.load %arg5[%c0_14, %c0_15, %c0_16, %c0_17] : memref<1x18x18x64xbf16, #tpu.memory_space<vmem>>, vector<1x16x16x64xbf16>
    %11 = vector.shape_cast %10 : vector<1x16x16x64xbf16> to vector<16x16x64xbf16>
    %c0_18 = arith.constant 0 : index
    %c0_19 = arith.constant 0 : index
    %c1_20 = arith.constant 1 : index
    %c0_21 = arith.constant 0 : index
    %12 = vector.load %arg5[%c0_18, %c0_19, %c1_20, %c0_21] : memref<1x18x18x64xbf16, #tpu.memory_space<vmem>>, vector<1x16x16x64xbf16>
    %13 = vector.shape_cast %12 : vector<1x16x16x64xbf16> to vector<16x16x64xbf16>
    %c0_22 = arith.constant 0 : index
    %c0_23 = arith.constant 0 : index
    %c2 = arith.constant 2 : index
    %c0_24 = arith.constant 0 : index
    %14 = vector.load %arg5[%c0_22, %c0_23, %c2, %c0_24] : memref<1x18x18x64xbf16, #tpu.memory_space<vmem>>, vector<1x16x16x64xbf16>
    %15 = vector.shape_cast %14 : vector<1x16x16x64xbf16> to vector<16x16x64xbf16>
    %c0_25 = arith.constant 0 : index
    %c1_26 = arith.constant 1 : index
    %c0_27 = arith.constant 0 : index
    %c0_28 = arith.constant 0 : index
    %16 = vector.load %arg5[%c0_25, %c1_26, %c0_27, %c0_28] : memref<1x18x18x64xbf16, #tpu.memory_space<vmem>>, vector<1x16x16x64xbf16>
    %17 = vector.shape_cast %16 : vector<1x16x16x64xbf16> to vector<16x16x64xbf16>
    %c0_29 = arith.constant 0 : index
    %c1_30 = arith.constant 1 : index
    %c1_31 = arith.constant 1 : index
    %c0_32 = arith.constant 0 : index
    %18 = vector.load %arg5[%c0_29, %c1_30, %c1_31, %c0_32] : memref<1x18x18x64xbf16, #tpu.memory_space<vmem>>, vector<1x16x16x64xbf16>
    %19 = vector.shape_cast %18 : vector<1x16x16x64xbf16> to vector<16x16x64xbf16>
    %c0_33 = arith.constant 0 : index
    %c1_34 = arith.constant 1 : index
    %c2_35 = arith.constant 2 : index
    %c0_36 = arith.constant 0 : index
    %20 = vector.load %arg5[%c0_33, %c1_34, %c2_35, %c0_36] : memref<1x18x18x64xbf16, #tpu.memory_space<vmem>>, vector<1x16x16x64xbf16>
    %21 = vector.shape_cast %20 : vector<1x16x16x64xbf16> to vector<16x16x64xbf16>
    %c0_37 = arith.constant 0 : index
    %c2_38 = arith.constant 2 : index
    %c0_39 = arith.constant 0 : index
    %c0_40 = arith.constant 0 : index
    %22 = vector.load %arg5[%c0_37, %c2_38, %c0_39, %c0_40] : memref<1x18x18x64xbf16, #tpu.memory_space<vmem>>, vector<1x16x16x64xbf16>
    %23 = vector.shape_cast %22 : vector<1x16x16x64xbf16> to vector<16x16x64xbf16>
    %c0_41 = arith.constant 0 : index
    %c2_42 = arith.constant 2 : index
    %c1_43 = arith.constant 1 : index
    %c0_44 = arith.constant 0 : index
    %24 = vector.load %arg5[%c0_41, %c2_42, %c1_43, %c0_44] : memref<1x18x18x64xbf16, #tpu.memory_space<vmem>>, vector<1x16x16x64xbf16>
    %25 = vector.shape_cast %24 : vector<1x16x16x64xbf16> to vector<16x16x64xbf16>
    %c0_45 = arith.constant 0 : index
    %c2_46 = arith.constant 2 : index
    %c2_47 = arith.constant 2 : index
    %c0_48 = arith.constant 0 : index
    %26 = vector.load %arg5[%c0_45, %c2_46, %c2_47, %c0_48] : memref<1x18x18x64xbf16, #tpu.memory_space<vmem>>, vector<1x16x16x64xbf16>
    %27 = vector.shape_cast %26 : vector<1x16x16x64xbf16> to vector<16x16x64xbf16>
    %28 = tpu.concatenate %11, %13, %15, %17, %19, %21, %23, %25, %27 in 2 : vector<16x16x64xbf16>, vector<16x16x64xbf16>, vector<16x16x64xbf16>, vector<16x16x64xbf16>, vector<16x16x64xbf16>, vector<16x16x64xbf16>, vector<16x16x64xbf16>, vector<16x16x64xbf16>, vector<16x16x64xbf16> -> vector<16x16x576xbf16>
    %29 = vector.shape_cast %28 : vector<16x16x576xbf16> to vector<256x576xbf16>
    %c0_49 = arith.constant 0 : index
    %c0_50 = arith.constant 0 : index
    %30 = vector.load %arg2[%c0_49, %c0_50] : memref<576x64xbf16, #tpu.memory_space<vmem>>, vector<576x64xbf16>
    %cst_51 = arith.constant dense<0.000000e+00> : vector<256x64xf32>
    %31 = tpu.matmul %29, %30, %cst_51 {dimension_numbers = #tpu.dot_dimension_numbers<[1], [0], [0], [1], [0, 0, 1, 1], [], []>} : vector<256x576xbf16>, vector<576x64xbf16>, vector<256x64xf32> -> vector<256x64xf32>
    %32 = vector.shape_cast %31 : vector<256x64xf32> to vector<1x16x16x64xf32>
    %33 = arith.truncf %32 : vector<1x16x16x64xf32> to vector<1x16x16x64xbf16>
    %c0_52 = arith.constant 0 : index
    %c0_53 = arith.constant 0 : index
    %c0_54 = arith.constant 0 : index
    %c0_55 = arith.constant 0 : index
    %34 = vector.load %arg3[%c0_52, %c0_53, %c0_54, %c0_55] : memref<1x16x16x64xbf16, #tpu.memory_space<vmem>>, vector<1x16x16x64xbf16>
    tpu.vector_store %arg3[%c0_52, %c0_53, %c0_54, %c0_55], %33 {strides = array<i32>} : memref<1x16x16x64xbf16, #tpu.memory_space<vmem>>, vector<1x16x16x64xbf16>,
    %cst_56 = arith.constant dense<0.000000e+00> : vector<64xf32>
    %35 = vector.multi_reduction <add>, %31, %cst_56 [0] : vector<256x64xf32> to vector<64xf32>
    %36 = vector.shape_cast %35 : vector<64xf32> to vector<1x64xf32>
    %cst_57 = arith.constant 3.906250e-03 : f32
    %37 = vector.broadcast %cst_57 : f32 to vector<1x64xf32>
    %38 = arith.mulf %36, %37 : vector<1x64xf32>
    %39 = vector.broadcast %38 : vector<1x64xf32> to vector<256x64xf32>
    %40 = arith.subf %31, %39 : vector<256x64xf32>
    %41 = arith.mulf %40, %40 : vector<256x64xf32>
    %cst_58 = arith.constant dense<0.000000e+00> : vector<64xf32>
    %42 = vector.multi_reduction <add>, %41, %cst_58 [0] : vector<256x64xf32> to vector<64xf32>
    %43 = vector.shape_cast %42 : vector<64xf32> to vector<1x64xf32>
    %44 = tpu.concatenate %38, %43 in 0 : vector<1x64xf32>, vector<1x64xf32> -> vector<2x64xf32>
    %45 = vector.shape_cast %44 : vector<2x64xf32> to vector<1x2x64xf32>
    %c0_59 = arith.constant 0 : index
    %c0_60 = arith.constant 0 : index
    %c0_61 = arith.constant 0 : index
    %46 = vector.load %arg4[%c0_59, %c0_60, %c0_61] : memref<1x2x64xf32, #tpu.memory_space<vmem>>, vector<1x2x64xf32>
    tpu.vector_store %arg4[%c0_59, %c0_60, %c0_61], %45 {strides = array<i32>} : memref<1x2x64xf32, #tpu.memory_space<vmem>>, vector<1x2x64xf32>,
    return
  }
  func.func @transform_0(%arg0: i32) -> (i32, i32, i32, i32) {
    %c0_i32 = arith.constant 0 : i32
    %c0_i32_0 = arith.constant 0 : i32
    %c0_i32_1 = arith.constant 0 : i32
    %c0_i32_2 = arith.constant 0 : i32
    return %arg0, %c0_i32, %c0_i32_0, %c0_i32_1 : i32, i32, i32, i32
  }
  func.func @transform_1(%arg0: i32) -> (i32, i32) {
    %c0_i32 = arith.constant 0 : i32
    %c0_i32_0 = arith.constant 0 : i32
    %c0_i32_1 = arith.constant 0 : i32
    return %c0_i32, %c0_i32_0 : i32, i32
  }
  func.func @transform_2(%arg0: i32) -> (i32, i32, i32, i32) {
    %c0_i32 = arith.constant 0 : i32
    %c0_i32_0 = arith.constant 0 : i32
    %c0_i32_1 = arith.constant 0 : i32
    %c0_i32_2 = arith.constant 0 : i32
    return %arg0, %c0_i32, %c0_i32_0, %c0_i32_1 : i32, i32, i32, i32
  }
  func.func @transform_3(%arg0: i32) -> (i32, i32, i32) {
    %c0_i32 = arith.constant 0 : i32
    %c0_i32_0 = arith.constant 0 : i32
    %c0_i32_1 = arith.constant 0 : i32
    return %arg0, %c0_i32, %c0_i32_0 : i32, i32, i32
  }
}

module attributes {stable_mosaic.version = 11 : i64} {
  func.func @_bn_act_conv2_kernel(%arg0: i32, %arg1: memref<1x16x16x64xbf16, #tpu.memory_space<vmem>>, %arg2: memref<1x64xf32, #tpu.memory_space<vmem>>, %arg3: memref<1x64xf32, #tpu.memory_space<vmem>>, %arg4: memref<1x64xf32, #tpu.memory_space<vmem>>, %arg5: memref<576x64xbf16, #tpu.memory_space<vmem>>, %arg6: memref<1x16x16x64xbf16, #tpu.memory_space<vmem>>, %arg7: memref<1x2x64xf32, #tpu.memory_space<vmem>>, %arg8: memref<1x18x18x64xbf16, #tpu.memory_space<vmem>>) attributes {dimension_semantics = [#tpu.dimension_semantics<parallel>], iteration_bounds = array<i64: 2>, scalar_prefetch = 0 : i64, scratch_operands = 1 : i64, tpu.core_type = #tpu.core_type<tc>, window_params = [{transform_indices = @transform_0, window_bounds = array<i64: 1, 16, 16, 64>}, {pipeline_mode = #tpu.pipeline_mode<synchronous>, transform_indices = @transform_1, window_bounds = array<i64: 1, 64>}, {pipeline_mode = #tpu.pipeline_mode<synchronous>, transform_indices = @transform_2, window_bounds = array<i64: 1, 64>}, {pipeline_mode = #tpu.pipeline_mode<synchronous>, transform_indices = @transform_3, window_bounds = array<i64: 1, 64>}, {pipeline_mode = #tpu.pipeline_mode<synchronous>, transform_indices = @transform_4, window_bounds = array<i64: 576, 64>}, {transform_indices = @transform_5, window_bounds = array<i64: 1, 16, 16, 64>}, {transform_indices = @transform_6, window_bounds = array<i64: 1, 2, 64>}]} {
    %c0 = arith.constant 0 : index
    %c0_0 = arith.constant 0 : index
    %c0_1 = arith.constant 0 : index
    %c0_2 = arith.constant 0 : index
    %0 = vector.load %arg1[%c0, %c0_0, %c0_1, %c0_2] : memref<1x16x16x64xbf16, #tpu.memory_space<vmem>>, vector<1x16x16x64xbf16>
    %1 = arith.extf %0 : vector<1x16x16x64xbf16> to vector<1x16x16x64xf32>
    %2 = vector.shape_cast %1 : vector<1x16x16x64xf32> to vector<256x64xf32>
    %c0_3 = arith.constant 0 : index
    %c0_4 = arith.constant 0 : index
    %3 = vector.load %arg2[%c0_3, %c0_4] : memref<1x64xf32, #tpu.memory_space<vmem>>, vector<1x64xf32>
    %4 = vector.broadcast %3 : vector<1x64xf32> to vector<256x64xf32>
    %5 = arith.mulf %2, %4 : vector<256x64xf32>
    %c0_5 = arith.constant 0 : index
    %c0_6 = arith.constant 0 : index
    %6 = vector.load %arg3[%c0_5, %c0_6] : memref<1x64xf32, #tpu.memory_space<vmem>>, vector<1x64xf32>
    %7 = vector.broadcast %6 : vector<1x64xf32> to vector<256x64xf32>
    %8 = arith.addf %5, %7 : vector<256x64xf32>
    %cst = arith.constant 0.000000e+00 : f32
    %9 = vector.broadcast %cst : f32 to vector<256x64xf32>
    %10 = arith.cmpf oge, %8, %9 : vector<256x64xf32>
    %c0_7 = arith.constant 0 : index
    %c0_8 = arith.constant 0 : index
    %11 = vector.load %arg4[%c0_7, %c0_8] : memref<1x64xf32, #tpu.memory_space<vmem>>, vector<1x64xf32>
    %12 = vector.broadcast %11 : vector<1x64xf32> to vector<256x64xf32>
    %13 = arith.mulf %12, %8 : vector<256x64xf32>
    %14 = arith.select %10, %8, %13 : vector<256x64xi1>, vector<256x64xf32>
    %cst_9 = arith.constant 0.000000e+00 : bf16
    %15 = vector.broadcast %cst_9 : bf16 to vector<1x16x1x64xbf16>
    %16 = vector.shape_cast %14 : vector<256x64xf32> to vector<1x16x16x64xf32>
    %17 = arith.truncf %16 : vector<1x16x16x64xf32> to vector<1x16x16x64xbf16>
    %18 = tpu.concatenate %15, %17, %15 in 2 : vector<1x16x1x64xbf16>, vector<1x16x16x64xbf16>, vector<1x16x1x64xbf16> -> vector<1x16x18x64xbf16>
    %c0_10 = arith.constant 0 : index
    %c1 = arith.constant 1 : index
    %c0_11 = arith.constant 0 : index
    %c0_12 = arith.constant 0 : index
    %19 = vector.load %arg8[%c0_10, %c1, %c0_11, %c0_12] : memref<1x18x18x64xbf16, #tpu.memory_space<vmem>>, vector<1x16x18x64xbf16>
    tpu.vector_store %arg8[%c0_10, %c1, %c0_11, %c0_12], %18 {strides = array<i32>} : memref<1x18x18x64xbf16, #tpu.memory_space<vmem>>, vector<1x16x18x64xbf16>,
    %cst_13 = arith.constant 0.000000e+00 : bf16
    %20 = vector.broadcast %cst_13 : bf16 to vector<1x1x18x64xbf16>
    %c0_14 = arith.constant 0 : index
    %c0_15 = arith.constant 0 : index
    %c0_16 = arith.constant 0 : index
    %c0_17 = arith.constant 0 : index
    %21 = vector.load %arg8[%c0_14, %c0_15, %c0_16, %c0_17] : memref<1x18x18x64xbf16, #tpu.memory_space<vmem>>, vector<1x1x18x64xbf16>
    tpu.vector_store %arg8[%c0_14, %c0_15, %c0_16, %c0_17], %20 {strides = array<i32>} : memref<1x18x18x64xbf16, #tpu.memory_space<vmem>>, vector<1x1x18x64xbf16>,
    %c0_18 = arith.constant 0 : index
    %c17 = arith.constant 17 : index
    %c0_19 = arith.constant 0 : index
    %c0_20 = arith.constant 0 : index
    %22 = vector.load %arg8[%c0_18, %c17, %c0_19, %c0_20] : memref<1x18x18x64xbf16, #tpu.memory_space<vmem>>, vector<1x1x18x64xbf16>
    tpu.vector_store %arg8[%c0_18, %c17, %c0_19, %c0_20], %20 {strides = array<i32>} : memref<1x18x18x64xbf16, #tpu.memory_space<vmem>>, vector<1x1x18x64xbf16>,
    %c0_21 = arith.constant 0 : index
    %c0_22 = arith.constant 0 : index
    %c0_23 = arith.constant 0 : index
    %c0_24 = arith.constant 0 : index
    %23 = vector.load %arg8[%c0_21, %c0_22, %c0_23, %c0_24] : memref<1x18x18x64xbf16, #tpu.memory_space<vmem>>, vector<1x16x16x64xbf16>
    %24 = vector.shape_cast %23 : vector<1x16x16x64xbf16> to vector<16x16x64xbf16>
    %c0_25 = arith.constant 0 : index
    %c0_26 = arith.constant 0 : index
    %c1_27 = arith.constant 1 : index
    %c0_28 = arith.constant 0 : index
    %25 = vector.load %arg8[%c0_25, %c0_26, %c1_27, %c0_28] : memref<1x18x18x64xbf16, #tpu.memory_space<vmem>>, vector<1x16x16x64xbf16>
    %26 = vector.shape_cast %25 : vector<1x16x16x64xbf16> to vector<16x16x64xbf16>
    %c0_29 = arith.constant 0 : index
    %c0_30 = arith.constant 0 : index
    %c2 = arith.constant 2 : index
    %c0_31 = arith.constant 0 : index
    %27 = vector.load %arg8[%c0_29, %c0_30, %c2, %c0_31] : memref<1x18x18x64xbf16, #tpu.memory_space<vmem>>, vector<1x16x16x64xbf16>
    %28 = vector.shape_cast %27 : vector<1x16x16x64xbf16> to vector<16x16x64xbf16>
    %c0_32 = arith.constant 0 : index
    %c1_33 = arith.constant 1 : index
    %c0_34 = arith.constant 0 : index
    %c0_35 = arith.constant 0 : index
    %29 = vector.load %arg8[%c0_32, %c1_33, %c0_34, %c0_35] : memref<1x18x18x64xbf16, #tpu.memory_space<vmem>>, vector<1x16x16x64xbf16>
    %30 = vector.shape_cast %29 : vector<1x16x16x64xbf16> to vector<16x16x64xbf16>
    %c0_36 = arith.constant 0 : index
    %c1_37 = arith.constant 1 : index
    %c1_38 = arith.constant 1 : index
    %c0_39 = arith.constant 0 : index
    %31 = vector.load %arg8[%c0_36, %c1_37, %c1_38, %c0_39] : memref<1x18x18x64xbf16, #tpu.memory_space<vmem>>, vector<1x16x16x64xbf16>
    %32 = vector.shape_cast %31 : vector<1x16x16x64xbf16> to vector<16x16x64xbf16>
    %c0_40 = arith.constant 0 : index
    %c1_41 = arith.constant 1 : index
    %c2_42 = arith.constant 2 : index
    %c0_43 = arith.constant 0 : index
    %33 = vector.load %arg8[%c0_40, %c1_41, %c2_42, %c0_43] : memref<1x18x18x64xbf16, #tpu.memory_space<vmem>>, vector<1x16x16x64xbf16>
    %34 = vector.shape_cast %33 : vector<1x16x16x64xbf16> to vector<16x16x64xbf16>
    %c0_44 = arith.constant 0 : index
    %c2_45 = arith.constant 2 : index
    %c0_46 = arith.constant 0 : index
    %c0_47 = arith.constant 0 : index
    %35 = vector.load %arg8[%c0_44, %c2_45, %c0_46, %c0_47] : memref<1x18x18x64xbf16, #tpu.memory_space<vmem>>, vector<1x16x16x64xbf16>
    %36 = vector.shape_cast %35 : vector<1x16x16x64xbf16> to vector<16x16x64xbf16>
    %c0_48 = arith.constant 0 : index
    %c2_49 = arith.constant 2 : index
    %c1_50 = arith.constant 1 : index
    %c0_51 = arith.constant 0 : index
    %37 = vector.load %arg8[%c0_48, %c2_49, %c1_50, %c0_51] : memref<1x18x18x64xbf16, #tpu.memory_space<vmem>>, vector<1x16x16x64xbf16>
    %38 = vector.shape_cast %37 : vector<1x16x16x64xbf16> to vector<16x16x64xbf16>
    %c0_52 = arith.constant 0 : index
    %c2_53 = arith.constant 2 : index
    %c2_54 = arith.constant 2 : index
    %c0_55 = arith.constant 0 : index
    %39 = vector.load %arg8[%c0_52, %c2_53, %c2_54, %c0_55] : memref<1x18x18x64xbf16, #tpu.memory_space<vmem>>, vector<1x16x16x64xbf16>
    %40 = vector.shape_cast %39 : vector<1x16x16x64xbf16> to vector<16x16x64xbf16>
    %41 = tpu.concatenate %24, %26, %28, %30, %32, %34, %36, %38, %40 in 2 : vector<16x16x64xbf16>, vector<16x16x64xbf16>, vector<16x16x64xbf16>, vector<16x16x64xbf16>, vector<16x16x64xbf16>, vector<16x16x64xbf16>, vector<16x16x64xbf16>, vector<16x16x64xbf16>, vector<16x16x64xbf16> -> vector<16x16x576xbf16>
    %42 = vector.shape_cast %41 : vector<16x16x576xbf16> to vector<256x576xbf16>
    %c0_56 = arith.constant 0 : index
    %c0_57 = arith.constant 0 : index
    %43 = vector.load %arg5[%c0_56, %c0_57] : memref<576x64xbf16, #tpu.memory_space<vmem>>, vector<576x64xbf16>
    %cst_58 = arith.constant dense<0.000000e+00> : vector<256x64xf32>
    %44 = tpu.matmul %42, %43, %cst_58 {dimension_numbers = #tpu.dot_dimension_numbers<[1], [0], [0], [1], [0, 0, 1, 1], [], []>} : vector<256x576xbf16>, vector<576x64xbf16>, vector<256x64xf32> -> vector<256x64xf32>
    %45 = vector.shape_cast %44 : vector<256x64xf32> to vector<1x16x16x64xf32>
    %46 = arith.truncf %45 : vector<1x16x16x64xf32> to vector<1x16x16x64xbf16>
    %c0_59 = arith.constant 0 : index
    %c0_60 = arith.constant 0 : index
    %c0_61 = arith.constant 0 : index
    %c0_62 = arith.constant 0 : index
    %47 = vector.load %arg6[%c0_59, %c0_60, %c0_61, %c0_62] : memref<1x16x16x64xbf16, #tpu.memory_space<vmem>>, vector<1x16x16x64xbf16>
    tpu.vector_store %arg6[%c0_59, %c0_60, %c0_61, %c0_62], %46 {strides = array<i32>} : memref<1x16x16x64xbf16, #tpu.memory_space<vmem>>, vector<1x16x16x64xbf16>,
    %cst_63 = arith.constant dense<0.000000e+00> : vector<64xf32>
    %48 = vector.multi_reduction <add>, %44, %cst_63 [0] : vector<256x64xf32> to vector<64xf32>
    %49 = vector.shape_cast %48 : vector<64xf32> to vector<1x64xf32>
    %cst_64 = arith.constant 3.906250e-03 : f32
    %50 = vector.broadcast %cst_64 : f32 to vector<1x64xf32>
    %51 = arith.mulf %49, %50 : vector<1x64xf32>
    %52 = vector.broadcast %51 : vector<1x64xf32> to vector<256x64xf32>
    %53 = arith.subf %44, %52 : vector<256x64xf32>
    %54 = arith.mulf %53, %53 : vector<256x64xf32>
    %cst_65 = arith.constant dense<0.000000e+00> : vector<64xf32>
    %55 = vector.multi_reduction <add>, %54, %cst_65 [0] : vector<256x64xf32> to vector<64xf32>
    %56 = vector.shape_cast %55 : vector<64xf32> to vector<1x64xf32>
    %57 = tpu.concatenate %51, %56 in 0 : vector<1x64xf32>, vector<1x64xf32> -> vector<2x64xf32>
    %58 = vector.shape_cast %57 : vector<2x64xf32> to vector<1x2x64xf32>
    %c0_66 = arith.constant 0 : index
    %c0_67 = arith.constant 0 : index
    %c0_68 = arith.constant 0 : index
    %59 = vector.load %arg7[%c0_66, %c0_67, %c0_68] : memref<1x2x64xf32, #tpu.memory_space<vmem>>, vector<1x2x64xf32>
    tpu.vector_store %arg7[%c0_66, %c0_67, %c0_68], %58 {strides = array<i32>} : memref<1x2x64xf32, #tpu.memory_space<vmem>>, vector<1x2x64xf32>,
    return
  }
  func.func @transform_0(%arg0: i32) -> (i32, i32, i32, i32) {
    %c0_i32 = arith.constant 0 : i32
    %c0_i32_0 = arith.constant 0 : i32
    %c0_i32_1 = arith.constant 0 : i32
    %c0_i32_2 = arith.constant 0 : i32
    return %arg0, %c0_i32, %c0_i32_0, %c0_i32_1 : i32, i32, i32, i32
  }
  func.func @transform_1(%arg0: i32) -> (i32, i32) {
    %c0_i32 = arith.constant 0 : i32
    %c0_i32_0 = arith.constant 0 : i32
    %c0_i32_1 = arith.constant 0 : i32
    return %c0_i32, %c0_i32_0 : i32, i32
  }
  func.func @transform_2(%arg0: i32) -> (i32, i32) {
    %c0_i32 = arith.constant 0 : i32
    %c0_i32_0 = arith.constant 0 : i32
    %c0_i32_1 = arith.constant 0 : i32
    return %c0_i32, %c0_i32_0 : i32, i32
  }
  func.func @transform_3(%arg0: i32) -> (i32, i32) {
    %c0_i32 = arith.constant 0 : i32
    %c0_i32_0 = arith.constant 0 : i32
    %c0_i32_1 = arith.constant 0 : i32
    return %c0_i32, %c0_i32_0 : i32, i32
  }
  func.func @transform_4(%arg0: i32) -> (i32, i32) {
    %c0_i32 = arith.constant 0 : i32
    %c0_i32_0 = arith.constant 0 : i32
    %c0_i32_1 = arith.constant 0 : i32
    return %c0_i32, %c0_i32_0 : i32, i32
  }
  func.func @transform_5(%arg0: i32) -> (i32, i32, i32, i32) {
    %c0_i32 = arith.constant 0 : i32
    %c0_i32_0 = arith.constant 0 : i32
    %c0_i32_1 = arith.constant 0 : i32
    %c0_i32_2 = arith.constant 0 : i32
    return %arg0, %c0_i32, %c0_i32_0, %c0_i32_1 : i32, i32, i32, i32
  }
  func.func @transform_6(%arg0: i32) -> (i32, i32, i32) {
    %c0_i32 = arith.constant 0 : i32
    %c0_i32_0 = arith.constant 0 : i32
    %c0_i32_1 = arith.constant 0 : i32
    return %arg0, %c0_i32, %c0_i32_0 : i32, i32, i32
  }
}

module attributes {stable_mosaic.version = 11 : i64} {
  func.func @_bn_act_residual_kernel(%arg0: i32, %arg1: memref<256x128xbf16, #tpu.memory_space<vmem>>, %arg2: memref<256x128xf32, #tpu.memory_space<vmem>>, %arg3: memref<1x128xf32, #tpu.memory_space<vmem>>, %arg4: memref<1x128xf32, #tpu.memory_space<vmem>>, %arg5: memref<1x128xf32, #tpu.memory_space<vmem>>, %arg6: memref<256x128xf32, #tpu.memory_space<vmem>>) attributes {dimension_semantics = [#tpu.dimension_semantics<parallel>], iteration_bounds = array<i64: 1>, scalar_prefetch = 0 : i64, scratch_operands = 0 : i64, tpu.core_type = #tpu.core_type<tc>, window_params = [{transform_indices = @transform_0, window_bounds = array<i64: 256, 128>}, {transform_indices = @transform_1, window_bounds = array<i64: 256, 128>}, {pipeline_mode = #tpu.pipeline_mode<synchronous>, transform_indices = @transform_2, window_bounds = array<i64: 1, 128>}, {pipeline_mode = #tpu.pipeline_mode<synchronous>, transform_indices = @transform_3, window_bounds = array<i64: 1, 128>}, {pipeline_mode = #tpu.pipeline_mode<synchronous>, transform_indices = @transform_4, window_bounds = array<i64: 1, 128>}, {transform_indices = @transform_5, window_bounds = array<i64: 256, 128>}]} {
    %c0 = arith.constant 0 : index
    %c0_0 = arith.constant 0 : index
    %0 = vector.load %arg1[%c0, %c0_0] : memref<256x128xbf16, #tpu.memory_space<vmem>>, vector<256x128xbf16>
    %1 = arith.extf %0 : vector<256x128xbf16> to vector<256x128xf32>
    %c0_1 = arith.constant 0 : index
    %c0_2 = arith.constant 0 : index
    %2 = vector.load %arg3[%c0_1, %c0_2] : memref<1x128xf32, #tpu.memory_space<vmem>>, vector<1x128xf32>
    %3 = vector.broadcast %2 : vector<1x128xf32> to vector<256x128xf32>
    %4 = arith.mulf %1, %3 : vector<256x128xf32>
    %c0_3 = arith.constant 0 : index
    %c0_4 = arith.constant 0 : index
    %5 = vector.load %arg4[%c0_3, %c0_4] : memref<1x128xf32, #tpu.memory_space<vmem>>, vector<1x128xf32>
    %6 = vector.broadcast %5 : vector<1x128xf32> to vector<256x128xf32>
    %7 = arith.addf %4, %6 : vector<256x128xf32>
    %cst = arith.constant 0.000000e+00 : f32
    %8 = vector.broadcast %cst : f32 to vector<256x128xf32>
    %9 = arith.cmpf oge, %7, %8 : vector<256x128xf32>
    %c0_5 = arith.constant 0 : index
    %c0_6 = arith.constant 0 : index
    %10 = vector.load %arg5[%c0_5, %c0_6] : memref<1x128xf32, #tpu.memory_space<vmem>>, vector<1x128xf32>
    %11 = vector.broadcast %10 : vector<1x128xf32> to vector<256x128xf32>
    %12 = arith.mulf %11, %7 : vector<256x128xf32>
    %13 = arith.select %9, %7, %12 : vector<256x128xi1>, vector<256x128xf32>
    %c0_7 = arith.constant 0 : index
    %c0_8 = arith.constant 0 : index
    %14 = vector.load %arg2[%c0_7, %c0_8] : memref<256x128xf32, #tpu.memory_space<vmem>>, vector<256x128xf32>
    %15 = arith.addf %13, %14 : vector<256x128xf32>
    %c0_9 = arith.constant 0 : index
    %c0_10 = arith.constant 0 : index
    %16 = vector.load %arg6[%c0_9, %c0_10] : memref<256x128xf32, #tpu.memory_space<vmem>>, vector<256x128xf32>
    tpu.vector_store %arg6[%c0_9, %c0_10], %15 {strides = array<i32>} : memref<256x128xf32, #tpu.memory_space<vmem>>, vector<256x128xf32>,
    return
  }
  func.func @transform_0(%arg0: i32) -> (i32, i32) {
    %c0_i32 = arith.constant 0 : i32
    %c0_i32_0 = arith.constant 0 : i32
    return %arg0, %c0_i32 : i32, i32
  }
  func.func @transform_1(%arg0: i32) -> (i32, i32) {
    %c0_i32 = arith.constant 0 : i32
    %c0_i32_0 = arith.constant 0 : i32
    return %arg0, %c0_i32 : i32, i32
  }
  func.func @transform_2(%arg0: i32) -> (i32, i32) {
    %c0_i32 = arith.constant 0 : i32
    %c0_i32_0 = arith.constant 0 : i32
    %c0_i32_1 = arith.constant 0 : i32
    return %c0_i32, %c0_i32_0 : i32, i32
  }
  func.func @transform_3(%arg0: i32) -> (i32, i32) {
    %c0_i32 = arith.constant 0 : i32
    %c0_i32_0 = arith.constant 0 : i32
    %c0_i32_1 = arith.constant 0 : i32
    return %c0_i32, %c0_i32_0 : i32, i32
  }
  func.func @transform_4(%arg0: i32) -> (i32, i32) {
    %c0_i32 = arith.constant 0 : i32
    %c0_i32_0 = arith.constant 0 : i32
    %c0_i32_1 = arith.constant 0 : i32
    return %c0_i32, %c0_i32_0 : i32, i32
  }
  func.func @transform_5(%arg0: i32) -> (i32, i32) {
    %c0_i32 = arith.constant 0 : i32
    %c0_i32_0 = arith.constant 0 : i32
    return %arg0, %c0_i32 : i32, i32
  }
}

</mosaic_0001>

<bundles_post_ra>
// kernel: tile.21
= control target key start
LH: loop header
LB: loop body
LE: loop exit
PB: predicated region body
PF: predicated region fallthrough
CT: control target
= control target key end

     0   :  { %s22_s0 = inlined_call_operand.vmem [shape: f32[64], index: 0, kind: input, shape index: {}]   ;;  %s23_s1 = inlined_call_operand.vmem [shape: f32[2,64], index: 1, kind: output, shape index: {}]  }
   0x1   :  { %v4_v0 = vld [vmem:[%s22_s0] ss:$0 sm:$0xff] }
   0x2   :  { %5 = vst [vmem:[%s23_s1] sm:$0x3] %v4_v0 }

// kernel: tile.22
= control target key start
LH: loop header
LB: loop body
LE: loop exit
PB: predicated region body
PF: predicated region fallthrough
CT: control target
= control target key end

     0   :  { %vm7_vm0 = vcmask 523264   ;;  %vm13_vm1 = vcmask 1048064   ;;  %s39_s0 = inlined_call_operand.vmem [shape: f32[2,64], index: 0, kind: input, shape index: {}]   ;;  %s40_s1 = inlined_call_operand.vmem [shape: f32[1,128], index: 1, kind: output, shape index: {}]  }
   0x1   :  { %v4_v0 = vld [vmem:[%s39_s0] sm:$0x3]  ;;  %s22_s0 = smov 64  }
   0x2   :  { %5 = vst [vmem:[#allocation1] sm:$0x3] %v4_v0 }
   0x9   :  { %v10_v1 = vld [vmem:[#allocation1 + $0x1] sm:$0x1]   ;;  %v6_v2 = vld [vmem:[#allocation1] sm:$0x1]  }
   0xa   :  { %11 = vrot.lane.b32.xlu0 %v10_v1, %s22_s0  ;;  %8 = vst.msk [vmem:[#allocation0] sm:$0x1] %vm7_vm0, %v6_v2  }
  0x7c   :  { %v12_v3 = vpop.permute.xlu0 %11  }
  0x7d   :  { %14 = vst.msk [vmem:[#allocation0] sm:$0x1] %vm13_vm1, %v12_v3  }
  0x84   :  { %v18_v4 = vld [vmem:[#allocation0] sm:$0x1] }
  0x85   :  { %20 = vst [vmem:[%s40_s1] sm:$0x1] %v18_v4 }

// kernel: generator_residual_block.5
= control target key start
LH: loop header
LB: loop body
LE: loop exit
PB: predicated region body
PF: predicated region fallthrough
CT: control target
= control target key end

     0   :  { %s830_s0 = inlined_call_operand.vmem [shape: bf16[256,128], index: 0, kind: input, shape index: {}]   ;;  %s831_s2 = inlined_call_operand.vmem [shape: f32[1,128], index: 2, kind: input, shape index: {}]   ;;  %s832_s3 = inlined_call_operand.vmem [shape: f32[1,128], index: 3, kind: input, shape index: {}]   ;;  %s833_s4 = inlined_call_operand.vmem [shape: f32[1,128], index: 4, kind: input, shape index: {}]   ;;  %s834_s1 = inlined_call_operand.vmem [shape: f32[256,128], index: 1, kind: input, shape index: {}]   ;;  %s835_s5 = inlined_call_operand.vmem [shape: f32[256,128], index: 5, kind: output, shape index: {}]  }
   0x1   :  { %v369_v0 = vld [vmem:[%s830_s0] sm:$0xff]   ;;  %v432_v5 = vld [vmem:[%s830_s0 + $0x8] sm:$0xff]   ;;  %v433_v10 = vld [vmem:[%s830_s0 + $0x10] sm:$0xff]  }
   0x2   :  { %v483_v1 = vld [vmem:[%s831_s2] ss:$0 sm:$0xff]  ;;  %v370_v2 = vunpack.c.l.bf16 %v369_v0  ;;  %v371_v3 = vunpack.c.h.bf16 %v369_v0  ;;  %v374_v8 = vunpack.c.l.bf16 %v432_v5  ;;  %v375_v9 = vunpack.c.h.bf16 %v432_v5  ;;  %v434_v14 = vld [vmem:[%s830_s0 + $0x18] sm:$0xff]   ;;  %v266_v26 = vld [vmem:[%s834_s1 + $0x8] sm:$0xff] }
   0x3   :  { %v488_v4 = vld [vmem:[%s832_s3] ss:$0 sm:$0xff]  ;;  %v378_v12 = vunpack.c.l.bf16 %v433_v10  ;;  %v379_v13 = vunpack.c.h.bf16 %v433_v10  ;;  %v382_v21 = vunpack.c.l.bf16 %v434_v14  ;;  %v383_v22 = vunpack.c.h.bf16 %v434_v14  ;;  %v267_v38 = vld [vmem:[%s834_s1 + $0x10] sm:$0xff]  ;;  %v268_v40 = vld [vmem:[%s834_s1 + $0x18] sm:$0xff] }
   0x4   :  { %v91_v6 = vmul.f32 %v370_v2, %v483_v1  ;;  %v92_v7 = vmul.f32 %v371_v3, %v483_v1  ;;  %v501_v11 = vld [vmem:[%s833_s4] ss:$0 sm:$0xff]  ;;  %v93_v17 = vmul.f32 %v374_v8, %v483_v1  ;;  %v94_v18 = vmul.f32 %v375_v9, %v483_v1  ;;  %v270_v45 = vld [vmem:[%s834_s1 + $0x28] sm:$0xff]  ;;  %v437_v56 = vld [vmem:[%s830_s0 + $0x30] sm:$0xff]  }
   0x5   :  { %v95_v19 = vmul.f32 %v378_v12, %v483_v1  ;;  %v96_v20 = vmul.f32 %v379_v13, %v483_v1  ;;  %v265_v24 = vld [vmem:[%s834_s1] sm:$0xff]  ;;  %v97_v33 = vmul.f32 %v382_v21, %v483_v1  ;;  %v98_v34 = vmul.f32 %v383_v22, %v483_v1  ;;  %v436_v52 = vld [vmem:[%s830_s0 + $0x28] sm:$0xff]   ;;  %v271_v59 = vld [vmem:[%s834_s1 + $0x30] sm:$0xff] }
   0x6   :  { %v130_v15 = vadd.f32 %v488_v4, %v91_v6  ;;  %v131_v16 = vadd.f32 %v488_v4, %v92_v7  ;;  %v132_v27 = vadd.f32 %v488_v4, %v93_v17  ;;  %v133_v28 = vadd.f32 %v488_v4, %v94_v18  ;;  %v269_v42 = vld [vmem:[%s834_s1 + $0x20] sm:$0xff]  ;;  %v272_v61 = vld [vmem:[%s834_s1 + $0x38] sm:$0xff] }
   0x7   :  { %v134_v29 = vadd.f32 %v488_v4, %v95_v19  ;;  %v135_v30 = vadd.f32 %v488_v4, %v96_v20  ;;  %v136_v46 = vadd.f32 %v488_v4, %v97_v33  ;;  %v137_v50 = vadd.f32 %v488_v4, %v98_v34  ;;  %v435_v51 = vld [vmem:[%s830_s0 + $0x20] sm:$0xff]   ;;  %v438_v8 = vld [vmem:[%s830_s0 + $0x38] sm:$0xff]  }
   0x8   :  { %vm162_vm0 = vcmp.ge.f32.partialorder %v130_v15, 0.0  ;;  %v201_v23 = vmul.f32 %v501_v11, %v130_v15  ;;  %vm163_vm1 = vcmp.ge.f32.partialorder %v131_v16, 0.0  ;;  %v202_v25 = vmul.f32 %v501_v11, %v131_v16  ;;  %v276_v33 = vld [vmem:[%s834_s1 + $0x58] sm:$0xff] }
   0x9   :  { %vm164_vm2 = vcmp.ge.f32.partialorder %v132_v27, 0.0  ;;  %v203_v37 = vmul.f32 %v501_v11, %v132_v27  ;;  %vm165_vm3 = vcmp.ge.f32.partialorder %v133_v28, 0.0  ;;  %v204_v39 = vmul.f32 %v501_v11, %v133_v28 }
   0xa   :  { %v233_v31 = vsel %vm162_vm0, %v130_v15, %v201_v23  ;;  %v234_v32 = vsel %vm163_vm1, %v131_v16, %v202_v25  ;;  %vm166_vm4 = vcmp.ge.f32.partialorder %v134_v29, 0.0  ;;  %v205_v41 = vmul.f32 %v501_v11, %v134_v29 }
   0xb   :  { %v297_v35 = vadd.f32 %v265_v24, %v233_v31  ;;  %v298_v36 = vadd.f32 %v266_v26, %v234_v32  ;;  %v235_v43 = vsel %vm164_vm2, %v132_v27, %v203_v37  ;;  %vm167_vm5 = vcmp.ge.f32.partialorder %v135_v30, 0.0  ;;  %v273_v27 = vld [vmem:[%s834_s1 + $0x40] sm:$0xff]  ;;  %v275_v31 = vld [vmem:[%s834_s1 + $0x50] sm:$0xff] }
   0xc   :  { %v206_v44 = vmul.f32 %v501_v11, %v135_v30  ;;  %v299_v47 = vadd.f32 %v267_v38, %v235_v43  ;;  %v236_v48 = vsel %vm165_vm3, %v133_v28, %v204_v39  ;;  %v237_v49 = vsel %vm166_vm4, %v134_v29, %v205_v41  ;;  %v274_v29 = vld [vmem:[%s834_s1 + $0x48] sm:$0xff]  ;;  %v277_v37 = vld [vmem:[%s834_s1 + $0x60] sm:$0xff] }
   0xd   :  { %329 = vst [vmem:[%s835_s5] sm:$0xff] %v297_v35  ;;  %330 = vst [vmem:[%s835_s5 + $0x8] sm:$0xff] %v298_v36  ;;  %v300_v53 = vadd.f32 %v268_v40, %v236_v48  ;;  %v301_v54 = vadd.f32 %v269_v42, %v237_v49  ;;  %vm168_vm6 = vcmp.ge.f32.partialorder %v136_v46, 0.0  ;;  %v207_v58 = vmul.f32 %v501_v11, %v136_v46  ;;  %v439_v42 = vld [vmem:[%s830_s0 + $0x40] sm:$0xff]   ;;  %v440_v43 = vld [vmem:[%s830_s0 + $0x48] sm:$0xff]  }
   0xe   :  { %v238_v55 = vsel %vm167_vm5, %v135_v30, %v206_v44  ;;  %331 = vst [vmem:[%s835_s5 + $0x10] sm:$0xff] %v299_v47  ;;  %vm169_vm7 = vcmp.ge.f32.partialorder %v137_v50, 0.0  ;;  %v208_v60 = vmul.f32 %v501_v11, %v137_v50  ;;  %v386_v62 = vunpack.c.l.bf16 %v435_v51  ;;  %v441_v47 = vld [vmem:[%s830_s0 + $0x50] sm:$0xff]  }
   0xf   :  { %v302_v57 = vadd.f32 %v270_v45, %v238_v55  ;;  %332 = vst [vmem:[%s835_s5 + $0x18] sm:$0xff] %v300_v53  ;;  %333 = vst [vmem:[%s835_s5 + $0x20] sm:$0xff] %v301_v54  ;;  %v387_v63 = vunpack.c.h.bf16 %v435_v51  ;;  %v390_v0 = vunpack.c.l.bf16 %v436_v52  ;;  %v391_v2 = vunpack.c.h.bf16 %v436_v52 }
  0x10   :  { %v239_v3 = vsel %vm168_vm6, %v136_v46, %v207_v58  ;;  %v240_v5 = vsel %vm169_vm7, %v137_v50, %v208_v60  ;;  %v394_v6 = vunpack.c.l.bf16 %v437_v56  ;;  %v395_v7 = vunpack.c.h.bf16 %v437_v56  ;;  %v278_v50 = vld [vmem:[%s834_s1 + $0x68] sm:$0xff] }
  0x11   :  { %334 = vst [vmem:[%s835_s5 + $0x28] sm:$0xff] %v302_v57  ;;  %v303_v9 = vadd.f32 %v271_v59, %v239_v3  ;;  %v304_v10 = vadd.f32 %v272_v61, %v240_v5  ;;  %v99_v12 = vmul.f32 %v386_v62, %v483_v1  ;;  %v100_v13 = vmul.f32 %v387_v63, %v483_v1  ;;  %v279_v3 = vld [vmem:[%s834_s1 + $0x70] sm:$0xff] }
  0x12   :  { %v101_v14 = vmul.f32 %v390_v0, %v483_v1  ;;  %v102_v15 = vmul.f32 %v391_v2, %v483_v1  ;;  %v103_v16 = vmul.f32 %v394_v6, %v483_v1  ;;  %v104_v17 = vmul.f32 %v395_v7, %v483_v1  ;;  %v280_v6 = vld [vmem:[%s834_s1 + $0x78] sm:$0xff] }
  0x13   :  { %335 = vst [vmem:[%s835_s5 + $0x30] sm:$0xff] %v303_v9  ;;  %336 = vst [vmem:[%s835_s5 + $0x38] sm:$0xff] %v304_v10  ;;  %v138_v18 = vadd.f32 %v488_v4, %v99_v12  ;;  %v139_v19 = vadd.f32 %v488_v4, %v100_v13  ;;  %v398_v20 = vunpack.c.l.bf16 %v438_v8  ;;  %v399_v21 = vunpack.c.h.bf16 %v438_v8 }
  0x14   :  { %v140_v22 = vadd.f32 %v488_v4, %v101_v14  ;;  %v141_v23 = vadd.f32 %v488_v4, %v102_v15  ;;  %v142_v24 = vadd.f32 %v488_v4, %v103_v16  ;;  %v143_v25 = vadd.f32 %v488_v4, %v104_v17 }
  0x15   :  { %vm170_vm8 = vcmp.ge.f32.partialorder %v138_v18, 0.0  ;;  %v209_v26 = vmul.f32 %v501_v11, %v138_v18  ;;  %vm171_vm9 = vcmp.ge.f32.partialorder %v139_v19, 0.0  ;;  %v210_v28 = vmul.f32 %v501_v11, %v139_v19 }
  0x16   :  { %vm172_vm10 = vcmp.ge.f32.partialorder %v140_v22, 0.0  ;;  %v211_v30 = vmul.f32 %v501_v11, %v140_v22  ;;  %vm173_vm11 = vcmp.ge.f32.partialorder %v141_v23, 0.0  ;;  %v212_v32 = vmul.f32 %v501_v11, %v141_v23 }
  0x17   :  { %v241_v34 = vsel %vm170_vm8, %v138_v18, %v209_v26  ;;  %v242_v35 = vsel %vm171_vm9, %v139_v19, %v210_v28  ;;  %vm174_vm12 = vcmp.ge.f32.partialorder %v142_v24, 0.0  ;;  %v213_v36 = vmul.f32 %v501_v11, %v142_v24  ;;  %v281_v19 = vld [vmem:[%s834_s1 + $0x80] sm:$0xff] }
  0x18   :  { %v305_v38 = vadd.f32 %v273_v27, %v241_v34  ;;  %v306_v39 = vadd.f32 %v274_v29, %v242_v35  ;;  %v243_v40 = vsel %vm172_vm10, %v140_v22, %v211_v30  ;;  %v244_v41 = vsel %vm173_vm11, %v141_v23, %v212_v32  ;;  %v282_v22 = vld [vmem:[%s834_s1 + $0x88] sm:$0xff] }
  0x19   :  { %v307_v44 = vadd.f32 %v275_v31, %v243_v40  ;;  %v308_v45 = vadd.f32 %v276_v33, %v244_v41  ;;  %v245_v46 = vsel %vm174_vm12, %v142_v24, %v213_v36  ;;  %vm175_vm13 = vcmp.ge.f32.partialorder %v143_v25, 0.0  ;;  %v283_v24 = vld [vmem:[%s834_s1 + $0x90] sm:$0xff]  ;;  %v443_v33 = vld [vmem:[%s830_s0 + $0x60] sm:$0xff]  }
  0x1a   :  { %337 = vst [vmem:[%s835_s5 + $0x40] sm:$0xff] %v305_v38  ;;  %338 = vst [vmem:[%s835_s5 + $0x48] sm:$0xff] %v306_v39  ;;  %v309_v48 = vadd.f32 %v277_v37, %v245_v46  ;;  %v214_v49 = vmul.f32 %v501_v11, %v143_v25  ;;  %v105_v51 = vmul.f32 %v398_v20, %v483_v1  ;;  %v402_v53 = vunpack.c.l.bf16 %v439_v42  ;;  %v442_v20 = vld [vmem:[%s830_s0 + $0x58] sm:$0xff]   ;;  %v285_v39 = vld [vmem:[%s834_s1 + $0xa0] sm:$0xff] }
  0x1b   :  { %v106_v52 = vmul.f32 %v399_v21, %v483_v1  ;;  %339 = vst [vmem:[%s835_s5 + $0x50] sm:$0xff] %v307_v44  ;;  %340 = vst [vmem:[%s835_s5 + $0x58] sm:$0xff] %v308_v45  ;;  %v403_v54 = vunpack.c.h.bf16 %v439_v42  ;;  %v406_v55 = vunpack.c.l.bf16 %v440_v43  ;;  %v407_v56 = vunpack.c.h.bf16 %v440_v43  ;;  %v284_v37 = vld [vmem:[%s834_s1 + $0x98] sm:$0xff]  ;;  %v444_v46 = vld [vmem:[%s830_s0 + $0x68] sm:$0xff]  }
  0x1c   :  { %341 = vst [vmem:[%s835_s5 + $0x60] sm:$0xff] %v309_v48  ;;  %v246_v57 = vsel %vm175_vm13, %v143_v25, %v214_v49  ;;  %v144_v58 = vadd.f32 %v488_v4, %v105_v51  ;;  %v410_v60 = vunpack.c.l.bf16 %v441_v47  ;;  %v107_v62 = vmul.f32 %v402_v53, %v483_v1 }
  0x1d   :  { %v145_v59 = vadd.f32 %v488_v4, %v106_v52  ;;  %v310_v61 = vadd.f32 %v278_v50, %v246_v57  ;;  %v108_v63 = vmul.f32 %v403_v54, %v483_v1  ;;  %v109_v0 = vmul.f32 %v406_v55, %v483_v1  ;;  %v286_v50 = vld [vmem:[%s834_s1 + $0xa8] sm:$0xff] }
  0x1e   :  { %vm176_vm14 = vcmp.ge.f32.partialorder %v144_v58, 0.0  ;;  %v215_v2 = vmul.f32 %v501_v11, %v144_v58  ;;  %v146_v7 = vadd.f32 %v488_v4, %v107_v62  ;;  %v110_v10 = vmul.f32 %v407_v56, %v483_v1  ;;  %v287_v62 = vld [vmem:[%s834_s1 + $0xb0] sm:$0xff] }
  0x1f   :  { %vm177_vm15 = vcmp.ge.f32.partialorder %v145_v59, 0.0  ;;  %v216_v5 = vmul.f32 %v501_v11, %v145_v59  ;;  %342 = vst [vmem:[%s835_s5 + $0x68] sm:$0xff] %v310_v61  ;;  %v147_v8 = vadd.f32 %v488_v4, %v108_v63  ;;  %v148_v9 = vadd.f32 %v488_v4, %v109_v0 }
  0x20   :  { %v247_v12 = vsel %vm176_vm14, %v144_v58, %v215_v2  ;;  %v111_v14 = vmul.f32 %v410_v60, %v483_v1  ;;  %v411_v15 = vunpack.c.h.bf16 %v441_v47  ;;  %vm178_vm0 = vcmp.ge.f32.partialorder %v146_v7, 0.0 }
  0x21   :  { %v248_v13 = vsel %vm177_vm15, %v145_v59, %v216_v5  ;;  %v311_v16 = vadd.f32 %v279_v3, %v247_v12  ;;  %v217_v18 = vmul.f32 %v501_v11, %v146_v7  ;;  %vm179_vm1 = vcmp.ge.f32.partialorder %v147_v8, 0.0  ;;  %v445_v59 = vld [vmem:[%s830_s0 + $0x70] sm:$0xff]  }
  0x22   :  { %v312_v17 = vadd.f32 %v280_v6, %v248_v13  ;;  %v218_v21 = vmul.f32 %v501_v11, %v147_v8  ;;  %vm180_vm2 = vcmp.ge.f32.partialorder %v148_v9, 0.0  ;;  %v219_v23 = vmul.f32 %v501_v11, %v148_v9  ;;  %v289_v13 = vld [vmem:[%s834_s1 + $0xc0] sm:$0xff] }
  0x23   :  { %343 = vst [vmem:[%s835_s5 + $0x70] sm:$0xff] %v311_v16  ;;  %v249_v25 = vsel %vm178_vm0, %v146_v7, %v217_v18  ;;  %v149_v26 = vadd.f32 %v488_v4, %v110_v10  ;;  %v150_v27 = vadd.f32 %v488_v4, %v111_v14  ;;  %v112_v28 = vmul.f32 %v411_v15, %v483_v1  ;;  %v290_v16 = vld [vmem:[%s834_s1 + $0xc8] sm:$0xff] }
  0x24   :  { %344 = vst [vmem:[%s835_s5 + $0x78] sm:$0xff] %v312_v17  ;;  %v313_v29 = vadd.f32 %v281_v19, %v249_v25  ;;  %v250_v30 = vsel %vm179_vm1, %v147_v8, %v218_v21  ;;  %v251_v31 = vsel %vm180_vm2, %v148_v9, %v219_v23  ;;  %v414_v32 = vunpack.c.l.bf16 %v442_v20  ;;  %v288_v8 = vld [vmem:[%s834_s1 + $0xb8] sm:$0xff] }
  0x25   :  { %v314_v34 = vadd.f32 %v282_v22, %v250_v30  ;;  %v315_v35 = vadd.f32 %v283_v24, %v251_v31  ;;  %vm181_vm3 = vcmp.ge.f32.partialorder %v149_v26, 0.0  ;;  %v220_v36 = vmul.f32 %v501_v11, %v149_v26  ;;  %v446_v23 = vld [vmem:[%s830_s0 + $0x78] sm:$0xff]  }
  0x26   :  { %345 = vst [vmem:[%s835_s5 + $0x80] sm:$0xff] %v313_v29  ;;  %vm182_vm4 = vcmp.ge.f32.partialorder %v150_v27, 0.0  ;;  %v221_v38 = vmul.f32 %v501_v11, %v150_v27  ;;  %v151_v40 = vadd.f32 %v488_v4, %v112_v28  ;;  %v113_v41 = vmul.f32 %v414_v32, %v483_v1  ;;  %v292_v30 = vld [vmem:[%s834_s1 + $0xd8] sm:$0xff] }
  0x27   :  { %346 = vst [vmem:[%s835_s5 + $0x88] sm:$0xff] %v314_v34  ;;  %347 = vst [vmem:[%s835_s5 + $0x90] sm:$0xff] %v315_v35  ;;  %v252_v42 = vsel %vm181_vm3, %v149_v26, %v220_v36  ;;  %v415_v43 = vunpack.c.h.bf16 %v442_v20  ;;  %v418_v44 = vunpack.c.l.bf16 %v443_v33  ;;  %v419_v45 = vunpack.c.h.bf16 %v443_v33 }
  0x28   :  { %v316_v47 = vadd.f32 %v284_v37, %v252_v42  ;;  %v253_v48 = vsel %vm182_vm4, %v150_v27, %v221_v38  ;;  %vm183_vm5 = vcmp.ge.f32.partialorder %v151_v40, 0.0  ;;  %v222_v49 = vmul.f32 %v501_v11, %v151_v40  ;;  %v291_v27 = vld [vmem:[%s834_s1 + $0xd0] sm:$0xff] }
  0x29   :  { %v317_v51 = vadd.f32 %v285_v39, %v253_v48  ;;  %v152_v52 = vadd.f32 %v488_v4, %v113_v41  ;;  %v114_v53 = vmul.f32 %v415_v43, %v483_v1  ;;  %v115_v54 = vmul.f32 %v418_v44, %v483_v1  ;;  %v293_v39 = vld [vmem:[%s834_s1 + $0xe0] sm:$0xff] }
  0x2a   :  { %348 = vst [vmem:[%s835_s5 + $0x98] sm:$0xff] %v316_v47  ;;  %v254_v55 = vsel %vm183_vm5, %v151_v40, %v222_v49  ;;  %v116_v56 = vmul.f32 %v419_v45, %v483_v1  ;;  %v422_v57 = vunpack.c.l.bf16 %v444_v46  ;;  %v423_v58 = vunpack.c.h.bf16 %v444_v46  ;;  %v294_v47 = vld [vmem:[%s834_s1 + $0xe8] sm:$0xff] }
  0x2b   :  { %349 = vst [vmem:[%s835_s5 + $0xa0] sm:$0xff] %v317_v51  ;;  %v318_v60 = vadd.f32 %v286_v50, %v254_v55  ;;  %vm184_vm6 = vcmp.ge.f32.partialorder %v152_v52, 0.0  ;;  %v223_v61 = vmul.f32 %v501_v11, %v152_v52  ;;  %v153_v63 = vadd.f32 %v488_v4, %v114_v53  ;;  %v295_v51 = vld [vmem:[%s834_s1 + $0xf0] sm:$0xff] }
  0x2c   :  { %v154_v0 = vadd.f32 %v488_v4, %v115_v54  ;;  %v155_v2 = vadd.f32 %v488_v4, %v116_v56  ;;  %v117_v3 = vmul.f32 %v422_v57, %v483_v1  ;;  %v118_v5 = vmul.f32 %v423_v58, %v483_v1 }
  0x2d   :  { %350 = vst [vmem:[%s835_s5 + $0xa8] sm:$0xff] %v318_v60  ;;  %v255_v6 = vsel %vm184_vm6, %v152_v52, %v223_v61  ;;  %vm185_vm7 = vcmp.ge.f32.partialorder %v153_v63, 0.0  ;;  %v224_v7 = vmul.f32 %v501_v11, %v153_v63  ;;  %v426_v9 = vunpack.c.l.bf16 %v445_v59 }
  0x2e   :  { %v319_v10 = vadd.f32 %v287_v62, %v255_v6  ;;  %vm186_vm8 = vcmp.ge.f32.partialorder %v154_v0, 0.0  ;;  %v225_v12 = vmul.f32 %v501_v11, %v154_v0  ;;  %vm187_vm9 = vcmp.ge.f32.partialorder %v155_v2, 0.0 }
  0x2f   :  { %v256_v14 = vsel %vm185_vm7, %v153_v63, %v224_v7  ;;  %v226_v15 = vmul.f32 %v501_v11, %v155_v2  ;;  %v156_v17 = vadd.f32 %v488_v4, %v117_v3  ;;  %v157_v18 = vadd.f32 %v488_v4, %v118_v5 }
  0x30   :  { %351 = vst [vmem:[%s835_s5 + $0xb0] sm:$0xff] %v319_v10  ;;  %v320_v19 = vadd.f32 %v288_v8, %v256_v14  ;;  %v257_v20 = vsel %vm186_vm8, %v154_v0, %v225_v12  ;;  %v119_v21 = vmul.f32 %v426_v9, %v483_v1  ;;  %v427_v22 = vunpack.c.h.bf16 %v445_v59 }
  0x31   :  { %v321_v24 = vadd.f32 %v289_v13, %v257_v20  ;;  %v258_v25 = vsel %vm187_vm9, %v155_v2, %v226_v15  ;;  %vm188_vm10 = vcmp.ge.f32.partialorder %v156_v17, 0.0  ;;  %v227_v26 = vmul.f32 %v501_v11, %v156_v17 }
  0x32   :  { %352 = vst [vmem:[%s835_s5 + $0xb8] sm:$0xff] %v320_v19  ;;  %v322_v28 = vadd.f32 %v290_v16, %v258_v25  ;;  %vm189_vm11 = vcmp.ge.f32.partialorder %v157_v18, 0.0  ;;  %v228_v29 = vmul.f32 %v501_v11, %v157_v18  ;;  %v158_v31 = vadd.f32 %v488_v4, %v119_v21 }
  0x33   :  { %353 = vst [vmem:[%s835_s5 + $0xc0] sm:$0xff] %v321_v24  ;;  %v259_v32 = vsel %vm188_vm10, %v156_v17, %v227_v26  ;;  %v120_v33 = vmul.f32 %v427_v22, %v483_v1  ;;  %v430_v34 = vunpack.c.l.bf16 %v446_v23  ;;  %v431_v35 = vunpack.c.h.bf16 %v446_v23 }
  0x34   :  { %354 = vst [vmem:[%s835_s5 + $0xc8] sm:$0xff] %v322_v28  ;;  %v323_v36 = vadd.f32 %v291_v27, %v259_v32  ;;  %v260_v37 = vsel %vm189_vm11, %v157_v18, %v228_v29  ;;  %vm190_vm12 = vcmp.ge.f32.partialorder %v158_v31, 0.0  ;;  %v229_v38 = vmul.f32 %v501_v11, %v158_v31 }
  0x35   :  { %v324_v40 = vadd.f32 %v292_v30, %v260_v37  ;;  %v159_v41 = vadd.f32 %v488_v4, %v120_v33  ;;  %v121_v42 = vmul.f32 %v430_v34, %v483_v1  ;;  %v122_v43 = vmul.f32 %v431_v35, %v483_v1 }
  0x36   :  { %355 = vst [vmem:[%s835_s5 + $0xd0] sm:$0xff] %v323_v36  ;;  %v261_v44 = vsel %vm190_vm12, %v158_v31, %v229_v38 }
  0x37   :  { %356 = vst [vmem:[%s835_s5 + $0xd8] sm:$0xff] %v324_v40  ;;  %v325_v45 = vadd.f32 %v293_v39, %v261_v44  ;;  %vm191_vm13 = vcmp.ge.f32.partialorder %v159_v41, 0.0  ;;  %v230_v46 = vmul.f32 %v501_v11, %v159_v41  ;;  %v160_v48 = vadd.f32 %v488_v4, %v121_v42 }
  0x38   :  { %v161_v1 = vadd.f32 %v488_v4, %v122_v43  ;;  %v296_v4 = vld [vmem:[%s834_s1 + $0xf8] sm:$0xff] }
  0x39   :  { %357 = vst [vmem:[%s835_s5 + $0xe0] sm:$0xff] %v325_v45  ;;  %v262_v49 = vsel %vm191_vm13, %v159_v41, %v230_v46  ;;  %vm192_vm14 = vcmp.ge.f32.partialorder %v160_v48, 0.0  ;;  %v231_v50 = vmul.f32 %v501_v11, %v160_v48 }
  0x3a   :  { %v326_v52 = vadd.f32 %v294_v47, %v262_v49  ;;  %vm193_vm15 = vcmp.ge.f32.partialorder %v161_v1, 0.0  ;;  %v232_v53 = vmul.f32 %v501_v11, %v161_v1 }
  0x3b   :  { %v263_v54 = vsel %vm192_vm14, %v160_v48, %v231_v50 }
  0x3c   :  { %358 = vst [vmem:[%s835_s5 + $0xe8] sm:$0xff] %v326_v52  ;;  %v327_v55 = vadd.f32 %v295_v51, %v263_v54  ;;  %v264_v56 = vsel %vm193_vm15, %v161_v1, %v232_v53 }
  0x3d   :  { %v328_v57 = vadd.f32 %v296_v4, %v264_v56 }
  0x3e   :  { %359 = vst [vmem:[%s835_s5 + $0xf0] sm:$0xff] %v327_v55 }
  0x3f   :  { %360 = vst [vmem:[%s835_s5 + $0xf8] sm:$0xff] %v328_v57 }

// kernel: generator_residual_block.3
= control target key start
LH: loop header
LB: loop body
LE: loop exit
PB: predicated region body
PF: predicated region fallthrough
CT: control target
= control target key end

     0   :  { %s4587_s12 = smov 0   ;;  %s6133_s0 = inlined_call_operand.vmem [shape: f32[2,16,16,64], index: 0, kind: input, shape index: {}]   ;;  %s6134_s1 = inlined_call_operand.vmem [shape: bf16[576,64], index: 1, kind: input, shape index: {}]   ;;  %s6135_s2 = inlined_call_operand.vmem [shape: bf16[2,16,16,64], index: 2, kind: output, shape index: {0}]   ;;  %s6136_s3 = inlined_call_operand.vmem [shape: f32[2,2,64], index: 3, kind: output, shape index: {1}]  }
   0x1 LB: > { %s3712_s13 = sadd.s32 4294967295, %s4563_s12   ;;  %p3716_p0 = scmp.ge.s32.totalorder %s4563_s12, 1  ;;  %s4563_s12 = sphi %s4587_s12, %s14_s12  }
   0x2   : > { %p140_p1 = scmp.lt.s32.totalorder %s4563_s12, 3 }
   0x4   : > { %p141_p2 = pnand %p3716_p0, %p140_p1 }
   0x6   : > { %144 = sbr.rel (%p141_p2) target bundleno = 646 (0x286), region = 28 }
   0xd   : > { %p168_p3 = scmp.lt.s32.totalorder %s3712_s13, 1  ;;  %vm587_vm0 = vcmask 519168   ;;  %vm590_vm1 = vcmask 516096   ;;  %v4565_v0 = vmov 0   ;;  %v4424_v1 = vld [vmem:[%s6134_s1 + $0x40] sm:$0xff]   ;;  %vm375_vm2 = vcmask 1040384  }
   0xe   : > { %637 = vst.msk [vmem:[#allocation2] sm:$0xf] %vm587_vm0, %v4565_v0  ;;  %638 = vst.msk [vmem:[#allocation2 + $0x4] sm:$0xf] %vm587_vm0, %v4565_v0  ;;  %4034 = vmatprep.subr.bf16.mxu0 %v4424_v1  ;;  %4318 = vmatprep.subr.bf16.mxu1 %v4424_v1  ;;  %vm376_vm3 = vsmask.f32 256 }
   0xf   : > { %s6222_s13 = smov (!%p168_p3, %s3712_s13), 1  ;;  %639 = vst.msk [vmem:[#allocation2 + $0x8] sm:$0x1] %vm590_vm1, %v4565_v0  ;;  %643 = vst.msk [vmem:[#allocation2 + $0xd4] sm:$0x1] %vm590_vm1, %v4565_v0  ;;  %s4566_s20 = smov 64  }
  0x10   : > { %641 = vst.msk [vmem:[#allocation2 + $0xcc] sm:$0xf] %vm587_vm0, %v4565_v0  ;;  %642 = vst.msk [vmem:[#allocation2 + $0xd0] sm:$0xf] %vm587_vm0, %v4565_v0  ;;  %s4000_s14 = sshll.u32 %s6222_s13, 8  ;;  %v4425_v62 = vld [vmem:[%s6134_s1] sm:$0xff]  }
  0x11   : > { %s4607_s17 = scalar_lea.vmem %s6133_s0, %s4000_s14  ;;  %vm965_vm4 = vsmask.f32 7424  ;;  %vm4626_vm5 = vmand %vm375_vm2, %vm376_vm3  ;;  %4035 = vmatpush3.bf16.msra.mxu0 %v4425_v62  ;;  %4326 = vmatpush3.bf16.msra.mxu1 %v4425_v62  ;;  %v4440_v62 = vld [vmem:[%s6134_s1 + $0x60] sm:$0xff]   ;;  %vm1238_vm6 = vcmask 1046528   ;;  %vm2215_vm7 = vcmask 523264   ;;  %s3721_s23 = sshll.u32 %s6222_s13, 1 }
  0x12   : > { %v183_v2 = vld [vmem:[%s4607_s17] sm:$0xff]  ;;  %v184_v3 = vld [vmem:[%s4607_s17 + $0x8] sm:$0xff]  ;;  %v205_v7 = vld [vmem:[%s4607_s17 + $0xb0] sm:$0xff]  ;;  %s181_s26 = scalar_lea.vmem %s6136_s3, %s3721_s23  ;;  %vm3624_vm8 = vcmask 517120  }
  0x13   : > { %v207_v4 = vld [vmem:[%s4607_s17 + $0xc0] sm:$0xff]  ;;  %v215_v5 = vpack.c.bf16 %v184_v3, %v183_v2  ;;  %v208_v6 = vld [vmem:[%s4607_s17 + $0xc8] sm:$0xff]  ;;  %v206_v8 = vld [vmem:[%s4607_s17 + $0xb8] sm:$0xff] }
  0x14   : > { %v227_v9 = vpack.c.bf16 %v208_v6, %v207_v4  ;;  %v226_v10 = vpack.c.bf16 %v206_v8, %v205_v7  ;;  %v185_v11 = vld [vmem:[%s4607_s17 + $0x10] sm:$0xff]  ;;  %v186_v12 = vld [vmem:[%s4607_s17 + $0x18] sm:$0xff]  ;;  %v187_v52 = vld [vmem:[%s4607_s17 + $0x20] sm:$0xff] }
  0x15   : > { %v232_v13 = vshrl.u32 %v215_v5, 16  ;;  %v235_v14 = vshll.u32 %v215_v5, 16  ;;  %v644_v15 = vld [vmem:[#allocation2] sm:$0xf]  ;;  %v645_v16 = vld [vmem:[#allocation2 + $0x4] sm:$0xf]  ;;  %v216_v17 = vpack.c.bf16 %v186_v12, %v185_v11 }
  0x16   : > { %v4620_v18 = vcombine.low %v644_v15, %v645_v16  ;;  %v4347_v19 = vld [vmem:[#allocation2 + $0x8] ss:$0 sps:$4 sm:$0x11]   ;;  %v316_v20 = vshrl.u32 %v227_v9, 16  ;;  %v319_v22 = vshll.u32 %v227_v9, 16  ;;  %v309_v23 = vshrl.u32 %v226_v10, 16 }
  0x17   : > { %v234_v21 = vrot.slane %v232_v13, 7  ;;  %v312_v24 = vshll.u32 %v226_v10, 16  ;;  %v209_v25 = vld [vmem:[%s4607_s17 + $0xd0] sm:$0xff]  ;;  %v210_v26 = vld [vmem:[%s4607_s17 + $0xd8] sm:$0xff]  ;;  %v974_v30 = vshll.u32 %v4347_v19, 16  ;;  %v239_v34 = vshrl.u32 %v216_v17, 16 }
  0x18   : > { %v967_v28 = vshrl.u32 %v4620_v18, 16  ;;  %v969_v29 = vshll.u32 %v4620_v18, 16  ;;  %v318_v31 = vrot.slane %v316_v20, 7  ;;  %v311_v33 = vrot.slane %v309_v23, 7  ;;  %v188_v53 = vld [vmem:[%s4607_s17 + $0x28] sm:$0xff]  ;;  %v4435_v10 = vld [vmem:[%s6134_s1 + $0x50] sm:$0xff]  }
  0x19   : > { %v237_v32 = vor.u32 %v235_v14, %v234_v21  ;;  %v242_v35 = vshll.u32 %v216_v17, 16  ;;  %v976_v37 = vrot.slane %v974_v30, 1  ;;  %v228_v39 = vpack.c.bf16 %v210_v26, %v209_v25  ;;  %v4429_v3 = vld [vmem:[%s6134_s1 + $0x48] sm:$0xff]   ;;  %v211_v12 = vld [vmem:[%s4607_s17 + $0xe0] sm:$0xff]  ;;  %v189_v19 = vld [vmem:[%s4607_s17 + $0x30] sm:$0xff] }
  0x1a   : > { %v971_v36 = vrot.slane %v969_v29, 1  ;;  %v321_v38 = vor.u32 %v319_v22, %v318_v31  ;;  %v314_v41 = vor.u32 %v312_v24, %v311_v33  ;;  %v405_v42 = vsel %vm4626_vm5, %v311_v33, 0  ;;  %v4430_v7 = vld [vmem:[%s6134_s1 + $0x8] sm:$0xff]   ;;  %4036 = vmatprep.subr.bf16.mxu0 %v4429_v3  ;;  %4319 = vmatprep.subr.bf16.mxu1 %v4429_v3  ;;  %v190_v20 = vld [vmem:[%s4607_s17 + $0x38] sm:$0xff]  ;;  %v4436_v24 = vld [vmem:[%s6134_s1 + $0x10] sm:$0xff]  }
  0x1b   : > { %v378_v40 = vsel %vm4626_vm5, 0, %v237_v32  ;;  %v241_v43 = vrot.slane %v239_v34, 7  ;;  %v3757_v51 = vcombine.low %v405_v42, %v405_v42  ;;  %v323_v58 = vshrl.u32 %v228_v39, 16  ;;  %v212_v13 = vld [vmem:[%s4607_s17 + $0xe8] sm:$0xff]  ;;  %4037 = vmatpush3.bf16.msra.mxu0 %v4430_v7  ;;  %v4438_v29 = vld [vmem:[%s6134_s1 + $0x58] sm:$0xff]   ;;  %4327 = vmatpush3.bf16.msra.mxu1 %v4430_v7 }
  0x1c   : > { %v3722_v44 = vcombine.low %v378_v40, %v378_v40  ;;  %v3723_v45 = vcombine.high %v378_v40, %v378_v40  ;;  %v972_v46 = vor.u32 %v971_v36, %v967_v28  ;;  %v390_v47 = vsel %vm4626_vm5, 0, %v321_v38  ;;  %4038 = vmatprep.subr.bf16.mxu0 %v4435_v10  ;;  %4320 = vmatprep.subr.bf16.mxu1 %v4435_v10 }
  0x1d   : > { %v3758_v48 = vcombine.low %v390_v47, %v390_v47  ;;  %v3759_v49 = vcombine.high %v390_v47, %v390_v47  ;;  %v389_v50 = vsel %vm4626_vm5, 0, %v314_v41  ;;  %v244_v57 = vor.u32 %v242_v35, %v241_v43  ;;  %624 = vst.msk [vmem:[#allocation2 + $0x98] sm:$0x1] %vm590_vm1, %v3757_v51 }
  0x1e   : > { %588 = vst.msk [vmem:[#allocation2 + $0xc] sm:$0xf] %vm587_vm0, %v3722_v44  ;;  %589 = vst.msk [vmem:[#allocation2 + $0x10] sm:$0xf] %vm587_vm0, %v3723_v45  ;;  %v977_v54 = vsel %vm965_vm4, %v972_v46, %v976_v37  ;;  %v3755_v55 = vcombine.low %v389_v50, %v389_v50  ;;  %v3756_v56 = vcombine.high %v389_v50, %v389_v50  ;;  %v326_v59 = vshll.u32 %v228_v39, 16 }
  0x1f   : > { %1158 = vrot.lane.b32.xlu1 %v977_v54, %s4566_s20  ;;  %625 = vst.msk [vmem:[#allocation2 + $0x9c] sm:$0xf] %vm587_vm0, %v3758_v48  ;;  %626 = vst.msk [vmem:[#allocation2 + $0xa0] sm:$0xf] %vm587_vm0, %v3759_v49  ;;  %v394_v60 = vsel %vm4626_vm5, %v234_v21, 0  ;;  %v406_v61 = vsel %vm4626_vm5, %v318_v31, 0  ;;  %v217_v2 = vpack.c.bf16 %v188_v53, %v187_v52  ;;  %v4696_v33 = vpack.c.bf16 %v212_v13, %v211_v12 }
  0x20   : > { %622 = vst.msk [vmem:[#allocation2 + $0x90] sm:$0xf] %vm587_vm0, %v3755_v55  ;;  %623 = vst.msk [vmem:[#allocation2 + $0x94] sm:$0xf] %vm587_vm0, %v3756_v56  ;;  %v379_v63 = vsel %vm4626_vm5, 0, %v244_v57  ;;  %v3724_v0 = vcombine.low %v394_v60, %v394_v60  ;;  %v3760_v1 = vcombine.low %v406_v61, %v406_v61  ;;  %v325_v6 = vrot.slane %v323_v58, 7  ;;  %4039 = vmatpush3.bf16.msra.mxu0 %v4436_v24 }
  0x21   : > { %v3725_v4 = vcombine.low %v379_v63, %v379_v63  ;;  %v3726_v5 = vcombine.high %v379_v63, %v379_v63  ;;  %v246_v8 = vshrl.u32 %v217_v2, 16  ;;  %v395_v9 = vsel %vm4626_vm5, %v241_v43, 0  ;;  %v4439_v43 = vld [vmem:[%s6134_s1 + $0x18] sm:$0xff]   ;;  %4040 = vmatprep.subr.bf16.mxu0 %v4438_v29  ;;  %4328 = vmatpush3.bf16.msra.mxu1 %v4436_v24  ;;  %v213_v12 = vld [vmem:[%s4607_s17 + $0xf0] sm:$0xff] }
  0x22   : > { %591 = vst.msk [vmem:[#allocation2 + $0x14] sm:$0x1] %vm590_vm1, %v3724_v0  ;;  %627 = vst.msk [vmem:[#allocation2 + $0xa4] sm:$0x1] %vm590_vm1, %v3760_v1  ;;  %v249_v11 = vshll.u32 %v217_v2, 16  ;;  %v3727_v14 = vcombine.low %v395_v9, %v395_v9  ;;  %v328_v15 = vor.u32 %v326_v59, %v325_v6  ;;  %v407_v17 = vsel %vm4626_vm5, %v325_v6, 0  ;;  %4321 = vmatprep.subr.bf16.mxu1 %v4438_v29 }
  0x23   : > { %592 = vst.msk [vmem:[#allocation2 + $0x18] sm:$0xf] %vm587_vm0, %v3725_v4  ;;  %593 = vst.msk [vmem:[#allocation2 + $0x1c] sm:$0xf] %vm587_vm0, %v3726_v5  ;;  %v4677_v16 = vrot.slane %v246_v8, 7  ;;  %v3763_v23 = vcombine.low %v407_v17, %v407_v17  ;;  %v4699_v34 = vpack.c.bf16 %v190_v20, %v189_v19  ;;  %v330_v51 = vshrl.u32 %v4696_v33, 16 }
  0x24   : > { %594 = vst.msk [vmem:[#allocation2 + $0x20] sm:$0x1] %vm590_vm1, %v3727_v14  ;;  %v4351_v37 = vld [vmem:[#allocation2 + $0x98] ss:$0 sps:$4 sm:$0x11]   ;;  %v391_v38 = vsel %vm4626_vm5, 0, %v328_v15  ;;  %4041 = vmatpush3.bf16.msra.mxu0 %v4439_v43 }
  0x25   : > { %v708_v21 = vld [vmem:[#allocation2 + $0xc] sm:$0xf]  ;;  %v4683_v22 = vld [vmem:[#allocation2 + $0x10] sm:$0xf]  ;;  %v251_v32 = vor.u32 %v249_v11, %v4677_v16  ;;  %630 = vst.msk [vmem:[#allocation2 + $0xb0] sm:$0x1] %vm590_vm1, %v3763_v23  ;;  %v3761_v39 = vcombine.low %v391_v38, %v391_v38  ;;  %v3762_v40 = vcombine.high %v391_v38, %v391_v38  ;;  %4042 = vmatprep.subr.bf16.mxu0 %v4440_v62 }
  0x26   : > { %v4690_v25 = vcombine.low %v708_v21, %v4683_v22  ;;  %v732_v26 = vld [vmem:[#allocation2 + $0x9c] sm:$0xf]  ;;  %v733_v28 = vld [vmem:[#allocation2 + $0xa0] sm:$0xf]  ;;  %v646_v41 = vld [vmem:[#allocation2 + $0xc] sm:$0xf]  ;;  %4329 = vmatpush3.bf16.msra.mxu1 %v4439_v43 }
  0x27   : > { %v668_v30 = vld [vmem:[#allocation2 + $0x90] sm:$0xf]  ;;  %v669_v31 = vld [vmem:[#allocation2 + $0x94] sm:$0xf]  ;;  %v4703_v35 = vcombine.low %v732_v26, %v733_v28  ;;  %v1118_v46 = vshll.u32 %v4351_v37, 16  ;;  %v380_v50 = vsel %vm4626_vm5, 0, %v251_v32  ;;  %4322 = vmatprep.subr.bf16.mxu1 %v4440_v62 }
  0x28   : > { %1367 = vrot.lane.b32.xlu0 %v4690_v25, %s4566_s20  ;;  %v4705_v36 = vcombine.low %v668_v30, %v669_v31  ;;  %v647_v42 = vld [vmem:[#allocation2 + $0x10] sm:$0xf]  ;;  %628 = vst.msk [vmem:[#allocation2 + $0xa8] sm:$0xf] %vm587_vm0, %v3761_v39  ;;  %629 = vst.msk [vmem:[#allocation2 + $0xac] sm:$0xf] %vm587_vm0, %v3762_v40  ;;  %v3728_v60 = vcombine.low %v380_v50, %v380_v50  ;;  %v3729_v61 = vcombine.high %v380_v50, %v380_v50 }
  0x29   : > { %v4718_v49 = vcombine.low %v646_v41, %v647_v42  ;;  %v253_v52 = vshrl.u32 %v4699_v34, 16  ;;  %v1120_v54 = vrot.slane %v1118_v46, 1  ;;  %v670_v56 = vld [vmem:[#allocation2 + $0x9c] sm:$0xf]  ;;  %v671_v0 = vld [vmem:[#allocation2 + $0xa0] sm:$0xf] }
  0x2a   : > { %v1111_v44 = vshrl.u32 %v4705_v36, 16  ;;  %v1113_v45 = vshll.u32 %v4705_v36, 16  ;;  %v710_v47 = vld [vmem:[#allocation2 + $0x18] sm:$0xf]  ;;  %v4714_v48 = vld [vmem:[#allocation2 + $0x1c] sm:$0xf]  ;;  %v4736_v5 = vcombine.low %v670_v56, %v671_v0 }
  0x2b   : > { %v4727_v55 = vcombine.low %v710_v47, %v4714_v48  ;;  %v4357_v57 = vld [vmem:[#allocation2 + $0x14] ss:$0 sps:$4 sm:$0x11]   ;;  %v979_v58 = vshrl.u32 %v4718_v49, 16  ;;  %v981_v59 = vshll.u32 %v4718_v49, 16  ;;  %v333_v1 = vshll.u32 %v4696_v33, 16 }
  0x2c   : > { %1391 = vrot.lane.b32.xlu0 %v4703_v35, %s4566_s20  ;;  %v1115_v53 = vrot.slane %v1113_v45, 1  ;;  %v256_v2 = vshll.u32 %v4699_v34, 16  ;;  %v986_v4 = vshll.u32 %v4357_v57, 16  ;;  %v4359_v6 = vld [vmem:[#allocation2 + $0xa4] ss:$0 sps:$4 sm:$0x11]  }
  0x2d   : > { %v983_v3 = vrot.slane %v981_v59, 1  ;;  %595 = vst.msk [vmem:[#allocation2 + $0x24] sm:$0xf] %vm587_vm0, %v3728_v60  ;;  %596 = vst.msk [vmem:[#allocation2 + $0x28] sm:$0xf] %vm587_vm0, %v3729_v61  ;;  %v4740_v7 = vrot.slane %v330_v51, 7 }
  0x2e   : > { %v1116_v63 = vor.u32 %v1115_v53, %v1111_v44  ;;  %v648_v9 = vld [vmem:[#allocation2 + $0x18] sm:$0xf]  ;;  %v649_v10 = vld [vmem:[#allocation2 + $0x1c] sm:$0xf]  ;;  %v4745_v11 = vrot.slane %v253_v52, 7  ;;  %v988_v14 = vrot.slane %v986_v4, 1 }
  0x2f   : > { %v984_v13 = vor.u32 %v983_v3, %v979_v58  ;;  %v1123_v15 = vshrl.u32 %v4736_v5, 16  ;;  %v1125_v17 = vshll.u32 %v4736_v5, 16  ;;  %v4441_v19 = vld [vmem:[%s6134_s1 + $0x20] sm:$0xff]   ;;  %v734_v20 = vld [vmem:[#allocation2 + $0xa8] sm:$0xf]  ;;  %v335_v23 = vor.u32 %v333_v1, %v4740_v7  ;;  %v214_v26 = vld [vmem:[%s4607_s17 + $0xf8] sm:$0xff] }
  0x30   : > { %v1121_v8 = vsel %vm965_vm4, %v1116_v63, %v1120_v54  ;;  %1369 = vrot.lane.b32.xlu0 %v4727_v55, %s4566_s20  ;;  %v735_v21 = vld [vmem:[#allocation2 + $0xac] sm:$0xf]  ;;  %v4755_v24 = vcombine.low %v648_v9, %v649_v10  ;;  %v4365_v31 = vld [vmem:[#allocation2 + $0x20] ss:$0 sps:$4 sm:$0x11]   ;;  %v258_v33 = vor.u32 %v256_v2, %v4745_v11  ;;  %4043 = vmatpush3.bf16.msra.mxu0 %v4441_v19  ;;  %v1130_v34 = vshll.u32 %v4359_v6, 16 }
  0x31   : > { %1182 = vrot.lane.b32.xlu1 %v1121_v8, %s4566_s20  ;;  %v4758_v28 = vcombine.low %v734_v20, %v735_v21  ;;  %v989_v29 = vsel %vm965_vm4, %v984_v13, %v988_v14  ;;  %v1127_v30 = vrot.slane %v1125_v17, 1  ;;  %v672_v32 = vld [vmem:[#allocation2 + $0xa8] sm:$0xf]  ;;  %4330 = vmatpush3.bf16.msra.mxu1 %v4441_v19  ;;  %v392_v37 = vsel %vm4626_vm5, 0, %v335_v23  ;;  %v673_v40 = vld [vmem:[#allocation2 + $0xac] sm:$0xf] }
  0x32   : > { %v991_v38 = vshrl.u32 %v4755_v24, 16  ;;  %v993_v39 = vshll.u32 %v4755_v24, 16  ;;  %v3764_v42 = vcombine.low %v392_v37, %v392_v37  ;;  %v230_v43 = vpack.c.bf16 %v214_v26, %v213_v12  ;;  %v191_v44 = vld [vmem:[%s4607_s17 + $0x40] sm:$0xff]  ;;  %v192_v45 = vld [vmem:[%s4607_s17 + $0x48] sm:$0xff]  ;;  %v773_v14 = vld [vmem:[#allocation2 + $0x18] sm:$0xf] }
  0x33   : > { %v1128_v41 = vor.u32 %v1127_v30, %v1123_v15  ;;  %v1132_v46 = vrot.slane %v1130_v34, 1  ;;  %v3765_v51 = vcombine.high %v392_v37, %v392_v37  ;;  %v4773_v53 = vcombine.low %v672_v32, %v673_v40  ;;  %v4445_v58 = vld [vmem:[%s6134_s1 + $0x68] sm:$0xff]   ;;  %v4367_v61 = vld [vmem:[#allocation2 + $0xb0] ss:$0 sps:$4 sm:$0x11]  }
  0x34   : > { %1160 = vrot.lane.b32.xlu0 %v989_v29, %s4566_s20  ;;  %v712_v47 = vld [vmem:[#allocation2 + $0x24] sm:$0xf]  ;;  %v4771_v50 = vld [vmem:[#allocation2 + $0x28] sm:$0xf]  ;;  %v995_v52 = vrot.slane %v993_v39, 1  ;;  %v998_v56 = vshll.u32 %v4365_v31, 16  ;;  %v4790_v2 = vpack.c.bf16 %v192_v45, %v191_v44  ;;  %4044 = vmatprep.subr.bf16.mxu0 %v4445_v58 }
  0x35   : > { %1393 = vrot.lane.b32.xlu1 %v4758_v28, %s4566_s20  ;;  %v4776_v54 = vcombine.low %v712_v47, %v4771_v50  ;;  %631 = vst.msk [vmem:[#allocation2 + $0xb4] sm:$0xf] %vm587_vm0, %v3764_v42  ;;  %v381_v57 = vsel %vm4626_vm5, 0, %v258_v33  ;;  %v1133_v59 = vsel %vm965_vm4, %v1128_v41, %v1132_v46  ;;  %632 = vst.msk [vmem:[#allocation2 + $0xb8] sm:$0xf] %vm587_vm0, %v3765_v51  ;;  %v1137_v63 = vshll.u32 %v4773_v53, 16 }
  0x36   : > { %v996_v60 = vor.u32 %v995_v52, %v991_v38  ;;  %v1000_v62 = vrot.slane %v998_v56, 1  ;;  %v650_v0 = vld [vmem:[#allocation2 + $0x24] sm:$0xf]  ;;  %v651_v1 = vld [vmem:[#allocation2 + $0x28] sm:$0xf]  ;;  %v1142_v3 = vshll.u32 %v4367_v61, 16  ;;  %v3731_v4 = vcombine.low %v381_v57, %v381_v57  ;;  %4323 = vmatprep.subr.bf16.mxu1 %v4445_v58 }
  0x37   : > { %v3732_v6 = vcombine.high %v381_v57, %v381_v57  ;;  %v337_v8 = vshrl.u32 %v230_v43, 16  ;;  %v1135_v10 = vshrl.u32 %v4773_v53, 16  ;;  %v1139_v12 = vrot.slane %v1137_v63, 1  ;;  %v4446_v20 = vld [vmem:[%s6134_s1 + $0x28] sm:$0xff]   ;;  %v774_v29 = vld [vmem:[#allocation2 + $0x1c] sm:$0xf] }
  0x38   : > { %1371 = vrot.lane.b32.xlu0 %v4776_v54, %s4566_s20  ;;  %v1001_v9 = vsel %vm965_vm4, %v996_v60, %v1000_v62  ;;  %v340_v13 = vshll.u32 %v230_v43, 16  ;;  %598 = vst.msk [vmem:[#allocation2 + $0x30] sm:$0xf] %vm587_vm0, %v3731_v4  ;;  %v396_v17 = vsel %vm4626_vm5, %v4677_v16, 0  ;;  %v4801_v19 = vcombine.low %v650_v0, %v651_v1  ;;  %v4447_v16 = vld [vmem:[%s6134_s1 + $0x70] sm:$0xff]   ;;  %4045 = vmatpush3.bf16.msra.mxu0 %v4446_v20  ;;  %v194_v4 = vld [vmem:[%s4607_s17 + $0x58] sm:$0xff] }
  0x39   : > { %1184 = vrot.lane.b32.xlu1 %v1133_v59, %s4566_s20  ;;  %599 = vst.msk [vmem:[#allocation2 + $0x34] sm:$0xf] %vm587_vm0, %v3732_v6  ;;  %v4796_v15 = vrot.slane %v337_v8, 7  ;;  %v3730_v21 = vcombine.low %v396_v17, %v396_v17  ;;  %v408_v23 = vsel %vm4626_vm5, %v4740_v7, 0  ;;  %v260_v26 = vshrl.u32 %v4790_v2, 16  ;;  %4331 = vmatpush3.bf16.msra.mxu1 %v4446_v20  ;;  %v4448_v51 = vld [vmem:[%s6134_s1 + $0x30] sm:$0xff]  }
  0x3a   : > { %v1144_v31 = vrot.slane %v1142_v3, 1  ;;  %v1005_v33 = vshll.u32 %v4801_v19, 16  ;;  %v3766_v34 = vcombine.low %v408_v23, %v408_v23  ;;  %v1140_v38 = vor.u32 %v1139_v12, %v1135_v10  ;;  %4046 = vmatprep.subr.bf16.mxu0 %v4447_v16  ;;  %4324 = vmatprep.subr.bf16.mxu1 %v4447_v16  ;;  %v4379_v61 = vld [vmem:[#allocation2 + $0x20] ss:$0 sps:$4 sm:$0x11]   ;;  %v193_v3 = vld [vmem:[%s4607_s17 + $0x50] sm:$0xff] }
  0x3b   : > { %v342_v32 = vor.u32 %v340_v13, %v4796_v15  ;;  %597 = vst.msk [vmem:[#allocation2 + $0x2c] sm:$0x1] %vm590_vm1, %v3730_v21  ;;  %v4822_v42 = vcombine.low %v773_v14, %v774_v29  ;;  %v4826_v46 = vrot.slane %v260_v26, 7  ;;  %v263_v47 = vshll.u32 %v4790_v2, 16  ;;  %v4452_v6 = vld [vmem:[%s6134_s1 + $0x78] sm:$0xff]  }
  0x3c   : > { %1162 = vrot.lane.b32.xlu0 %v1001_v9, %s4566_s20  ;;  %v736_v30 = vld [vmem:[#allocation2 + $0xb4] sm:$0xf]  ;;  %v737_v37 = vld [vmem:[#allocation2 + $0xb8] sm:$0xf]  ;;  %633 = vst.msk [vmem:[#allocation2 + $0xbc] sm:$0x1] %vm590_vm1, %v3766_v34  ;;  %v1145_v52 = vsel %vm965_vm4, %v1140_v38, %v1144_v31  ;;  %4047 = vmatpush3.bf16.msra.mxu0 %v4448_v51 }
  0x3d   : > { %v674_v7 = vld [vmem:[#allocation2 + $0xb4] sm:$0xf]  ;;  %v675_v39 = vld [vmem:[#allocation2 + $0xb8] sm:$0xf]  ;;  %v4817_v40 = vcombine.low %v736_v30, %v737_v37  ;;  %v393_v41 = vsel %vm4626_vm5, 0, %v342_v32  ;;  %v1003_v58 = vshrl.u32 %v4801_v19, 16  ;;  %4332 = vmatpush3.bf16.msra.mxu1 %v4448_v51  ;;  %v265_v0 = vor.u32 %v263_v47, %v4826_v46  ;;  %4048 = vmatprep.subr.bf16.mxu0 %v4452_v6 }
  0x3e   : > { %v3767_v43 = vcombine.low %v393_v41, %v393_v41  ;;  %v3768_v44 = vcombine.high %v393_v41, %v393_v41  ;;  %v4824_v45 = vcombine.low %v674_v7, %v675_v39  ;;  %v1007_v59 = vrot.slane %v1005_v33, 1  ;;  %v756_v8 = vld [vmem:[#allocation2 + $0xc] sm:$0xe]  ;;  %v775_v20 = vld [vmem:[#allocation2 + $0x24] sm:$0xf]  ;;  %4325 = vmatprep.subr.bf16.mxu1 %v4452_v6 }
  0x3f   : > { %1395 = vrot.lane.b32.xlu1 %v4817_v40, %s4566_s20  ;;  %v714_v56 = vld [vmem:[#allocation2 + $0x30] sm:$0xf]  ;;  %v1898_v1 = vshll.u32 %v4822_v42, 16  ;;  %v397_v10 = vsel %vm4626_vm5, %v4745_v11, 0  ;;  %v382_v23 = vsel %vm4626_vm5, 0, %v265_v0  ;;  %v1896_v26 = vshrl.u32 %v4822_v42, 16 }
  0x40   : > { %v4835_v57 = vld [vmem:[#allocation2 + $0x34] sm:$0xf]  ;;  %634 = vst.msk [vmem:[#allocation2 + $0xc0] sm:$0xf] %vm587_vm0, %v3767_v43  ;;  %635 = vst.msk [vmem:[#allocation2 + $0xc4] sm:$0xf] %vm587_vm0, %v3768_v44  ;;  %v1008_v13 = vor.u32 %v1007_v59, %v1003_v58  ;;  %v3733_v17 = vcombine.low %v397_v10, %v397_v10  ;;  %v3734_v31 = vcombine.low %v382_v23, %v382_v23 }
  0x41   : > { %v4841_v60 = vcombine.low %v714_v56, %v4835_v57  ;;  %v652_v62 = vld [vmem:[#allocation2 + $0x30] sm:$0xf]  ;;  %v1149_v63 = vshll.u32 %v4824_v45, 16  ;;  %v653_v2 = vld [vmem:[#allocation2 + $0x34] sm:$0xf]  ;;  %v1147_v9 = vshrl.u32 %v4824_v45, 16  ;;  %v3735_v32 = vcombine.high %v382_v23, %v382_v23 }
  0x42   : > { %v4373_v12 = vld [vmem:[#allocation2 + $0x2c] ss:$0 sps:$4 sm:$0x11]   ;;  %v1903_v29 = vshll.u32 %v4379_v61, 16  ;;  %v4861_v16 = vcombine.low %v652_v62, %v653_v2  ;;  %v1900_v11 = vrot.slane %v1898_v1, 1  ;;  %v3850_v34 = vcombine.low %v756_v8, %v4683_v22  ;;  %v195_v22 = vld [vmem:[%s4607_s17 + $0x60] sm:$0xff] }
  0x43   : > { %1186 = vrot.lane.b32.xlu1 %v1145_v52, %s4566_s20  ;;  %1373 = vrot.lane.b32.xlu0 %v4841_v60, %s4566_s20  ;;  %v1151_v14 = vrot.slane %v1149_v63, 1  ;;  %v4375_v21 = vld [vmem:[#allocation2 + $0xbc] ss:$0 sps:$4 sm:$0x11]   ;;  %v1010_v30 = vshll.u32 %v4373_v12, 16  ;;  %v220_v7 = vpack.c.bf16 %v194_v4, %v193_v3  ;;  %v196_v63 = vld [vmem:[%s4607_s17 + $0x68] sm:$0xff] }
  0x44   : > { %600 = vst.msk [vmem:[#allocation2 + $0x38] sm:$0x1] %vm590_vm1, %v3733_v17  ;;  %v776_v33 = vld [vmem:[#allocation2 + $0x28] sm:$0xf]  ;;  %v1154_v44 = vshll.u32 %v4375_v21, 16  ;;  %v1017_v51 = vshll.u32 %v4861_v16, 16  ;;  %v1901_v59 = vor.u32 %v1900_v11, %v1896_v26  ;;  %v4892_v17 = vpack.c.bf16 %v196_v63, %v195_v22 }
  0x45   : > { %v1012_v41 = vrot.slane %v1010_v30, 1  ;;  %v1152_v43 = vor.u32 %v1151_v14, %v1147_v9  ;;  %601 = vst.msk [vmem:[#allocation2 + $0x3c] sm:$0xf] %vm587_vm0, %v3734_v31  ;;  %602 = vst.msk [vmem:[#allocation2 + $0x40] sm:$0xf] %vm587_vm0, %v3735_v32  ;;  %v4872_v52 = vcombine.low %v775_v20, %v776_v33  ;;  %v1905_v61 = vrot.slane %v1903_v29, 1 }
  0x46   : > { %v4869_v47 = vld [vmem:[#allocation2 + $0x18] sm:$0xe]  ;;  %v1156_v58 = vrot.slane %v1154_v44, 1  ;;  %v4386_v62 = vld [vmem:[#allocation2 + $0x2c] ss:$0 sps:$4 sm:$0x11]  }
  0x47   : > { %v738_v37 = vld [vmem:[#allocation2 + $0xc0] sm:$0xf]  ;;  %v739_v38 = vld [vmem:[#allocation2 + $0xc4] sm:$0xf]  ;;  %v1013_v56 = vsel %vm965_vm4, %v1008_v13, %v1012_v41  ;;  %v1015_v0 = vshrl.u32 %v4861_v16, 16  ;;  %v267_v2 = vshrl.u32 %v220_v7, 16  ;;  %v3851_v12 = vcombine.low %v4869_v47, %v4714_v48 }
  0x48   : > { %v4865_v39 = vcombine.low %v738_v37, %v739_v38  ;;  %1164 = vrot.lane.b32.xlu0 %v1013_v56, %s4566_s20  ;;  %v4382_v1 = vld [vmem:[#allocation2 + $0x14] ss:$0 sps:$4 sm:$0x11]   ;;  %v4453_v3 = vld [vmem:[%s6134_s1 + $0x38] sm:$0xff]   ;;  %v1157_v4 = vsel %vm965_vm4, %v1152_v43, %v1156_v58  ;;  %v1019_v6 = vrot.slane %v1017_v51, 1  ;;  %v1687_v8 = vrot.slane %v3850_v34, 1 }
  0x49   : > { %v270_v9 = vshll.u32 %v220_v7, 16  ;;  %v4457_v10 = vld [vmem:[%s6134_s1 + $0xc0] sm:$0xff]   ;;  %v4890_v14 = vrot.slane %v267_v2, 7  ;;  %v777_v20 = vld [vmem:[#allocation2 + $0x30] sm:$0xf]  ;;  %4049 = vmatpush3.bf16.msra.mxu0 %v4453_v3  ;;  %4333 = vmatpush3.bf16.msra.mxu1 %v4453_v3  ;;  %v1906_v23 = vsel %vm965_vm4, %v1901_v59, %v1905_v61  ;;  %v1910_v26 = vshll.u32 %v4872_v52, 16 }
  0x4a   : > { %1397 = vrot.lane.b32.xlu1 %v4865_v39, %s4566_s20  ;;  %v778_v21 = vld [vmem:[#allocation2 + $0x34] sm:$0xf]  ;;  %v1915_v29 = vshll.u32 %v4386_v62, 16  ;;  %v398_v48 = vsel %vm4626_vm5, %v4826_v46, 0  ;;  %4146 = vmatprep.subr.bf16.mxu1 %v4457_v10  ;;  %v1688_v32 = vrot.slane %v4382_v1, 1  ;;  %v1908_v33 = vshrl.u32 %v4872_v52, 16 }
  0x4b   : > { %v4381_v13 = vld [vmem:[#allocation2 + $0x38] ss:$0 sps:$4 sm:$0x11]   ;;  %v272_v11 = vor.u32 %v270_v9, %v4890_v14  ;;  %v3736_v34 = vcombine.low %v398_v48, %v398_v48  ;;  %v1020_v38 = vor.u32 %v1019_v6, %v1015_v0  ;;  %v1912_v41 = vrot.slane %v1910_v26, 1  ;;  %v197_v22 = vld [vmem:[%s4607_s17 + $0x70] sm:$0xff]  ;;  %v4922_v0 = vld [vmem:[%s6134_s1 + $0x100] sm:$0xff]  }
  0x4c   : > { %v716_v30 = vld [vmem:[#allocation2 + $0x3c] sm:$0xf]  ;;  %v4900_v31 = vld [vmem:[#allocation2 + $0x40] sm:$0xf]  ;;  %v1022_v7 = vshll.u32 %v4381_v13, 16  ;;  %v1917_v61 = vrot.slane %v1915_v29, 1  ;;  %v4916_v62 = vcombine.low %v777_v20, %v778_v21  ;;  %v1689_v1 = vsel %vm1238_vm6, %v1687_v8, %v1688_v32  ;;  %4278 = vmatprep.subr.bf16.mxu0 %v4922_v0 }
  0x4d   : > { %v4905_v37 = vcombine.low %v716_v30, %v4900_v31  ;;  %v654_v43 = vld [vmem:[#allocation2 + $0x3c] sm:$0xf]  ;;  %v655_v46 = vld [vmem:[#allocation2 + $0x40] sm:$0xf]  ;;  %v383_v44 = vsel %vm4626_vm5, 0, %v272_v11  ;;  %v1913_v3 = vor.u32 %v1912_v41, %v1908_v33  ;;  %v1690_v10 = vrot.slane %v3851_v12, 1 }
  0x4e   : > { %1188 = vrot.lane.b32.xlu1 %v1157_v4, %s4566_s20  ;;  %603 = vst.msk [vmem:[#allocation2 + $0x44] sm:$0x1] %vm590_vm1, %v3736_v34  ;;  %v4910_v47 = vcombine.low %v654_v43, %v655_v46  ;;  %v4389_v51 = vld [vmem:[#allocation2 + $0x20] ss:$0 sps:$4 sm:$0x11]   ;;  %v1024_v58 = vrot.slane %v1022_v7, 1  ;;  %v3737_v59 = vcombine.low %v383_v44, %v383_v44  ;;  %v3738_v2 = vcombine.high %v383_v44, %v383_v44 }
  0x4f   : > { %v758_v56 = vld [vmem:[#allocation2 + $0x24] sm:$0xe]  ;;  %1375 = vrot.lane.b32.xlu0 %v4905_v37, %s4566_s20  ;;  %6166 = vst [vmem:[#allocation4_spill] sm:$0xff] %v4916_v62  ;;  %v198_v63 = vld [vmem:[%s4607_s17 + $0x78] sm:$0xff]  ;;  %v274_v13 = vshrl.u32 %v4892_v17, 16  ;;  %v1691_v8 = vrot.slane %v4389_v51, 1 }
  0x50   : > { %6165 = vst [vmem:[#allocation3_spill] sm:$0xff] %v4910_v47  ;;  %v1029_v4 = vshll.u32 %v4910_v47, 16  ;;  %v4393_v6 = vld [vmem:[#allocation2 + $0x38] ss:$0 sps:$4 sm:$0x11]   ;;  %v1025_v9 = vsel %vm965_vm4, %v1020_v38, %v1024_v58  ;;  %v3852_v21 = vcombine.low %v758_v56, %v4771_v50  ;;  %v222_v26 = vpack.c.bf16 %v198_v63, %v197_v22  ;;  %v199_v38 = vld [vmem:[%s4607_s17 + $0x80] sm:$0xff] }
  0x51   : > { %604 = vst.msk [vmem:[#allocation2 + $0x48] sm:$0xf] %vm587_vm0, %v3737_v59  ;;  %v779_v20 = vld [vmem:[#allocation2 + $0x3c] sm:$0xf]  ;;  %605 = vst.msk [vmem:[#allocation2 + $0x4c] sm:$0xf] %vm587_vm0, %v3738_v2  ;;  %v1918_v50 = vsel %vm965_vm4, %v1913_v3, %v1917_v61  ;;  %v1692_v22 = vsel %vm1238_vm6, %v1690_v10, %v1691_v8 }
  0x52   : > { %2087 = vrot.lane.b32.xlu1 %v1906_v23, %s4566_s20  ;;  %v277_v23 = vshll.u32 %v4892_v17, 16  ;;  %v780_v29 = vld [vmem:[#allocation2 + $0x40] sm:$0xf]  ;;  %v1027_v12 = vshrl.u32 %v4910_v47, 16  ;;  %v1031_v48 = vrot.slane %v1029_v4, 1  ;;  %v276_v30 = vrot.slane %v274_v13, 7 }
  0x53   : > { %1166 = vrot.lane.b32.xlu0 %v1025_v9, %s4566_s20  ;;  %v1922_v32 = vshll.u32 %v4916_v62, 16  ;;  %v1920_v11 = vshrl.u32 %v4916_v62, 16  ;;  %v1927_v33 = vshll.u32 %v4393_v6, 16  ;;  %v399_v17 = vsel %vm4626_vm5, %v4890_v14, 0  ;;  %v200_v7 = vld [vmem:[%s4607_s17 + $0x88] sm:$0xff] }
  0x54   : > { %v4396_v34 = vld [vmem:[#allocation2 + $0x2c] ss:$0 sps:$4 sm:$0x11]   ;;  %v279_v43 = vor.u32 %v277_v23, %v276_v30  ;;  %v3739_v44 = vcombine.low %v399_v17, %v399_v17  ;;  %v4944_v51 = vld [vmem:[#allocation2 + $0x30] sm:$0xe]  ;;  %v1693_v56 = vrot.slane %v3852_v21, 1  ;;  %v4947_v59 = vcombine.low %v779_v20, %v780_v29 }
  0x55   : > { %v4388_v41 = vld [vmem:[#allocation2 + $0x44] ss:$0 sps:$4 sm:$0x11]   ;;  %v1924_v46 = vrot.slane %v1922_v32, 1  ;;  %v281_v58 = vshrl.u32 %v222_v26, 16  ;;  %v1032_v61 = vor.u32 %v1031_v48, %v1027_v12  ;;  %v1929_v10 = vrot.slane %v1927_v33, 1 }
  0x56   : > { %1735 = vrot.lane.b32.xlu1 %v1689_v1, %s4566_s20  ;;  %6167 = vst [vmem:[#allocation5_spill] sm:$0xff] %v4947_v59  ;;  %v1034_v63 = vshll.u32 %v4388_v41, 16  ;;  %v384_v14 = vsel %vm4626_vm5, 0, %v279_v43  ;;  %606 = vst.msk [vmem:[#allocation2 + $0x50] sm:$0x1] %vm590_vm1, %v3739_v44  ;;  %v284_v1 = vshll.u32 %v222_v26, 16  ;;  %v4957_v29 = vpack.c.bf16 %v200_v7, %v199_v38 }
  0x57   : > { %v4400_v2 = vld [vmem:[#allocation2 + $0x44] ss:$0 sps:$4 sm:$0x11]   ;;  %v3740_v4 = vcombine.low %v384_v14, %v384_v14  ;;  %v3741_v6 = vcombine.high %v384_v14, %v384_v14  ;;  %v1925_v9 = vor.u32 %v1924_v46, %v1920_v11  ;;  %v4955_v23 = vrot.slane %v281_v58, 7 }
  0x58   : > { %v718_v3 = vld [vmem:[#allocation2 + $0x48] sm:$0xf]  ;;  %v4953_v21 = vld [vmem:[#allocation2 + $0x4c] sm:$0xf]  ;;  %v1036_v20 = vrot.slane %v1034_v63, 1  ;;  %v1694_v48 = vrot.slane %v4396_v34, 1  ;;  %v3853_v11 = vcombine.low %v4944_v51, %v4835_v57 }
  0x59   : > { %v656_v13 = vld [vmem:[#allocation2 + $0x48] sm:$0xf]  ;;  %v657_v8 = vld [vmem:[#allocation2 + $0x4c] sm:$0xf]  ;;  %v4960_v12 = vcombine.low %v718_v3, %v4953_v21  ;;  %607 = vst.msk [vmem:[#allocation2 + $0x54] sm:$0xf] %vm587_vm0, %v3740_v4  ;;  %v286_v33 = vor.u32 %v284_v1, %v4955_v23  ;;  %v1930_v7 = vsel %vm965_vm4, %v1925_v9, %v1929_v10 }
  0x5a   : > { %2089 = vrot.lane.b32.xlu1 %v1918_v50, %s4566_s20  ;;  %608 = vst.msk [vmem:[#allocation2 + $0x58] sm:$0xf] %vm587_vm0, %v3741_v6  ;;  %v4964_v26 = vcombine.low %v656_v13, %v657_v8  ;;  %v1934_v32 = vshll.u32 %v4947_v59, 16  ;;  %v781_v50 = vld [vmem:[#allocation2 + $0x48] sm:$0xf]  ;;  %v1932_v17 = vshrl.u32 %v4947_v59, 16  ;;  %v1037_v34 = vsel %vm965_vm4, %v1032_v61, %v1036_v20 }
  0x5b   : > { %v400_v38 = vsel %vm4626_vm5, %v276_v30, 0  ;;  %1377 = vrot.lane.b32.xlu0 %v4960_v12, %s4566_s20  ;;  %v1939_v43 = vshll.u32 %v4400_v2, 16  ;;  %v782_v57 = vld [vmem:[#allocation2 + $0x4c] sm:$0xf]  ;;  %v385_v44 = vsel %vm4626_vm5, 0, %v286_v33  ;;  %v1695_v61 = vsel %vm1238_vm6, %v1693_v56, %v1694_v48 }
  0x5c   : > { %6168 = vst [vmem:[#allocation6_spill] sm:$0xff] %v4964_v26  ;;  %v1041_v41 = vshll.u32 %v4964_v26, 16  ;;  %v1039_v46 = vshrl.u32 %v4964_v26, 16  ;;  %v1936_v51 = vrot.slane %v1934_v32, 1  ;;  %v3743_v30 = vcombine.low %v385_v44, %v385_v44  ;;  %v793_v26 = vld [vmem:[#allocation2 + $0x90] sm:$0xf] }
  0x5d   : > { %v4395_v58 = vld [vmem:[#allocation2 + $0x50] ss:$0 sps:$4 sm:$0x11]   ;;  %v3744_v63 = vcombine.high %v385_v44, %v385_v44  ;;  %v4403_v1 = vld [vmem:[#allocation2 + $0x38] ss:$0 sps:$4 sm:$0x11]   ;;  %v4985_v2 = vcombine.low %v781_v50, %v782_v57 }
  0x5e   : > { %1737 = vrot.lane.b32.xlu1 %v1692_v22, %s4566_s20  ;;  %v3742_v22 = vcombine.low %v400_v38, %v400_v38  ;;  %v1043_v14 = vrot.slane %v1041_v41, 1  ;;  %v1046_v3 = vshll.u32 %v4395_v58, 16  ;;  %610 = vst.msk [vmem:[#allocation2 + $0x60] sm:$0xf] %vm587_vm0, %v3743_v30  ;;  %v1937_v4 = vor.u32 %v1936_v51, %v1932_v17  ;;  %v202_v44 = vld [vmem:[%s4607_s17 + $0x98] sm:$0xff] }
  0x5f   : > { %6169 = vst [vmem:[#allocation7_spill] sm:$0xff] %v4985_v2  ;;  %1168 = vrot.lane.b32.xlu0 %v1037_v34, %s4566_s20  ;;  %611 = vst.msk [vmem:[#allocation2 + $0x64] sm:$0xf] %vm587_vm0, %v3744_v63  ;;  %v1941_v6 = vrot.slane %v1939_v43, 1  ;;  %v288_v9 = vshrl.u32 %v4957_v29, 16  ;;  %v1696_v8 = vrot.slane %v3853_v11, 1 }
  0x60   : > { %609 = vst.msk [vmem:[#allocation2 + $0x5c] sm:$0x1] %vm590_vm1, %v3742_v22  ;;  %v4407_v10 = vld [vmem:[#allocation2 + $0x50] ss:$0 sps:$4 sm:$0x11]   ;;  %v1044_v56 = vor.u32 %v1043_v14, %v1039_v46  ;;  %v291_v48 = vshll.u32 %v4957_v29, 16 }
  0x61   : > { %v720_v13 = vld [vmem:[#allocation2 + $0x54] sm:$0xf]  ;;  %v4991_v20 = vld [vmem:[#allocation2 + $0x58] sm:$0xf]  ;;  %v1048_v50 = vrot.slane %v1046_v3, 1  ;;  %v4997_v17 = vrot.slane %v288_v9, 7  ;;  %v1942_v29 = vsel %vm965_vm4, %v1937_v4, %v1941_v6 }
  0x62   : > { %2091 = vrot.lane.b32.xlu1 %v1930_v7, %s4566_s20  ;;  %v4995_v32 = vcombine.low %v720_v13, %v4991_v20  ;;  %v658_v33 = vld [vmem:[#allocation2 + $0x54] sm:$0xf]  ;;  %v659_v38 = vld [vmem:[#allocation2 + $0x58] sm:$0xf]  ;;  %v1697_v7 = vrot.slane %v4403_v1, 1  ;;  %v1946_v41 = vshll.u32 %v4985_v2, 16 }
  0x63   : > { %v5000_v34 = vcombine.low %v658_v33, %v659_v38  ;;  %v1951_v11 = vshll.u32 %v4407_v10, 16  ;;  %v760_v43 = vld [vmem:[#allocation2 + $0x3c] sm:$0xe]  ;;  %v1944_v57 = vshrl.u32 %v4985_v2, 16  ;;  %v201_v46 = vld [vmem:[%s4607_s17 + $0x90] sm:$0xff]  ;;  %v1049_v51 = vsel %vm965_vm4, %v1044_v56, %v1048_v50  ;;  %v203_v3 = vld [vmem:[%s4607_s17 + $0xa0] sm:$0xff] }
  0x64   : > { %6170 = vst [vmem:[#allocation8_spill] sm:$0xff] %v4995_v32  ;;  %1379 = vrot.lane.b32.xlu0 %v4995_v32, %s4566_s20  ;;  %v293_v58 = vor.u32 %v291_v48, %v4997_v17  ;;  %v1948_v30 = vrot.slane %v1946_v41, 1  ;;  %v783_v63 = vld [vmem:[#allocation2 + $0x54] sm:$0xf]  ;;  %v784_v14 = vld [vmem:[#allocation2 + $0x58] sm:$0xf]  ;;  %v3854_v4 = vcombine.low %v760_v43, %v4900_v31  ;;  %v1698_v10 = vsel %vm1238_vm6, %v1696_v8, %v1697_v7 }
  0x65   : > { %6171 = vst [vmem:[#allocation9_spill] sm:$0xff] %v5000_v34  ;;  %v1053_v22 = vshll.u32 %v5000_v34, 16  ;;  %v1051_v1 = vshrl.u32 %v5000_v34, 16  ;;  %v722_v6 = vld [vmem:[#allocation2 + $0x60] sm:$0xf]  ;;  %v1953_v13 = vrot.slane %v1951_v11, 1  ;;  %v224_v11 = vpack.c.bf16 %v202_v44, %v201_v46 }
  0x66   : > { %1739 = vrot.lane.b32.xlu1 %v1695_v61, %s4566_s20  ;;  %v5015_v9 = vld [vmem:[#allocation2 + $0x64] sm:$0xf]  ;;  %v204_v50 = vld [vmem:[%s4607_s17 + $0xa8] sm:$0xff]  ;;  %v1949_v41 = vor.u32 %v1948_v30, %v1944_v57  ;;  %v660_v32 = vld [vmem:[#allocation2 + $0x60] sm:$0xf]  ;;  %v386_v34 = vsel %vm4626_vm5, 0, %v293_v58 }
  0x67   : > { %v4402_v61 = vld [vmem:[#allocation2 + $0x5c] ss:$0 sps:$4 sm:$0x11]   ;;  %v4410_v56 = vld [vmem:[#allocation2 + $0x44] ss:$0 sps:$4 sm:$0x11]   ;;  %v5022_v48 = vcombine.low %v722_v6, %v5015_v9  ;;  %v5031_v6 = vcombine.low %v783_v63, %v784_v14  ;;  %v3746_v57 = vcombine.low %v386_v34, %v386_v34  ;;  %v3747_v30 = vcombine.high %v386_v34, %v386_v34 }
  0x68   : > { %1170 = vrot.lane.b32.xlu0 %v1049_v51, %s4566_s20  ;;  %v1055_v33 = vrot.slane %v1053_v22, 1  ;;  %v1058_v38 = vshll.u32 %v4402_v61, 16  ;;  %v661_v31 = vld [vmem:[#allocation2 + $0x64] sm:$0xf]  ;;  %v761_v43 = vld [vmem:[#allocation2 + $0x48] sm:$0xe]  ;;  %v225_v2 = vpack.c.bf16 %v204_v50, %v203_v3 }
  0x69   : > { %v401_v8 = vsel %vm4626_vm5, %v4955_v23, 0  ;;  %v5029_v7 = vcombine.low %v660_v32, %v661_v31  ;;  %6173 = vst [vmem:[#allocation11_spill] sm:$0xff] %v5031_v6  ;;  %v4414_v22 = vld [vmem:[#allocation2 + $0x5c] ss:$0 sps:$4 sm:$0x11]   ;;  %v3855_v58 = vcombine.low %v761_v43, %v4953_v21  ;;  %v1954_v23 = vsel %vm965_vm4, %v1949_v41, %v1953_v13 }
  0x6a   : > { %2093 = vrot.lane.b32.xlu1 %v1942_v29, %s4566_s20  ;;  %v1056_v29 = vor.u32 %v1055_v33, %v1051_v1  ;;  %v1060_v51 = vrot.slane %v1058_v38, 1  ;;  %v3745_v61 = vcombine.low %v401_v8, %v401_v8  ;;  %v1699_v46 = vrot.slane %v3854_v4, 1  ;;  %v5039_v44 = vld [vmem:[#allocation2 + $0x50] ss:$0 sps:$4 sm:$0x11]  }
  0x6b   : > { %6172 = vst [vmem:[#allocation10_spill] sm:$0xff] %v5029_v7  ;;  %v1065_v32 = vshll.u32 %v5029_v7, 16  ;;  %v785_v63 = vld [vmem:[#allocation2 + $0x60] sm:$0xf]  ;;  %v786_v14 = vld [vmem:[#allocation2 + $0x64] sm:$0xf] }
  0x6c   : > { %1381 = vrot.lane.b32.xlu0 %v5022_v48, %s4566_s20  ;;  %v1061_v1 = vsel %vm965_vm4, %v1056_v29, %v1060_v51  ;;  %613 = vst.msk [vmem:[#allocation2 + $0x6c] sm:$0xf] %vm587_vm0, %v3746_v57  ;;  %614 = vst.msk [vmem:[#allocation2 + $0x70] sm:$0xf] %vm587_vm0, %v3747_v30  ;;  %v1700_v21 = vrot.slane %v4410_v56, 1  ;;  %v295_v34 = vshrl.u32 %v224_v11, 16 }
  0x6d   : > { %612 = vst.msk [vmem:[#allocation2 + $0x68] sm:$0x1] %vm590_vm1, %v3745_v61  ;;  %v298_v3 = vshll.u32 %v224_v11, 16  ;;  %v1958_v13 = vshll.u32 %v5031_v6, 16  ;;  %v1963_v4 = vshll.u32 %v4414_v22, 16  ;;  %v402_v50 = vsel %vm4626_vm5, %v4997_v17, 0 }
  0x6e   : > { %1741 = vrot.lane.b32.xlu1 %v1698_v10, %s4566_s20  ;;  %v1956_v10 = vshrl.u32 %v5031_v6, 16  ;;  %v1063_v33 = vshrl.u32 %v5029_v7, 16  ;;  %v1067_v38 = vrot.slane %v1065_v32, 1  ;;  %v297_v41 = vrot.slane %v295_v34, 7 }
  0x6f   : > { %v3748_v31 = vcombine.low %v402_v50, %v402_v50  ;;  %v1701_v56 = vsel %vm1238_vm6, %v1699_v46, %v1700_v21  ;;  %v1960_v43 = vrot.slane %v1958_v13, 1  ;;  %v1965_v8 = vrot.slane %v1963_v4, 1 }
  0x70   : > { %1172 = vrot.lane.b32.xlu0 %v1061_v1, %s4566_s20  ;;  %v1702_v11 = vrot.slane %v3855_v58, 1  ;;  %v300_v29 = vor.u32 %v298_v3, %v297_v41  ;;  %v302_v51 = vshrl.u32 %v225_v2, 16  ;;  %v305_v22 = vshll.u32 %v225_v2, 16  ;;  %v762_v2 = vld [vmem:[#allocation2 + $0x54] sm:$0xe] }
  0x71   : > { %615 = vst.msk [vmem:[#allocation2 + $0x74] sm:$0x1] %vm590_vm1, %v3748_v31  ;;  %v5055_v17 = vcombine.low %v785_v63, %v786_v14  ;;  %v1961_v57 = vor.u32 %v1960_v43, %v1956_v10  ;;  %v1703_v30 = vrot.slane %v5039_v44, 1  ;;  %v403_v61 = vsel %vm4626_vm5, %v297_v41, 0 }
  0x72   : > { %2095 = vrot.lane.b32.xlu1 %v1954_v23, %s4566_s20  ;;  %v387_v23 = vsel %vm4626_vm5, 0, %v300_v29  ;;  %v5063_v32 = vrot.slane %v302_v51, 7  ;;  %v3751_v34 = vcombine.low %v403_v61, %v403_v61  ;;  %v4426_v31 = vld [vmem:[#allocation2 + $0x5c] ss:$0 sps:$4 sm:$0x11]   ;;  %v1068_v43 = vor.u32 %v1067_v38, %v1063_v33 }
  0x73   : > { %6174 = vst [vmem:[#allocation12_spill] sm:$0xff] %v5055_v17  ;;  %v1968_v58 = vshrl.u32 %v5055_v17, 16  ;;  %v1970_v46 = vshll.u32 %v5055_v17, 16  ;;  %v724_v63 = vld [vmem:[#allocation2 + $0x6c] sm:$0xf]  ;;  %v3749_v1 = vcombine.low %v387_v23, %v387_v23  ;;  %v3750_v44 = vcombine.high %v387_v23, %v387_v23 }
  0x74   : > { %v5067_v14 = vld [vmem:[#allocation2 + $0x70] sm:$0xf]  ;;  %v1966_v21 = vsel %vm965_vm4, %v1961_v57, %v1965_v8  ;;  %v4409_v10 = vld [vmem:[#allocation2 + $0x68] ss:$0 sps:$4 sm:$0x11]   ;;  %v307_v13 = vor.u32 %v305_v22, %v5063_v32  ;;  %v1704_v57 = vsel %vm1238_vm6, %v1702_v11, %v1703_v30 }
  0x75   : > { %v5071_v3 = vcombine.low %v724_v63, %v5067_v14  ;;  %v1972_v4 = vrot.slane %v1970_v46, 1  ;;  %616 = vst.msk [vmem:[#allocation2 + $0x78] sm:$0xf] %vm587_vm0, %v3749_v1  ;;  %617 = vst.msk [vmem:[#allocation2 + $0x7c] sm:$0xf] %vm587_vm0, %v3750_v44  ;;  %v1070_v8 = vshll.u32 %v4409_v10, 16 }
  0x76   : > { %1743 = vrot.lane.b32.xlu1 %v1701_v56, %s4566_s20  ;;  %v662_v50 = vld [vmem:[#allocation2 + $0x6c] sm:$0xf]  ;;  %v663_v41 = vld [vmem:[#allocation2 + $0x70] sm:$0xf]  ;;  %618 = vst.msk [vmem:[#allocation2 + $0x80] sm:$0x1] %vm590_vm1, %v3751_v34  ;;  %v3856_v56 = vcombine.low %v762_v2, %v4991_v20 }
  0x77   : > { %1383 = vrot.lane.b32.xlu0 %v5071_v3, %s4566_s20  ;;  %v5081_v29 = vcombine.low %v662_v50, %v663_v41  ;;  %v4421_v51 = vld [vmem:[#allocation2 + $0x68] ss:$0 sps:$4 sm:$0x11]   ;;  %v388_v61 = vsel %vm4626_vm5, 0, %v307_v13  ;;  %v1072_v23 = vrot.slane %v1070_v8, 1  ;;  %v1973_v2 = vor.u32 %v1972_v4, %v1968_v58 }
  0x78   : > { %v4416_v22 = vld [vmem:[#allocation2 + $0x74] ss:$0 sps:$4 sm:$0x11]   ;;  %v787_v63 = vld [vmem:[#allocation2 + $0x6c] sm:$0xf]  ;;  %v3752_v1 = vcombine.low %v388_v61, %v388_v61  ;;  %v3753_v44 = vcombine.high %v388_v61, %v388_v61  ;;  %v1705_v11 = vrot.slane %v3856_v56, 1 }
  0x79   : > { %6175 = vst [vmem:[#allocation13_spill] sm:$0xff] %v5081_v29  ;;  %v1075_v46 = vshrl.u32 %v5081_v29, 16  ;;  %v1077_v20 = vshll.u32 %v5081_v29, 16  ;;  %v763_v33 = vld [vmem:[#allocation2 + $0x60] sm:$0xe]  ;;  %v1082_v38 = vshll.u32 %v4416_v22, 16  ;;  %v1073_v10 = vsel %vm965_vm4, %v1068_v43, %v1072_v23 }
  0x7a   : > { %2097 = vrot.lane.b32.xlu1 %v1966_v21, %s4566_s20  ;;  %v1975_v21 = vshll.u32 %v4421_v51, 16  ;;  %v788_v34 = vld [vmem:[#allocation2 + $0x70] sm:$0xf]  ;;  %v4432_v30 = vld [vmem:[#allocation2 + $0x74] ss:$0 sps:$4 sm:$0x11]   ;;  %v3857_v23 = vcombine.low %v763_v33, %v5015_v9 }
  0x7b   : > { %v1079_v50 = vrot.slane %v1077_v20, 1  ;;  %1174 = vrot.lane.b32.xlu0 %v1073_v10, %s4566_s20  ;;  %v1084_v13 = vrot.slane %v1082_v38, 1  ;;  %619 = vst.msk [vmem:[#allocation2 + $0x84] sm:$0xf] %vm587_vm0, %v3752_v1  ;;  %620 = vst.msk [vmem:[#allocation2 + $0x88] sm:$0xf] %vm587_vm0, %v3753_v44  ;;  %v5093_v41 = vcombine.low %v787_v63, %v788_v34 }
  0x7c   : > { %v1977_v58 = vrot.slane %v1975_v21, 1  ;;  %v1706_v4 = vrot.slane %v4426_v31, 1  ;;  %v726_v8 = vld [vmem:[#allocation2 + $0x78] sm:$0xf]  ;;  %v5095_v51 = vld [vmem:[#allocation2 + $0x7c] sm:$0xf] }
  0x7d   : > { %6176 = vst [vmem:[#allocation14_spill] sm:$0xff] %v5093_v41  ;;  %v1080_v43 = vor.u32 %v1079_v50, %v1075_v46  ;;  %v5098_v22 = vcombine.low %v726_v8, %v5095_v51  ;;  %v665_v61 = vld [vmem:[#allocation2 + $0x7c] sm:$0xf]  ;;  %v4423_v31 = vld [vmem:[#allocation2 + $0x80] ss:$0 sps:$4 sm:$0x11]  }
  0x7e   : > { %1745 = vrot.lane.b32.xlu1 %v1704_v57, %s4566_s20  ;;  %v1978_v56 = vsel %vm965_vm4, %v1973_v2, %v1977_v58  ;;  %v664_v57 = vld [vmem:[#allocation2 + $0x78] sm:$0xf]  ;;  %v764_v63 = vld [vmem:[#allocation2 + $0x6c] sm:$0xe]  ;;  %v1707_v38 = vsel %vm1238_vm6, %v1705_v11, %v1706_v4  ;;  %v1982_v1 = vshll.u32 %v5093_v41, 16  ;;  %v1987_v2 = vshll.u32 %v4432_v30, 16 }
  0x7f   : > { %v5103_v20 = vcombine.low %v664_v57, %v665_v61  ;;  %1385 = vrot.lane.b32.xlu0 %v5098_v22, %s4566_s20  ;;  %v1085_v46 = vsel %vm965_vm4, %v1080_v43, %v1084_v13  ;;  %v789_v44 = vld [vmem:[#allocation2 + $0x78] sm:$0xf]  ;;  %v1094_v9 = vshll.u32 %v4423_v31, 16  ;;  %v1980_v33 = vshrl.u32 %v5093_v41, 16  ;;  %v790_v10 = vld [vmem:[#allocation2 + $0x7c] sm:$0xf] }
  0x80   : > { %v404_v34 = vsel %vm4626_vm5, %v5063_v32, 0  ;;  %v765_v50 = vld [vmem:[#allocation2 + $0x78] sm:$0xe]  ;;  %v1984_v13 = vrot.slane %v1982_v1, 1  ;;  %v3858_v30 = vcombine.low %v764_v63, %v5067_v14  ;;  %v730_v41 = vld [vmem:[#allocation2 + $0x90] sm:$0xf] }
  0x81   : > { %6177 = vst [vmem:[#allocation15_spill] sm:$0xff] %v5103_v20  ;;  %v1089_v21 = vshll.u32 %v5103_v20, 16  ;;  %v1087_v58 = vshrl.u32 %v5103_v20, 16  ;;  %v3754_v8 = vcombine.low %v404_v34, %v404_v34  ;;  %v5116_v11 = vld [vmem:[#allocation2 + $0x68] ss:$0 sps:$4 sm:$0x11]   ;;  %v5129_v34 = vcombine.low %v789_v44, %v790_v10 }
  0x82   : > { %2099 = vrot.lane.b32.xlu1 %v1978_v56, %s4566_s20  ;;  %v728_v4 = vld [vmem:[#allocation2 + $0x84] sm:$0xf]  ;;  %v5119_v43 = vld [vmem:[#allocation2 + $0x88] sm:$0xf]  ;;  %v1989_v56 = vrot.slane %v1987_v2, 1  ;;  %v1096_v61 = vrot.slane %v1094_v9, 1  ;;  %v1985_v14 = vor.u32 %v1984_v13, %v1980_v33  ;;  %v3859_v20 = vcombine.low %v765_v50, %v5095_v51 }
  0x83   : > { %1176 = vrot.lane.b32.xlu0 %v1085_v46, %s4566_s20  ;;  %v5124_v32 = vcombine.low %v728_v4, %v5119_v43  ;;  %v1091_v57 = vrot.slane %v1089_v21, 1  ;;  %621 = vst.msk [vmem:[#allocation2 + $0x8c] sm:$0x1] %vm590_vm1, %v3754_v8  ;;  %v666_v31 = vld [vmem:[#allocation2 + $0x84] sm:$0xf]  ;;  %6178 = vst [vmem:[#allocation16_spill] sm:$0xff] %v5129_v34 }
  0x84   : > { %v5127_v1 = vld [vmem:[#allocation2 + $0x88] sm:$0xf]  ;;  %v1709_v2 = vrot.slane %v5116_v11, 1  ;;  %v4443_v8 = vld [vmem:[#allocation2 + $0x80] ss:$0 sps:$4 sm:$0x11]   ;;  %v1990_v33 = vsel %vm965_vm4, %v1985_v14, %v1989_v56 }
  0x85   : > { %v5132_v63 = vcombine.low %v666_v31, %v5127_v1  ;;  %v1092_v9 = vor.u32 %v1091_v57, %v1087_v58  ;;  %v5139_v44 = vld [vmem:[#allocation2 + $0x94] sm:$0xf]  ;;  %v1994_v51 = vshll.u32 %v5129_v34, 16  ;;  %v1999_v50 = vshll.u32 %v4443_v8, 16  ;;  %v791_v57 = vld [vmem:[#allocation2 + $0x84] sm:$0xf] }
  0x86   : > { %1747 = vrot.lane.b32.xlu1 %v1707_v38, %s4566_s20  ;;  %v1708_v38 = vrot.slane %v3857_v23, 1  ;;  %v5143_v23 = vld [vmem:[#allocation2 + $0x74] ss:$0 sps:$4 sm:$0x11]   ;;  %v766_v31 = vld [vmem:[#allocation2 + $0x84] sm:$0xe] }
  0x87   : > { %6179 = vst [vmem:[#allocation17_spill] sm:$0xff] %v5132_v63  ;;  %v1101_v10 = vshll.u32 %v5132_v63, 16  ;;  %1387 = vrot.lane.b32.xlu0 %v5124_v32, %s4566_s20  ;;  %v1099_v13 = vshrl.u32 %v5132_v63, 16  ;;  %v1097_v56 = vsel %vm965_vm4, %v1092_v9, %v1096_v61  ;;  %v1711_v46 = vrot.slane %v3858_v30, 1  ;;  %v792_v4 = vld [vmem:[#allocation2 + $0x88] sm:$0xf] }
  0x88   : > { %v1710_v58 = vsel %vm1238_vm6, %v1708_v38, %v1709_v2  ;;  %v1712_v21 = vrot.slane %v5143_v23, 1  ;;  %v1992_v29 = vshrl.u32 %v5129_v34, 16  ;;  %v1996_v17 = vrot.slane %v1994_v51, 1  ;;  %v5163_v9 = vld [vmem:[#allocation2 + $0x90] sm:$0xe] }
  0x89   : > { %v1103_v14 = vrot.slane %v1101_v10, 1  ;;  %v1714_v38 = vrot.slane %v3859_v20, 1  ;;  %v5160_v2 = vcombine.low %v730_v41, %v5139_v44  ;;  %v2001_v61 = vrot.slane %v1999_v50, 1  ;;  %v692_v34 = vld [vmem:[#allocation2] sm:$0xe] }
  0x8a   : > { %2101 = vrot.lane.b32.xlu1 %v1990_v33, %s4566_s20  ;;  %v5154_v33 = vcombine.low %v791_v57, %v792_v4  ;;  %v5156_v63 = vld [vmem:[#allocation2 + $0x8c] ss:$0 sps:$4 sm:$0x11]   ;;  %v1713_v4 = vsel %vm1238_vm6, %v1711_v46, %v1712_v21  ;;  %v5168_v57 = vld [vmem:[#allocation2 + $0x80] ss:$0 sps:$4 sm:$0x11]   ;;  %v3860_v20 = vcombine.low %v766_v31, %v5119_v43 }
  0x8b   : > { %1178 = vrot.lane.b32.xlu0 %v1097_v56, %s4566_s20  ;;  %v4450_v30 = vld [vmem:[#allocation2 + $0x8c] ss:$0 sps:$4 sm:$0x11]   ;;  %v1104_v8 = vor.u32 %v1103_v14, %v1099_v13  ;;  %v1106_v10 = vshll.u32 %v5156_v63, 16  ;;  %v1997_v56 = vor.u32 %v1996_v17, %v1992_v29  ;;  %v1715_v6 = vrot.slane %v5168_v57, 1 }
  0x8c   : > { %6180 = vst [vmem:[#allocation18_spill] sm:$0xff] %v5154_v33  ;;  %v2006_v51 = vshll.u32 %v5154_v33, 16  ;;  %v2004_v41 = vshrl.u32 %v5154_v33, 16  ;;  %v4495_v13 = vld [vmem:[#allocation2 + $0x4] sm:$0xf]  ;;  %v2011_v43 = vshll.u32 %v4450_v30, 16 }
  0x8d   : > { %v1108_v7 = vrot.slane %v1106_v10, 1  ;;  %v3802_v14 = vcombine.low %v692_v34, %v4495_v13  ;;  %v794_v29 = vld [vmem:[#allocation2 + $0x94] sm:$0xf]  ;;  %v1716_v31 = vsel %vm1238_vm6, %v1714_v38, %v1715_v6  ;;  %v3861_v34 = vcombine.low %v5163_v9, %v5139_v44  ;;  %v5183_v59 = vld [vmem:[#allocation2 + $0x8c] ss:$0 sps:$4 sm:$0x11]  }
  0x8e   : > { %1749 = vrot.lane.b32.xlu1 %v1710_v58, %s4566_s20  ;;  %v4494_v58 = vld [vmem:[#allocation2 + $0x8] ss:$0 sps:$4 sm:$0x11]   ;;  %v2008_v46 = vrot.slane %v2006_v51, 1  ;;  %v2002_v13 = vsel %vm965_vm4, %v1997_v56, %v2001_v61  ;;  %v5181_v33 = vcombine.low %v793_v26, %v794_v29  ;;  %v704_v51 = vld [vmem:[#allocation2 + $0x90] sm:$0xe] }
  0x8f   : > { %v1240_v50 = vrot.slane %v4494_v58, 1  ;;  %1389 = vrot.lane.b32.xlu0 %v5160_v2, %s4566_s20  ;;  %v1109_v21 = vsel %vm965_vm4, %v1104_v8, %v1108_v7  ;;  %v1239_v10 = vrot.slane %v3802_v14, 1  ;;  %v4455_v58 = vld [vmem:[#allocation2 + $0x98] ss:$0 sps:$4 sm:$0x11]   ;;  %v2013_v44 = vrot.slane %v2011_v43, 1 }
  0x90   : > { %6181 = vst [vmem:[#allocation19_spill] sm:$0xff] %v5181_v33  ;;  %v4496_v8 = vld [vmem:[#allocation2 + $0x94] sm:$0xf]  ;;  %v4497_v38 = vld [vmem:[#allocation2 + $0x98] ss:$0 sps:$4 sm:$0x11]   ;;  %v2009_v56 = vor.u32 %v2008_v46, %v2004_v41 }
  0x91   : > { %v1159_v17 = vpop.permute.xlu1 %1158  ;;  %v1241_v30 = vsel %vm1238_vm6, %v1239_v10, %v1240_v50  ;;  %v3814_v6 = vcombine.low %v704_v51, %v4496_v8  ;;  %v1276_v14 = vrot.slane %v4497_v38, 1  ;;  %v2018_v61 = vshll.u32 %v5181_v33, 16  ;;  %v4480_v43 = vld [vmem:[%s6134_s1 + $0x108] sm:$0xff]   ;;  %v5201_v41 = vld [vmem:[#allocation2 + $0xa0] sm:$0xf] }
  0x92   : > { %1751 = vrot.lane.b32.xlu1 %v1713_v4, %s4566_s20  ;;  %v1717_v4 = vrot.slane %v3860_v20, 1  ;;  %v2217_v7 = vsel %vm2215_vm7, %v4620_v18, %v1159_v17  ;;  %v2023_v9 = vshll.u32 %v4455_v58, 16  ;;  %v1718_v20 = vrot.slane %v5183_v59, 1  ;;  %v795_v58 = vld [vmem:[#allocation2 + $0x9c] sm:$0xf]  ;;  %6182 = vst [vmem:[#allocation20_spill] sm:$0xff] %v5201_v41 }
  0x93   : > { %1180 = vrot.lane.b32.xlu0 %v1109_v21, %s4566_s20  ;;  %v2016_v18 = vshrl.u32 %v5181_v33, 16  ;;  %v1275_v17 = vrot.slane %v3814_v6, 1  ;;  %v2020_v29 = vrot.slane %v2018_v61, 1  ;;  %v5198_v21 = vld [vmem:[#allocation2 + $0x9c] sm:$0xe]  ;;  %v5206_v51 = vcombine.low %v795_v58, %v5201_v41 }
  0x94   : > { %v1719_v10 = vsel %vm1238_vm6, %v1717_v4, %v1718_v20  ;;  %v5208_v4 = vld [vmem:[#allocation2 + $0xa4] ss:$0 sps:$4 sm:$0x11]   ;;  %v2014_v8 = vsel %vm965_vm4, %v2009_v56, %v2013_v44  ;;  %v693_v44 = vld [vmem:[#allocation2 + $0xc] sm:$0xe] }
  0x95   : > { %6183 = vst [vmem:[#allocation21_spill] sm:$0xff] %v5206_v51  ;;  %6184 = vst [vmem:[#allocation22_spill] sm:$0xff] %v5208_v4  ;;  %v2021_v6 = vor.u32 %v2020_v29, %v2016_v18  ;;  %v2030_v61 = vshll.u32 %v5206_v51, 16  ;;  %v4498_v56 = vld [vmem:[#allocation2 + $0x10] sm:$0xf] }
  0x96   : > { %1753 = vrot.lane.b32.xlu1 %v1716_v31, %s4566_s20  ;;  %v1277_v31 = vsel %vm1238_vm6, %v1275_v17, %v1276_v14  ;;  %v5213_v14 = vld [vmem:[#allocation2 + $0x98] ss:$0 sps:$4 sm:$0x11]   ;;  %v4499_v18 = vld [vmem:[#allocation2 + $0x14] ss:$0 sps:$4 sm:$0x11]  }
  0x97   : > { %2103 = vrot.lane.b32.xlu0 %v2002_v13, %s4566_s20  ;;  %v4459_v13 = vld [vmem:[%s6134_s1 + $0x80] sm:$0xff]   ;;  %v1721_v20 = vrot.slane %v5213_v14, 1  ;;  %v1243_v17 = vrot.slane %v4499_v18, 1  ;;  %v705_v29 = vld [vmem:[#allocation2 + $0x9c] sm:$0xe] }
  0x98   : > { %v4502_v33 = vld [vmem:[#allocation2 + $0xa4] ss:$0 sps:$4 sm:$0x11]  }
  0x9a   : > { %v1368_v26 = vpop.permute.xlu0 %1367  ;;  %1755 = vrot.lane.b32.xlu1 %v1719_v10, %s4566_s20  ;;  %v4500_v10 = vld [vmem:[#allocation2 + $0xa0] sm:$0xf] }
  0x9b   : > { %v2266_v50 = vsel %vm2215_vm7, %v1241_v30, %v1368_v26  ;;  %v1720_v30 = vrot.slane %v3861_v34, 1  ;;  %v2028_v26 = vshrl.u32 %v5206_v51, 16  ;;  %v2035_v34 = vshll.u32 %v5208_v4, 16  ;;  %2105 = vrot.lane.b32.xlu0 %v2014_v8, %s4566_s20 }
  0x9c   : > { %2808 = vmatprep.mubr.bf16.mxu0 %v2266_v50  ;;  %v3803_v50 = vcombine.low %v693_v44, %v4498_v56  ;;  %v1279_v4 = vrot.slane %v4502_v33, 1 }
  0x9d   : > { %2809 = vmatmul.mubr.bf16.vlgmr.msra.gmra.mrb[0].mxu0 %v2217_v7  ;;  %v2025_v7 = vrot.slane %v2023_v9, 1  ;;  %v5224_v9 = vld [vmem:[%s6134_s1 + $0x110] sm:$0xff]   ;;  %v2037_v62 = vrot.slane %v2035_v34, 1  ;;  %v1722_v44 = vsel %vm1238_vm6, %v1720_v30, %v1721_v20  ;;  %v797_v30 = vld [vmem:[#allocation2 + $0xa8] sm:$0xf] }
  0x9e   : > { %v1392_v46 = vpop.permute.xlu0 %1391  ;;  %4279 = vmatpush3.bf16.msra.mxu0 %v4922_v0  ;;  %v4460_v0 = vld [vmem:[%s6134_s1 + $0xc8] sm:$0xff]   ;;  %v1242_v56 = vrot.slane %v3803_v50, 1  ;;  %1757 = vrot.lane.b32.xlu1 %v1722_v44, %s4566_s20  ;;  %v4504_v44 = vld [vmem:[#allocation2 + $0x1c] sm:$0xf] }
  0x9f   : > { %v2314_v38 = vsel %vm2215_vm7, %v1277_v31, %v1392_v46  ;;  %4280 = vmatprep.subr.bf16.mxu0 %v4480_v43  ;;  %v3862_v31 = vcombine.low %v5198_v21, %v4500_v10  ;;  %v2032_v46 = vrot.slane %v2030_v61, 1  ;;  %v2026_v41 = vsel %vm965_vm4, %v2021_v6, %v2025_v7  ;;  %v4464_v61 = vld [vmem:[%s6134_s1 + $0x88] sm:$0xff]   ;;  %v694_v10 = vld [vmem:[#allocation2 + $0x18] sm:$0xe] }
  0xa0   : > { %2904 = vmatprep.mubr.bf16.mxu1 %v2314_v38  ;;  %v4501_v38 = vld [vmem:[#allocation2 + $0xa0] sm:$0xf]  ;;  %v1244_v33 = vsel %vm1238_vm6, %v1242_v56, %v1243_v17  ;;  %v5245_v6 = vld [vmem:[#allocation2 + $0xac] sm:$0xf]  ;;  %2107 = vrot.lane.b32.xlu0 %v2026_v41, %s4566_s20  ;;  %v3804_v56 = vcombine.low %v694_v10, %v4504_v44  ;;  %v4471_v10 = vld [vmem:[%s6134_s1 + $0x98] sm:$0xff]  }
  0xa1   : > { %v3815_v51 = vcombine.low %v705_v29, %v4501_v38  ;;  %v2033_v21 = vor.u32 %v2032_v46, %v2028_v26  ;;  %v5252_v26 = vld [vmem:[#allocation2 + $0xb0] ss:$0 sps:$4 sm:$0x11]   ;;  %v1723_v34 = vrot.slane %v3862_v31, 1  ;;  %v5258_v29 = vcombine.low %v797_v30, %v5245_v6  ;;  %v4505_v30 = vld [vmem:[#allocation2 + $0xac] sm:$0xf] }
  0xa2   : > { %v1370_v58 = vpop.permute.xlu0 %1369  ;;  %4281 = vmatpush3.bf16.msra.mxu0 %v4480_v43  ;;  %v4465_v43 = vld [vmem:[%s6134_s1 + $0xd0] sm:$0xff]   ;;  %v5260_v41 = vld [vmem:[#allocation2 + $0xa4] ss:$0 sps:$4 sm:$0x11]  }
  0xa3   : > { %v1183_v47 = vpop.permute.xlu1 %1182  ;;  %v1278_v8 = vrot.slane %v3815_v51, 1  ;;  %4282 = vmatprep.subr.bf16.mxu0 %v5224_v9  ;;  %v2270_v51 = vsel %vm2215_vm7, %v1244_v33, %v1370_v58  ;;  %v2038_v50 = vsel %vm965_vm4, %v2033_v21, %v2037_v62  ;;  %6185 = vst [vmem:[#allocation23_spill] sm:$0xff] %v5258_v29  ;;  %v4466_v62 = vld [vmem:[%s6134_s1 + $0x90] sm:$0xff]   ;;  %v706_v58 = vld [vmem:[#allocation2 + $0xa8] sm:$0xe]  ;;  %v2040_v38 = vshrl.u32 %v5258_v29, 16 }
  0xa4   : > { %v2253_v18 = vsel %vm2215_vm7, %v4705_v36, %v1183_v47  ;;  %v5247_v36 = vld [vmem:[#allocation2 + $0xa8] sm:$0xe]  ;;  %2816 = vmatprep.mubr.bf16.mxu0 %v2270_v51  ;;  %v2042_v27 = vshll.u32 %v5258_v29, 16  ;;  %v5277_v21 = vld [vmem:[#allocation2 + $0xb4] sm:$0xe]  ;;  %2109 = vrot.lane.b32.xlu0 %v2038_v50, %s4566_s20  ;;  %v1245_v50 = vrot.slane %v3804_v56, 1 }
  0xa5   : > { %2905 = vmatmul.mubr.bf16.vlgmr.msra.gmra.mrb[0].mxu1 %v2253_v18  ;;  %v1280_v7 = vsel %vm1238_vm6, %v1278_v8, %v1279_v4  ;;  %v409_v4 = vsel %vm4626_vm5, %v4796_v15, 0  ;;  %v1724_v15 = vrot.slane %v5260_v41, 1  ;;  %v4491_v18 = vld [vmem:[%s6134_s1 + $0x118] sm:$0xff]   ;;  %v4506_v51 = vld [vmem:[#allocation2 + $0xac] sm:$0xf]  ;;  %v1592_v29 = vshrl.u32 %v4703_v35, 16 }
  0xa6   : > { %4147 = vmatpush3.bf16.msra.mxu1 %v4459_v13  ;;  %v1161_v47 = vpop.permute.xlu0 %1160  ;;  %v3769_v46 = vcombine.low %v409_v4, %v409_v4  ;;  %4283 = vmatpush3.bf16.msra.mxu0 %v5224_v9  ;;  %v4467_v8 = vld [vmem:[%s6134_s1 + $0xd8] sm:$0xff]   ;;  %v3863_v9 = vcombine.low %v5247_v36, %v4506_v51  ;;  %v5306_v51 = vld [vmem:[#allocation2 + $0xb0] ss:$0 sps:$4 sm:$0x11]  }
  0xa7   : > { %v1394_v20 = vpop.permute.xlu1 %1393  ;;  %4148 = vmatprep.subr.bf16.mxu1 %v4460_v0  ;;  %v2220_v17 = vsel %vm2215_vm7, %v4718_v49, %v1161_v47  ;;  %v2047_v0 = vshll.u32 %v5252_v26, 16  ;;  %v4503_v49 = vld [vmem:[#allocation2 + $0x20] ss:$0 sps:$4 sm:$0x11]   ;;  %v3816_v47 = vcombine.low %v706_v58, %v4505_v30  ;;  %v1725_v4 = vsel %vm1238_vm6, %v1723_v34, %v1724_v15  ;;  %4284 = vmatprep.subr.bf16.mxu0 %v4491_v18  ;;  %v5296_v58 = vld [vmem:[#allocation2 + $0xb8] sm:$0xf] }
  0xa8   : > { %v2318_v13 = vsel %vm2215_vm7, %v1280_v7, %v1394_v20  ;;  %2817 = vmatmul.mubr.bf16.gmra.mrb[4].mxu0 %v2220_v17  ;;  %v1246_v31 = vrot.slane %v4503_v49, 1  ;;  %636 = vst.msk [vmem:[#allocation2 + $0xc8] sm:$0x1] %vm590_vm1, %v3769_v46  ;;  %v2044_v17 = vrot.slane %v2042_v27, 1  ;;  %1759 = vrot.lane.b32.xlu1 %v1725_v4, %s4566_s20  ;;  %v4472_v34 = vld [vmem:[%s6134_s1 + $0xe0] sm:$0xff]  }
  0xa9   : > { %2912 = vmatprep.mubr.bf16.mxu1 %v2318_v13  ;;  %v2049_v33 = vrot.slane %v2047_v0, 1  ;;  %v4507_v13 = vld [vmem:[#allocation2 + $0xb0] ss:$0 sps:$4 sm:$0x11]   ;;  %v799_v49 = vld [vmem:[#allocation2 + $0xb4] sm:$0xf] }
  0xaa   : > { %4149 = vmatpush3.bf16.msra.mxu1 %v4464_v61  ;;  %v1372_v20 = vpop.permute.xlu0 %1371  ;;  %v1282_v0 = vrot.slane %v4507_v13, 1  ;;  %v2045_v36 = vor.u32 %v2044_v17, %v2040_v38  ;;  %4285 = vmatpush3.bf16.msra.mxu0 %v4491_v18  ;;  %v1281_v27 = vrot.slane %v3816_v47, 1  ;;  %v5300_v15 = vcombine.low %v799_v49, %v5296_v58  ;;  %v5302_v44 = vld [vmem:[#allocation2 + $0xbc] ss:$0 sps:$4 sm:$0x11]   ;;  %v4473_v47 = vld [vmem:[%s6134_s1 + $0xa0] sm:$0xff]  }
  0xab   : > { %v1185_v7 = vpop.permute.xlu1 %1184  ;;  %4150 = vmatprep.subr.bf16.mxu1 %v4465_v43  ;;  %v1247_v43 = vsel %vm1238_vm6, %v1245_v50, %v1246_v31  ;;  %v4508_v38 = vld [vmem:[#allocation2 + $0xb8] sm:$0xf]  ;;  %v1726_v18 = vrot.slane %v3863_v9, 1  ;;  %v4509_v9 = vld [vmem:[#allocation2 + $0x28] sm:$0xf] }
  0xac   : > { %v2256_v61 = vsel %vm2215_vm7, %v4736_v5, %v1185_v7  ;;  %v771_v5 = vld [vmem:[#allocation2 + $0xc0] sm:$0xe]  ;;  %v2274_v46 = vsel %vm2215_vm7, %v1247_v43, %v1372_v20  ;;  %6186 = vst [vmem:[#allocation24_spill] sm:$0xff] %v5300_v15  ;;  %v3864_v31 = vcombine.low %v5277_v21, %v4508_v38  ;;  %v2050_v56 = vsel %vm965_vm4, %v2045_v36, %v2049_v33  ;;  %v695_v33 = vld [vmem:[#allocation2 + $0x24] sm:$0xe] }
  0xad   : > { %2913 = vmatmul.mubr.bf16.gmra.mrb[4].mxu1 %v2256_v61  ;;  %2824 = vmatprep.mubr.bf16.mxu0 %v2274_v46  ;;  %v2052_v7 = vshrl.u32 %v5300_v15, 16  ;;  %v2054_v21 = vshll.u32 %v5300_v15, 16  ;;  %v1727_v20 = vrot.slane %v5306_v51, 1  ;;  %v3805_v17 = vcombine.low %v695_v33, %v4509_v9  ;;  %v4510_v4 = vld [vmem:[#allocation2 + $0x2c] ss:$0 sps:$4 sm:$0x11]  }
  0xae   : > { %4151 = vmatpush3.bf16.msra.mxu1 %v4466_v62  ;;  %v1163_v30 = vpop.permute.xlu0 %1162  ;;  %2111 = vrot.lane.b32.xlu0 %v2050_v56, %s4566_s20  ;;  %v1249_v50 = vrot.slane %v4510_v4, 1  ;;  %v707_v61 = vld [vmem:[#allocation2 + $0xb4] sm:$0xe]  ;;  %v4511_v43 = vld [vmem:[#allocation2 + $0xc4] sm:$0xf]  ;;  %v4474_v46 = vld [vmem:[%s6134_s1 + $0xe8] sm:$0xff]  }
  0xaf   : > { %4152 = vmatprep.subr.bf16.mxu1 %v4467_v8  ;;  %v2223_v62 = vsel %vm2215_vm7, %v4755_v24, %v1163_v30  ;;  %v2059_v8 = vshll.u32 %v5302_v44, 16  ;;  %v1283_v24 = vsel %vm1238_vm6, %v1281_v27, %v1282_v0  ;;  %v2056_v13 = vrot.slane %v2054_v21, 1  ;;  %v4512_v33 = vld [vmem:[#allocation2 + $0xb8] sm:$0xf] }
  0xb0   : > { %2825 = vmatmul.mubr.bf16.gmra.mrb[8].mxu0 %v2223_v62  ;;  %v3865_v49 = vcombine.low %v771_v5, %v4511_v43  ;;  %v1728_v38 = vsel %vm1238_vm6, %v1726_v18, %v1727_v20  ;;  %v1248_v56 = vrot.slane %v3805_v17, 1  ;;  %v3817_v9 = vcombine.low %v707_v61, %v4512_v33  ;;  %v4513_v0 = vld [vmem:[#allocation2 + $0xbc] ss:$0 sps:$4 sm:$0x11]   ;;  %v5333_v20 = vld [vmem:[#allocation2 + $0xc4] sm:$0xf] }
  0xb1   : > { %v2061_v36 = vrot.slane %v2059_v8, 1  ;;  %v1396_v30 = vpop.permute.xlu1 %1395  ;;  %v2057_v62 = vor.u32 %v2056_v13, %v2052_v7  ;;  %1761 = vrot.lane.b32.xlu1 %v1728_v38, %s4566_s20  ;;  %v1729_v27 = vrot.slane %v3864_v31, 1  ;;  %v4479_v7 = vld [vmem:[%s6134_s1 + $0xf0] sm:$0xff]   ;;  %v801_v8 = vld [vmem:[#allocation2 + $0xc0] sm:$0xf] }
  0xb2   : > { %4153 = vmatpush3.bf16.msra.mxu1 %v4471_v10  ;;  %v1285_v10 = vrot.slane %v4513_v0, 1  ;;  %v2322_v21 = vsel %vm2215_vm7, %v1283_v24, %v1396_v30  ;;  %v1250_v18 = vsel %vm1238_vm6, %v1248_v56, %v1249_v50  ;;  %v5337_v31 = vcombine.low %v801_v8, %v5333_v20  ;;  %v5339_v17 = vld [vmem:[#allocation2 + $0xc8] ss:$0 sps:$4 sm:$0x11]   ;;  %v696_v13 = vld [vmem:[#allocation2 + $0x30] sm:$0xe] }
  0xb3   : > { %4154 = vmatprep.subr.bf16.mxu1 %v4472_v34  ;;  %v4478_v34 = vld [vmem:[%s6134_s1 + $0xa8] sm:$0xff]   ;;  %2920 = vmatprep.mubr.bf16.mxu1 %v2322_v21  ;;  %v2062_v5 = vsel %vm965_vm4, %v2057_v62, %v2061_v36  ;;  %v1284_v24 = vrot.slane %v3817_v9, 1  ;;  %v5341_v50 = vld [vmem:[#allocation2 + $0xbc] ss:$0 sps:$4 sm:$0x11]  }
  0xb4   : > { %2113 = vrot.lane.b32.xlu0 %v2062_v5, %s4566_s20  ;;  %6187 = vst [vmem:[#allocation25_spill] sm:$0xff] %v5337_v31  ;;  %v2064_v38 = vshrl.u32 %v5337_v31, 16  ;;  %v2066_v56 = vshll.u32 %v5337_v31, 16  ;;  %v1730_v30 = vrot.slane %v5341_v50, 1  ;;  %v803_v62 = vld [vmem:[#allocation2 + $0xcc] sm:$0xf] }
  0xb5   : > { %v1187_v4 = vpop.permute.xlu1 %1186  ;;  %v1374_v61 = vpop.permute.xlu0 %1373  ;;  %v5353_v33 = vld [vmem:[#allocation2 + $0xd0] sm:$0xf]  ;;  %v5358_v0 = vld [vmem:[#allocation2 + $0xd4] ss:$0 sps:$4 sm:$0x11]   ;;  %v1286_v21 = vsel %vm1238_vm6, %v1284_v24, %v1285_v10  ;;  %v4482_v5 = vld [vmem:[%s6134_s1 + $0xf8] sm:$0xff]  }
  0xb6   : > { %4155 = vmatpush3.bf16.msra.mxu1 %v4473_v47  ;;  %v1732_v47 = vrot.slane %v3865_v49, 1  ;;  %v2259_v36 = vsel %vm2215_vm7, %v4773_v53, %v1187_v4  ;;  %v2278_v43 = vsel %vm2215_vm7, %v1250_v18, %v1374_v61  ;;  %v2071_v49 = vshll.u32 %v5339_v17, 16  ;;  %v4514_v4 = vld [vmem:[#allocation2 + $0x34] sm:$0xf] }
  0xb7   : > { %4156 = vmatprep.subr.bf16.mxu1 %v4474_v46  ;;  %v4481_v46 = vld [vmem:[%s6134_s1 + $0xb0] sm:$0xff]   ;;  %2921 = vmatmul.mubr.bf16.gmra.mrb[8].mxu1 %v2259_v36  ;;  %v2068_v53 = vrot.slane %v2066_v56, 1  ;;  %v5356_v9 = vcombine.low %v803_v62, %v5353_v33  ;;  %v1731_v8 = vsel %vm1238_vm6, %v1729_v27, %v1730_v30  ;;  %v3806_v61 = vcombine.low %v696_v13, %v4514_v4  ;;  %v5369_v10 = vld [vmem:[#allocation2 + $0xc8] ss:$0 sps:$4 sm:$0x11]   ;;  %v4486_v13 = vld [vmem:[%s6134_s1 + $0xb8] sm:$0xff]  }
  0xb8   : > { %2832 = vmatprep.mubr.bf16.mxu0 %v2278_v43  ;;  %v2073_v18 = vrot.slane %v2071_v49, 1  ;;  %1763 = vrot.lane.b32.xlu1 %v1731_v8, %s4566_s20  ;;  %v2083_v56 = vshll.u32 %v5358_v0, 16  ;;  %6189 = vst [vmem:[#allocation27_spill] sm:$0xff] %v5369_v10  ;;  %v1462_v49 = vshll.u32 %v4727_v55, 16  ;;  %v1606_v8 = vshll.u32 %v4758_v28, 16 }
  0xb9   : > { %6188 = vst [vmem:[#allocation26_spill] sm:$0xff] %v5356_v9  ;;  %v2069_v36 = vor.u32 %v2068_v53, %v2064_v38  ;;  %v2078_v43 = vshll.u32 %v5356_v9, 16  ;;  %v1733_v53 = vrot.slane %v5369_v10, 1  ;;  %v4516_v31 = vld [vmem:[#allocation2 + $0x14] ss:$0 sps:$4 sm:$0x11]  }
  0xba   : > { %4157 = vmatpush3.bf16.msra.mxu1 %v4478_v34  ;;  %v2076_v34 = vshrl.u32 %v5356_v9, 16  ;;  %v2085_v30 = vrot.slane %v2083_v56, 1  ;;  %v1165_v4 = vpop.permute.xlu0 %1164  ;;  %v6191_v10 = vshll.u32 %v4703_v35, 16  ;;  %v6196_v35 = vld [vmem:[#allocation20_spill] sm:$0xff] }
  0xbb   : > { %4158 = vmatprep.subr.bf16.mxu1 %v4479_v7  ;;  %v6190_v7 = vshll.u32 %v4690_v25, 16  ;;  %v2074_v27 = vsel %vm965_vm4, %v2069_v36, %v2073_v18  ;;  %v2080_v38 = vrot.slane %v2078_v43, 1  ;;  %v1455_v18 = vshll.u32 %v4516_v31, 16 }
  0xbc   : > { %v1398_v62 = vpop.permute.xlu1 %1397  ;;  %2115 = vrot.lane.b32.xlu0 %v2074_v27, %s4566_s20  ;;  %v2226_v36 = vsel %vm2215_vm7, %v4801_v19, %v1165_v4  ;;  %v1251_v43 = vrot.slane %v3806_v61, 1  ;;  %v1734_v15 = vsel %vm1238_vm6, %v1732_v47, %v1733_v53  ;;  %v1460_v31 = vshrl.u32 %v4727_v55, 16 }
  0xbd   : > { %v1452_v24 = vrot.slane %v6190_v7, 1  ;;  %v2326_v9 = vsel %vm2215_vm7, %v1286_v21, %v1398_v62  ;;  %v4515_v7 = vld [vmem:[#allocation2 + $0x38] ss:$0 sps:$4 sm:$0x11]   ;;  %v2081_v56 = vor.u32 %v2080_v38, %v2076_v34  ;;  %v5388_v21 = vrot.slane %v6191_v10, 1  ;;  %2833 = vmatmul.mubr.bf16.gmra.mrb[12].mxu0 %v2226_v36  ;;  %1765 = vrot.lane.b32.xlu1 %v1734_v15, %s4566_s20 }
  0xbe   : > { %4159 = vmatpush3.bf16.msra.mxu1 %v4481_v46  ;;  %v1252_v46 = vrot.slane %v4515_v7, 1  ;;  %2928 = vmatprep.mubr.bf16.mxu1 %v2326_v9  ;;  %v1534_v62 = vshll.u32 %v5022_v48, 16  ;;  %v1464_v19 = vrot.slane %v1462_v49, 1  ;;  %v1618_v9 = vshll.u32 %v4817_v40, 16  ;;  %v703_v36 = vld [vmem:[#allocation2 + $0x84] sm:$0xe] }
  0xbf   : > { %4160 = vmatprep.subr.bf16.mxu1 %v4482_v5  ;;  %v1474_v5 = vshll.u32 %v4776_v54, 16  ;;  %v2086_v47 = vsel %vm965_vm4, %v2081_v56, %v2085_v30  ;;  %v5397_v10 = vrot.slane %v1606_v8, 1  ;;  %v1472_v27 = vshrl.u32 %v4776_v54, 16  ;;  %v4518_v34 = vld [vmem:[#allocation2 + $0x40] sm:$0xf] }
  0xc0   : > { %v1189_v61 = vpop.permute.xlu1 %1188  ;;  %2117 = vrot.lane.b32.xlu0 %v2086_v47, %s4566_s20  ;;  %v1546_v55 = vshll.u32 %v5071_v3, 16  ;;  %v1253_v15 = vsel %vm1238_vm6, %v1251_v43, %v1252_v46  ;;  %v1457_v49 = vrot.slane %v1455_v18, 1  ;;  %v1532_v4 = vshrl.u32 %v5022_v48, 16  ;;  %v697_v18 = vld [vmem:[#allocation2 + $0x3c] sm:$0xe]  ;;  %s4001_s20 = sshll.u32 %s6222_s13, 7 }
  0xc1   : > { %v2262_v38 = vsel %vm2215_vm7, %v4824_v45, %v1189_v61  ;;  %v5407_v53 = vrot.slane %v1474_v5, 1  ;;  %v1536_v7 = vrot.slane %v1534_v62, 1  ;;  %v5411_v45 = vrot.slane %v1618_v9, 1  ;;  %v1376_v47 = vpop.permute.xlu0 %1375  ;;  %s5719_s22 = scalar_lea.vmem %s6135_s2, %s4001_s20 }
  0xc2   : > { %4161 = vmatpush3.bf16.msra.mxu1 %v4486_v13  ;;  %v6192_v13 = vshrl.u32 %v4690_v25, 16  ;;  %v1486_v61 = vshll.u32 %v4841_v60, 16  ;;  %v1465_v43 = vor.u32 %v1464_v19, %v1460_v31  ;;  %v1544_v25 = vshrl.u32 %v5071_v3, 16 }
  0xc3   : > { %2929 = vmatmul.mubr.bf16.gmra.mrb[12].mxu1 %v2262_v38  ;;  %v2282_v5 = vsel %vm2215_vm7, %v1253_v15, %v1376_v47  ;;  %v1548_v62 = vrot.slane %v1546_v55, 1  ;;  %v4517_v38 = vld [vmem:[#allocation2 + $0x20] ss:$0 sps:$4 sm:$0x11]   ;;  %v3813_v8 = vcombine.low %v703_v36, %v5127_v1  ;;  %v3807_v31 = vcombine.low %v697_v18, %v4518_v34 }
  0xc4   : > { %v1453_v30 = vor.u32 %v1452_v24, %v6192_v13  ;;  %v2088_v46 = vpop.permute.xlu1 %2087  ;;  %v1558_v24 = vshll.u32 %v5098_v22, 16  ;;  %2840 = vmatprep.mubr.bf16.mxu0 %v2282_v5  ;;  %v1467_v13 = vshll.u32 %v4517_v38, 16  ;;  %v1273_v3 = vrot.slane %v5156_v63, 1  ;;  %v698_v38 = vld [vmem:[#allocation2 + $0x48] sm:$0xe] }
  0xc5   : > { %v2393_v48 = vsel %vm2215_vm7, %v4822_v42, %v2088_v46  ;;  %v1537_v19 = vor.u32 %v1536_v7, %v1532_v4  ;;  %v1539_v56 = vshll.u32 %v5116_v11, 16  ;;  %v1556_v15 = vshrl.u32 %v5098_v22, 16  ;;  %v1167_v47 = vpop.permute.xlu0 %1166 }
  0xc6   : > { %2969 = vmatprep.mubr.bf16.mxu1 %v2393_v48  ;;  %v1458_v9 = vsel %vm965_vm4, %v1453_v30, %v1457_v49  ;;  %v1570_v42 = vshll.u32 %v5124_v32, 16  ;;  %v1582_v55 = vshll.u32 %v5160_v2, 16  ;;  %v1272_v49 = vrot.slane %v3813_v8, 1  ;;  %v4519_v8 = vld [vmem:[#allocation2 + $0x44] ss:$0 sps:$4 sm:$0x11]  }
  0xc7   : > { %v1560_v30 = vrot.slane %v1558_v24, 1  ;;  %v2229_v1 = vsel %vm2215_vm7, %v4861_v16, %v1167_v47  ;;  %v1541_v36 = vrot.slane %v1539_v56, 1  ;;  %v1469_v63 = vrot.slane %v1467_v13, 1 }
  0xc8   : > { %v1736_v46 = vpop.permute.xlu1 %1735  ;;  %2841 = vmatmul.mubr.bf16.gmra.mrb[16].mxu0 %v2229_v1  ;;  %v5431_v11 = vsel %vm1238_vm6, %v1272_v49, %v1273_v3  ;;  %v1549_v22 = vor.u32 %v1548_v62, %v1544_v25  ;;  %v1551_v4 = vshll.u32 %v5143_v23, 16  ;;  %v5434_v7 = vrot.slane %v1486_v61, 1  ;;  %v4521_v49 = vld [vmem:[#allocation2 + $0x4c] sm:$0xf] }
  0xc9   : > { %v2330_v34 = vsel %vm2215_vm7, %v1458_v9, %v1736_v46  ;;  %v1254_v18 = vrot.slane %v3807_v31, 1  ;;  %v1255_v24 = vrot.slane %v4519_v8, 1  ;;  %v5437_v5 = vsel %vm965_vm4, %v1537_v19, %v1541_v36  ;;  %v4520_v19 = vld [vmem:[#allocation2 + $0x2c] ss:$0 sps:$4 sm:$0x11]  }
  0xca   : > { %v1630_v16 = vshll.u32 %v4865_v39, 16  ;;  %v1568_v56 = vshrl.u32 %v5124_v32, 16  ;;  %v1572_v48 = vrot.slane %v1570_v42, 1  ;;  %v1553_v13 = vrot.slane %v1551_v4, 1  ;;  %v699_v46 = vld [vmem:[#allocation2 + $0x54] sm:$0xe] }
  0xcb   : > { %2970 = vmatmul.mubr.bf16.vlgmr.msra.gmra.mrb[16].mxu1 %v2330_v34  ;;  %v1580_v25 = vshrl.u32 %v5160_v2, 16  ;;  %v1561_v61 = vor.u32 %v1560_v30, %v1556_v15  ;;  %v1563_v62 = vshll.u32 %v5168_v57, 16  ;;  %v1584_v31 = vrot.slane %v1582_v55, 1 }
  0xcc   : > { %v2090_v9 = vpop.permute.xlu1 %2089  ;;  %v1470_v3 = vsel %vm965_vm4, %v1465_v43, %v1469_v63  ;;  %v1479_v47 = vshll.u32 %v4520_v19, 16  ;;  %v5447_v32 = vsel %vm965_vm4, %v1549_v22, %v1553_v13  ;;  %v1628_v42 = vshrl.u32 %v4865_v39, 16  ;;  %v4522_v22 = vld [vmem:[#allocation2 + $0x58] sm:$0xf]  ;;  %v6193_v19 = vld [vmem:[#allocation4_spill] sm:$0xff] }
  0xcd   : > { %v2396_v23 = vsel %vm2215_vm7, %v4872_v52, %v2090_v9  ;;  %v1256_v2 = vsel %vm1238_vm6, %v1254_v18, %v1255_v24  ;;  %v3808_v1 = vcombine.low %v698_v38, %v4521_v49  ;;  %v1565_v52 = vrot.slane %v1563_v62, 1  ;;  %v1378_v34 = vpop.permute.xlu0 %1377  ;;  %v4524_v38 = vld [vmem:[#allocation2 + $0x38] ss:$0 sps:$4 sm:$0x11]   ;;  %v832_v49 = vld [vmem:[#allocation2 + $0x9c] sm:$0xe] }
  0xce   : > { %2977 = vmatprep.mubr.bf16.mxu1 %v2396_v23  ;;  %v5451_v15 = vrot.slane %v1630_v16, 1  ;;  %v1498_v57 = vshll.u32 %v4905_v37, 16  ;;  %v1573_v30 = vor.u32 %v1572_v48, %v1568_v56  ;;  %v1575_v43 = vshll.u32 %v5183_v59, 16  ;;  %v4523_v48 = vld [vmem:[#allocation2 + $0x50] ss:$0 sps:$4 sm:$0x11]  }
  0xcf   : > { %v1477_v63 = vor.u32 %v5407_v53, %v1472_v27  ;;  %v3809_v4 = vcombine.low %v699_v46, %v4522_v22  ;;  %v5460_v18 = vsel %vm965_vm4, %v1561_v61, %v1565_v52  ;;  %v2286_v8 = vsel %vm2215_vm7, %v1256_v2, %v1378_v34 }
  0xd0   : > { %v1738_v55 = vpop.permute.xlu1 %1737  ;;  %v1481_v24 = vrot.slane %v1479_v47, 1  ;;  %v1577_v16 = vrot.slane %v1575_v43, 1  ;;  %v1585_v56 = vor.u32 %v1584_v31, %v1580_v25  ;;  %2848 = vmatprep.mubr.bf16.mxu0 %v2286_v8  ;;  %v1257_v59 = vrot.slane %v3808_v1, 1  ;;  %v4525_v47 = vld [vmem:[#allocation2 + $0x5c] ss:$0 sps:$4 sm:$0x11]  }
  0xd1   : > { %v2334_v36 = vsel %vm2215_vm7, %v1470_v3, %v1738_v55  ;;  %v1258_v9 = vrot.slane %v4523_v48, 1  ;;  %v1491_v13 = vshll.u32 %v4524_v38, 16  ;;  %v1587_v54 = vshll.u32 %v5213_v14, 16  ;;  %v1169_v3 = vpop.permute.xlu0 %1168  ;;  %v6194_v1 = vld [vmem:[#allocation3_spill] sm:$0xff]  ;;  %v6198_v48 = vld [vmem:[#allocation22_spill] sm:$0xff] }
  0xd2   : > { %v1496_v27 = vshrl.u32 %v4905_v37, 16  ;;  %v1500_v53 = vrot.slane %v1498_v57, 1  ;;  %v1510_v23 = vshll.u32 %v4960_v12, 16  ;;  %v5467_v62 = vsel %vm965_vm4, %v1573_v30, %v1577_v16 }
  0xd3   : > { %2978 = vmatmul.mubr.bf16.gmra.mrb[20].mxu1 %v2334_v36  ;;  %v1260_v31 = vrot.slane %v3809_v4, 1  ;;  %v1261_v46 = vrot.slane %v4525_v47, 1  ;;  %v1589_v2 = vrot.slane %v1587_v54, 1  ;;  %v2232_v14 = vsel %vm2215_vm7, %v6194_v1, %v1169_v3  ;;  %v835_v3 = vld [vmem:[#allocation2 + $0xc0] sm:$0xe]  ;;  %v6200_v1 = vld [vmem:[#allocation5_spill] sm:$0xff] }
  0xd4   : > { %v2092_v61 = vpop.permute.xlu1 %2091  ;;  %v1482_v37 = vsel %vm965_vm4, %v1477_v63, %v1481_v24  ;;  %v1597_v52 = vor.u32 %v5388_v21, %v1592_v29  ;;  %v1599_v57 = vshll.u32 %v5260_v41, 16  ;;  %2849 = vmatmul.mubr.bf16.gmra.mrb[20].mxu0 %v2232_v14  ;;  %v1259_v55 = vsel %vm1238_vm6, %v1257_v59, %v1258_v9  ;;  %v833_v21 = vld [vmem:[#allocation2 + $0xa8] sm:$0xe]  ;;  %v834_v24 = vld [vmem:[#allocation2 + $0xb4] sm:$0xe] }
  0xd5   : > { %v2399_v25 = vsel %vm2215_vm7, %v6193_v19, %v2092_v61  ;;  %v6195_v30 = vshrl.u32 %v4841_v60, 16  ;;  %v1493_v34 = vrot.slane %v1491_v13, 1  ;;  %v5483_v36 = vsel %vm965_vm4, %v1585_v56, %v1589_v2  ;;  %v4526_v59 = vld [vmem:[#allocation2 + $0x44] ss:$0 sps:$4 sm:$0x11]  }
  0xd6   : > { %2985 = vmatprep.mubr.bf16.mxu1 %v2399_v25  ;;  %v5485_v4 = vor.u32 %v1500_v53, %v1496_v27  ;;  %v1601_v63 = vrot.slane %v1599_v57, 1  ;;  %v3909_v8 = vcombine.low %v832_v49, %v6196_v35  ;;  %v6197_v29 = vshrl.u32 %v4758_v28, 16  ;;  %v1380_v16 = vpop.permute.xlu0 %1379  ;;  %v836_v2 = vld [vmem:[#allocation2 + $0xcc] sm:$0xe]  ;;  %v700_v57 = vld [vmem:[#allocation2 + $0x60] sm:$0xe] }
  0xd7   : > { %v1489_v43 = vor.u32 %v5434_v7, %v6195_v30  ;;  %v1262_v7 = vsel %vm1238_vm6, %v1260_v31, %v1261_v46  ;;  %v1503_v56 = vshll.u32 %v4526_v59, 16  ;;  %v2201_v9 = vrot.slane %v6198_v48, 1  ;;  %v6202_v35 = vld [vmem:[#allocation27_spill] sm:$0xff] }
  0xd8   : > { %v1740_v22 = vpop.permute.xlu1 %1739  ;;  %v1609_v41 = vor.u32 %v5397_v10, %v6197_v29  ;;  %v2290_v38 = vsel %vm2215_vm7, %v1259_v55, %v1380_v16  ;;  %v5496_v13 = vsel %vm965_vm4, %v1597_v52, %v1601_v63  ;;  %v2200_v28 = vrot.slane %v3909_v8, 1 }
  0xd9   : > { %v2338_v60 = vsel %vm2215_vm7, %v1482_v37, %v1740_v22  ;;  %v1611_v10 = vshll.u32 %v5306_v51, 16  ;;  %2856 = vmatprep.mubr.bf16.mxu0 %v2290_v38  ;;  %v1494_v54 = vsel %vm965_vm4, %v1489_v43, %v1493_v34  ;;  %v3910_v27 = vcombine.low %v833_v21, %v5245_v6  ;;  %v6201_v37 = vld [vmem:[#allocation6_spill] sm:$0xff]  ;;  %v4528_v38 = vld [vmem:[#allocation2 + $0x68] ss:$0 sps:$4 sm:$0x11]  }
  0xda   : > { %v2204_v53 = vrot.slane %v5252_v26, 1  ;;  %v3911_v61 = vcombine.low %v834_v24, %v5296_v58  ;;  %v5504_v25 = vsel %vm1238_vm6, %v2200_v28, %v2201_v9  ;;  %v2207_v47 = vrot.slane %v5302_v44, 1  ;;  %v1171_v49 = vpop.permute.xlu0 %1170  ;;  %v6203_v28 = vld [vmem:[#allocation7_spill] sm:$0xff] }
  0xdb   : > { %2986 = vmatmul.mubr.bf16.gmra.mrb[24].mxu1 %v2338_v60  ;;  %v1613_v31 = vrot.slane %v1611_v10, 1  ;;  %v6199_v46 = vshrl.u32 %v4817_v40, 16  ;;  %v2203_v26 = vrot.slane %v3910_v27, 1  ;;  %v1623_v58 = vshll.u32 %v5341_v50, 16 }
  0xdc   : > { %v2094_v19 = vpop.permute.xlu1 %2093  ;;  %v2206_v14 = vrot.slane %v3911_v61, 1  ;;  %v2235_v52 = vsel %vm2215_vm7, %v6201_v37, %v1171_v49  ;;  %v3912_v40 = vcombine.low %v835_v3, %v5333_v20  ;;  %v3913_v43 = vcombine.low %v836_v2, %v5353_v33  ;;  %v4529_v3 = vld [vmem:[#allocation2 + $0x50] ss:$0 sps:$4 sm:$0x11]  }
  0xdd   : > { %v1621_v51 = vor.u32 %v5411_v45, %v6199_v46  ;;  %v2402_v6 = vsel %vm2215_vm7, %v6200_v1, %v2094_v19  ;;  %v5516_v44 = vsel %vm965_vm4, %v1609_v41, %v1613_v31  ;;  %v2210_v45 = vrot.slane %v5339_v17, 1  ;;  %2857 = vmatmul.mubr.bf16.gmra.mrb[24].mxu0 %v2235_v52  ;;  %v4527_v41 = vld [vmem:[#allocation2 + $0x64] sm:$0xf]  ;;  %v4530_v1 = vld [vmem:[#allocation2 + $0x70] sm:$0xf] }
  0xde   : > { %2993 = vmatprep.mubr.bf16.mxu1 %v2402_v6  ;;  %v5521_v55 = vsel %vm1238_vm6, %v2203_v26, %v2204_v53  ;;  %v5524_v30 = vsel %vm1238_vm6, %v2206_v14, %v2207_v47  ;;  %v1625_v50 = vrot.slane %v1623_v58, 1  ;;  %v2209_v22 = vrot.slane %v3912_v40, 1  ;;  %v1382_v8 = vpop.permute.xlu0 %1381  ;;  %v6205_v47 = vld [vmem:[#allocation8_spill] sm:$0xff]  ;;  %v6206_v58 = vld [vmem:[#allocation11_spill] sm:$0xff] }
  0xdf   : > { %v2213_v63 = vrot.slane %v5358_v0, 1  ;;  %v1633_v20 = vor.u32 %v5451_v15, %v1628_v42  ;;  %v1635_v17 = vshll.u32 %v6202_v35, 16  ;;  %v3810_v21 = vcombine.low %v700_v57, %v4527_v41 }
  0xe0   : > { %v1742_v34 = vpop.permute.xlu1 %1741  ;;  %v5534_v24 = vsel %vm965_vm4, %v1621_v51, %v1625_v50  ;;  %v2212_v16 = vrot.slane %v3913_v43, 1  ;;  %v2294_v33 = vsel %vm2215_vm7, %v1262_v7, %v1382_v8  ;;  %v1505_v60 = vrot.slane %v1503_v56, 1  ;;  %v6207_v8 = vld [vmem:[#allocation10_spill] sm:$0xff] }
  0xe1   : > { %v2342_v29 = vsel %vm2215_vm7, %v1494_v54, %v1742_v34  ;;  %v5538_v0 = vsel %vm1238_vm6, %v2209_v22, %v2210_v45  ;;  %v1637_v39 = vrot.slane %v1635_v17, 1  ;;  %2864 = vmatprep.mubr.bf16.mxu0 %v2294_v33  ;;  %v1508_v48 = vshrl.u32 %v4960_v12, 16  ;;  %v6204_v54 = vld [vmem:[#allocation9_spill] sm:$0xff]  ;;  %v4531_v45 = vld [vmem:[#allocation2 + $0x5c] ss:$0 sps:$4 sm:$0x11]  }
  0xe2   : > { %v5541_v42 = vsel %vm1238_vm6, %v2212_v16, %v2213_v63  ;;  %v1512_v9 = vrot.slane %v1510_v23, 1  ;;  %v1173_v7 = vpop.permute.xlu0 %1172  ;;  %v1264_v56 = vrot.slane %v4528_v38, 1  ;;  %v1263_v53 = vrot.slane %v3810_v21, 1  ;;  %v701_v12 = vld [vmem:[#allocation2 + $0x6c] sm:$0xe] }
  0xe3   : > { %2994 = vmatmul.mubr.bf16.gmra.mrb[28].mxu1 %v2342_v29  ;;  %v5544_v59 = vsel %vm965_vm4, %v1633_v20, %v1637_v39  ;;  %v2238_v27 = vsel %vm2215_vm7, %v6204_v54, %v1173_v7  ;;  %v1506_v61 = vsel %vm965_vm4, %v5485_v4, %v1505_v60  ;;  %v1515_v19 = vshll.u32 %v4529_v3, 16  ;;  %v4532_v34 = vld [vmem:[#allocation2 + $0x74] ss:$0 sps:$4 sm:$0x11]   ;;  %v702_v20 = vld [vmem:[#allocation2 + $0x78] sm:$0xe] }
  0xe4   : > { %v2096_v15 = vpop.permute.xlu1 %2095  ;;  %v1522_v46 = vshll.u32 %v6205_v47, 16  ;;  %v1265_v51 = vsel %vm1238_vm6, %v1263_v53, %v1264_v56  ;;  %v1513_v2 = vor.u32 %v1512_v9, %v1508_v48  ;;  %v3811_v6 = vcombine.low %v701_v12, %v4530_v1  ;;  %v4533_v33 = vld [vmem:[#allocation2 + $0x7c] sm:$0xf]  ;;  %v6208_v48 = vld [vmem:[#allocation12_spill] sm:$0xff] }
  0xe5   : > { %v2405_v10 = vsel %vm2215_vm7, %v6203_v28, %v2096_v15  ;;  %2865 = vmatmul.mubr.bf16.gmra.mrb[28].mxu0 %v2238_v27  ;;  %v1517_v49 = vrot.slane %v1515_v19, 1  ;;  %v1520_v52 = vshrl.u32 %v6205_v47, 16  ;;  %v1527_v50 = vshll.u32 %v4531_v45, 16  ;;  %v4534_v28 = vld [vmem:[#allocation2 + $0x80] ss:$0 sps:$4 sm:$0x11]  }
  0xe6   : > { %3001 = vmatprep.mubr.bf16.mxu1 %v2405_v10  ;;  %v1524_v57 = vrot.slane %v1522_v46, 1  ;;  %v1266_v43 = vrot.slane %v3811_v6, 1  ;;  %v1267_v22 = vrot.slane %v4532_v34, 1  ;;  %v3812_v60 = vcombine.low %v702_v20, %v4533_v33  ;;  %v6210_v47 = vld [vmem:[#allocation14_spill] sm:$0xff]  ;;  %v4535_v1 = vld [vmem:[#allocation2 + $0x1c] sm:$0xf] }
  0xe7   : > { %v1518_v40 = vsel %vm965_vm4, %v1513_v2, %v1517_v49  ;;  %v1529_v21 = vrot.slane %v1527_v50, 1  ;;  %v1270_v10 = vrot.slane %v4534_v28, 1  ;;  %v823_v50 = vld [vmem:[#allocation2 + $0x30] sm:$0xe]  ;;  %v4538_v20 = vld [vmem:[#allocation2 + $0x34] sm:$0xf] }
  0xe8   : > { %v1744_v31 = vpop.permute.xlu1 %1743  ;;  %v1525_v41 = vor.u32 %v1524_v57, %v1520_v52  ;;  %v1268_v16 = vsel %vm1238_vm6, %v1266_v43, %v1267_v22  ;;  %v1269_v56 = vrot.slane %v3812_v60, 1  ;;  %v4536_v52 = vld [vmem:[#allocation2 + $0x20] ss:$0 sps:$4 sm:$0x11]   ;;  %v4537_v43 = vld [vmem:[#allocation2 + $0x28] sm:$0xf] }
  0xe9   : > { %v2346_v23 = vsel %vm2215_vm7, %v1506_v61, %v1744_v31  ;;  %v1384_v26 = vpop.permute.xlu0 %1383  ;;  %v6209_v61 = vld [vmem:[#allocation13_spill] sm:$0xff]  ;;  %v2168_v57 = vrot.slane %v4536_v52, 1  ;;  %v4540_v60 = vld [vmem:[#allocation2 + $0x38] ss:$0 sps:$4 sm:$0x11]  }
  0xea   : > { %v2298_v4 = vsel %vm2215_vm7, %v1265_v51, %v1384_v26  ;;  %v1530_v38 = vsel %vm965_vm4, %v1525_v41, %v1529_v21  ;;  %v1271_v19 = vsel %vm1238_vm6, %v1269_v56, %v1270_v10  ;;  %v821_v51 = vld [vmem:[#allocation2 + $0x18] sm:$0xe]  ;;  %v4541_v56 = vld [vmem:[#allocation2 + $0x40] sm:$0xf]  ;;  %v4546_v52 = vld [vmem:[#allocation2 + $0x64] sm:$0xf] }
  0xeb   : > { %3002 = vmatmul.mubr.bf16.gmra.mrb[32].mxu1 %v2346_v23  ;;  %2872 = vmatprep.mubr.bf16.mxu0 %v2298_v4  ;;  %v3898_v6 = vcombine.low %v821_v51, %v4535_v1  ;;  %v6211_v26 = vld [vmem:[#allocation15_spill] sm:$0xff] }
  0xec   : > { %v2098_v14 = vpop.permute.xlu1 %2097  ;;  %v6215_v1 = vld [vmem:[#allocation19_spill] sm:$0xff] }
  0xed   : > { %v2408_v37 = vsel %vm2215_vm7, %v6206_v58, %v2098_v14  ;;  %v1175_v35 = vpop.permute.xlu0 %1174 }
  0xee   : > { %3009 = vmatprep.mubr.bf16.mxu1 %v2408_v37  ;;  %v2241_v29 = vsel %vm2215_vm7, %v6207_v8, %v1175_v35  ;;  %v2167_v37 = vrot.slane %v3898_v6, 1  ;;  %v3900_v35 = vcombine.low %v823_v50, %v4538_v20  ;;  %v4547_v50 = vld [vmem:[#allocation2 + $0x5c] ss:$0 sps:$4 sm:$0x11]  }
  0xef   : > { %2873 = vmatmul.mubr.bf16.gmra.mrb[32].mxu0 %v2241_v29  ;;  %v4539_v29 = vld [vmem:[#allocation2 + $0x2c] ss:$0 sps:$4 sm:$0x11]  }
  0xf0   : > { %v1746_v63 = vpop.permute.xlu1 %1745  ;;  %v2171_v41 = vrot.slane %v4539_v29, 1  ;;  %v2173_v33 = vrot.slane %v3900_v35, 1  ;;  %v828_v35 = vld [vmem:[#allocation2 + $0x6c] sm:$0xe] }
  0xf1   : > { %v2350_v17 = vsel %vm2215_vm7, %v1518_v40, %v1746_v63  ;;  %v1386_v15 = vpop.permute.xlu0 %1385  ;;  %v822_v40 = vld [vmem:[#allocation2 + $0x24] sm:$0xe]  ;;  %v2169_v63 = vsel %vm1238_vm6, %v2167_v37, %v2168_v57 }
  0xf2   : > { %v2302_v7 = vsel %vm2215_vm7, %v1268_v16, %v1386_v15  ;;  %v3899_v34 = vcombine.low %v822_v40, %v4537_v43  ;;  %v824_v15 = vld [vmem:[#allocation2 + $0x3c] sm:$0xe]  ;;  %v2183_v43 = vrot.slane %v4547_v50, 1  ;;  %v6220_v50 = vld [vmem:[#allocation26_spill] sm:$0xff] }
  0xf3   : > { %3010 = vmatmul.mubr.bf16.gmra.mrb[36].mxu1 %v2350_v17  ;;  %2880 = vmatprep.mubr.bf16.mxu0 %v2302_v7  ;;  %v825_v7 = vld [vmem:[#allocation2 + $0x48] sm:$0xe]  ;;  %v3901_v28 = vcombine.low %v824_v15, %v4541_v56  ;;  %v4551_v15 = vld [vmem:[#allocation2 + $0x74] ss:$0 sps:$4 sm:$0x11]  }
  0xf4   : > { %v2100_v39 = vpop.permute.xlu1 %2099  ;;  %v2170_v21 = vrot.slane %v3899_v34, 1 }
  0xf5   : > { %v2411_v9 = vsel %vm2215_vm7, %v6208_v48, %v2100_v39  ;;  %v1177_v27 = vpop.permute.xlu0 %1176  ;;  %v2174_v39 = vrot.slane %v4540_v60, 1  ;;  %v6213_v48 = vld [vmem:[#allocation16_spill] sm:$0xff] }
  0xf6   : > { %3017 = vmatprep.mubr.bf16.mxu1 %v2411_v9  ;;  %v2244_v3 = vsel %vm2215_vm7, %v6209_v61, %v1177_v27  ;;  %v4542_v27 = vld [vmem:[#allocation2 + $0x4c] sm:$0xf]  ;;  %v6214_v61 = vld [vmem:[#allocation18_spill] sm:$0xff] }
  0xf7   : > { %2881 = vmatmul.mubr.bf16.gmra.mrb[36].mxu0 %v2244_v3  ;;  %v2175_v10 = vsel %vm1238_vm6, %v2173_v33, %v2174_v39 }
  0xf8   : > { %v1748_v54 = vpop.permute.xlu1 %1747 }
  0xf9   : > { %v2354_v53 = vsel %vm2215_vm7, %v1530_v38, %v1748_v54  ;;  %v1388_v31 = vpop.permute.xlu0 %1387  ;;  %v2172_v38 = vsel %vm1238_vm6, %v2170_v21, %v2171_v41  ;;  %v4549_v41 = vld [vmem:[#allocation2 + $0x70] sm:$0xf] }
  0xfa   : > { %v2306_v23 = vsel %vm2215_vm7, %v1271_v19, %v1388_v31  ;;  %v2176_v19 = vrot.slane %v3901_v28, 1  ;;  %v4543_v31 = vld [vmem:[#allocation2 + $0x44] ss:$0 sps:$4 sm:$0x11]   ;;  %v3905_v21 = vcombine.low %v828_v35, %v4549_v41  ;;  %v830_v28 = vld [vmem:[#allocation2 + $0x84] sm:$0xe] }
  0xfb   : > { %3018 = vmatmul.mubr.bf16.gmra.mrb[40].mxu1 %v2354_v53  ;;  %2888 = vmatprep.mubr.bf16.mxu0 %v2306_v23  ;;  %v3902_v53 = vcombine.low %v825_v7, %v4542_v27  ;;  %v831_v27 = vld [vmem:[#allocation2 + $0x90] sm:$0xe] }
  0xfc   : > { %v2102_v12 = vpop.permute.xlu1 %2101  ;;  %v2188_v39 = vrot.slane %v3905_v21, 1 }
  0xfd   : > { %v2414_v46 = vsel %vm2215_vm7, %v6210_v47, %v2102_v12  ;;  %v1179_v2 = vpop.permute.xlu0 %1178  ;;  %v2177_v12 = vrot.slane %v4543_v31, 1  ;;  %v2179_v47 = vrot.slane %v3902_v53, 1 }
  0xfe   : > { %3025 = vmatprep.mubr.bf16.mxu1 %v2414_v46  ;;  %v2247_v14 = vsel %vm2215_vm7, %v6211_v26, %v1179_v2  ;;  %v4544_v46 = vld [vmem:[#allocation2 + $0x50] ss:$0 sps:$4 sm:$0x11]   ;;  %v826_v2 = vld [vmem:[#allocation2 + $0x54] sm:$0xe] }
  0xff   : > { %2889 = vmatmul.mubr.bf16.gmra.mrb[40].mxu0 %v2247_v14  ;;  %v2180_v51 = vrot.slane %v4544_v46, 1  ;;  %v827_v26 = vld [vmem:[#allocation2 + $0x60] sm:$0xe]  ;;  %v2178_v14 = vsel %vm1238_vm6, %v2176_v19, %v2177_v12  ;;  %v4554_v19 = vld [vmem:[#allocation2 + $0x94] sm:$0xf] }
 0x100   : > { %v1750_v49 = vpop.permute.xlu1 %1749  ;;  %v3904_v57 = vcombine.low %v827_v26, %v4546_v52  ;;  %v3908_v31 = vcombine.low %v831_v27, %v4554_v19  ;;  %v6219_v52 = vld [vmem:[#allocation25_spill] sm:$0xff] }
 0x101   : > { %v2358_v4 = vsel %vm2215_vm7, %v5437_v5, %v1750_v49  ;;  %v1390_v58 = vpop.permute.xlu0 %1389  ;;  %v6212_v5 = vld [vmem:[#allocation17_spill] sm:$0xff]  ;;  %v2181_v37 = vsel %vm1238_vm6, %v2179_v47, %v2180_v51 }
 0x102   : > { %v2310_v45 = vsel %vm2215_vm7, %v5431_v11, %v1390_v58  ;;  %v4555_v47 = vld [vmem:[#allocation2 + $0x8c] ss:$0 sps:$4 sm:$0x11]  }
 0x103   : > { %3026 = vmatmul.mubr.bf16.gmra.mrb[44].mxu1 %v2358_v4  ;;  %2896 = vmatprep.mubr.bf16.mxu0 %v2310_v45  ;;  %v4545_v4 = vld [vmem:[#allocation2 + $0x58] sm:$0xf]  ;;  %v2195_v46 = vrot.slane %v4555_v47, 1 }
 0x104   : > { %v1752_v8 = vpop.permute.xlu1 %1751  ;;  %v3903_v58 = vcombine.low %v826_v2, %v4545_v4  ;;  %v2197_v2 = vrot.slane %v3908_v31, 1 }
 0x105   : > { %v1181_v22 = vpop.permute.xlu0 %1180  ;;  %v2362_v16 = vsel %vm2215_vm7, %v5447_v32, %v1752_v8  ;;  %v829_v8 = vld [vmem:[#allocation2 + $0x78] sm:$0xe] }
 0x106   : > { %v2250_v17 = vsel %vm2215_vm7, %v6212_v5, %v1181_v22  ;;  %v2182_v45 = vrot.slane %v3903_v58, 1  ;;  %v2185_v22 = vrot.slane %v3904_v57, 1  ;;  %v6216_v5 = vld [vmem:[#allocation21_spill] sm:$0xff] }
 0x107   : > { %2897 = vmatmul.mubr.bf16.gmra.mrb[44].mxu0 %v2250_v17 }
 0x108   : > { %4286 = vmatprep.mubr.msk.bf16.mxu0 %vm2215_vm7, %v2169_v63  ;;  %v1754_v32 = vpop.permute.xlu1 %1753  ;;  %v4548_v63 = vld [vmem:[#allocation2 + $0x68] ss:$0 sps:$4 sm:$0x11]   ;;  %v2184_v29 = vsel %vm1238_vm6, %v2182_v45, %v2183_v43 }
 0x109   : > { %v2104_v11 = vpop.permute.xlu0 %2103  ;;  %v2366_v23 = vsel %vm2215_vm7, %v5460_v18, %v1754_v32  ;;  %v2186_v20 = vrot.slane %v4548_v63, 1  ;;  %v4553_v32 = vld [vmem:[#allocation2 + $0x88] sm:$0xf] }
 0x10a   : > { %v2417_v9 = vsel %vm2215_vm7, %v6213_v48, %v2104_v11  ;;  %v2189_v48 = vrot.slane %v4551_v15, 1 }
 0x10b   : > { %3033 = vmatprep.mubr.bf16.mxu1 %v2417_v9  ;;  %v2187_v11 = vsel %vm1238_vm6, %v2185_v22, %v2186_v20 }
 0x10c   : > { %3034 = vmatmul.mubr.bf16.gmra.mrb[48].mxu1 %v2362_v16  ;;  %v1756_v18 = vpop.permute.xlu1 %1755  ;;  %v4550_v16 = vld [vmem:[#allocation2 + $0x7c] sm:$0xf]  ;;  %v2190_v53 = vsel %vm1238_vm6, %v2188_v39, %v2189_v48 }
 0x10d   : > { %v2106_v54 = vpop.permute.xlu0 %2105  ;;  %v2370_v34 = vsel %vm2215_vm7, %v5467_v62, %v1756_v18  ;;  %v3906_v33 = vcombine.low %v829_v8, %v4550_v16 }
 0x10e   : > { %v2420_v3 = vsel %vm2215_vm7, %v6214_v61, %v2106_v54  ;;  %v3907_v61 = vcombine.low %v830_v28, %v4553_v32 }
 0x10f   : > { %4287 = vmatmul.mubr.msk.bf16.vlgmr.msra.gmra.mrb[48].mxu0 %vm2215_vm7, %v2172_v38  ;;  %3041 = vmatprep.mubr.bf16.mxu1 %v2420_v3  ;;  %v2191_v7 = vrot.slane %v3906_v33, 1  ;;  %v4552_v38 = vld [vmem:[#allocation2 + $0x80] ss:$0 sps:$4 sm:$0x11]  }
 0x110   : > { %4290 = vmatprep.mubr.msk.bf16.mxu0 %vm2215_vm7, %v2175_v10  ;;  %v1758_v60 = vpop.permute.xlu1 %1757  ;;  %v2192_v56 = vrot.slane %v4552_v38, 1  ;;  %v6217_v10 = vld [vmem:[#allocation23_spill] sm:$0xff] }
 0x111   : > { %v2374_v9 = vsel %vm2215_vm7, %v5483_v36, %v1758_v60 }
 0x112   : > { %v2108_v49 = vpop.permute.xlu0 %2107  ;;  %v2193_v3 = vsel %vm1238_vm6, %v2191_v7, %v2192_v56 }
 0x113   : > { %v2423_v6 = vsel %vm2215_vm7, %v6215_v1, %v2108_v49  ;;  %v4556_v49 = vld [vmem:[#allocation2 + $0x98] ss:$0 sps:$4 sm:$0x11]  }
 0x114   : > { %3042 = vmatmul.mubr.bf16.gmra.mrb[52].mxu1 %v2366_v23  ;;  %v2194_v23 = vrot.slane %v3907_v61, 1  ;;  %v2198_v1 = vrot.slane %v4556_v49, 1 }
 0x115   : > { %3049 = vmatprep.mubr.bf16.mxu1 %v2423_v6  ;;  %v6218_v6 = vld [vmem:[#allocation24_spill] sm:$0xff] }
 0x116   : > { %v2110_v40 = vpop.permute.xlu0 %2109  ;;  %v2199_v4 = vsel %vm1238_vm6, %v2197_v2, %v2198_v1 }
 0x117   : > { %4291 = vmatmul.mubr.msk.bf16.gmra.mrb[52].mxu0 %vm2215_vm7, %v2178_v14  ;;  %v2426_v17 = vsel %vm2215_vm7, %v6216_v5, %v2110_v40  ;;  %v2196_v14 = vsel %vm1238_vm6, %v2194_v23, %v2195_v46 }
 0x118   : > { %4294 = vmatprep.mubr.msk.bf16.mxu0 %vm2215_vm7, %v2181_v37 }
 0x11a   : > { %v1760_v12 = vpop.permute.xlu1 %1759 }
 0x11b   : > { %v2378_v51 = vsel %vm2215_vm7, %v5496_v13, %v1760_v12 }
 0x11c   : > { %3050 = vmatmul.mubr.bf16.gmra.mrb[56].mxu1 %v2370_v34 }
 0x11d   : > { %3057 = vmatprep.mubr.bf16.mxu1 %v2426_v17 }
 0x11f   : > { %4295 = vmatmul.mubr.msk.bf16.gmra.mrb[56].mxu0 %vm2215_vm7, %v2184_v29 }
 0x120   : > { %v2112_v62 = vpop.permute.xlu0 %2111  ;;  %4298 = vmatprep.mubr.msk.bf16.mxu0 %vm2215_vm7, %v2187_v11 }
 0x121   : > { %v2429_v54 = vsel %vm2215_vm7, %v6217_v10, %v2112_v62 }
 0x123   : > { %v1762_v58 = vpop.permute.xlu1 %1761 }
 0x124   : > { %3058 = vmatmul.mubr.bf16.gmra.mrb[60].mxu1 %v2374_v9  ;;  %v2382_v13 = vsel %vm2215_vm7, %v5516_v44, %v1762_v58 }
 0x125   : > { %3065 = vmatprep.mubr.bf16.mxu1 %v2429_v54 }
 0x126   : > { %v2114_v36 = vpop.permute.xlu0 %2113 }
 0x127   : > { %4299 = vmatmul.mubr.msk.bf16.gmra.mrb[60].mxu0 %vm2215_vm7, %v2190_v53  ;;  %v2432_v26 = vsel %vm2215_vm7, %v6218_v6, %v2114_v36 }
 0x128   : > { %4302 = vmatprep.mubr.msk.bf16.mxu0 %vm2215_vm7, %v2193_v3 }
 0x12a   : > { %v1764_v18 = vpop.permute.xlu1 %1763 }
 0x12b   : > { %v2386_v45 = vsel %vm2215_vm7, %v5534_v24, %v1764_v18 }
 0x12c   : > { %3066 = vmatmul.mubr.bf16.gmra.mrb[64].mxu1 %v2378_v51 }
 0x12d   : > { %3073 = vmatprep.mubr.bf16.mxu1 %v2432_v26 }
 0x12e   : > { %v2116_v37 = vpop.permute.xlu0 %2115 }
 0x12f   : > { %4303 = vmatmul.mubr.msk.bf16.gmra.mrb[64].mxu0 %vm2215_vm7, %v2196_v14  ;;  %v2435_v57 = vsel %vm2215_vm7, %v6219_v52, %v2116_v37  ;;  %v1766_v44 = vpop.permute.xlu1 %1765 }
 0x130   : > { %4306 = vmatprep.mubr.msk.bf16.mxu0 %vm2215_vm7, %v2199_v4 }
 0x132   : > { %v2118_v40 = vpop.permute.xlu0 %2117 }
 0x133   : > { %v2438_v43 = vsel %vm2215_vm7, %v6220_v50, %v2118_v40 }
 0x134   : > { %3074 = vmatmul.mubr.bf16.gmra.mrb[68].mxu1 %v2382_v13 }
 0x135   : > { %3081 = vmatprep.mubr.bf16.mxu1 %v2435_v57 }
 0x137   : > { %4307 = vmatmul.mubr.msk.bf16.gmra.mrb[68].mxu0 %vm2215_vm7, %v5504_v25  ;;  %v2390_v25 = vsel %vm2215_vm7, %v5544_v59, %v1766_v44 }
 0x138   : > { %4310 = vmatprep.mubr.msk.bf16.mxu0 %vm2215_vm7, %v5521_v55 }
 0x13c   : > { %3082 = vmatmul.mubr.bf16.gmra.mrb[72].mxu1 %v2386_v45 }
 0x13d   : > { %3089 = vmatprep.mubr.bf16.mxu1 %v2438_v43 }
 0x13f   : > { %4311 = vmatmul.mubr.msk.bf16.gmra.mrb[72].mxu0 %vm2215_vm7, %v5524_v30 }
 0x140   : > { %4314 = vmatprep.mubr.msk.bf16.mxu0 %vm2215_vm7, %v5538_v0 }
 0x144   : > { %3090 = vmatmul.mubr.bf16.gmra.mrb[76].mxu1 %v2390_v25 }
 0x147   : > { %4315 = vmatmul.mubr.msk.bf16.gmra.mrb[76].mxu0 %vm2215_vm7, %v5541_v42 }
 0x170   : > { %v4050_v55 = vpop.f32.mrb[0].mxu0 }
 0x171   : > { %v4051_v24 = vpop.f32.mrb[1].mxu0 }
 0x172   : > { %v4052_v34 = vadd.f32 %v4051_v24, %v4050_v55  ;;  %v4053_v22 = vpop.f32.mrb[2].mxu0 }
 0x173   : > { %v4054_v63 = vpop.f32.mrb[3].mxu0 }
 0x174   : > { %v4055_v20 = vadd.f32 %v4054_v63, %v4053_v22 }
 0x178   : > { %v4122_v35 = vpop.f32.mrb[0].mxu1 }
 0x179   : > { %v4123_v5 = vpop.f32.mrb[1].mxu1 }
 0x17a   : > { %v5650_v17 = vadd.f32 %v4123_v5, %v4122_v35  ;;  %v4125_v30 = vpop.f32.mrb[2].mxu1 }
 0x17b   : > { %v4126_v8 = vpop.f32.mrb[3].mxu1  ;;  %v4056_v0 = vpop.f32.mrb[4].mxu0 }
 0x17c   : > { %v5652_v29 = vadd.f32 %v4126_v8, %v4125_v30  ;;  %v4057_v59 = vpop.f32.mrb[5].mxu0 }
 0x17d   : > { %v4058_v41 = vadd.f32 %v4057_v59, %v4056_v0  ;;  %v4059_v21 = vpop.f32.mrb[6].mxu0 }
 0x17e   : > { %v4060_v11 = vpop.f32.mrb[7].mxu0 }
 0x17f   : > { %v4061_v42 = vadd.f32 %v4060_v11, %v4059_v21 }
 0x180   : > { %v4128_v16 = vpop.f32.mrb[4].mxu1 }
 0x181   : > { %v4129_v33 = vpop.f32.mrb[5].mxu1 }
 0x182   : > { %v5654_v60 = vadd.f32 %v4129_v33, %v4128_v16  ;;  %v4131_v62 = vpop.f32.mrb[6].mxu1 }
 0x183   : > { %v4132_v39 = vpop.f32.mrb[7].mxu1  ;;  %v4062_v48 = vpop.f32.mrb[8].mxu0 }
 0x184   : > { %v5656_v15 = vadd.f32 %v4132_v39, %v4131_v62  ;;  %v4063_v9 = vpop.f32.mrb[9].mxu0 }
 0x185   : > { %v4064_v7 = vadd.f32 %v4063_v9, %v4062_v48  ;;  %v4065_v38 = vpop.f32.mrb[10].mxu0 }
 0x186   : > { %v4066_v56 = vpop.f32.mrb[11].mxu0 }
 0x187   : > { %v4067_v28 = vadd.f32 %v4066_v56, %v4065_v38 }
 0x18a   : > { %v4134_v10 = vpop.f32.mrb[8].mxu1 }
 0x18b   : > { %v4135_v54 = vpop.f32.mrb[9].mxu1 }
 0x18c   : > { %v5658_v27 = vadd.f32 %v4135_v54, %v4134_v10  ;;  %v4137_v53 = vpop.f32.mrb[10].mxu1 }
 0x18d   : > { %v4138_v32 = vpop.f32.mrb[11].mxu1 }
 0x18e   : > { %v5660_v61 = vadd.f32 %v4138_v32, %v4137_v53 }
 0x190   : > { %v4068_v3 = vpop.f32.mrb[12].mxu0 }
 0x191   : > { %v4069_v19 = vpop.f32.mrb[13].mxu0 }
 0x192   : > { %v4070_v31 = vadd.f32 %v4069_v19, %v4068_v3  ;;  %v4071_v12 = vpop.f32.mrb[14].mxu0 }
 0x193   : > { %v4072_v36 = vpop.f32.mrb[15].mxu0 }
 0x194   : > { %v4073_v47 = vadd.f32 %v4072_v36, %v4071_v12 }
 0x196   : > { %v4140_v23 = vpop.f32.mrb[12].mxu1 }
 0x197   : > { %v4141_v46 = vpop.f32.mrb[13].mxu1 }
 0x198   : > { %v5662_v51 = vadd.f32 %v4141_v46, %v4140_v23  ;;  %v4143_v2 = vpop.f32.mrb[14].mxu1 }
 0x199   : > { %v4144_v49 = vpop.f32.mrb[15].mxu1 }
 0x19a   : > { %v5664_v1 = vadd.f32 %v4144_v49, %v4143_v2 }
 0x19b   : > { %v4074_v6 = vpop.f32.mrb[16].mxu0 }
 0x19c   : > { %v4075_v14 = vpop.f32.mrb[17].mxu0 }
 0x19d   : > { %v4076_v58 = vadd.f32 %v4075_v14, %v4074_v6  ;;  %v4077_v37 = vpop.f32.mrb[18].mxu0 }
 0x19e   : > { %v4162_v26 = vpop.f32.mrb[16].mxu1  ;;  %v4078_v57 = vpop.f32.mrb[19].mxu0 }
 0x19f   : > { %v4163_v4 = vpop.f32.mrb[17].mxu1  ;;  %v4079_v40 = vadd.f32 %v4078_v57, %v4077_v37 }
 0x1a0   : > { %v4164_v13 = vadd.f32 %v4163_v4, %v4162_v26  ;;  %v4165_v52 = vpop.f32.mrb[18].mxu1 }
 0x1a1   : > { %v4166_v18 = vpop.f32.mrb[19].mxu1 }
 0x1a2   : > { %v4167_v45 = vadd.f32 %v4166_v18, %v4165_v52  ;;  %v5666_v50 = vadd.f32 %v4164_v13, %v4052_v34 }
 0x1a4   : > { %v5668_v43 = vadd.f32 %v4167_v45, %v4055_v20 }
 0x1a6   : > { %v4168_v44 = vpop.f32.mrb[20].mxu1 }
 0x1a7   : > { %v4169_v25 = vpop.f32.mrb[21].mxu1  ;;  %v4080_v5 = vpop.f32.mrb[20].mxu0 }
 0x1a8   : > { %v4170_v55 = vadd.f32 %v4169_v25, %v4168_v44  ;;  %v4171_v24 = vpop.f32.mrb[22].mxu1  ;;  %v4081_v30 = vpop.f32.mrb[21].mxu0 }
 0x1a9   : > { %v4172_v22 = vpop.f32.mrb[23].mxu1  ;;  %v4082_v0 = vadd.f32 %v4081_v30, %v4080_v5  ;;  %v4083_v59 = vpop.f32.mrb[22].mxu0 }
 0x1aa   : > { %v4173_v63 = vadd.f32 %v4172_v22, %v4171_v24  ;;  %v5670_v35 = vadd.f32 %v4170_v55, %v4058_v41  ;;  %v4084_v21 = vpop.f32.mrb[23].mxu0 }
 0x1ab   : > { %v4085_v34 = vadd.f32 %v4084_v21, %v4083_v59 }
 0x1ac   : > { %v5672_v8 = vadd.f32 %v4173_v63, %v4061_v42 }
 0x1ae   : > { %v4174_v11 = vpop.f32.mrb[24].mxu1 }
 0x1af   : > { %v4175_v16 = vpop.f32.mrb[25].mxu1 }
 0x1b0   : > { %v4176_v20 = vadd.f32 %v4175_v16, %v4174_v11  ;;  %v4177_v33 = vpop.f32.mrb[26].mxu1  ;;  %v4086_v9 = vpop.f32.mrb[24].mxu0 }
 0x1b1   : > { %v4178_v62 = vpop.f32.mrb[27].mxu1  ;;  %v4087_v38 = vpop.f32.mrb[25].mxu0 }
 0x1b2   : > { %v4179_v39 = vadd.f32 %v4178_v62, %v4177_v33  ;;  %v5674_v48 = vadd.f32 %v4176_v20, %v4064_v7  ;;  %v4088_v56 = vadd.f32 %v4087_v38, %v4086_v9  ;;  %v4089_v10 = vpop.f32.mrb[26].mxu0 }
 0x1b3   : > { %v4090_v42 = vpop.f32.mrb[27].mxu0 }
 0x1b4   : > { %v5676_v41 = vadd.f32 %v4179_v39, %v4067_v28  ;;  %v4091_v53 = vadd.f32 %v4090_v42, %v4089_v10 }
 0x1b6   : > { %v4180_v54 = vpop.f32.mrb[28].mxu1 }
 0x1b7   : > { %v4181_v32 = vpop.f32.mrb[29].mxu1 }
 0x1b8   : > { %v4182_v3 = vadd.f32 %v4181_v32, %v4180_v54  ;;  %v4183_v19 = vpop.f32.mrb[30].mxu1  ;;  %v4092_v46 = vpop.f32.mrb[28].mxu0 }
 0x1b9   : > { %v4184_v12 = vpop.f32.mrb[31].mxu1  ;;  %v4093_v2 = vpop.f32.mrb[29].mxu0 }
 0x1ba   : > { %v4185_v36 = vadd.f32 %v4184_v12, %v4183_v19  ;;  %v5678_v23 = vadd.f32 %v4182_v3, %v4070_v31  ;;  %v4094_v49 = vadd.f32 %v4093_v2, %v4092_v46  ;;  %v4095_v6 = vpop.f32.mrb[30].mxu0 }
 0x1bb   : > { %v4096_v28 = vpop.f32.mrb[31].mxu0 }
 0x1bc   : > { %v5680_v7 = vadd.f32 %v4185_v36, %v4073_v47  ;;  %v4097_v14 = vadd.f32 %v4096_v28, %v4095_v6 }
 0x1be   : > { %v4186_v26 = vpop.f32.mrb[32].mxu1 }
 0x1bf   : > { %v4187_v4 = vpop.f32.mrb[33].mxu1 }
 0x1c0   : > { %v4188_v37 = vadd.f32 %v4187_v4, %v4186_v26  ;;  %v4189_v13 = vpop.f32.mrb[34].mxu1 }
 0x1c1   : > { %v4190_v52 = vpop.f32.mrb[35].mxu1 }
 0x1c2   : > { %v4191_v57 = vadd.f32 %v4190_v52, %v4189_v13  ;;  %v5682_v18 = vadd.f32 %v4188_v37, %v4076_v58  ;;  %v4098_v44 = vpop.f32.mrb[32].mxu0 }
 0x1c3   : > { %v4099_v55 = vpop.f32.mrb[33].mxu0 }
 0x1c4   : > { %v5684_v45 = vadd.f32 %v4191_v57, %v4079_v40  ;;  %v4100_v22 = vadd.f32 %v4099_v55, %v4098_v44  ;;  %v4101_v63 = vpop.f32.mrb[34].mxu0 }
 0x1c5   : > { %v4102_v30 = vpop.f32.mrb[35].mxu0 }
 0x1c6   : > { %v4192_v31 = vpop.f32.mrb[36].mxu1  ;;  %v4103_v11 = vadd.f32 %v4102_v30, %v4101_v63 }
 0x1c7   : > { %v4193_v25 = vpop.f32.mrb[37].mxu1 }
 0x1c8   : > { %v4194_v47 = vadd.f32 %v4193_v25, %v4192_v31  ;;  %v4195_v24 = vpop.f32.mrb[38].mxu1 }
 0x1c9   : > { %v4196_v5 = vpop.f32.mrb[39].mxu1 }
 0x1ca   : > { %v4197_v59 = vadd.f32 %v4196_v5, %v4195_v24  ;;  %v5686_v21 = vadd.f32 %v4194_v47, %v4082_v0  ;;  %v4104_v20 = vpop.f32.mrb[36].mxu0 }
 0x1cb   : > { %v4105_v33 = vpop.f32.mrb[37].mxu0 }
 0x1cc   : > { %v5688_v16 = vadd.f32 %v4197_v59, %v4085_v34  ;;  %v5690_v9 = vadd.f32 %v4105_v33, %v4104_v20  ;;  %v4107_v38 = vpop.f32.mrb[38].mxu0 }
 0x1cd   : > { %v4108_v42 = vpop.f32.mrb[39].mxu0 }
 0x1ce   : > { %v4198_v58 = vpop.f32.mrb[40].mxu1  ;;  %v5694_v3 = vadd.f32 %v4108_v42, %v4107_v38 }
 0x1cf   : > { %v4199_v40 = vpop.f32.mrb[41].mxu1 }
 0x1d0   : > { %v4200_v62 = vadd.f32 %v4199_v40, %v4198_v58  ;;  %v4201_v39 = vpop.f32.mrb[42].mxu1 }
 0x1d1   : > { %v4202_v10 = vpop.f32.mrb[43].mxu1 }
 0x1d2   : > { %v4203_v54 = vadd.f32 %v4202_v10, %v4201_v39  ;;  %v5692_v32 = vadd.f32 %v4200_v62, %v4088_v56  ;;  %v4110_v34 = vpop.f32.mrb[40].mxu0 }
 0x1d3   : > { %v4111_v12 = vpop.f32.mrb[41].mxu0 }
 0x1d4   : > { %v5696_v0 = vadd.f32 %v4203_v54, %v4091_v53  ;;  %v5698_v46 = vadd.f32 %v4111_v12, %v4110_v34  ;;  %v4113_v2 = vpop.f32.mrb[42].mxu0 }
 0x1d5   : > { %v4114_v26 = vpop.f32.mrb[43].mxu0 }
 0x1d6   : > { %v4204_v19 = vpop.f32.mrb[44].mxu1  ;;  %v5700_v37 = vadd.f32 %v4114_v26, %v4113_v2 }
 0x1d7   : > { %v4205_v36 = vpop.f32.mrb[45].mxu1 }
 0x1d8   : > { %v4206_v6 = vadd.f32 %v4205_v36, %v4204_v19  ;;  %v4207_v28 = vpop.f32.mrb[46].mxu1 }
 0x1d9   : > { %v4208_v4 = vpop.f32.mrb[47].mxu1 }
 0x1da   : > { %v4209_v56 = vadd.f32 %v4208_v4, %v4207_v28  ;;  %v5702_v13 = vadd.f32 %v4206_v6, %v4094_v49  ;;  %v4116_v53 = vpop.f32.mrb[44].mxu0 }
 0x1db   : > { %v4117_v57 = vpop.f32.mrb[45].mxu0 }
 0x1dc   : > { %v5704_v52 = vadd.f32 %v4209_v56, %v4097_v14  ;;  %v5706_v31 = vadd.f32 %v4117_v57, %v4116_v53  ;;  %v4119_v44 = vpop.f32.mrb[46].mxu0 }
 0x1dd   : > { %v4120_v25 = vpop.f32.mrb[47].mxu0 }
 0x1de   : > { %v5708_v55 = vadd.f32 %v4120_v25, %v4119_v44 }
 0x1df   : > { %v4210_v47 = vpop.f32.mrb[48].mxu1 }
 0x1e0   : > { %v4211_v24 = vpop.f32.mrb[49].mxu1 }
 0x1e1   : > { %v4212_v63 = vadd.f32 %v4211_v24, %v4210_v47  ;;  %v4213_v5 = vpop.f32.mrb[50].mxu1 }
 0x1e2   : > { %v4288_v30 = vpop.f32.mrb[48].mxu0  ;;  %v4214_v59 = vpop.f32.mrb[51].mxu1 }
 0x1e3   : > { %v5712_v49 = vadd.f32 %v4288_v30, %v5670_v35  ;;  %v3132_v14 = vpop.f32.mrb[49].mxu0  ;;  %v4215_v58 = vadd.f32 %v4214_v59, %v4213_v5  ;;  %v5714_v20 = vadd.f32 %v4212_v63, %v4100_v22 }
 0x1e4   : > { %v5722_v40 = vadd.f32 %v3132_v14, %v5666_v50  ;;  %v4289_v33 = vpop.f32.mrb[50].mxu0 }
 0x1e5   : > { %v4004_v35 = vpack.c.bf16 %v5712_v49, %v5712_v49  ;;  %v5727_v62 = vadd.f32 %v4289_v33, %v5672_v8  ;;  %v3135_v22 = vpop.f32.mrb[51].mxu0  ;;  %v5729_v39 = vadd.f32 %v4215_v58, %v4103_v11  ;;  %v3422_v36 = vsel %vm2215_vm7, %v5712_v49, 0.0 }
 0x1e6   : > { %v4002_v38 = vpack.c.bf16 %v5722_v40, %v5722_v40  ;;  %v5734_v10 = vadd.f32 %v3135_v22, %v5668_v43  ;;  %v3419_v8 = vsel %vm2215_vm7, %v5722_v40, 0.0 }
 0x1e7   : > { %3389 = vst.msk [vmem:[%s5719_s22 + $0x8] sm:$0xf] %vm587_vm0, %v4004_v35  ;;  %v4005_v50 = vpack.c.bf16 %v5727_v62, %v5727_v62  ;;  %v4216_v42 = vpop.f32.mrb[52].mxu1  ;;  %v3424_v57 = vsel %vm2215_vm7, %v5727_v62, 0.0 }
 0x1e8   : > { %3387 = vst.msk [vmem:[%s5719_s22] sm:$0xf] %vm587_vm0, %v4002_v38  ;;  %v4003_v11 = vpack.c.bf16 %v5734_v10, %v5734_v10  ;;  %v3420_v54 = vsel %vm2215_vm7, %v5734_v10, 0.0  ;;  %v4217_v34 = vpop.f32.mrb[53].mxu1 }
 0x1e9   : > { %3390 = vst.msk [vmem:[%s5719_s22 + $0xc] sm:$0xf] %vm587_vm0, %v4005_v50  ;;  %v3421_v43 = vadd.f32 %v3420_v54, %v3419_v8  ;;  %v4218_v19 = vadd.f32 %v4217_v34, %v4216_v42  ;;  %v4219_v12 = vpop.f32.mrb[54].mxu1 }
 0x1ea   : > { %3388 = vst.msk [vmem:[%s5719_s22 + $0x4] sm:$0xf] %vm587_vm0, %v4003_v11  ;;  %v4292_v2 = vpop.f32.mrb[52].mxu0  ;;  %v4220_v6 = vpop.f32.mrb[55].mxu1 }
 0x1eb   : > { %v3423_v28 = vadd.f32 %v3422_v36, %v3421_v43  ;;  %v5755_v26 = vadd.f32 %v4292_v2, %v5678_v23  ;;  %v3148_v4 = vpop.f32.mrb[53].mxu0  ;;  %v4221_v56 = vadd.f32 %v4220_v6, %v4219_v12  ;;  %v5758_v53 = vadd.f32 %v4218_v19, %v5690_v9 }
 0x1ec   : > { %v5763_v44 = vadd.f32 %v3148_v4, %v5674_v48  ;;  %v4293_v25 = vpop.f32.mrb[54].mxu0 }
 0x1ed   : > { %v4008_v47 = vpack.c.bf16 %v5755_v26, %v5755_v26  ;;  %v3425_v24 = vadd.f32 %v3424_v57, %v3423_v28  ;;  %v5768_v23 = vadd.f32 %v4293_v25, %v5680_v7  ;;  %v3151_v63 = vpop.f32.mrb[55].mxu0  ;;  %v5778_v30 = vadd.f32 %v4221_v56, %v5694_v3 }
 0x1ee   : > { %v4006_v9 = vpack.c.bf16 %v5763_v44, %v5763_v44  ;;  %v3426_v5 = vsel %vm2215_vm7, %v5763_v44, 0.0  ;;  %v5775_v48 = vadd.f32 %v3151_v63, %v5676_v41  ;;  %v3430_v38 = vsel %vm2215_vm7, %v5755_v26, 0.0 }
 0x1ef   : > { %3393 = vst.msk [vmem:[%s5719_s22 + $0x18] sm:$0xf] %vm587_vm0, %v4008_v47  ;;  %v3427_v59 = vadd.f32 %v3426_v5, %v3425_v24  ;;  %v4009_v7 = vpack.c.bf16 %v5768_v23, %v5768_v23  ;;  %v4222_v14 = vpop.f32.mrb[56].mxu1  ;;  %v3432_v19 = vsel %vm2215_vm7, %v5768_v23, 0.0 }
 0x1f0   : > { %3391 = vst.msk [vmem:[%s5719_s22 + $0x10] sm:$0xf] %vm587_vm0, %v4006_v9  ;;  %v4007_v58 = vpack.c.bf16 %v5775_v48, %v5775_v48  ;;  %v3428_v33 = vsel %vm2215_vm7, %v5775_v48, 0.0  ;;  %v4223_v41 = vpop.f32.mrb[57].mxu1 }
 0x1f1   : > { %3394 = vst.msk [vmem:[%s5719_s22 + $0x1c] sm:$0xf] %vm587_vm0, %v4009_v7  ;;  %v3429_v3 = vadd.f32 %v3428_v33, %v3427_v59  ;;  %v4224_v35 = vadd.f32 %v4223_v41, %v4222_v14  ;;  %v4225_v22 = vpop.f32.mrb[58].mxu1 }
 0x1f2   : > { %3392 = vst.msk [vmem:[%s5719_s22 + $0x14] sm:$0xf] %vm587_vm0, %v4007_v58  ;;  %v4296_v50 = vpop.f32.mrb[56].mxu0  ;;  %v4226_v42 = vpop.f32.mrb[59].mxu1 }
 0x1f3   : > { %v3431_v8 = vadd.f32 %v3430_v38, %v3429_v3  ;;  %v5797_v11 = vadd.f32 %v4296_v50, %v5686_v21  ;;  %v3164_v54 = vpop.f32.mrb[57].mxu0  ;;  %v4227_v34 = vadd.f32 %v4226_v42, %v4225_v22  ;;  %v5800_v43 = vadd.f32 %v4224_v35, %v5698_v46 }
 0x1f4   : > { %v5805_v12 = vadd.f32 %v3164_v54, %v5682_v18  ;;  %v4297_v36 = vpop.f32.mrb[58].mxu0 }
 0x1f5   : > { %v4012_v2 = vpack.c.bf16 %v5797_v11, %v5797_v11  ;;  %v3433_v6 = vadd.f32 %v3432_v19, %v3431_v8  ;;  %v5810_v21 = vadd.f32 %v4297_v36, %v5688_v16  ;;  %v3167_v28 = vpop.f32.mrb[59].mxu0  ;;  %v5820_v56 = vadd.f32 %v4227_v34, %v5700_v37 }
 0x1f6   : > { %v4010_v46 = vpack.c.bf16 %v5805_v12, %v5805_v12  ;;  %v3434_v4 = vsel %vm2215_vm7, %v5805_v12, 0.0  ;;  %v5817_v18 = vadd.f32 %v3167_v28, %v5684_v45  ;;  %v3438_v5 = vsel %vm2215_vm7, %v5797_v11, 0.0 }
 0x1f7   : > { %3397 = vst.msk [vmem:[%s5719_s22 + $0x28] sm:$0xf] %vm587_vm0, %v4012_v2  ;;  %v3435_v57 = vadd.f32 %v3434_v4, %v3433_v6  ;;  %v4013_v16 = vpack.c.bf16 %v5810_v21, %v5810_v21  ;;  %v4228_v25 = vpop.f32.mrb[60].mxu1  ;;  %v3440_v35 = vsel %vm2215_vm7, %v5810_v21, 0.0 }
 0x1f8   : > { %3395 = vst.msk [vmem:[%s5719_s22 + $0x20] sm:$0xf] %vm587_vm0, %v4010_v46  ;;  %v4011_v47 = vpack.c.bf16 %v5817_v18, %v5817_v18  ;;  %v3436_v24 = vsel %vm2215_vm7, %v5817_v18, 0.0  ;;  %v4229_v45 = vpop.f32.mrb[61].mxu1 }
 0x1f9   : > { %3398 = vst.msk [vmem:[%s5719_s22 + $0x2c] sm:$0xf] %vm587_vm0, %v4013_v16  ;;  %v3437_v37 = vadd.f32 %v3436_v24, %v3435_v57  ;;  %v4230_v63 = vadd.f32 %v4229_v45, %v4228_v25  ;;  %v4231_v9 = vpop.f32.mrb[62].mxu1 }
 0x1fa   : > { %3396 = vst.msk [vmem:[%s5719_s22 + $0x24] sm:$0xf] %vm587_vm0, %v4011_v47  ;;  %v4300_v59 = vpop.f32.mrb[60].mxu0  ;;  %v4232_v7 = vpop.f32.mrb[63].mxu1 }
 0x1fb   : > { %v3439_v14 = vadd.f32 %v3438_v5, %v3437_v37  ;;  %v5839_v58 = vadd.f32 %v4300_v59, %v5702_v13  ;;  %v3180_v33 = vpop.f32.mrb[61].mxu0  ;;  %v4233_v41 = vadd.f32 %v4232_v7, %v4231_v9  ;;  %v3060_v3 = vadd.f32 %v4230_v63, %v5706_v31 }
 0x1fc   : > { %v5845_v22 = vadd.f32 %v3180_v33, %v5692_v32  ;;  %v4301_v38 = vpop.f32.mrb[62].mxu0 }
 0x1fd   : > { %v4016_v50 = vpack.c.bf16 %v5839_v58, %v5839_v58  ;;  %v3441_v42 = vadd.f32 %v3440_v35, %v3439_v14  ;;  %v5850_v13 = vadd.f32 %v4301_v38, %v5704_v52  ;;  %v3183_v8 = vpop.f32.mrb[63].mxu0  ;;  %v3063_v34 = vadd.f32 %v4233_v41, %v5708_v55 }
 0x1fe   : > { %v4014_v31 = vpack.c.bf16 %v5845_v22, %v5845_v22  ;;  %v3442_v54 = vsel %vm2215_vm7, %v5845_v22, 0.0  ;;  %v5857_v32 = vadd.f32 %v3183_v8, %v5696_v0  ;;  %v3446_v4 = vsel %vm2215_vm7, %v5839_v58, 0.0 }
 0x1ff   : > { %3401 = vst.msk [vmem:[%s5719_s22 + $0x38] sm:$0xf] %vm587_vm0, %v4016_v50  ;;  %v3443_v19 = vadd.f32 %v3442_v54, %v3441_v42  ;;  %v4017_v52 = vpack.c.bf16 %v5850_v13, %v5850_v13  ;;  %v4234_v36 = vpop.f32.mrb[64].mxu1  ;;  %v3448_v63 = vsel %vm2215_vm7, %v5850_v13, 0.0 }
 0x200   : > { %3399 = vst.msk [vmem:[%s5719_s22 + $0x30] sm:$0xf] %vm587_vm0, %v4014_v31  ;;  %v4015_v2 = vpack.c.bf16 %v5857_v32, %v5857_v32  ;;  %v3444_v6 = vsel %vm2215_vm7, %v5857_v32, 0.0  ;;  %v4235_v28 = vpop.f32.mrb[65].mxu1 }
 0x201   : > { %3402 = vst.msk [vmem:[%s5719_s22 + $0x3c] sm:$0xf] %vm587_vm0, %v4017_v52  ;;  %v3445_v0 = vadd.f32 %v3444_v6, %v3443_v19  ;;  %v4236_v55 = vadd.f32 %v4235_v28, %v4234_v36  ;;  %v4237_v46 = vpop.f32.mrb[66].mxu1 }
 0x202   : > { %3400 = vst.msk [vmem:[%s5719_s22 + $0x34] sm:$0xf] %vm587_vm0, %v4015_v2  ;;  %v4304_v57 = vpop.f32.mrb[64].mxu0  ;;  %v4238_v16 = vpop.f32.mrb[67].mxu1 }
 0x203   : > { %v3447_v25 = vadd.f32 %v3446_v4, %v3445_v0  ;;  %v5877_v47 = vadd.f32 %v4304_v57, %v5758_v53  ;;  %v3196_v24 = vpop.f32.mrb[65].mxu0  ;;  %v4239_v45 = vadd.f32 %v4238_v16, %v4237_v46  ;;  %v5880_v37 = vadd.f32 %v4236_v55, %v5650_v17 }
 0x204   : > { %v5885_v9 = vadd.f32 %v3196_v24, %v5714_v20  ;;  %v4305_v5 = vpop.f32.mrb[66].mxu0 }
 0x205   : > { %v4020_v59 = vpack.c.bf16 %v5877_v47, %v5877_v47  ;;  %v3449_v7 = vadd.f32 %v3448_v63, %v3447_v25  ;;  %v5890_v53 = vadd.f32 %v4305_v5, %v5778_v30  ;;  %v3199_v14 = vpop.f32.mrb[67].mxu0  ;;  %v5900_v41 = vadd.f32 %v4239_v45, %v5652_v29 }
 0x206   : > { %v4018_v17 = vpack.c.bf16 %v5885_v9, %v5885_v9  ;;  %v3450_v33 = vsel %vm2215_vm7, %v5885_v9, 0.0  ;;  %v5897_v20 = vadd.f32 %v3199_v14, %v5729_v39  ;;  %v3454_v54 = vsel %vm2215_vm7, %v5877_v47, 0.0 }
 0x207   : > { %3405 = vst.msk [vmem:[%s5719_s22 + $0x48] sm:$0xf] %vm587_vm0, %v4020_v59  ;;  %v3451_v35 = vadd.f32 %v3450_v33, %v3449_v7  ;;  %v4021_v30 = vpack.c.bf16 %v5890_v53, %v5890_v53  ;;  %v4240_v38 = vpop.f32.mrb[68].mxu1  ;;  %v3456_v55 = vsel %vm2215_vm7, %v5890_v53, 0.0 }
 0x208   : > { %3403 = vst.msk [vmem:[%s5719_s22 + $0x40] sm:$0xf] %vm587_vm0, %v4018_v17  ;;  %v4019_v50 = vpack.c.bf16 %v5897_v20, %v5897_v20  ;;  %v3452_v42 = vsel %vm2215_vm7, %v5897_v20, 0.0  ;;  %v4241_v39 = vpop.f32.mrb[69].mxu1 }
 0x209   : > { %3406 = vst.msk [vmem:[%s5719_s22 + $0x4c] sm:$0xf] %vm587_vm0, %v4021_v30  ;;  %v3453_v29 = vadd.f32 %v3452_v42, %v3451_v35  ;;  %v4242_v8 = vadd.f32 %v4241_v39, %v4240_v38  ;;  %v4243_v31 = vpop.f32.mrb[70].mxu1 }
 0x20a   : > { %3404 = vst.msk [vmem:[%s5719_s22 + $0x44] sm:$0xf] %vm587_vm0, %v4019_v50  ;;  %v4308_v19 = vpop.f32.mrb[68].mxu0  ;;  %v4244_v52 = vpop.f32.mrb[71].mxu1 }
 0x20b   : > { %v3455_v36 = vadd.f32 %v3454_v54, %v3453_v29  ;;  %v5918_v2 = vadd.f32 %v4308_v19, %v3060_v3  ;;  %v3212_v6 = vpop.f32.mrb[69].mxu0  ;;  %v4245_v28 = vadd.f32 %v4244_v52, %v4243_v31  ;;  %v3076_v0 = vadd.f32 %v4242_v8, %v5654_v60 }
 0x20c   : > { %v5924_v46 = vadd.f32 %v3212_v6, %v5800_v43  ;;  %v4309_v4 = vpop.f32.mrb[70].mxu0 }
 0x20d   : > { %v4024_v57 = vpack.c.bf16 %v5918_v2, %v5918_v2  ;;  %v3457_v16 = vadd.f32 %v3456_v55, %v3455_v36  ;;  %v5928_v25 = vadd.f32 %v4309_v4, %v3063_v34  ;;  %v3215_v3 = vpop.f32.mrb[71].mxu0  ;;  %v3079_v43 = vadd.f32 %v4245_v28, %v5656_v15 }
 0x20e   : > { %v4022_v24 = vpack.c.bf16 %v5924_v46, %v5924_v46  ;;  %v3458_v60 = vsel %vm2215_vm7, %v5924_v46, 0.0  ;;  %v5935_v45 = vadd.f32 %v3215_v3, %v5820_v56  ;;  %v3462_v33 = vsel %vm2215_vm7, %v5918_v2, 0.0 }
 0x20f   : > { %3409 = vst.msk [vmem:[%s5719_s22 + $0x58] sm:$0xf] %vm587_vm0, %v4024_v57  ;;  %v3459_v63 = vadd.f32 %v3458_v60, %v3457_v16  ;;  %v4025_v34 = vpack.c.bf16 %v5928_v25, %v5928_v25  ;;  %v4246_v5 = vpop.f32.mrb[72].mxu1  ;;  %v3464_v8 = vsel %vm2215_vm7, %v5928_v25, 0.0 }
 0x210   : > { %3407 = vst.msk [vmem:[%s5719_s22 + $0x50] sm:$0xf] %vm587_vm0, %v4022_v24  ;;  %v4023_v59 = vpack.c.bf16 %v5935_v45, %v5935_v45  ;;  %v3460_v7 = vsel %vm2215_vm7, %v5935_v45, 0.0  ;;  %v4247_v14 = vpop.f32.mrb[73].mxu1 }
 0x211   : > { %3410 = vst.msk [vmem:[%s5719_s22 + $0x5c] sm:$0xf] %vm587_vm0, %v4025_v34  ;;  %v3461_v56 = vadd.f32 %v3460_v7, %v3459_v63  ;;  %v4248_v15 = vadd.f32 %v4247_v14, %v4246_v5  ;;  %v4249_v17 = vpop.f32.mrb[74].mxu1 }
 0x212   : > { %3408 = vst.msk [vmem:[%s5719_s22 + $0x54] sm:$0xf] %vm587_vm0, %v4023_v59  ;;  %v4312_v35 = vpop.f32.mrb[72].mxu0  ;;  %v4250_v30 = vpop.f32.mrb[75].mxu1 }
 0x213   : > { %v3463_v38 = vadd.f32 %v3462_v33, %v3461_v56  ;;  %v5954_v50 = vadd.f32 %v4312_v35, %v3076_v0  ;;  %v3228_v42 = vpop.f32.mrb[73].mxu0  ;;  %v4251_v39 = vadd.f32 %v4250_v30, %v4249_v17  ;;  %v3084_v29 = vadd.f32 %v4248_v15, %v5658_v27 }
 0x214   : > { %v5960_v31 = vadd.f32 %v3228_v42, %v5880_v37  ;;  %v4313_v54 = vpop.f32.mrb[74].mxu0 }
 0x215   : > { %v4028_v19 = vpack.c.bf16 %v5954_v50, %v5954_v50  ;;  %v3465_v52 = vadd.f32 %v3464_v8, %v3463_v38  ;;  %v5964_v36 = vadd.f32 %v4313_v54, %v3079_v43  ;;  %v3231_v6 = vpop.f32.mrb[75].mxu0  ;;  %v3087_v37 = vadd.f32 %v4251_v39, %v5660_v61 }
 0x216   : > { %v4026_v28 = vpack.c.bf16 %v5960_v31, %v5960_v31  ;;  %v3466_v27 = vsel %vm2215_vm7, %v5960_v31, 0.0  ;;  %v5971_v0 = vadd.f32 %v3231_v6, %v5900_v41  ;;  %v3470_v43 = vsel %vm2215_vm7, %v5954_v50, 0.0 }
 0x217   : > { %3413 = vst.msk [vmem:[%s5719_s22 + $0x68] sm:$0xf] %vm587_vm0, %v4028_v19  ;;  %v3467_v55 = vadd.f32 %v3466_v27, %v3465_v52  ;;  %v4029_v4 = vpack.c.bf16 %v5964_v36, %v5964_v36  ;;  %v4252_v57 = vpop.f32.mrb[76].mxu1  ;;  %v3472_v56 = vsel %vm2215_vm7, %v5964_v36, 0.0 }
 0x218   : > { %3411 = vst.msk [vmem:[%s5719_s22 + $0x60] sm:$0xf] %vm587_vm0, %v4026_v28  ;;  %v4027_v16 = vpack.c.bf16 %v5971_v0, %v5971_v0  ;;  %v3468_v3 = vsel %vm2215_vm7, %v5971_v0, 0.0  ;;  %v4253_v24 = vpop.f32.mrb[77].mxu1 }
 0x219   : > { %3414 = vst.msk [vmem:[%s5719_s22 + $0x6c] sm:$0xf] %vm587_vm0, %v4029_v4  ;;  %v3469_v41 = vadd.f32 %v3468_v3, %v3467_v55  ;;  %v4254_v61 = vadd.f32 %v4253_v24, %v4252_v57  ;;  %v4255_v60 = vpop.f32.mrb[78].mxu1 }
 0x21a   : > { %3412 = vst.msk [vmem:[%s5719_s22 + $0x64] sm:$0xf] %vm587_vm0, %v4027_v16  ;;  %v4316_v63 = vpop.f32.mrb[76].mxu0  ;;  %v4256_v34 = vpop.f32.mrb[79].mxu1 }
 0x21b   : > { %v3471_v5 = vadd.f32 %v3470_v43, %v3469_v41  ;;  %v3244_v59 = vpop.f32.mrb[77].mxu0  ;;  %v3092_v7 = vadd.f32 %v4254_v61, %v5662_v51  ;;  %v4257_v14 = vadd.f32 %v4256_v34, %v4255_v60 }
 0x21c   : > { %v5993_v15 = vadd.f32 %v3244_v59, %v3084_v29  ;;  %v4317_v17 = vpop.f32.mrb[78].mxu0 }
 0x21d   : > { %v3473_v33 = vadd.f32 %v3472_v56, %v3471_v5  ;;  %v3247_v35 = vpop.f32.mrb[79].mxu0  ;;  %v5995_v30 = vadd.f32 %v4316_v63, %v3092_v7  ;;  %v3095_v38 = vadd.f32 %v4257_v14, %v5664_v1 }
 0x21e   : > { %v4030_v42 = vpack.c.bf16 %v5993_v15, %v5993_v15  ;;  %v3474_v51 = vsel %vm2215_vm7, %v5993_v15, 0.0  ;;  %v6002_v39 = vadd.f32 %v3247_v35, %v3087_v37 }
 0x21f   : > { %v3475_v29 = vadd.f32 %v3474_v51, %v3473_v33  ;;  %v4032_v8 = vpack.c.bf16 %v5995_v30, %v5995_v30  ;;  %v6006_v54 = vadd.f32 %v4317_v17, %v3095_v38  ;;  %v3478_v52 = vsel %vm2215_vm7, %v5995_v30, 0.0 }
 0x220   : > { %3415 = vst.msk [vmem:[%s5719_s22 + $0x70] sm:$0xf] %vm587_vm0, %v4030_v42  ;;  %v4031_v1 = vpack.c.bf16 %v6002_v39, %v6002_v39  ;;  %v3476_v19 = vsel %vm2215_vm7, %v6002_v39, 0.0 }
 0x221   : > { %v3477_v6 = vadd.f32 %v3476_v19, %v3475_v29  ;;  %3417 = vst.msk [vmem:[%s5719_s22 + $0x78] sm:$0xf] %vm587_vm0, %v4032_v8  ;;  %v4033_v28 = vpack.c.bf16 %v6006_v54, %v6006_v54  ;;  %v3480_v27 = vsel %vm2215_vm7, %v6006_v54, 0.0 }
 0x222   : > { %3416 = vst.msk [vmem:[%s5719_s22 + $0x74] sm:$0xf] %vm587_vm0, %v4031_v1 }
 0x223   : > { %v3479_v37 = vadd.f32 %v3478_v52, %v3477_v6  ;;  %3418 = vst.msk [vmem:[%s5719_s22 + $0x7c] sm:$0xf] %vm587_vm0, %v4033_v28 }
 0x225   : > { %v3481_v55 = vadd.f32 %v3480_v27, %v3479_v37 }
 0x227   : > { %v3482_v4 = vrot.slane %v3481_v55, 4 }
 0x229   : > { %v3483_v57 = vadd.f32 %v3482_v4, %v3481_v55 }
 0x22b   : > { %v3484_v16 = vrot.slane %v3483_v57, 2 }
 0x22d   : > { %v3485_v3 = vadd.f32 %v3484_v16, %v3483_v57 }
 0x22f   : > { %v3486_v24 = vrot.slane %v3485_v3, 1 }
 0x231   : > { %v3487_v41 = vadd.f32 %v3486_v24, %v3485_v3 }
 0x233   : > { %v6026_v61 = vmul.f32 0.00390625, %v3487_v41 }
 0x235   : > { %v3489_v60 = vsub.f32 %v5722_v40, %v6026_v61  ;;  %v3490_v43 = vsub.f32 %v5734_v10, %v6026_v61  ;;  %v3491_v63 = vsub.f32 %v5712_v49, %v6026_v61  ;;  %v3492_v34 = vsub.f32 %v5727_v62, %v6026_v61 }
 0x236   : > { %v3493_v7 = vsub.f32 %v5763_v44, %v6026_v61  ;;  %v3494_v56 = vsub.f32 %v5775_v48, %v6026_v61  ;;  %v3495_v49 = vsub.f32 %v5755_v26, %v6026_v61  ;;  %v3496_v44 = vsub.f32 %v5768_v23, %v6026_v61 }
 0x237   : > { %v3521_v5 = vmul.f32 %v3489_v60, %v3489_v60  ;;  %v3522_v59 = vmul.f32 %v3490_v43, %v3490_v43  ;;  %v3523_v14 = vmul.f32 %v3491_v63, %v3491_v63  ;;  %v3524_v17 = vmul.f32 %v3492_v34, %v3492_v34 }
 0x238   : > { %v3525_v35 = vmul.f32 %v3493_v7, %v3493_v7  ;;  %v3526_v42 = vmul.f32 %v3494_v56, %v3494_v56  ;;  %v3497_v29 = vsub.f32 %v5805_v12, %v6026_v61  ;;  %v3527_v8 = vmul.f32 %v3495_v49, %v3495_v49 }
 0x239   : > { %v3553_v40 = vsel %vm2215_vm7, %v3521_v5, 0.0  ;;  %v3554_v10 = vsel %vm2215_vm7, %v3522_v59, 0.0  ;;  %v3556_v62 = vsel %vm2215_vm7, %v3523_v14, 0.0  ;;  %v3558_v51 = vsel %vm2215_vm7, %v3524_v17, 0.0 }
 0x23a   : > { %v3555_v33 = vadd.f32 %v3554_v10, %v3553_v40  ;;  %v3560_v1 = vsel %vm2215_vm7, %v3525_v35, 0.0  ;;  %v3498_v26 = vsub.f32 %v5817_v18, %v6026_v61  ;;  %v3528_v52 = vmul.f32 %v3496_v44, %v3496_v44 }
 0x23b   : > { %v3562_v6 = vsel %vm2215_vm7, %v3526_v42, 0.0  ;;  %v3499_v23 = vsub.f32 %v5797_v11, %v6026_v61  ;;  %v3529_v27 = vmul.f32 %v3497_v29, %v3497_v29  ;;  %v3564_v37 = vsel %vm2215_vm7, %v3527_v8, 0.0 }
 0x23c   : > { %v3557_v38 = vadd.f32 %v3556_v62, %v3555_v33  ;;  %v3500_v12 = vsub.f32 %v5810_v21, %v6026_v61  ;;  %v3530_v4 = vmul.f32 %v3498_v26, %v3498_v26  ;;  %v3566_v57 = vsel %vm2215_vm7, %v3528_v52, 0.0 }
 0x23d   : > { %v3501_v18 = vsub.f32 %v5845_v22, %v6026_v61  ;;  %v3531_v3 = vmul.f32 %v3499_v23, %v3499_v23  ;;  %v3568_v24 = vsel %vm2215_vm7, %v3529_v27, 0.0  ;;  %v3502_v11 = vsub.f32 %v5857_v32, %v6026_v61 }
 0x23e   : > { %v3559_v48 = vadd.f32 %v3558_v51, %v3557_v38  ;;  %v3532_v60 = vmul.f32 %v3500_v12, %v3500_v12  ;;  %v3570_v43 = vsel %vm2215_vm7, %v3530_v4, 0.0  ;;  %v3503_v21 = vsub.f32 %v5839_v58, %v6026_v61 }
 0x23f   : > { %v3533_v34 = vmul.f32 %v3501_v18, %v3501_v18  ;;  %v3572_v5 = vsel %vm2215_vm7, %v3531_v3, 0.0  ;;  %v3504_v22 = vsub.f32 %v5850_v13, %v6026_v61  ;;  %v3534_v7 = vmul.f32 %v3502_v11, %v3502_v11 }
 0x240   : > { %v3561_v19 = vadd.f32 %v3560_v1, %v3559_v48  ;;  %v3574_v14 = vsel %vm2215_vm7, %v3532_v60, 0.0  ;;  %v3505_v32 = vsub.f32 %v5885_v9, %v6026_v61  ;;  %v3535_v17 = vmul.f32 %v3503_v21, %v3503_v21 }
 0x241   : > { %v3576_v40 = vsel %vm2215_vm7, %v3533_v34, 0.0  ;;  %v3506_v58 = vsub.f32 %v5897_v20, %v6026_v61  ;;  %v3536_v33 = vmul.f32 %v3504_v22, %v3504_v22  ;;  %v3578_v49 = vsel %vm2215_vm7, %v3534_v7, 0.0 }
 0x242   : > { %v3563_v28 = vadd.f32 %v3562_v6, %v3561_v19  ;;  %v3507_v13 = vsub.f32 %v5877_v47, %v6026_v61  ;;  %v3537_v62 = vmul.f32 %v3505_v32, %v3505_v32  ;;  %v3580_v38 = vsel %vm2215_vm7, %v3535_v17, 0.0 }
 0x243   : > { %v3508_v9 = vsub.f32 %v5890_v53, %v6026_v61  ;;  %v3538_v42 = vmul.f32 %v3506_v58, %v3506_v58  ;;  %v3582_v51 = vsel %vm2215_vm7, %v3536_v33, 0.0  ;;  %v3509_v20 = vsub.f32 %v5924_v46, %v6026_v61 }
 0x244   : > { %v3565_v55 = vadd.f32 %v3564_v37, %v3563_v28  ;;  %v3539_v29 = vmul.f32 %v3507_v13, %v3507_v13  ;;  %v3584_v8 = vsel %vm2215_vm7, %v3537_v62, 0.0  ;;  %v3510_v47 = vsub.f32 %v5935_v45, %v6026_v61 }
 0x245   : > { %v3540_v19 = vmul.f32 %v3508_v9, %v3508_v9  ;;  %v3586_v26 = vsel %vm2215_vm7, %v3538_v42, 0.0  ;;  %v3511_v53 = vsub.f32 %v5918_v2, %v6026_v61  ;;  %v3541_v6 = vmul.f32 %v3509_v20, %v3509_v20 }
 0x246   : > { %v3567_v16 = vadd.f32 %v3566_v57, %v3565_v55  ;;  %v3588_v28 = vsel %vm2215_vm7, %v3539_v29, 0.0  ;;  %v3512_v46 = vsub.f32 %v5928_v25, %v6026_v61  ;;  %v3542_v27 = vmul.f32 %v3510_v47, %v3510_v47 }
 0x247   : > { %v3590_v37 = vsel %vm2215_vm7, %v3540_v19, 0.0  ;;  %v3513_v45 = vsub.f32 %v5960_v31, %v6026_v61  ;;  %v3543_v12 = vmul.f32 %v3511_v53, %v3511_v53  ;;  %v3592_v4 = vsel %vm2215_vm7, %v3541_v6, 0.0 }
 0x248   : > { %v3569_v41 = vadd.f32 %v3568_v24, %v3567_v16  ;;  %v3514_v2 = vsub.f32 %v5971_v0, %v6026_v61  ;;  %v3544_v16 = vmul.f32 %v3512_v46, %v3512_v46  ;;  %v3594_v18 = vsel %vm2215_vm7, %v3542_v27, 0.0 }
 0x249   : > { %v3515_v25 = vsub.f32 %v5954_v50, %v6026_v61  ;;  %v3545_v24 = vmul.f32 %v3513_v45, %v3513_v45  ;;  %v3516_v31 = vsub.f32 %v5964_v36, %v6026_v61  ;;  %v3517_v0 = vsub.f32 %v5993_v15, %v6026_v61 }
 0x24a   : > { %v3571_v63 = vadd.f32 %v3570_v43, %v3569_v41  ;;  %v3596_v41 = vsel %vm2215_vm7, %v3543_v12, 0.0  ;;  %v3546_v60 = vmul.f32 %v3514_v2, %v3514_v2  ;;  %v3598_v43 = vsel %vm2215_vm7, %v3544_v16, 0.0 }
 0x24b   : > { %v3547_v21 = vmul.f32 %v3515_v25, %v3515_v25  ;;  %v3600_v34 = vsel %vm2215_vm7, %v3545_v24, 0.0  ;;  %v3518_v50 = vsub.f32 %v6002_v39, %v6026_v61  ;;  %v3519_v36 = vsub.f32 %v5995_v30, %v6026_v61 }
 0x24c   : > { %v3573_v59 = vadd.f32 %v3572_v5, %v3571_v63  ;;  %v3602_v22 = vsel %vm2215_vm7, %v3546_v60, 0.0  ;;  %v3520_v15 = vsub.f32 %v6006_v54, %v6026_v61 }
 0x24d   : > { %v3550_v17 = vmul.f32 %v3518_v50, %v3518_v50  ;;  %v3551_v39 = vmul.f32 %v3519_v36, %v3519_v36 }
 0x24e   : > { %v3575_v56 = vadd.f32 %v3574_v14, %v3573_v59  ;;  %v3548_v59 = vmul.f32 %v3516_v31, %v3516_v31  ;;  %v3549_v14 = vmul.f32 %v3517_v0, %v3517_v0 }
 0x24f   : > { %v3612_v13 = vsel %vm2215_vm7, %v3551_v39, 0.0 }
 0x250   : > { %v3577_v10 = vadd.f32 %v3576_v40, %v3575_v56  ;;  %v3604_v56 = vsel %vm2215_vm7, %v3547_v21, 0.0  ;;  %v3606_v40 = vsel %vm2215_vm7, %v3548_v59, 0.0  ;;  %v3608_v58 = vsel %vm2215_vm7, %v3549_v14, 0.0 }
 0x252   : > { %v3579_v35 = vadd.f32 %v3578_v49, %v3577_v10  ;;  %v3552_v49 = vmul.f32 %v3520_v15, %v3520_v15 }
 0x254   : > { %v3581_v44 = vadd.f32 %v3580_v38, %v3579_v35  ;;  %v3610_v35 = vsel %vm2215_vm7, %v3550_v17, 0.0  ;;  %v3614_v38 = vsel %vm2215_vm7, %v3552_v49, 0.0 }
 0x256   : > { %v3583_v48 = vadd.f32 %v3582_v51, %v3581_v44 }
 0x258   : > { %v3585_v1 = vadd.f32 %v3584_v8, %v3583_v48 }
 0x25a   : > { %v3587_v52 = vadd.f32 %v3586_v26, %v3585_v1 }
 0x25c   : > { %v3589_v23 = vadd.f32 %v3588_v28, %v3587_v52 }
 0x25e   : > { %v3591_v55 = vadd.f32 %v3590_v37, %v3589_v23 }
 0x260   : > { %v3593_v57 = vadd.f32 %v3592_v4, %v3591_v55 }
 0x262   : > { %v3595_v3 = vadd.f32 %v3594_v18, %v3593_v57 }
 0x264   : > { %v3597_v11 = vadd.f32 %v3596_v41, %v3595_v3 }
 0x266   : > { %v3599_v63 = vadd.f32 %v3598_v43, %v3597_v11 }
 0x268   : > { %v3601_v5 = vadd.f32 %v3600_v34, %v3599_v63 }
 0x26a   : > { %v3603_v7 = vadd.f32 %v3602_v22, %v3601_v5 }
 0x26c   : > { %v3605_v32 = vadd.f32 %v3604_v56, %v3603_v7 }
 0x26e   : > { %v3607_v10 = vadd.f32 %v3606_v40, %v3605_v32 }
 0x270   : > { %v3609_v33 = vadd.f32 %v3608_v58, %v3607_v10 }
 0x272   : > { %v3611_v30 = vadd.f32 %v3610_v35, %v3609_v33 }
 0x274   : > { %v3613_v62 = vadd.f32 %v3612_v13, %v3611_v30 }
 0x276   : > { %v3615_v44 = vadd.f32 %v3614_v38, %v3613_v62 }
 0x278   : > { %v3616_v54 = vrot.slane %v3615_v44, 4 }
 0x27a   : > { %v3617_v9 = vadd.f32 %v3616_v54, %v3615_v44 }
 0x27c   : > { %v3618_v42 = vrot.slane %v3617_v9, 2 }
 0x27e   : > { %v3619_v51 = vadd.f32 %v3618_v42, %v3617_v9 }
 0x280   : > { %v3620_v48 = vrot.slane %v3619_v51, 1 }
 0x282   : > { %v3621_v20 = vadd.f32 %v3620_v48, %v3619_v51 }
 0x284   : > { %v3623_v29 = vsel %vm375_vm2, %v6026_v61, %v3621_v20 }
 0x285   : > { %3625 = vst.msk [vmem:[%s181_s26] sm:$0x3] %vm3624_vm8, %v3623_v29 }
 0x286 PF: > { %s14_s12 = sadd.s32 1, %s4563_s12  }
 0x287   : > { %p11_p4 = scmp.ge.s32.totalorder %s14_s12, 4  }
 0x289   :  { %13 = sbr.rel (!%p11_p4) target bundleno = 1 (0x1), region = 73 }

// kernel: generator_residual_block.4
= control target key start
LH: loop header
LB: loop body
LE: loop exit
PB: predicated region body
PF: predicated region fallthrough
CT: control target
= control target key end

     0   :  { %s4977_s21 = smov 0   ;;  %s6684_s0 = inlined_call_operand.vmem [shape: bf16[2,16,16,64], index: 0, kind: input, shape index: {}]   ;;  %s6685_s1 = inlined_call_operand.vmem [shape: f32[1,64], index: 1, kind: input, shape index: {}]   ;;  %s6686_s2 = inlined_call_operand.vmem [shape: f32[1,64], index: 2, kind: input, shape index: {}]   ;;  %s6687_s3 = inlined_call_operand.vmem [shape: f32[1,64], index: 3, kind: input, shape index: {}]   ;;  %s6688_s4 = inlined_call_operand.vmem [shape: bf16[576,64], index: 4, kind: input, shape index: {}]   ;;  %s6689_s5 = inlined_call_operand.vmem [shape: bf16[2,16,16,64], index: 5, kind: output, shape index: {0}]   ;;  %s6690_s6 = inlined_call_operand.vmem [shape: f32[2,2,64], index: 6, kind: output, shape index: {1}]  }
   0x1 LB: > { %s4006_s22 = sadd.s32 4294967295, %s4938_s21   ;;  %p4010_p0 = scmp.ge.s32.totalorder %s4938_s21, 1  ;;  %s4938_s21 = sphi %s4977_s21, %s17_s21  }
   0x2   : > { %p215_p1 = scmp.lt.s32.totalorder %s4938_s21, 3 }
   0x4   : > { %p216_p2 = pnand %p4010_p0, %p215_p1 }
   0x6   : > { %219 = sbr.rel (%p216_p2) target bundleno = 692 (0x2b4), region = 40 }
   0xd   : > { %p249_p3 = scmp.lt.s32.totalorder %s4006_s22, 1  ;;  %vm881_vm0 = vcmask 519168   ;;  %vm884_vm1 = vcmask 516096   ;;  %v4940_v0 = vmov 0   ;;  %v4997_v1 = vld [vmem:[%s6685_s1] ss:$0 sm:$0xff] }
   0xe   : > { %931 = vst.msk [vmem:[#allocation2] sm:$0xf] %vm881_vm0, %v4940_v0  ;;  %932 = vst.msk [vmem:[#allocation2 + $0x4] sm:$0xf] %vm881_vm0, %v4940_v0  ;;  %v5013_v10 = vld [vmem:[%s6686_s2] ss:$0 sm:$0xff] }
   0xf   : > { %s6823_s22 = smov (!%p249_p3, %s4006_s22), 1  ;;  %933 = vst.msk [vmem:[#allocation2 + $0x8] sm:$0x1] %vm884_vm1, %v4940_v0  ;;  %937 = vst.msk [vmem:[#allocation2 + $0xd4] sm:$0x1] %vm884_vm1, %v4940_v0  ;;  %vm669_vm3 = vcmask 1040384  }
  0x10   : > { %935 = vst.msk [vmem:[#allocation2 + $0xcc] sm:$0xf] %vm881_vm0, %v4940_v0  ;;  %936 = vst.msk [vmem:[#allocation2 + $0xd0] sm:$0xf] %vm881_vm0, %v4940_v0  ;;  %s4297_s23 = sshll.u32 %s6823_s22, 7  ;;  %s4941_s9 = smov 64  }
  0x11   : > { %s5004_s28 = scalar_lea.vmem %s6684_s0, %s4297_s23  ;;  %v5020_v17 = vld [vmem:[%s6687_s3] ss:$0 sm:$0xff]  ;;  %vm1259_vm2 = vsmask.f32 7424  ;;  %vm670_vm4 = vsmask.f32 256  ;;  %s6270_s13 = scalar_lea.vmem %s6689_s5, %s4297_s23 }
  0x12   : > { %v4332_v2 = vld [vmem:[%s5004_s28] sm:$0xff]   ;;  %v4405_v4 = vld [vmem:[%s5004_s28 + $0x58] sm:$0xff]   ;;  %v4395_v9 = vld [vmem:[%s5004_s28 + $0x8] sm:$0xff]   ;;  %s4015_s23 = sshll.u32 %s6823_s22, 1 }
  0x13   : > { %v4406_v3 = vld [vmem:[%s5004_s28 + $0x60] sm:$0xff]   ;;  %v4333_v5 = vunpack.c.l.bf16 %v4332_v2  ;;  %v4334_v6 = vunpack.c.h.bf16 %v4332_v2  ;;  %v4377_v11 = vunpack.c.l.bf16 %v4405_v4  ;;  %v4378_v12 = vunpack.c.h.bf16 %v4405_v4  ;;  %v4407_v53 = vld [vmem:[%s5004_s28 + $0x68] sm:$0xff]   ;;  %vm5051_vm12 = vmand %vm669_vm3, %vm670_vm4  ;;  %s262_s15 = scalar_lea.vmem %s6690_s6, %s4015_s23 }
  0x14   : > { %v4381_v7 = vunpack.c.l.bf16 %v4406_v3  ;;  %v4382_v8 = vunpack.c.h.bf16 %v4406_v3  ;;  %v4337_v13 = vunpack.c.l.bf16 %v4395_v9  ;;  %v4338_v14 = vunpack.c.h.bf16 %v4395_v9 }
  0x15   : > { %v335_v15 = vmul.f32 %v4333_v5, %v4997_v1  ;;  %v336_v16 = vmul.f32 %v4334_v6, %v4997_v1  ;;  %v938_v20 = vld [vmem:[#allocation2] sm:$0xf]  ;;  %v939_v21 = vld [vmem:[#allocation2 + $0x4] sm:$0xf]  ;;  %v357_v22 = vmul.f32 %v4377_v11, %v4997_v1  ;;  %v358_v23 = vmul.f32 %v4378_v12, %v4997_v1 }
  0x16   : > { %v359_v18 = vmul.f32 %v4381_v7, %v4997_v1  ;;  %v360_v19 = vmul.f32 %v4382_v8, %v4997_v1  ;;  %v337_v24 = vmul.f32 %v4337_v13, %v4997_v1  ;;  %v338_v25 = vmul.f32 %v4338_v14, %v4997_v1  ;;  %v4723_v29 = vld [vmem:[#allocation2 + $0x8] ss:$0 sps:$4 sm:$0x11]  }
  0x17   : > { %v374_v26 = vadd.f32 %v5013_v10, %v335_v15  ;;  %v375_v27 = vadd.f32 %v5013_v10, %v336_v16  ;;  %v5030_v28 = vcombine.low %v938_v20, %v939_v21  ;;  %v396_v32 = vadd.f32 %v5013_v10, %v357_v22 }
  0x18   : > { %v398_v30 = vadd.f32 %v5013_v10, %v359_v18  ;;  %v399_v31 = vadd.f32 %v5013_v10, %v360_v19  ;;  %v397_v33 = vadd.f32 %v5013_v10, %v358_v23  ;;  %v376_v34 = vadd.f32 %v5013_v10, %v337_v24  ;;  %v4396_v24 = vld [vmem:[%s5004_s28 + $0x10] sm:$0xff]  }
  0x19   : > { %vm406_vm5 = vcmp.ge.f32.partialorder %v374_v26, 0.0  ;;  %vm407_vm6 = vcmp.ge.f32.partialorder %v375_v27, 0.0  ;;  %v445_v35 = vmul.f32 %v5020_v17, %v374_v26  ;;  %v446_v36 = vmul.f32 %v5020_v17, %v375_v27 }
  0x1a   : > { %v1261_v37 = vshrl.u32 %v5030_v28, 16  ;;  %v1263_v38 = vshll.u32 %v5030_v28, 16  ;;  %v1268_v39 = vshll.u32 %v4723_v29, 16  ;;  %vm430_vm7 = vcmp.ge.f32.partialorder %v398_v30, 0.0 }
  0x1b   : > { %v477_v40 = vsel %vm406_vm5, %v374_v26, %v445_v35  ;;  %v478_v41 = vsel %vm407_vm6, %v375_v27, %v446_v36  ;;  %vm431_vm8 = vcmp.ge.f32.partialorder %v399_v31, 0.0  ;;  %v469_v42 = vmul.f32 %v5020_v17, %v398_v30 }
  0x1c   : > { %v509_v43 = vpack.c.bf16 %v478_v41, %v477_v40  ;;  %v1265_v44 = vrot.slane %v1263_v38, 1  ;;  %v1270_v45 = vrot.slane %v1268_v39, 1  ;;  %v470_v46 = vmul.f32 %v5020_v17, %v399_v31 }
  0x1d   : > { %v501_v47 = vsel %vm430_vm7, %v398_v30, %v469_v42  ;;  %vm428_vm9 = vcmp.ge.f32.partialorder %v396_v32, 0.0  ;;  %vm429_vm10 = vcmp.ge.f32.partialorder %v397_v33, 0.0  ;;  %v467_v48 = vmul.f32 %v5020_v17, %v396_v32  ;;  %v4408_v42 = vld [vmem:[%s5004_s28 + $0x70] sm:$0xff]  }
  0x1e   : > { %v526_v49 = vshrl.u32 %v509_v43, 16  ;;  %v529_v50 = vshll.u32 %v509_v43, 16  ;;  %v1266_v51 = vor.u32 %v1265_v44, %v1261_v37  ;;  %v502_v52 = vsel %vm431_vm8, %v399_v31, %v470_v46 }
  0x1f   : > { %v521_v54 = vpack.c.bf16 %v502_v52, %v501_v47  ;;  %v468_v55 = vmul.f32 %v5020_v17, %v397_v33  ;;  %v499_v56 = vsel %vm428_vm9, %v396_v32, %v467_v48  ;;  %v377_v57 = vadd.f32 %v5013_v10, %v338_v25 }
  0x20   : > { %v528_v58 = vrot.slane %v526_v49, 7  ;;  %v1271_v59 = vsel %vm1259_vm2, %v1266_v51, %v1270_v45  ;;  %vm408_vm11 = vcmp.ge.f32.partialorder %v376_v34, 0.0  ;;  %v447_v60 = vmul.f32 %v5020_v17, %v376_v34 }
  0x21   : > { %1452 = vrot.lane.b32.xlu1 %v1271_v59, %s4941_s9  ;;  %v610_v62 = vshrl.u32 %v521_v54, 16  ;;  %v613_v63 = vshll.u32 %v521_v54, 16  ;;  %v500_v0 = vsel %vm429_vm10, %v397_v33, %v468_v55  ;;  %vm409_vm13 = vcmp.ge.f32.partialorder %v377_v57, 0.0 }
  0x22   : > { %v531_v2 = vor.u32 %v529_v50, %v528_v58  ;;  %v520_v3 = vpack.c.bf16 %v500_v0, %v499_v56  ;;  %v448_v4 = vmul.f32 %v5020_v17, %v377_v57  ;;  %v479_v5 = vsel %vm408_vm11, %v376_v34, %v447_v60 }
  0x23   : > { %v612_v6 = vrot.slane %v610_v62, 7  ;;  %v4385_v7 = vunpack.c.l.bf16 %v4407_v53  ;;  %v4386_v8 = vunpack.c.h.bf16 %v4407_v53  ;;  %v688_v9 = vsel %vm5051_vm12, %v528_v58, 0 }
  0x24   : > { %v672_v11 = vsel %vm5051_vm12, 0, %v531_v2  ;;  %v603_v12 = vshrl.u32 %v520_v3, 16  ;;  %v606_v13 = vshll.u32 %v520_v3, 16  ;;  %v480_v14 = vsel %vm409_vm13, %v377_v57, %v448_v4 }
  0x25   : > { %v4019_v15 = vcombine.low %v672_v11, %v672_v11  ;;  %v4020_v16 = vcombine.high %v672_v11, %v672_v11  ;;  %v615_v18 = vor.u32 %v613_v63, %v612_v6  ;;  %v510_v19 = vpack.c.bf16 %v480_v14, %v479_v5 }
  0x26   : > { %v605_v20 = vrot.slane %v603_v12, 7  ;;  %v361_v21 = vmul.f32 %v4385_v7, %v4997_v1  ;;  %v362_v22 = vmul.f32 %v4386_v8, %v4997_v1  ;;  %v4021_v23 = vcombine.low %v688_v9, %v688_v9 }
  0x27   : > { %882 = vst.msk [vmem:[#allocation2 + $0xc] sm:$0xf] %vm881_vm0, %v4019_v15  ;;  %883 = vst.msk [vmem:[#allocation2 + $0x10] sm:$0xf] %vm881_vm0, %v4020_v16  ;;  %v684_v25 = vsel %vm5051_vm12, 0, %v615_v18  ;;  %v533_v26 = vshrl.u32 %v510_v19, 16  ;;  %v4341_v40 = vunpack.c.l.bf16 %v4396_v24  ;;  %v4342_v41 = vunpack.c.h.bf16 %v4396_v24 }
  0x28   : > { %v536_v27 = vshll.u32 %v510_v19, 16  ;;  %v700_v29 = vsel %vm5051_vm12, %v612_v6, 0  ;;  %v4055_v30 = vcombine.low %v684_v25, %v684_v25  ;;  %v4056_v31 = vcombine.high %v684_v25, %v684_v25  ;;  %885 = vst.msk [vmem:[#allocation2 + $0x14] sm:$0x1] %vm884_vm1, %v4021_v23 }
  0x29   : > { %v608_v32 = vor.u32 %v606_v13, %v605_v20  ;;  %v699_v33 = vsel %vm5051_vm12, %v605_v20, 0  ;;  %v5074_v35 = vrot.slane %v533_v26, 7  ;;  %v400_v36 = vadd.f32 %v5013_v10, %v361_v21 }
  0x2a   : > { %v4054_v34 = vcombine.low %v699_v33, %v699_v33  ;;  %v401_v37 = vadd.f32 %v5013_v10, %v362_v22  ;;  %919 = vst.msk [vmem:[#allocation2 + $0x9c] sm:$0xf] %vm881_vm0, %v4055_v30  ;;  %920 = vst.msk [vmem:[#allocation2 + $0xa0] sm:$0xf] %vm881_vm0, %v4056_v31  ;;  %v4057_v39 = vcombine.low %v700_v29, %v700_v29  ;;  %v4389_v51 = vunpack.c.l.bf16 %v4408_v42 }
  0x2b   : > { %v683_v38 = vsel %vm5051_vm12, 0, %v608_v32  ;;  %v538_v45 = vor.u32 %v536_v27, %v5074_v35  ;;  %vm432_vm14 = vcmp.ge.f32.partialorder %v400_v36, 0.0  ;;  %v471_v46 = vmul.f32 %v5020_v17, %v400_v36 }
  0x2c   : > { %v4052_v43 = vcombine.low %v683_v38, %v683_v38  ;;  %v4053_v44 = vcombine.high %v683_v38, %v683_v38  ;;  %918 = vst.msk [vmem:[#allocation2 + $0x98] sm:$0x1] %vm884_vm1, %v4054_v34  ;;  %vm433_vm15 = vcmp.ge.f32.partialorder %v401_v37, 0.0  ;;  %v472_v47 = vmul.f32 %v5020_v17, %v401_v37  ;;  %921 = vst.msk [vmem:[#allocation2 + $0xa4] sm:$0x1] %vm884_vm1, %v4057_v39 }
  0x2d   : > { %v673_v48 = vsel %vm5051_vm12, 0, %v538_v45  ;;  %v339_v49 = vmul.f32 %v4341_v40, %v4997_v1  ;;  %v340_v50 = vmul.f32 %v4342_v41, %v4997_v1  ;;  %v503_v56 = vsel %vm432_vm14, %v400_v36, %v471_v46 }
  0x2e   : > { %916 = vst.msk [vmem:[#allocation2 + $0x90] sm:$0xf] %vm881_vm0, %v4052_v43  ;;  %917 = vst.msk [vmem:[#allocation2 + $0x94] sm:$0xf] %vm881_vm0, %v4053_v44  ;;  %v1002_v52 = vld [vmem:[#allocation2 + $0xc] sm:$0xf]  ;;  %v4022_v54 = vcombine.low %v673_v48, %v673_v48  ;;  %v4023_v55 = vcombine.high %v673_v48, %v673_v48  ;;  %v504_v57 = vsel %vm433_vm15, %v401_v37, %v472_v47  ;;  %v4390_v63 = vunpack.c.h.bf16 %v4408_v42 }
  0x2f   : > { %v5094_v53 = vld [vmem:[#allocation2 + $0x10] sm:$0xf]  ;;  %v522_v59 = vpack.c.bf16 %v504_v57, %v503_v56  ;;  %v940_v60 = vld [vmem:[#allocation2 + $0xc] sm:$0xf]  ;;  %v378_v4 = vadd.f32 %v5013_v10, %v339_v49  ;;  %v379_v8 = vadd.f32 %v5013_v10, %v340_v50  ;;  %v363_v9 = vmul.f32 %v4389_v51, %v4997_v1 }
  0x30   : > { %v5097_v58 = vcombine.low %v1002_v52, %v5094_v53  ;;  %v941_v62 = vld [vmem:[#allocation2 + $0x10] sm:$0xf]  ;;  %886 = vst.msk [vmem:[#allocation2 + $0x18] sm:$0xf] %vm881_vm0, %v4022_v54  ;;  %887 = vst.msk [vmem:[#allocation2 + $0x1c] sm:$0xf] %vm881_vm0, %v4023_v55  ;;  %v364_v14 = vmul.f32 %v4390_v63, %v4997_v1 }
  0x31   : > { %v5101_v0 = vcombine.low %v940_v60, %v941_v62  ;;  %v1026_v2 = vld [vmem:[#allocation2 + $0x9c] sm:$0xf]  ;;  %v1027_v3 = vld [vmem:[#allocation2 + $0xa0] sm:$0xf]  ;;  %v617_v6 = vshrl.u32 %v522_v59, 16  ;;  %v620_v12 = vshll.u32 %v522_v59, 16  ;;  %v449_v26 = vmul.f32 %v5020_v17, %v378_v4 }
  0x32   : > { %1661 = vrot.lane.b32.xlu0 %v5097_v58, %s4941_s9  ;;  %v5106_v5 = vcombine.low %v1026_v2, %v1027_v3  ;;  %v4733_v7 = vld [vmem:[#allocation2 + $0x14] ss:$0 sps:$4 sm:$0x11]   ;;  %v964_v23 = vld [vmem:[#allocation2 + $0x9c] sm:$0xf]  ;;  %v450_v27 = vmul.f32 %v5020_v17, %v379_v8  ;;  %v402_v29 = vadd.f32 %v5013_v10, %v363_v9  ;;  %v403_v34 = vadd.f32 %v5013_v10, %v364_v14  ;;  %v4800_v2 = vld [vmem:[%s6688_s4 + $0x40] sm:$0xff]  }
  0x33   : > { %v4727_v11 = vld [vmem:[#allocation2 + $0x98] ss:$0 sps:$4 sm:$0x11]   ;;  %v1275_v13 = vshll.u32 %v5101_v0, 16  ;;  %v1273_v18 = vshrl.u32 %v5101_v0, 16  ;;  %v619_v21 = vrot.slane %v617_v6, 7  ;;  %4410 = vmatprep.subr.bf16.mxu0 %v4800_v2  ;;  %4694 = vmatprep.subr.bf16.mxu1 %v4800_v2 }
  0x34   : > { %6738 = vst [vmem:[#allocation3_spill] sm:$0xff] %v5106_v5  ;;  %v1412_v20 = vshll.u32 %v4727_v11, 16  ;;  %v1280_v24 = vshll.u32 %v4733_v7, 16  ;;  %v965_v25 = vld [vmem:[#allocation2 + $0xa0] sm:$0xf]  ;;  %vm410_vm4 = vcmp.ge.f32.partialorder %v378_v4, 0.0  ;;  %v473_v47 = vmul.f32 %v5020_v17, %v402_v29 }
  0x35   : > { %v962_v15 = vld [vmem:[#allocation2 + $0x90] sm:$0xf]  ;;  %v963_v16 = vld [vmem:[#allocation2 + $0x94] sm:$0xf]  ;;  %v1277_v22 = vrot.slane %v1275_v13, 1  ;;  %v622_v33 = vor.u32 %v620_v12, %v619_v21  ;;  %v5125_v40 = vcombine.low %v964_v23, %v965_v25  ;;  %v474_v51 = vmul.f32 %v5020_v17, %v403_v34  ;;  %v4397_v55 = vld [vmem:[%s5004_s28 + $0x18] sm:$0xff]  }
  0x36   : > { %1685 = vrot.lane.b32.xlu0 %v5106_v5, %s4941_s9  ;;  %v5115_v19 = vcombine.low %v962_v15, %v963_v16  ;;  %v1414_v36 = vrot.slane %v1412_v20, 1  ;;  %v1282_v39 = vrot.slane %v1280_v24, 1  ;;  %v4735_v44 = vld [vmem:[#allocation2 + $0xa4] ss:$0 sps:$4 sm:$0x11]   ;;  %vm411_vm5 = vcmp.ge.f32.partialorder %v379_v8, 0.0 }
  0x37   : > { %v1004_v32 = vld [vmem:[#allocation2 + $0x18] sm:$0xf]  ;;  %v5123_v37 = vld [vmem:[#allocation2 + $0x1c] sm:$0xf]  ;;  %v1278_v38 = vor.u32 %v1277_v22, %v1273_v18  ;;  %v685_v43 = vsel %vm5051_vm12, 0, %v622_v33  ;;  %v1419_v50 = vshll.u32 %v5125_v40, 16  ;;  %v481_v54 = vsel %vm410_vm4, %v378_v4, %v449_v26 }
  0x38   : > { %v1405_v30 = vshrl.u32 %v5115_v19, 16  ;;  %v1407_v31 = vshll.u32 %v5115_v19, 16  ;;  %v5128_v42 = vcombine.low %v1004_v32, %v5123_v37  ;;  %v4058_v45 = vcombine.low %v685_v43, %v685_v43  ;;  %v4801_v7 = vld [vmem:[%s6688_s4] sm:$0xff]   ;;  %v942_v13 = vld [vmem:[#allocation2 + $0x18] sm:$0xf]  ;;  %v4805_v24 = vld [vmem:[%s6688_s4 + $0x48] sm:$0xff]  }
  0x39   : > { %v4059_v46 = vcombine.high %v685_v43, %v685_v43  ;;  %v1283_v49 = vsel %vm1259_vm2, %v1278_v38, %v1282_v39  ;;  %v1417_v52 = vshrl.u32 %v5125_v40, 16  ;;  %vm434_vm6 = vcmp.ge.f32.partialorder %v402_v29, 0.0  ;;  %v943_v16 = vld [vmem:[#allocation2 + $0x1c] sm:$0xf]  ;;  %4411 = vmatpush3.bf16.msra.mxu0 %v4801_v7  ;;  %4702 = vmatpush3.bf16.msra.mxu1 %v4801_v7  ;;  %v4806_v38 = vld [vmem:[%s6688_s4 + $0x8] sm:$0xff]  }
  0x3a   : > { %v1409_v41 = vrot.slane %v1407_v31, 1  ;;  %1663 = vrot.lane.b32.xlu0 %v5128_v42, %s4941_s9  ;;  %922 = vst.msk [vmem:[#allocation2 + $0xa8] sm:$0xf] %vm881_vm0, %v4058_v45  ;;  %v1421_v57 = vrot.slane %v1419_v50, 1  ;;  %v1424_v59 = vshll.u32 %v4735_v44, 16  ;;  %v482_v60 = vsel %vm411_vm5, %v379_v8, %v450_v27  ;;  %4412 = vmatprep.subr.bf16.mxu0 %v4805_v24 }
  0x3b   : > { %923 = vst.msk [vmem:[#allocation2 + $0xac] sm:$0xf] %vm881_vm0, %v4059_v46  ;;  %v511_v62 = vpack.c.bf16 %v482_v60, %v481_v54  ;;  %vm435_vm7 = vcmp.ge.f32.partialorder %v403_v34, 0.0  ;;  %v505_v63 = vsel %vm434_vm6, %v402_v29, %v473_v47  ;;  %v689_v4 = vsel %vm5051_vm12, %v5074_v35, 0  ;;  %4695 = vmatprep.subr.bf16.mxu1 %v4805_v24  ;;  %v4812_v54 = vld [vmem:[%s6688_s4 + $0x10] sm:$0xff]  }
  0x3c   : > { %v1410_v48 = vor.u32 %v1409_v41, %v1405_v30  ;;  %v506_v3 = vsel %vm435_vm7, %v403_v34, %v474_v51  ;;  %v4345_v6 = vunpack.c.l.bf16 %v4397_v55  ;;  %v4024_v12 = vcombine.low %v689_v4, %v689_v4  ;;  %v4409_v30 = vld [vmem:[%s5004_s28 + $0x78] sm:$0xff]  }
  0x3d   : > { %v540_v8 = vshrl.u32 %v511_v62, 16  ;;  %v543_v9 = vshll.u32 %v511_v62, 16  ;;  %v523_v11 = vpack.c.bf16 %v506_v3, %v505_v63  ;;  %v1422_v14 = vor.u32 %v1421_v57, %v1417_v52  ;;  %4413 = vmatpush3.bf16.msra.mxu0 %v4806_v38  ;;  %4703 = vmatpush3.bf16.msra.mxu1 %v4806_v38  ;;  %v4815_v62 = vld [vmem:[%s6688_s4 + $0x18] sm:$0xff]   ;;  %v4821_v38 = vld [vmem:[%s6688_s4 + $0x68] sm:$0xff]  }
  0x3e   : > { %v1415_v56 = vsel %vm1259_vm2, %v1410_v48, %v1414_v36  ;;  %1454 = vrot.lane.b32.xlu0 %v1283_v49, %s4941_s9  ;;  %v1426_v15 = vrot.slane %v1424_v59, 1  ;;  %v701_v18 = vsel %vm5051_vm12, %v619_v21, 0  ;;  %888 = vst.msk [vmem:[#allocation2 + $0x20] sm:$0x1] %vm884_vm1, %v4024_v12  ;;  %v4346_v27 = vunpack.c.h.bf16 %v4397_v55  ;;  %v4811_v48 = vld [vmem:[%s6688_s4 + $0x50] sm:$0xff]   ;;  %v4814_v55 = vld [vmem:[%s6688_s4 + $0x58] sm:$0xff]  }
  0x3f   : > { %1476 = vrot.lane.b32.xlu1 %v1415_v56, %s4941_s9  ;;  %v5156_v35 = vrot.slane %v540_v8, 7  ;;  %v624_v20 = vshrl.u32 %v523_v11, 16  ;;  %v627_v22 = vshll.u32 %v523_v11, 16  ;;  %v4060_v23 = vcombine.low %v701_v18, %v701_v18  ;;  %4414 = vmatprep.subr.bf16.mxu0 %v4811_v48  ;;  %v4816_v8 = vld [vmem:[%s6688_s4 + $0x60] sm:$0xff]  }
  0x40   : > { %v341_v29 = vmul.f32 %v4345_v6, %v4997_v1  ;;  %v5169_v33 = vcombine.low %v942_v13, %v943_v16  ;;  %v342_v41 = vmul.f32 %v4346_v27, %v4997_v1  ;;  %v1427_v44 = vsel %vm1259_vm2, %v1422_v14, %v1426_v15  ;;  %4696 = vmatprep.subr.bf16.mxu1 %v4811_v48 }
  0x41   : > { %v1028_v25 = vld [vmem:[#allocation2 + $0xa8] sm:$0xf]  ;;  %v545_v31 = vor.u32 %v543_v9, %v5156_v35  ;;  %v5167_v32 = vrot.slane %v624_v20, 7  ;;  %924 = vst.msk [vmem:[#allocation2 + $0xb0] sm:$0x1] %vm884_vm1, %v4060_v23  ;;  %v4393_v47 = vunpack.c.l.bf16 %v4409_v30  ;;  %v4394_v52 = vunpack.c.h.bf16 %v4409_v30  ;;  %4415 = vmatpush3.bf16.msra.mxu0 %v4812_v54  ;;  %4704 = vmatpush3.bf16.msra.mxu1 %v4812_v54  ;;  %v4398_v20 = vld [vmem:[%s5004_s28 + $0x20] sm:$0xff]  }
  0x42   : > { %v1029_v26 = vld [vmem:[#allocation2 + $0xac] sm:$0xf]  ;;  %v966_v34 = vld [vmem:[#allocation2 + $0xa8] sm:$0xf]  ;;  %v380_v43 = vadd.f32 %v5013_v10, %v341_v29  ;;  %v1285_v51 = vshrl.u32 %v5169_v33, 16  ;;  %v1287_v57 = vshll.u32 %v5169_v33, 16  ;;  %v381_v60 = vadd.f32 %v5013_v10, %v342_v41  ;;  %4416 = vmatprep.subr.bf16.mxu0 %v4814_v55  ;;  %4697 = vmatprep.subr.bf16.mxu1 %v4814_v55 }
  0x43   : > { %v5164_v21 = vcombine.low %v1028_v25, %v1029_v26  ;;  %v967_v36 = vld [vmem:[#allocation2 + $0xac] sm:$0xf]  ;;  %v674_v45 = vsel %vm5051_vm12, 0, %v545_v31  ;;  %v629_v46 = vor.u32 %v627_v22, %v5167_v32  ;;  %v365_v7 = vmul.f32 %v4393_v47, %v4997_v1  ;;  %v4817_v30 = vld [vmem:[%s6688_s4 + $0x20] sm:$0xff]  }
  0x44   : > { %v5175_v39 = vcombine.low %v966_v34, %v967_v36  ;;  %v4025_v49 = vcombine.low %v674_v45, %v674_v45  ;;  %v4026_v50 = vcombine.high %v674_v45, %v674_v45  ;;  %vm412_vm8 = vcmp.ge.f32.partialorder %v380_v43, 0.0 }
  0x45   : > { %1687 = vrot.lane.b32.xlu1 %v5164_v21, %s4941_s9  ;;  %v686_v56 = vsel %vm5051_vm12, 0, %v629_v46  ;;  %v4741_v3 = vld [vmem:[#allocation2 + $0x20] ss:$0 sps:$4 sm:$0x11]   ;;  %v451_v4 = vmul.f32 %v5020_v17, %v380_v43  ;;  %vm413_vm9 = vcmp.ge.f32.partialorder %v381_v60, 0.0  ;;  %v452_v6 = vmul.f32 %v5020_v17, %v381_v60  ;;  %4417 = vmatpush3.bf16.msra.mxu0 %v4815_v62 }
  0x46   : > { %v1431_v59 = vshll.u32 %v5175_v39, 16  ;;  %889 = vst.msk [vmem:[#allocation2 + $0x24] sm:$0xf] %vm881_vm0, %v4025_v49  ;;  %890 = vst.msk [vmem:[#allocation2 + $0x28] sm:$0xf] %vm881_vm0, %v4026_v50  ;;  %v4061_v63 = vcombine.low %v686_v56, %v686_v56  ;;  %v4062_v2 = vcombine.high %v686_v56, %v686_v56  ;;  %v1292_v9 = vshll.u32 %v4741_v3, 16  ;;  %4418 = vmatprep.subr.bf16.mxu0 %v4816_v8 }
  0x47   : > { %v483_v12 = vsel %vm412_vm8, %v380_v43, %v451_v4  ;;  %v366_v13 = vmul.f32 %v4394_v52, %v4997_v1  ;;  %v1289_v14 = vrot.slane %v1287_v57, 1  ;;  %v484_v15 = vsel %vm413_vm9, %v381_v60, %v452_v6  ;;  %4705 = vmatpush3.bf16.msra.mxu1 %v4815_v62 }
  0x48   : > { %925 = vst.msk [vmem:[#allocation2 + $0xb4] sm:$0xf] %vm881_vm0, %v4061_v63  ;;  %926 = vst.msk [vmem:[#allocation2 + $0xb8] sm:$0xf] %vm881_vm0, %v4062_v2  ;;  %v404_v16 = vadd.f32 %v5013_v10, %v365_v7  ;;  %v690_v18 = vsel %vm5051_vm12, %v5156_v35, 0  ;;  %v1429_v22 = vshrl.u32 %v5175_v39, 16  ;;  %v512_v23 = vpack.c.bf16 %v484_v15, %v483_v12  ;;  %4698 = vmatprep.subr.bf16.mxu1 %v4816_v8 }
  0x49   : > { %1478 = vrot.lane.b32.xlu1 %v1427_v44, %s4941_s9  ;;  %v4743_v11 = vld [vmem:[#allocation2 + $0xb0] ss:$0 sps:$4 sm:$0x11]   ;;  %v405_v24 = vadd.f32 %v5013_v10, %v366_v13  ;;  %v1433_v25 = vrot.slane %v1431_v59, 1  ;;  %v4027_v27 = vcombine.low %v690_v18, %v690_v18  ;;  %v702_v29 = vsel %vm5051_vm12, %v5167_v32, 0  ;;  %4419 = vmatpush3.bf16.msra.mxu0 %v4817_v30  ;;  %v4822_v59 = vld [vmem:[%s6688_s4 + $0x28] sm:$0xff]  }
  0x4a   : > { %v1436_v26 = vshll.u32 %v4743_v11, 16  ;;  %v1294_v35 = vrot.slane %v1292_v9, 1  ;;  %v547_v31 = vshrl.u32 %v512_v23, 16  ;;  %v475_v34 = vmul.f32 %v5020_v17, %v404_v16  ;;  %4420 = vmatprep.subr.bf16.mxu0 %v4821_v38  ;;  %v4823_v2 = vld [vmem:[%s6688_s4 + $0x70] sm:$0xff]  }
  0x4b   : > { %v4349_v36 = vunpack.c.l.bf16 %v4398_v20  ;;  %v1290_v32 = vor.u32 %v1289_v14, %v1285_v51  ;;  %v550_v44 = vshll.u32 %v512_v23, 16  ;;  %vm436_vm10 = vcmp.ge.f32.partialorder %v404_v16, 0.0  ;;  %891 = vst.msk [vmem:[#allocation2 + $0x2c] sm:$0x1] %vm884_vm1, %v4027_v27  ;;  %4706 = vmatpush3.bf16.msra.mxu1 %v4817_v30  ;;  %v4824_v8 = vld [vmem:[%s6688_s4 + $0x30] sm:$0xff]   ;;  %v4828_v23 = vld [vmem:[%s6688_s4 + $0x78] sm:$0xff]  }
  0x4c   : > { %v4063_v45 = vcombine.low %v702_v29, %v702_v29  ;;  %v5238_v47 = vrot.slane %v547_v31, 7  ;;  %v476_v48 = vmul.f32 %v5020_v17, %v405_v24  ;;  %v4350_v52 = vunpack.c.h.bf16 %v4398_v20  ;;  %4699 = vmatprep.subr.bf16.mxu1 %v4821_v38  ;;  %v4829_v38 = vld [vmem:[%s6688_s4 + $0x38] sm:$0xff]  }
  0x4d   : > { %v1006_v41 = vld [vmem:[#allocation2 + $0x24] sm:$0xf]  ;;  %v5232_v43 = vld [vmem:[#allocation2 + $0x28] sm:$0xf]  ;;  %v1434_v56 = vor.u32 %v1433_v25, %v1429_v22  ;;  %v1438_v51 = vrot.slane %v1436_v26, 1  ;;  %v507_v62 = vsel %vm436_vm10, %v404_v16, %v475_v34  ;;  %v343_v63 = vmul.f32 %v4349_v36, %v4997_v1  ;;  %4421 = vmatpush3.bf16.msra.mxu0 %v4822_v59 }
  0x4e   : > { %v5236_v46 = vcombine.low %v1006_v41, %v5232_v43  ;;  %v944_v49 = vld [vmem:[#allocation2 + $0x24] sm:$0xf]  ;;  %v945_v50 = vld [vmem:[#allocation2 + $0x28] sm:$0xf]  ;;  %927 = vst.msk [vmem:[#allocation2 + $0xbc] sm:$0x1] %vm884_vm1, %v4063_v45  ;;  %v1295_v3 = vsel %vm1259_vm2, %v1290_v32, %v1294_v35  ;;  %v552_v4 = vor.u32 %v550_v44, %v5238_v47  ;;  %v344_v7 = vmul.f32 %v4350_v52, %v4997_v1 }
  0x4f   : > { %v1030_v54 = vld [vmem:[#allocation2 + $0xb4] sm:$0xf]  ;;  %v1031_v55 = vld [vmem:[#allocation2 + $0xb8] sm:$0xf]  ;;  %v5241_v57 = vcombine.low %v944_v49, %v945_v50  ;;  %vm437_vm11 = vcmp.ge.f32.partialorder %v405_v24, 0.0  ;;  %v1439_v9 = vsel %vm1259_vm2, %v1434_v56, %v1438_v51  ;;  %v382_v22 = vadd.f32 %v5013_v10, %v343_v63  ;;  %4422 = vmatprep.subr.bf16.mxu0 %v4823_v2  ;;  %4707 = vmatpush3.bf16.msra.mxu1 %v4822_v59  ;;  %v4834_v32 = vld [vmem:[%s6688_s4 + $0x100] sm:$0xff]  }
  0x50   : > { %6739 = vst [vmem:[#allocation4_spill] sm:$0xff] %v5236_v46  ;;  %1665 = vrot.lane.b32.xlu0 %v5236_v46, %s4941_s9  ;;  %v5249_v60 = vcombine.low %v1030_v54, %v1031_v55  ;;  %v508_v6 = vsel %vm437_vm11, %v405_v24, %v476_v48  ;;  %v675_v11 = vsel %vm5051_vm12, 0, %v552_v4  ;;  %v968_v14 = vld [vmem:[#allocation2 + $0xb4] sm:$0xf]  ;;  %v969_v15 = vld [vmem:[#allocation2 + $0xb8] sm:$0xf]  ;;  %v383_v29 = vadd.f32 %v5013_v10, %v344_v7 }
  0x51   : > { %v524_v12 = vpack.c.bf16 %v508_v6, %v507_v62  ;;  %v1299_v13 = vshll.u32 %v5241_v57, 16  ;;  %v4028_v16 = vcombine.low %v675_v11, %v675_v11  ;;  %v4029_v18 = vcombine.high %v675_v11, %v675_v11  ;;  %v1067_v26 = vld [vmem:[#allocation2 + $0x18] sm:$0xf]  ;;  %v1068_v35 = vld [vmem:[#allocation2 + $0x1c] sm:$0xf]  ;;  %4700 = vmatprep.subr.bf16.mxu1 %v4823_v2  ;;  %4423 = vmatpush3.bf16.msra.mxu0 %v4824_v8  ;;  %v4399_v50 = vld [vmem:[%s5004_s28 + $0x28] sm:$0xff]  }
  0x52   : > { %6740 = vst [vmem:[#allocation5_spill] sm:$0xff] %v5249_v60  ;;  %1689 = vrot.lane.b32.xlu1 %v5249_v60, %s4941_s9  ;;  %v4749_v20 = vld [vmem:[#allocation2 + $0x2c] ss:$0 sps:$4 sm:$0x11]   ;;  %v1297_v27 = vshrl.u32 %v5241_v57, 16  ;;  %v453_v30 = vmul.f32 %v5020_v17, %v382_v22  ;;  %v5281_v36 = vcombine.low %v968_v14, %v969_v15  ;;  %vm414_vm13 = vcmp.ge.f32.partialorder %v382_v22, 0.0  ;;  %4424 = vmatprep.subr.bf16.mxu0 %v4828_v23 }
  0x53   : > { %v631_v24 = vshrl.u32 %v524_v12, 16  ;;  %v634_v25 = vshll.u32 %v524_v12, 16  ;;  %892 = vst.msk [vmem:[#allocation2 + $0x30] sm:$0xf] %vm881_vm0, %v4028_v16  ;;  %893 = vst.msk [vmem:[#allocation2 + $0x34] sm:$0xf] %vm881_vm0, %v4029_v18  ;;  %v454_v41 = vmul.f32 %v5020_v17, %v383_v29  ;;  %v5291_v49 = vcombine.low %v1067_v26, %v1068_v35  ;;  %4708 = vmatpush3.bf16.msra.mxu1 %v4824_v8 }
  0x54   : > { %1456 = vrot.lane.b32.xlu0 %v1295_v3, %s4941_s9  ;;  %v1301_v34 = vrot.slane %v1299_v13, 1  ;;  %6741 = vst [vmem:[#allocation6_spill] sm:$0xff] %v5281_v36  ;;  %vm415_vm14 = vcmp.ge.f32.partialorder %v383_v29, 0.0  ;;  %v1304_v45 = vshll.u32 %v4749_v20, 16  ;;  %v485_v48 = vsel %vm414_vm13, %v382_v22, %v453_v30  ;;  %4701 = vmatprep.subr.bf16.mxu1 %v4828_v23  ;;  %v4833_v54 = vld [vmem:[%s6688_s4 + $0xc0] sm:$0xff]  }
  0x55   : > { %v5279_v31 = vrot.slane %v631_v24, 7  ;;  %6742 = vst [vmem:[#allocation7_spill] sm:$0xff] %v5291_v49  ;;  %v486_v52 = vsel %vm415_vm14, %v383_v29, %v454_v41  ;;  %v4751_v51 = vld [vmem:[#allocation2 + $0xbc] ss:$0 sps:$4 sm:$0x11]   ;;  %v1443_v59 = vshll.u32 %v5281_v36, 16  ;;  %4425 = vmatpush3.bf16.msra.mxu0 %v4829_v38  ;;  %v4353_v7 = vunpack.c.l.bf16 %v4399_v50 }
  0x56   : > { %1480 = vrot.lane.b32.xlu1 %v1439_v9, %s4941_s9  ;;  %v1302_v56 = vor.u32 %v1301_v34, %v1297_v27  ;;  %v513_v62 = vpack.c.bf16 %v486_v52, %v485_v48  ;;  %v5300_v63 = vld [vmem:[#allocation2 + $0xc] sm:$0xe]  ;;  %v4755_v4 = vld [vmem:[#allocation2 + $0x20] ss:$0 sps:$4 sm:$0x11]   ;;  %v691_v6 = vsel %vm5051_vm12, %v5238_v47, 0  ;;  %4654 = vmatprep.subr.bf16.mxu0 %v4834_v32  ;;  %v4354_v14 = vunpack.c.h.bf16 %v4399_v50 }
  0x57   : > { %v636_v44 = vor.u32 %v634_v25, %v5279_v31  ;;  %v1306_v11 = vrot.slane %v1304_v45, 1  ;;  %v2192_v12 = vshll.u32 %v5291_v49, 16  ;;  %v4030_v13 = vcombine.low %v691_v6, %v691_v6  ;;  %4709 = vmatpush3.bf16.msra.mxu1 %v4829_v38  ;;  %v1069_v29 = vld [vmem:[#allocation2 + $0x24] sm:$0xf]  ;;  %v1070_v30 = vld [vmem:[#allocation2 + $0x28] sm:$0xf] }
  0x58   : > { %v554_v16 = vshrl.u32 %v513_v62, 16  ;;  %v557_v47 = vshll.u32 %v513_v62, 16  ;;  %4522 = vmatprep.subr.bf16.mxu1 %v4833_v54  ;;  %v1441_v22 = vshrl.u32 %v5281_v36, 16  ;;  %v1445_v23 = vrot.slane %v1443_v59, 1  ;;  %v5326_v41 = vld [vmem:[%s6685_s1] ss:$0 sm:$0xff] }
  0x59   : > { %v687_v55 = vsel %vm5051_vm12, 0, %v636_v44  ;;  %v1448_v24 = vshll.u32 %v4751_v51, 16  ;;  %894 = vst.msk [vmem:[#allocation2 + $0x38] sm:$0x1] %vm884_vm1, %v4030_v13  ;;  %v345_v27 = vmul.f32 %v4353_v7, %v4997_v1  ;;  %v4147_v35 = vcombine.low %v5300_v63, %v5094_v53  ;;  %v1001_v61 = vld [vmem:[#allocation2 + $0xb4] sm:$0xe] }
  0x5a   : > { %v4064_v2 = vcombine.low %v687_v55, %v687_v55  ;;  %v4065_v3 = vcombine.high %v687_v55, %v687_v55  ;;  %v1008_v8 = vld [vmem:[#allocation2 + $0x30] sm:$0xf]  ;;  %v5305_v9 = vld [vmem:[#allocation2 + $0x34] sm:$0xf]  ;;  %v556_v25 = vrot.slane %v554_v16, 7  ;;  %v1307_v34 = vsel %vm1259_vm2, %v1302_v56, %v1306_v11 }
  0x5b   : > { %v5309_v15 = vcombine.low %v1008_v8, %v5305_v9  ;;  %v946_v18 = vld [vmem:[#allocation2 + $0x30] sm:$0xf]  ;;  %v947_v20 = vld [vmem:[#allocation2 + $0x34] sm:$0xf]  ;;  %v2197_v38 = vshll.u32 %v4755_v4, 16  ;;  %v346_v32 = vmul.f32 %v5326_v41, %v4354_v14  ;;  %v2190_v45 = vshrl.u32 %v5291_v49, 16 }
  0x5c   : > { %928 = vst.msk [vmem:[#allocation2 + $0xc0] sm:$0xf] %vm881_vm0, %v4064_v2  ;;  %929 = vst.msk [vmem:[#allocation2 + $0xc4] sm:$0xf] %vm881_vm0, %v4065_v3  ;;  %v5317_v26 = vcombine.low %v946_v18, %v947_v20  ;;  %v559_v44 = vor.u32 %v557_v47, %v556_v25  ;;  %v2194_v48 = vrot.slane %v2192_v12, 1  ;;  %v384_v1 = vadd.f32 %v5013_v10, %v345_v27 }
  0x5d   : > { %6743 = vst [vmem:[#allocation8_spill] sm:$0xff] %v5309_v15  ;;  %1667 = vrot.lane.b32.xlu0 %v5309_v15, %s4941_s9  ;;  %v1446_v50 = vor.u32 %v1445_v23, %v1441_v22  ;;  %v1450_v52 = vrot.slane %v1448_v24, 1  ;;  %v5331_v54 = vld [vmem:[#allocation2 + $0x14] ss:$0 sps:$4 sm:$0x11]   ;;  %v385_v53 = vadd.f32 %v5013_v10, %v346_v32  ;;  %v5334_v55 = vcombine.low %v1069_v29, %v1070_v30 }
  0x5e   : > { %6744 = vst [vmem:[#allocation9_spill] sm:$0xff] %v5317_v26  ;;  %v676_v56 = vsel %vm5051_vm12, 0, %v559_v44  ;;  %v1311_v51 = vshll.u32 %v5317_v26, 16  ;;  %vm416_vm15 = vcmp.ge.f32.partialorder %v384_v1, 0.0  ;;  %v455_v59 = vmul.f32 %v5020_v17, %v384_v1  ;;  %v5344_v10 = vld [vmem:[%s6687_s3] ss:$0 sm:$0xff] }
  0x5f   : > { %6745 = vst [vmem:[#allocation10_spill] sm:$0xff] %v5334_v55  ;;  %v4762_v62 = vld [vmem:[#allocation2 + $0x2c] ss:$0 sps:$4 sm:$0x11]   ;;  %v4031_v3 = vcombine.low %v676_v56, %v676_v56  ;;  %v4032_v4 = vcombine.high %v676_v56, %v676_v56  ;;  %v2199_v6 = vrot.slane %v2197_v38, 1  ;;  %v456_v7 = vmul.f32 %v5344_v10, %v385_v53  ;;  %v4400_v29 = vld [vmem:[%s5004_s28 + $0x30] sm:$0xff]  }
  0x60   : > { %v1051_v8 = vld [vmem:[#allocation2 + $0x18] sm:$0xe]  ;;  %v2195_v12 = vor.u32 %v2194_v48, %v2190_v45  ;;  %v4757_v13 = vld [vmem:[#allocation2 + $0x38] ss:$0 sps:$4 sm:$0x11]   ;;  %vm417_vm4 = vcmp.ge.f32.partialorder %v385_v53, 0.0  ;;  %v487_v17 = vsel %vm416_vm15, %v384_v1, %v455_v59  ;;  %v1451_v30 = vsel %vm1259_vm2, %v1446_v50, %v1450_v52 }
  0x61   : > { %1458 = vrot.lane.b32.xlu0 %v1307_v34, %s4941_s9  ;;  %895 = vst.msk [vmem:[#allocation2 + $0x3c] sm:$0xf] %vm881_vm0, %v4031_v3  ;;  %896 = vst.msk [vmem:[#allocation2 + $0x40] sm:$0xf] %vm881_vm0, %v4032_v4  ;;  %v1981_v14 = vrot.slane %v4147_v35, 1  ;;  %v488_v16 = vsel %vm417_vm4, %v385_v53, %v456_v7  ;;  %v2204_v47 = vshll.u32 %v5334_v55, 16  ;;  %v4148_v53 = vcombine.low %v1051_v8, %v5123_v37 }
  0x62   : > { %v692_v18 = vsel %vm5051_vm12, %v556_v25, 0  ;;  %v5354_v20 = vld [vmem:[#allocation2 + $0x24] sm:$0xe]  ;;  %v1309_v22 = vshrl.u32 %v5317_v26, 16  ;;  %v1313_v23 = vrot.slane %v1311_v51, 1  ;;  %v1982_v24 = vrot.slane %v5331_v54, 1 }
  0x63   : > { %v1032_v63 = vld [vmem:[#allocation2 + $0xc0] sm:$0xf]  ;;  %v1033_v2 = vld [vmem:[#allocation2 + $0xc4] sm:$0xf]  ;;  %v514_v27 = vpack.c.bf16 %v488_v16, %v487_v17  ;;  %v1316_v35 = vshll.u32 %v4757_v13, 16  ;;  %v2209_v34 = vshll.u32 %v4762_v62, 16  ;;  %v4033_v38 = vcombine.low %v692_v18, %v692_v18 }
  0x64   : > { %v5347_v11 = vcombine.low %v1032_v63, %v1033_v2  ;;  %v1071_v32 = vld [vmem:[#allocation2 + $0x30] sm:$0xf]  ;;  %v2202_v45 = vshrl.u32 %v5334_v55, 16  ;;  %v2206_v48 = vrot.slane %v2204_v47, 1  ;;  %v1072_v1 = vld [vmem:[#allocation2 + $0x34] sm:$0xf]  ;;  %v4357_v54 = vunpack.c.l.bf16 %v4400_v29 }
  0x65   : > { %v561_v44 = vshrl.u32 %v514_v27, 16  ;;  %v564_v25 = vshll.u32 %v514_v27, 16  ;;  %vm1532_vm5 = vcmask 1046528   ;;  %897 = vst.msk [vmem:[#allocation2 + $0x44] sm:$0x1] %vm884_vm1, %v4033_v38  ;;  %v4358_v56 = vunpack.c.h.bf16 %v4400_v29  ;;  %v4401_v63 = vld [vmem:[%s5004_s28 + $0x38] sm:$0xff]  }
  0x66   : > { %6746 = vst [vmem:[#allocation11_spill] sm:$0xff] %v5347_v11  ;;  %1691 = vrot.lane.b32.xlu1 %v5347_v11, %s4941_s9  ;;  %v4149_v50 = vcombine.low %v5354_v20, %v5232_v43  ;;  %v2200_v52 = vsel %vm1259_vm2, %v2195_v12, %v2199_v6  ;;  %v1314_v51 = vor.u32 %v1313_v23, %v1309_v22  ;;  %v5369_v62 = vld [vmem:[#allocation2 + $0x20] ss:$0 sps:$4 sm:$0x11]   ;;  %v1318_v2 = vrot.slane %v1316_v35, 1 }
  0x67   : > { %v563_v59 = vrot.slane %v561_v44, 7  ;;  %v347_v37 = vmul.f32 %v5326_v41, %v4357_v54  ;;  %v348_v3 = vmul.f32 %v5326_v41, %v4358_v56  ;;  %v5374_v4 = vcombine.low %v1071_v32, %v1072_v1  ;;  %v4769_v7 = vld [vmem:[#allocation2 + $0x38] ss:$0 sps:$4 sm:$0x11]   ;;  %v5385_v22 = vld [vmem:[%s6686_s2] ss:$0 sm:$0xff] }
  0x68   : > { %v1010_v8 = vld [vmem:[#allocation2 + $0x3c] sm:$0xf]  ;;  %v5376_v13 = vld [vmem:[#allocation2 + $0x40] sm:$0xf]  ;;  %v1983_v43 = vsel %vm1532_vm5, %v1981_v14, %v1982_v24  ;;  %v2207_v6 = vor.u32 %v2206_v48, %v2202_v45  ;;  %v2211_v12 = vrot.slane %v2209_v34, 1  ;;  %v1984_v20 = vrot.slane %v4148_v53, 1 }
  0x69   : > { %6747 = vst [vmem:[#allocation12_spill] sm:$0xff] %v5374_v4  ;;  %v566_v17 = vor.u32 %v564_v25, %v563_v59  ;;  %v5380_v16 = vcombine.low %v1010_v8, %v5376_v13  ;;  %v948_v47 = vld [vmem:[#allocation2 + $0x3c] sm:$0xf]  ;;  %v949_v18 = vld [vmem:[#allocation2 + $0x40] sm:$0xf]  ;;  %v386_v23 = vadd.f32 %v5385_v22, %v347_v37  ;;  %v387_v27 = vadd.f32 %v5385_v22, %v348_v3 }
  0x6a   : > { %1482 = vrot.lane.b32.xlu1 %v1451_v30, %s4941_s9  ;;  %v5392_v24 = vcombine.low %v948_v47, %v949_v18  ;;  %v1985_v29 = vrot.slane %v5369_v62, 1  ;;  %v4361_v30 = vunpack.c.l.bf16 %v4401_v63  ;;  %v1319_v35 = vsel %vm1259_vm2, %v1314_v51, %v1318_v2  ;;  %v4402_v8 = vld [vmem:[%s5004_s28 + $0x40] sm:$0xff]  }
  0x6b   : > { %6748 = vst [vmem:[#allocation13_spill] sm:$0xff] %v5380_v16  ;;  %v677_v14 = vsel %vm5051_vm12, 0, %v566_v17  ;;  %1669 = vrot.lane.b32.xlu0 %v5380_v16, %s4941_s9  ;;  %v2216_v32 = vshll.u32 %v5374_v4, 16  ;;  %v2212_v44 = vsel %vm1259_vm2, %v2207_v6, %v2211_v12  ;;  %v457_v45 = vmul.f32 %v5344_v10, %v386_v23  ;;  %v1090_v55 = vld [vmem:[#allocation2 + $0xa0] sm:$0xf] }
  0x6c   : > { %6749 = vst [vmem:[#allocation14_spill] sm:$0xff] %v5392_v24  ;;  %v4034_v34 = vcombine.low %v677_v14, %v677_v14  ;;  %v4035_v38 = vcombine.high %v677_v14, %v677_v14  ;;  %v4764_v25 = vld [vmem:[#allocation2 + $0x44] ss:$0 sps:$4 sm:$0x11]   ;;  %v458_v48 = vmul.f32 %v5344_v10, %v387_v27  ;;  %v2221_v1 = vshll.u32 %v4769_v7, 16 }
  0x6d   : > { %v1323_v53 = vshll.u32 %v5392_v24, 16  ;;  %vm418_vm6 = vcmp.ge.f32.partialorder %v386_v23, 0.0  ;;  %vm419_vm7 = vcmp.ge.f32.partialorder %v387_v27, 0.0  ;;  %v4362_v54 = vunpack.c.h.bf16 %v4401_v63  ;;  %v1074_v14 = vld [vmem:[#allocation2 + $0x40] sm:$0xf] }
  0x6e   : > { %2381 = vrot.lane.b32.xlu1 %v2200_v52, %s4941_s9  ;;  %898 = vst.msk [vmem:[#allocation2 + $0x48] sm:$0xf] %vm881_vm0, %v4034_v34  ;;  %899 = vst.msk [vmem:[#allocation2 + $0x4c] sm:$0xf] %vm881_vm0, %v4035_v38  ;;  %v489_v56 = vsel %vm418_vm6, %v386_v23, %v457_v45  ;;  %v490_v52 = vsel %vm419_vm7, %v387_v27, %v458_v48  ;;  %v2214_v51 = vshrl.u32 %v5374_v4, 16  ;;  %v1328_v2 = vshll.u32 %v4764_v25, 16 }
  0x6f   : > { %v349_v62 = vmul.f32 %v5326_v41, %v4361_v30  ;;  %1460 = vrot.lane.b32.xlu0 %v1319_v35, %s4941_s9  ;;  %v515_v37 = vpack.c.bf16 %v490_v52, %v489_v56  ;;  %v2218_v3 = vrot.slane %v2216_v32, 1  ;;  %v693_v7 = vsel %vm5051_vm12, %v563_v59, 0  ;;  %v1073_v27 = vld [vmem:[#allocation2 + $0x3c] sm:$0xf] }
  0x70   : > { %v1321_v17 = vshrl.u32 %v5392_v24, 16  ;;  %v1325_v63 = vrot.slane %v1323_v53, 1  ;;  %v4036_v6 = vcombine.low %v693_v7, %v693_v7  ;;  %v1987_v12 = vrot.slane %v4149_v50, 1  ;;  %v4776_v34 = vld [vmem:[#allocation2 + $0x44] ss:$0 sps:$4 sm:$0x11]  }
  0x71   : > { %v568_v47 = vshrl.u32 %v515_v37, 16  ;;  %v571_v18 = vshll.u32 %v515_v37, 16  ;;  %v350_v23 = vmul.f32 %v5326_v41, %v4362_v54  ;;  %v1986_v30 = vsel %vm1532_vm5, %v1984_v20, %v1985_v29 }
  0x72   : > { %2029 = vrot.lane.b32.xlu1 %v1983_v43, %s4941_s9  ;;  %v4772_v43 = vld [vmem:[#allocation2 + $0x2c] ss:$0 sps:$4 sm:$0x11]   ;;  %v2223_v35 = vrot.slane %v2221_v1, 1  ;;  %900 = vst.msk [vmem:[#allocation2 + $0x50] sm:$0x1] %vm884_vm1, %v4036_v6  ;;  %v388_v59 = vadd.f32 %v5385_v22, %v349_v62  ;;  %v4365_v38 = vunpack.c.l.bf16 %v4402_v8  ;;  %v2219_v50 = vor.u32 %v2218_v3, %v2214_v51 }
  0x73   : > { %v1330_v32 = vrot.slane %v1328_v2, 1  ;;  %v570_v25 = vrot.slane %v568_v47, 7  ;;  %v389_v45 = vadd.f32 %v5385_v22, %v350_v23  ;;  %v1326_v54 = vor.u32 %v1325_v63, %v1321_v17  ;;  %v1053_v51 = vld [vmem:[#allocation2 + $0x30] sm:$0xe] }
  0x74   : > { %v1988_v56 = vrot.slane %v4772_v43, 1  ;;  %v5422_v20 = vcombine.low %v1073_v27, %v1074_v14  ;;  %vm420_vm8 = vcmp.ge.f32.partialorder %v388_v59, 0.0  ;;  %v4366_v2 = vunpack.c.h.bf16 %v4402_v8 }
  0x75   : > { %v1012_v48 = vld [vmem:[#allocation2 + $0x48] sm:$0xf]  ;;  %v5419_v53 = vld [vmem:[#allocation2 + $0x4c] sm:$0xf]  ;;  %v573_v1 = vor.u32 %v571_v18, %v570_v25  ;;  %vm421_vm9 = vcmp.ge.f32.partialorder %v389_v45, 0.0  ;;  %v460_v3 = vmul.f32 %v5344_v10, %v389_v45  ;;  %v351_v7 = vmul.f32 %v5326_v41, %v4365_v38 }
  0x76   : > { %2383 = vrot.lane.b32.xlu1 %v2212_v44, %s4941_s9  ;;  %v459_v44 = vmul.f32 %v5344_v10, %v388_v59  ;;  %6750 = vst [vmem:[#allocation15_spill] sm:$0xff] %v5422_v20  ;;  %v5425_v29 = vcombine.low %v1012_v48, %v5419_v53  ;;  %v950_v52 = vld [vmem:[#allocation2 + $0x48] sm:$0xf]  ;;  %v951_v62 = vld [vmem:[#allocation2 + $0x4c] sm:$0xf]  ;;  %v2224_v63 = vsel %vm1259_vm2, %v2219_v50, %v2223_v35  ;;  %v2233_v8 = vshll.u32 %v4776_v34, 16 }
  0x77   : > { %v5428_v37 = vcombine.low %v950_v52, %v951_v62  ;;  %v678_v17 = vsel %vm5051_vm12, 0, %v573_v1  ;;  %v1331_v43 = vsel %vm1259_vm2, %v1326_v54, %v1330_v32  ;;  %v4150_v27 = vcombine.low %v1053_v51, %v5305_v9  ;;  %v4779_v48 = vld [vmem:[#allocation2 + $0x38] ss:$0 sps:$4 sm:$0x11]   ;;  %v5449_v32 = vld [vmem:[%s5004_s28 + $0x48] sm:$0xff]  }
  0x78   : > { %6751 = vst [vmem:[#allocation16_spill] sm:$0xff] %v5425_v29  ;;  %1671 = vrot.lane.b32.xlu0 %v5425_v29, %s4941_s9  ;;  %v491_v6 = vsel %vm420_vm8, %v388_v59, %v459_v44  ;;  %v4037_v47 = vcombine.low %v678_v17, %v678_v17  ;;  %v4038_v18 = vcombine.high %v678_v17, %v678_v17  ;;  %v2226_v59 = vshrl.u32 %v5422_v20, 16  ;;  %v1076_v51 = vld [vmem:[#allocation2 + $0x4c] sm:$0xf] }
  0x79   : > { %6752 = vst [vmem:[#allocation17_spill] sm:$0xff] %v5428_v37  ;;  %v1335_v23 = vshll.u32 %v5428_v37, 16  ;;  %v4771_v14 = vld [vmem:[#allocation2 + $0x50] ss:$0 sps:$4 sm:$0x11]   ;;  %v492_v38 = vsel %vm421_vm9, %v389_v45, %v460_v3  ;;  %v352_v1 = vmul.f32 %v5326_v41, %v4366_v2  ;;  %v2228_v34 = vshll.u32 %v5422_v20, 16 }
  0x7a   : > { %2031 = vrot.lane.b32.xlu1 %v1986_v30, %s4941_s9  ;;  %v1989_v30 = vsel %vm1532_vm5, %v1987_v12, %v1988_v56  ;;  %901 = vst.msk [vmem:[#allocation2 + $0x54] sm:$0xf] %vm881_vm0, %v4037_v47  ;;  %902 = vst.msk [vmem:[#allocation2 + $0x58] sm:$0xf] %vm881_vm0, %v4038_v18  ;;  %v516_v35 = vpack.c.bf16 %v492_v38, %v491_v6  ;;  %v390_v9 = vadd.f32 %v5385_v22, %v351_v7  ;;  %v1075_v2 = vld [vmem:[#allocation2 + $0x48] sm:$0xf] }
  0x7b   : > { %v1333_v12 = vshrl.u32 %v5428_v37, 16  ;;  %v1337_v50 = vrot.slane %v1335_v23, 1  ;;  %v2235_v45 = vrot.slane %v2233_v8, 1  ;;  %v694_v54 = vsel %vm5051_vm12, %v570_v25, 0  ;;  %v1054_v47 = vld [vmem:[#allocation2 + $0x3c] sm:$0xe] }
  0x7c   : > { %1462 = vrot.lane.b32.xlu0 %v1331_v43, %s4941_s9  ;;  %v1340_v56 = vshll.u32 %v4771_v14, 16  ;;  %v575_v44 = vshrl.u32 %v516_v35, 16  ;;  %v578_v52 = vshll.u32 %v516_v35, 16  ;;  %v2230_v62 = vrot.slane %v2228_v34, 1 }
  0x7d   : > { %v4039_v3 = vcombine.low %v694_v54, %v694_v54  ;;  %v1990_v17 = vrot.slane %v4150_v27, 1  ;;  %v391_v7 = vadd.f32 %v5385_v22, %v352_v1  ;;  %v4369_v6 = vunpack.c.l.bf16 %v5449_v32 }
  0x7e   : > { %2385 = vrot.lane.b32.xlu1 %v2224_v63, %s4941_s9  ;;  %v4783_v63 = vld [vmem:[#allocation2 + $0x50] ss:$0 sps:$4 sm:$0x11]   ;;  %v577_v43 = vrot.slane %v575_v44, 7  ;;  %v2231_v8 = vor.u32 %v2230_v62, %v2226_v59  ;;  %vm422_vm10 = vcmp.ge.f32.partialorder %v390_v9, 0.0  ;;  %v461_v25 = vmul.f32 %v5344_v10, %v390_v9 }
  0x7f   : > { %v1338_v18 = vor.u32 %v1337_v50, %v1333_v12  ;;  %903 = vst.msk [vmem:[#allocation2 + $0x5c] sm:$0x1] %vm884_vm1, %v4039_v3  ;;  %v1991_v23 = vrot.slane %v4779_v48, 1  ;;  %vm423_vm11 = vcmp.ge.f32.partialorder %v391_v7, 0.0  ;;  %v462_v27 = vmul.f32 %v5344_v10, %v391_v7 }
  0x80   : > { %v1342_v14 = vrot.slane %v1340_v56, 1  ;;  %v580_v38 = vor.u32 %v578_v52, %v577_v43  ;;  %v2236_v1 = vsel %vm1259_vm2, %v2231_v8, %v2235_v45  ;;  %v493_v35 = vsel %vm422_vm10, %v390_v9, %v461_v25 }
  0x81   : > { %v1014_v34 = vld [vmem:[#allocation2 + $0x54] sm:$0xf]  ;;  %v494_v59 = vsel %vm423_vm11, %v391_v7, %v462_v27  ;;  %v5464_v54 = vcombine.low %v1075_v2, %v1076_v51  ;;  %v2245_v44 = vshll.u32 %v4783_v63, 16  ;;  %v4370_v12 = vunpack.c.h.bf16 %v5449_v32  ;;  %v953_v45 = vld [vmem:[#allocation2 + $0x58] sm:$0xf] }
  0x82   : > { %2033 = vrot.lane.b32.xlu1 %v1989_v30, %s4941_s9  ;;  %v5462_v30 = vld [vmem:[#allocation2 + $0x58] sm:$0xf]  ;;  %v679_v48 = vsel %vm5051_vm12, 0, %v580_v38  ;;  %v952_v56 = vld [vmem:[#allocation2 + $0x54] sm:$0xf]  ;;  %v517_v9 = vpack.c.bf16 %v494_v59, %v493_v35  ;;  %v353_v52 = vmul.f32 %v5326_v41, %v4369_v6  ;;  %v1992_v51 = vsel %vm1532_vm5, %v1990_v17, %v1991_v23 }
  0x83   : > { %6753 = vst [vmem:[#allocation18_spill] sm:$0xff] %v5464_v54  ;;  %v5468_v50 = vcombine.low %v1014_v34, %v5462_v30  ;;  %v4040_v62 = vcombine.low %v679_v48, %v679_v48  ;;  %v4041_v3 = vcombine.high %v679_v48, %v679_v48  ;;  %v5474_v2 = vcombine.low %v952_v56, %v953_v45  ;;  %v4786_v32 = vld [vmem:[#allocation2 + $0x44] ss:$0 sps:$4 sm:$0x11]   ;;  %v1077_v7 = vld [vmem:[#allocation2 + $0x54] sm:$0xf] }
  0x84   : > { %v4151_v63 = vcombine.low %v1054_v47, %v5376_v13  ;;  %v1343_v8 = vsel %vm1259_vm2, %v1338_v18, %v1342_v14  ;;  %v582_v25 = vshrl.u32 %v517_v9, 16  ;;  %v2238_v27 = vshrl.u32 %v5464_v54, 16  ;;  %v1078_v38 = vld [vmem:[#allocation2 + $0x58] sm:$0xf] }
  0x85   : > { %6754 = vst [vmem:[#allocation19_spill] sm:$0xff] %v5474_v2  ;;  %1673 = vrot.lane.b32.xlu0 %v5468_v50, %s4941_s9  ;;  %904 = vst.msk [vmem:[#allocation2 + $0x60] sm:$0xf] %vm881_vm0, %v4040_v62  ;;  %v1345_v6 = vshrl.u32 %v5474_v2, 16  ;;  %v1347_v17 = vshll.u32 %v5474_v2, 16  ;;  %v585_v23 = vshll.u32 %v517_v9, 16  ;;  %v354_v18 = vmul.f32 %v5326_v41, %v4370_v12 }
  0x86   : > { %2387 = vrot.lane.b32.xlu1 %v2236_v1, %s4941_s9  ;;  %905 = vst.msk [vmem:[#allocation2 + $0x64] sm:$0xf] %vm881_vm0, %v4041_v3  ;;  %v2240_v13 = vshll.u32 %v5464_v54, 16  ;;  %v4778_v47 = vld [vmem:[#allocation2 + $0x5c] ss:$0 sps:$4 sm:$0x11]   ;;  %v392_v14 = vadd.f32 %v5385_v22, %v353_v52  ;;  %v5493_v62 = vcombine.low %v1077_v7, %v1078_v38 }
  0x87   : > { %v2247_v1 = vrot.slane %v2245_v44, 1  ;;  %v1349_v35 = vrot.slane %v1347_v17, 1  ;;  %v584_v34 = vrot.slane %v582_v25, 7  ;;  %v695_v48 = vsel %vm5051_vm12, %v577_v43, 0 }
  0x88   : > { %v2242_v59 = vrot.slane %v2240_v13, 1  ;;  %v1352_v56 = vshll.u32 %v4778_v47, 16  ;;  %v4042_v45 = vcombine.low %v695_v48, %v695_v48  ;;  %v1993_v9 = vrot.slane %v4151_v63, 1  ;;  %6755 = vst [vmem:[#allocation20_spill] sm:$0xff] %v5493_v62  ;;  %v4404_v13 = vld [vmem:[%s5004_s28 + $0x50] sm:$0xff]  }
  0x89   : > { %1464 = vrot.lane.b32.xlu0 %v1343_v8, %s4941_s9  ;;  %v587_v3 = vor.u32 %v585_v23, %v584_v34  ;;  %v393_v12 = vadd.f32 %v5385_v22, %v354_v18  ;;  %v4790_v52 = vld [vmem:[#allocation2 + $0x5c] ss:$0 sps:$4 sm:$0x11]   ;;  %v1350_v17 = vor.u32 %v1349_v35, %v1345_v6  ;;  %vm424_vm13 = vcmp.ge.f32.partialorder %v392_v14, 0.0 }
  0x8a   : > { %2035 = vrot.lane.b32.xlu1 %v1992_v51, %s4941_s9  ;;  %v2243_v44 = vor.u32 %v2242_v59, %v2238_v27  ;;  %v1994_v51 = vrot.slane %v4786_v32, 1  ;;  %v1354_v25 = vrot.slane %v1352_v56, 1  ;;  %906 = vst.msk [vmem:[#allocation2 + $0x68] sm:$0x1] %vm884_vm1, %v4042_v45  ;;  %v463_v43 = vmul.f32 %v5344_v10, %v392_v14  ;;  %v1055_v32 = vld [vmem:[#allocation2 + $0x48] sm:$0xe] }
  0x8b   : > { %v680_v8 = vsel %vm5051_vm12, 0, %v587_v3  ;;  %vm425_vm14 = vcmp.ge.f32.partialorder %v393_v12, 0.0  ;;  %v464_v63 = vmul.f32 %v5344_v10, %v393_v12  ;;  %v4373_v56 = vunpack.c.l.bf16 %v4404_v13 }
  0x8c   : > { %v2248_v7 = vsel %vm1259_vm2, %v2243_v44, %v2247_v1  ;;  %v1016_v27 = vld [vmem:[#allocation2 + $0x60] sm:$0xf]  ;;  %v4043_v6 = vcombine.low %v680_v8, %v680_v8  ;;  %v4044_v23 = vcombine.high %v680_v8, %v680_v8  ;;  %v495_v47 = vsel %vm424_vm13, %v392_v14, %v463_v43 }
  0x8d   : > { %v5503_v38 = vld [vmem:[#allocation2 + $0x64] sm:$0xf]  ;;  %v954_v35 = vld [vmem:[#allocation2 + $0x60] sm:$0xf]  ;;  %v1995_v48 = vsel %vm1532_vm5, %v1993_v9, %v1994_v51  ;;  %v496_v1 = vsel %vm425_vm14, %v393_v12, %v464_v63  ;;  %v2252_v44 = vshll.u32 %v5493_v62, 16  ;;  %v4152_v14 = vcombine.low %v1055_v32, %v5419_v53 }
  0x8e   : > { %2389 = vrot.lane.b32.xlu1 %v2248_v7, %s4941_s9  ;;  %v5507_v18 = vcombine.low %v1016_v27, %v5503_v38  ;;  %v955_v59 = vld [vmem:[#allocation2 + $0x64] sm:$0xf]  ;;  %907 = vst.msk [vmem:[#allocation2 + $0x6c] sm:$0xf] %vm881_vm0, %v4043_v6  ;;  %908 = vst.msk [vmem:[#allocation2 + $0x70] sm:$0xf] %vm881_vm0, %v4044_v23  ;;  %v518_v3 = vpack.c.bf16 %v496_v1, %v495_v47  ;;  %v1355_v43 = vsel %vm1259_vm2, %v1350_v17, %v1354_v25 }
  0x8f   : > { %v5512_v45 = vcombine.low %v954_v35, %v955_v59  ;;  %v2257_v8 = vshll.u32 %v4790_v52, 16  ;;  %v696_v9 = vsel %vm5051_vm12, %v584_v34, 0  ;;  %v4793_v51 = vld [vmem:[#allocation2 + $0x50] ss:$0 sps:$4 sm:$0x11]   ;;  %v2250_v27 = vshrl.u32 %v5493_v62, 16 }
  0x90   : > { %1675 = vrot.lane.b32.xlu0 %v5507_v18, %s4941_s9  ;;  %v589_v7 = vshrl.u32 %v518_v3, 16  ;;  %v592_v63 = vshll.u32 %v518_v3, 16  ;;  %v1079_v6 = vld [vmem:[#allocation2 + $0x60] sm:$0xf]  ;;  %v1080_v53 = vld [vmem:[#allocation2 + $0x64] sm:$0xf]  ;;  %v4045_v47 = vcombine.low %v696_v9, %v696_v9  ;;  %v4374_v17 = vunpack.c.h.bf16 %v4404_v13 }
  0x91   : > { %6756 = vst [vmem:[#allocation21_spill] sm:$0xff] %v5512_v45  ;;  %v1359_v12 = vshll.u32 %v5512_v45, 16  ;;  %v4785_v32 = vld [vmem:[#allocation2 + $0x68] ss:$0 sps:$4 sm:$0x11]   ;;  %v1357_v23 = vshrl.u32 %v5512_v45, 16  ;;  %v355_v52 = vmul.f32 %v5326_v41, %v4373_v56 }
  0x92   : > { %2037 = vrot.lane.b32.xlu1 %v1995_v48, %s4941_s9  ;;  %v591_v34 = vrot.slane %v589_v7, 7  ;;  %v2254_v35 = vrot.slane %v2252_v44, 1  ;;  %v1364_v59 = vshll.u32 %v4785_v32, 16  ;;  %v2259_v48 = vrot.slane %v2257_v8, 1  ;;  %909 = vst.msk [vmem:[#allocation2 + $0x74] sm:$0x1] %vm884_vm1, %v4045_v47 }
  0x93   : > { %v1361_v25 = vrot.slane %v1359_v12, 1  ;;  %v356_v1 = vmul.f32 %v5326_v41, %v4374_v17  ;;  %v394_v3 = vadd.f32 %v5385_v22, %v355_v52  ;;  %v1996_v45 = vrot.slane %v4152_v14, 1  ;;  %v5556_v17 = vld [vmem:[#allocation2 + $0x5c] ss:$0 sps:$4 sm:$0x11]  }
  0x94   : > { %1466 = vrot.lane.b32.xlu0 %v1355_v43, %s4941_s9  ;;  %v594_v62 = vor.u32 %v592_v63, %v591_v34  ;;  %v2255_v2 = vor.u32 %v2254_v35, %v2250_v27  ;;  %v1997_v9 = vrot.slane %v4793_v51, 1  ;;  %v5533_v12 = vcombine.low %v1079_v6, %v1080_v53  ;;  %v1056_v51 = vld [vmem:[#allocation2 + $0x54] sm:$0xe]  ;;  %v4797_v6 = vld [vmem:[#allocation2 + $0x68] ss:$0 sps:$4 sm:$0x11]  }
  0x95   : > { %v1018_v13 = vld [vmem:[#allocation2 + $0x6c] sm:$0xf]  ;;  %v5530_v29 = vld [vmem:[#allocation2 + $0x70] sm:$0xf]  ;;  %v1362_v56 = vor.u32 %v1361_v25, %v1357_v23  ;;  %v395_v44 = vadd.f32 %v5385_v22, %v356_v1  ;;  %v1366_v8 = vrot.slane %v1364_v59, 1  ;;  %v465_v14 = vmul.f32 %v5344_v10, %v394_v3  ;;  %6759 = vst [vmem:[#allocation24_spill] sm:$0xff] %v5556_v17 }
  0x96   : > { %6757 = vst [vmem:[#allocation22_spill] sm:$0xff] %v5533_v12  ;;  %v5536_v43 = vcombine.low %v1018_v13, %v5530_v29  ;;  %v681_v41 = vsel %vm5051_vm12, 0, %v594_v62  ;;  %v956_v7 = vld [vmem:[#allocation2 + $0x6c] sm:$0xf]  ;;  %v5540_v63 = vld [vmem:[#allocation2 + $0x70] sm:$0xf]  ;;  %v2260_v23 = vsel %vm1259_vm2, %v2255_v2, %v2259_v48  ;;  %v1998_v62 = vsel %vm1532_vm5, %v1996_v45, %v1997_v9 }
  0x97   : > { %v4046_v27 = vcombine.low %v681_v41, %v681_v41  ;;  %v4047_v32 = vcombine.high %v681_v41, %v681_v41  ;;  %v5545_v22 = vcombine.low %v956_v7, %v5540_v63  ;;  %2391 = vrot.lane.b32.xlu1 %v2260_v23, %s4941_s9  ;;  %vm426_vm15 = vcmp.ge.f32.partialorder %v394_v3, 0.0  ;;  %v1081_v52 = vld [vmem:[#allocation2 + $0x6c] sm:$0xf]  ;;  %v1082_v25 = vld [vmem:[#allocation2 + $0x70] sm:$0xf] }
  0x98   : > { %1677 = vrot.lane.b32.xlu0 %v5536_v43, %s4941_s9  ;;  %v1367_v53 = vsel %vm1259_vm2, %v1362_v56, %v1366_v8  ;;  %vm427_vm4 = vcmp.ge.f32.partialorder %v395_v44, 0.0  ;;  %v466_v47 = vmul.f32 %v5344_v10, %v395_v44  ;;  %v4153_v35 = vcombine.low %v1056_v51, %v5462_v30  ;;  %v5572_v23 = vld [vmem:[#allocation2 + $0x6c] sm:$0xe] }
  0x99   : > { %6758 = vst [vmem:[#allocation23_spill] sm:$0xff] %v5545_v22  ;;  %910 = vst.msk [vmem:[#allocation2 + $0x78] sm:$0xf] %vm881_vm0, %v4046_v27  ;;  %v1371_v2 = vshll.u32 %v5545_v22, 16  ;;  %v1369_v59 = vshrl.u32 %v5545_v22, 16  ;;  %v497_v48 = vsel %vm426_vm15, %v394_v3, %v465_v14  ;;  %v2262_v13 = vshrl.u32 %v5533_v12, 16 }
  0x9a   : > { %911 = vst.msk [vmem:[#allocation2 + $0x7c] sm:$0xf] %vm881_vm0, %v4047_v32  ;;  %v5559_v45 = vld [vmem:[#allocation2 + $0x74] ss:$0 sps:$4 sm:$0x11]   ;;  %v498_v9 = vsel %vm427_vm4, %v395_v44, %v466_v47  ;;  %v2264_v56 = vshll.u32 %v5533_v12, 16  ;;  %v5570_v32 = vcombine.low %v1081_v52, %v1082_v25 }
  0x9b   : > { %v1373_v1 = vrot.slane %v1371_v2, 1  ;;  %v1376_v10 = vshll.u32 %v5559_v45, 16  ;;  %2039 = vrot.lane.b32.xlu1 %v1998_v62, %s4941_s9  ;;  %v519_v8 = vpack.c.bf16 %v498_v9, %v497_v48  ;;  %v2269_v41 = vshll.u32 %v4797_v6, 16  ;;  %v1057_v44 = vld [vmem:[#allocation2 + $0x60] sm:$0xe] }
  0x9c   : > { %1468 = vrot.lane.b32.xlu0 %v1367_v53, %s4941_s9  ;;  %v697_v30 = vsel %vm5051_vm12, %v591_v34, 0  ;;  %v1744_v7 = vshll.u32 %v5097_v58, 16  ;;  %v2266_v3 = vrot.slane %v2264_v56, 1  ;;  %6760 = vst [vmem:[#allocation25_spill] sm:$0xff] %v5570_v32  ;;  %v1999_v62 = vrot.slane %v4153_v35, 1 }
  0x9d   : > { %v4048_v14 = vcombine.low %v697_v30, %v697_v30  ;;  %v596_v51 = vshrl.u32 %v519_v8, 16  ;;  %v2271_v27 = vrot.slane %v2269_v41, 1  ;;  %v599_v53 = vshll.u32 %v519_v8, 16  ;;  %v4808_v47 = vld [vmem:[#allocation2 + $0x74] ss:$0 sps:$4 sm:$0x11]  }
  0x9e   : > { %v2267_v2 = vor.u32 %v2266_v3, %v2262_v13  ;;  %v2000_v6 = vrot.slane %v5556_v17, 1  ;;  %v1374_v56 = vor.u32 %v1373_v1, %v1369_v59  ;;  %v1378_v30 = vrot.slane %v1376_v10, 1  ;;  %v5595_v1 = vld [vmem:[#allocation2 + $0x68] ss:$0 sps:$4 sm:$0x11]  }
  0x9f   : > { %912 = vst.msk [vmem:[#allocation2 + $0x80] sm:$0x1] %vm884_vm1, %v4048_v14  ;;  %v5581_v52 = vrot.slane %v1744_v7, 1  ;;  %v598_v13 = vrot.slane %v596_v51, 7  ;;  %v1888_v14 = vshll.u32 %v5106_v5, 16  ;;  %v4154_v34 = vcombine.low %v1057_v44, %v5503_v38  ;;  %6762 = vst [vmem:[#allocation27_spill] sm:$0xff] %v5595_v1 }
  0xa0   : > { %v1020_v48 = vld [vmem:[#allocation2 + $0x78] sm:$0xf]  ;;  %v2272_v35 = vsel %vm1259_vm2, %v2267_v2, %v2271_v27  ;;  %v986_v10 = vld [vmem:[#allocation2] sm:$0xe]  ;;  %v2001_v51 = vsel %vm1532_vm5, %v1999_v62, %v2000_v6  ;;  %v2274_v27 = vshrl.u32 %v5570_v32, 16  ;;  %v2276_v2 = vshll.u32 %v5570_v32, 16 }
  0xa1   : > { %v5577_v9 = vld [vmem:[#allocation2 + $0x7c] sm:$0xf]  ;;  %v958_v8 = vld [vmem:[#allocation2 + $0x78] sm:$0xf]  ;;  %2393 = vrot.lane.b32.xlu1 %v2272_v35, %s4941_s9  ;;  %v601_v7 = vor.u32 %v599_v53, %v598_v13  ;;  %v4155_v44 = vcombine.low %v5572_v23, %v5530_v29  ;;  %v1379_v35 = vsel %vm1259_vm2, %v1374_v56, %v1378_v30  ;;  %v698_v22 = vsel %vm5051_vm12, %v598_v13, 0 }
  0xa2   : > { %v5584_v25 = vcombine.low %v1020_v48, %v5577_v9  ;;  %v5587_v3 = vld [vmem:[#allocation2 + $0x7c] sm:$0xf]  ;;  %v1083_v48 = vld [vmem:[#allocation2 + $0x78] sm:$0xf]  ;;  %v2278_v62 = vrot.slane %v2276_v2, 1  ;;  %v4051_v6 = vcombine.low %v698_v22, %v698_v22  ;;  %v2002_v30 = vrot.slane %v4154_v34, 1 }
  0xa3   : > { %v5593_v59 = vcombine.low %v958_v8, %v5587_v3  ;;  %v1084_v38 = vld [vmem:[#allocation2 + $0x7c] sm:$0xf]  ;;  %v2281_v8 = vshll.u32 %v4808_v47, 16  ;;  %v1059_v12 = vld [vmem:[#allocation2 + $0x78] sm:$0xe]  ;;  %v682_v53 = vsel %vm5051_vm12, 0, %v601_v7 }
  0xa4   : > { %v5579_v41 = vpop.permute.xlu0 %1661  ;;  %1679 = vrot.lane.b32.xlu0 %v5584_v25, %s4941_s9  ;;  %v5609_v54 = vld [vmem:[#allocation2 + $0x74] ss:$0 sps:$4 sm:$0x11]   ;;  %v4873_v32 = vld [vmem:[#allocation2 + $0x4] sm:$0xf]  ;;  %v4049_v20 = vcombine.low %v682_v53, %v682_v53  ;;  %v4050_v16 = vcombine.high %v682_v53, %v682_v53  ;;  %v5615_v23 = vcombine.low %v1083_v48, %v1084_v38  ;;  %v2279_v56 = vor.u32 %v2278_v62, %v2274_v27 }
  0xa5   : > { %6761 = vst [vmem:[#allocation26_spill] sm:$0xff] %v5593_v59  ;;  %6763 = vst [vmem:[#allocation28_spill] sm:$0xff] %v5609_v54  ;;  %v4099_v37 = vcombine.low %v986_v10, %v4873_v32  ;;  %v1383_v29 = vshll.u32 %v5593_v59, 16  ;;  %2041 = vrot.lane.b32.xlu1 %v2001_v51, %s4941_s9  ;;  %v2283_v22 = vrot.slane %v2281_v8, 1  ;;  %v2003_v32 = vrot.slane %v5595_v1, 1 }
  0xa6   : > { %v5611_v24 = vld [vmem:[#allocation2 + $0x80] ss:$0 sps:$4 sm:$0x11]   ;;  %6765 = vst [vmem:[#allocation30_spill] sm:$0xff] %v5615_v23  ;;  %915 = vst.msk [vmem:[#allocation2 + $0x8c] sm:$0x1] %vm884_vm1, %v4051_v6  ;;  %v4156_v48 = vcombine.low %v1059_v12, %v5577_v9  ;;  %v1453_v6 = vpop.permute.xlu1 %1452 }
  0xa7   : > { %6764 = vst [vmem:[#allocation29_spill] sm:$0xff] %v5611_v24  ;;  %v1087_v13 = vld [vmem:[#allocation2 + $0x90] sm:$0xf]  ;;  %913 = vst.msk [vmem:[#allocation2 + $0x84] sm:$0xf] %vm881_vm0, %v4049_v20  ;;  %v2288_v7 = vshll.u32 %v5615_v23, 16  ;;  %v2284_v38 = vsel %vm1259_vm2, %v2279_v56, %v2283_v22  ;;  %v2004_v12 = vsel %vm1532_vm5, %v2002_v30, %v2003_v32 }
  0xa8   : > { %v5617_v47 = vpop.permute.xlu0 %1685  ;;  %1470 = vrot.lane.b32.xlu0 %v1379_v35, %s4941_s9  ;;  %914 = vst.msk [vmem:[#allocation2 + $0x88] sm:$0xf] %vm881_vm0, %v4050_v16  ;;  %v4819_v10 = vld [vmem:[#allocation2 + $0x80] ss:$0 sps:$4 sm:$0x11]   ;;  %v1388_v27 = vshll.u32 %v5611_v24, 16 }
  0xa9   : > { %v1088_v51 = vld [vmem:[#allocation2 + $0x94] sm:$0xf]  ;;  %v5629_v34 = vld [vmem:[#allocation2 + $0x9c] sm:$0xe]  ;;  %v5631_v35 = vrot.slane %v1888_v14, 1  ;;  %v1381_v16 = vshrl.u32 %v5593_v59, 16  ;;  %2395 = vrot.lane.b32.xlu1 %v2284_v38, %s4941_s9 }
  0xaa   : > { %v5633_v8 = vld [vmem:[#allocation2 + $0xa8] sm:$0xe]  ;;  %v1385_v20 = vrot.slane %v1383_v29, 1  ;;  %v1024_v53 = vld [vmem:[#allocation2 + $0x90] sm:$0xf]  ;;  %v2005_v56 = vrot.slane %v4155_v44, 1  ;;  %v5646_v11 = vcombine.low %v1087_v13, %v1088_v51 }
  0xab   : > { %6766 = vst [vmem:[#allocation31_spill] sm:$0xff] %v5631_v35  ;;  %v5636_v62 = vld [vmem:[#allocation2 + $0x94] sm:$0xf]  ;;  %v5640_v9 = vld [vmem:[#allocation2 + $0x80] ss:$0 sps:$4 sm:$0x11]  }
  0xac   : > { %6767 = vst [vmem:[#allocation32_spill] sm:$0xff] %v5640_v9  ;;  %v2006_v22 = vrot.slane %v5609_v54, 1  ;;  %v1533_v14 = vrot.slane %v4099_v37, 1  ;;  %v4874_v2 = vld [vmem:[#allocation2 + $0x8] ss:$0 sps:$4 sm:$0x11]   ;;  %v5650_v30 = vpop.permute.xlu0 %1663 }
  0xad   : > { %v1534_v35 = vrot.slane %v4874_v2, 1  ;;  %v5643_v5 = vld [vmem:[#allocation2 + $0x90] sm:$0xe]  ;;  %v2286_v29 = vshrl.u32 %v5615_v23, 16  ;;  %v2290_v59 = vrot.slane %v2288_v7, 1  ;;  %v2293_v4 = vshll.u32 %v4819_v10, 16  ;;  %2043 = vrot.lane.b32.xlu1 %v2004_v12, %s4941_s9 }
  0xae   : > { %v5648_v38 = vld [vmem:[#allocation2 + $0x90] sm:$0xe]  ;;  %v1390_v32 = vrot.slane %v1388_v27, 1  ;;  %v2008_v15 = vrot.slane %v4156_v48, 1  ;;  %vm2509_vm6 = vcmask 523264   ;;  %v5656_v2 = vld [vmem:[%s6688_s4 + $0x108] sm:$0xff]   ;;  %v1386_v7 = vor.u32 %v1385_v20, %v1381_v16 }
  0xaf   : > { %v1535_v44 = vsel %vm1532_vm5, %v1533_v14, %v1534_v35  ;;  %v1089_v37 = vld [vmem:[#allocation2 + $0x9c] sm:$0xf]  ;;  %v5658_v10 = vld [vmem:[#allocation2 + $0x8c] ss:$0 sps:$4 sm:$0x11]   ;;  %v2009_v13 = vrot.slane %v5640_v9, 1  ;;  %v2511_v48 = vsel %vm2509_vm6, %v5030_v28, %v1453_v6  ;;  %v5675_v9 = vcombine.low %v1024_v53, %v5636_v62 }
  0xb0   : > { %6768 = vst [vmem:[#allocation33_spill] sm:$0xff] %v5658_v10  ;;  %v2560_v51 = vsel %vm2509_vm6, %v1535_v44, %v5579_v41  ;;  %v5666_v35 = vld [vmem:[#allocation2 + $0xa0] sm:$0xf]  ;;  %v5670_v23 = vld [vmem:[#allocation2 + $0xac] sm:$0xf]  ;;  %v2007_v41 = vsel %vm1532_vm5, %v2005_v56, %v2006_v22  ;;  %v2291_v54 = vor.u32 %v2290_v59, %v2286_v29  ;;  %v2295_v16 = vrot.slane %v2293_v4, 1 }
  0xb1   : > { %v1477_v27 = vpop.permute.xlu1 %1476  ;;  %v1022_v20 = vld [vmem:[#allocation2 + $0x84] sm:$0xf]  ;;  %v1023_v12 = vld [vmem:[#allocation2 + $0x88] sm:$0xf]  ;;  %3102 = vmatprep.mubr.bf16.mxu0 %v2560_v51  ;;  %v5678_v28 = vld [vmem:[#allocation2 + $0xc] sm:$0xe]  ;;  %2045 = vrot.lane.b32.xlu1 %v2007_v41, %s4941_s9 }
  0xb2   : > { %v1060_v60 = vld [vmem:[#allocation2 + $0x84] sm:$0xe]  ;;  %v5680_v6 = vld [vmem:[#allocation2 + $0x9c] sm:$0xe]  ;;  %v5682_v44 = vcombine.low %v1022_v20, %v1023_v12  ;;  %v5684_v26 = vld [vmem:[#allocation2 + $0x88] sm:$0xf]  ;;  %3103 = vmatmul.mubr.bf16.vlgmr.msra.gmra.mrb[0].mxu0 %v2511_v48 }
  0xb3   : > { %v960_v14 = vld [vmem:[#allocation2 + $0x84] sm:$0xf]  ;;  %6770 = vst [vmem:[#allocation35_spill] sm:$0xff] %v5684_v26  ;;  %v2312_v46 = vshll.u32 %v5646_v11, 16  ;;  %v4157_v1 = vcombine.low %v1060_v60, %v1023_v12  ;;  %v5692_v51 = vld [vmem:[#allocation2 + $0x88] sm:$0xf]  ;;  %v1391_v60 = vsel %vm1259_vm2, %v1386_v7, %v1390_v32  ;;  %v2010_v7 = vsel %vm1532_vm5, %v2008_v15, %v2009_v13 }
  0xb4   : > { %6769 = vst [vmem:[#allocation34_spill] sm:$0xff] %v5682_v44  ;;  %v5690_v56 = vcombine.low %v960_v14, %v5684_v26  ;;  %v1085_v22 = vld [vmem:[#allocation2 + $0x84] sm:$0xf]  ;;  %6772 = vst [vmem:[#allocation37_spill] sm:$0xff] %v5692_v51  ;;  %v4877_v20 = vld [vmem:[#allocation2 + $0x94] sm:$0xf]  ;;  %1681 = vrot.lane.b32.xlu0 %v5682_v44, %s4941_s9  ;;  %v1455_v14 = vpop.permute.xlu0 %1454 }
  0xb5   : > { %v4111_v49 = vcombine.low %v5648_v38, %v4877_v20  ;;  %v4878_v4 = vld [vmem:[%s6688_s4 + $0x100] sm:$0xff]   ;;  %v1400_v59 = vshll.u32 %v5658_v10, 16  ;;  %v5704_v29 = vcombine.low %v1085_v22, %v5692_v51  ;;  %v5706_v48 = vld [vmem:[#allocation2 + $0x98] ss:$0 sps:$4 sm:$0x11]   ;;  %v5708_v38 = vcombine.low %v1089_v37, %v1090_v55  ;;  %v4866_v55 = vld [vmem:[%s6688_s4 + $0x110] sm:$0xff]   ;;  %2047 = vrot.lane.b32.xlu1 %v2010_v7, %s4941_s9 }
  0xb6   : > { %6771 = vst [vmem:[#allocation36_spill] sm:$0xff] %v5690_v56  ;;  %4655 = vmatpush3.bf16.msra.mxu0 %v4878_v4  ;;  %v1091_v12 = vld [vmem:[#allocation2 + $0xa8] sm:$0xf]  ;;  %v5710_v20 = vld [vmem:[#allocation2 + $0xac] sm:$0xf]  ;;  %v1393_v53 = vshrl.u32 %v5690_v56, 16  ;;  %v5725_v37 = vsel %vm1259_vm2, %v2291_v54, %v2295_v16  ;;  %v5741_v16 = vsel %vm2509_vm6, %v5101_v0, %v1455_v14 }
  0xb7   : > { %6773 = vst [vmem:[#allocation38_spill] sm:$0xff] %v5704_v29  ;;  %6774 = vst [vmem:[#allocation39_spill] sm:$0xff] %v5710_v20  ;;  %v5712_v4 = vld [vmem:[#allocation2 + $0x18] sm:$0xe]  ;;  %v1395_v32 = vshll.u32 %v5690_v56, 16  ;;  %4656 = vmatprep.subr.bf16.mxu0 %v5656_v2  ;;  %v2547_v56 = vsel %vm2509_vm6, %v5115_v19, %v1477_v27  ;;  %v5731_v44 = vpop.permute.xlu1 %1687  ;;  %v2314_v24 = vrot.slane %v2312_v46, 1 }
  0xb8   : > { %v5718_v22 = vld [vmem:[#allocation2 + $0xa8] sm:$0xe]  ;;  %v5727_v51 = vld [vmem:[#allocation2 + $0x8c] ss:$0 sps:$4 sm:$0x11]   ;;  %v2011_v54 = vrot.slane %v4157_v1, 1  ;;  %1472 = vrot.lane.b32.xlu0 %v1391_v60, %s4941_s9  ;;  %v5749_v1 = vcombine.low %v1091_v12, %v5710_v20 }
  0xb9   : > { %6775 = vst [vmem:[#allocation40_spill] sm:$0xff] %v5727_v51  ;;  %v5733_v15 = vld [vmem:[#allocation2 + $0x98] ss:$0 sps:$4 sm:$0x11]   ;;  %v4879_v13 = vld [vmem:[#allocation2 + $0x10] sm:$0xf] }
  0xba   : > { %6776 = vst [vmem:[#allocation41_spill] sm:$0xff] %v5733_v15  ;;  %v4100_v41 = vcombine.low %v5678_v28, %v4879_v13  ;;  %v4880_v10 = vld [vmem:[#allocation2 + $0xa0] sm:$0xf]  ;;  %v1397_v17 = vrot.slane %v1395_v32, 1  ;;  %4657 = vmatpush3.bf16.msra.mxu0 %v5656_v2  ;;  %v1402_v19 = vrot.slane %v1400_v59, 1  ;;  %v2300_v27 = vshll.u32 %v5704_v29, 16 }
  0xbb   : > { %v4112_v26 = vcombine.low %v5680_v6, %v4880_v10  ;;  %v5737_v36 = vld [vmem:[#allocation2 + $0x8c] ss:$0 sps:$4 sm:$0x11]   ;;  %v1569_v28 = vrot.slane %v4111_v49, 1  ;;  %v4882_v0 = vld [vmem:[#allocation2 + $0x1c] sm:$0xf]  ;;  %4658 = vmatprep.subr.bf16.mxu0 %v4866_v55 }
  0xbc   : > { %v4881_v10 = vld [vmem:[#allocation2 + $0x98] ss:$0 sps:$4 sm:$0x11]   ;;  %v1398_v46 = vor.u32 %v1397_v17, %v1393_v53  ;;  %v2012_v32 = vrot.slane %v5737_v36, 1  ;;  %v4101_v14 = vcombine.low %v5712_v4, %v4882_v0  ;;  %v2305_v60 = vshll.u32 %v5727_v51, 16  ;;  %v4835_v17 = vld [vmem:[%s6688_s4 + $0x80] sm:$0xff]   ;;  %1683 = vrot.lane.b32.xlu0 %v5675_v9, %s4941_s9  ;;  %v1479_v0 = vpop.permute.xlu1 %1478 }
  0xbd   : > { %v1570_v6 = vrot.slane %v4881_v10, 1  ;;  %v4867_v2 = vld [vmem:[%s6688_s4 + $0x118] sm:$0xff]   ;;  %v2317_v49 = vshll.u32 %v5706_v48, 16  ;;  %v4883_v53 = vld [vmem:[#allocation2 + $0xac] sm:$0xf]  ;;  %v2298_v4 = vshrl.u32 %v5704_v29, 16 }
  0xbe   : > { %v4113_v12 = vcombine.low %v5718_v22, %v4883_v53  ;;  %v2013_v7 = vsel %vm1532_vm5, %v2011_v54, %v2012_v32  ;;  %v4836_v48 = vld [vmem:[%s6688_s4 + $0xc8] sm:$0xff]   ;;  %v5769_v10 = vld [vmem:[#allocation2 + $0xa4] ss:$0 sps:$4 sm:$0x11]   ;;  %4659 = vmatpush3.bf16.msra.mxu0 %v4866_v55  ;;  %v1403_v22 = vsel %vm1259_vm2, %v1398_v46, %v1402_v19  ;;  %v2302_v54 = vrot.slane %v2300_v27, 1 }
  0xbf   : > { %v1571_v59 = vsel %vm1532_vm5, %v1569_v28, %v1570_v6  ;;  %v6777_v28 = vcombine.low %v5643_v5, %v5636_v62  ;;  %2049 = vrot.lane.b32.xlu1 %v2013_v7, %s4941_s9  ;;  %v2015_v32 = vrot.slane %v5733_v15, 1  ;;  %v1536_v53 = vrot.slane %v4100_v41, 1  ;;  %v4884_v5 = vld [vmem:[#allocation2 + $0x14] ss:$0 sps:$4 sm:$0x11]   ;;  %4660 = vmatprep.subr.bf16.mxu0 %v4867_v2 }
  0xc0   : > { %v2608_v13 = vsel %vm2509_vm6, %v1571_v59, %v5617_v47  ;;  %v2324_v47 = vshll.u32 %v5708_v38, 16  ;;  %v5780_v59 = vld [vmem:[#allocation2 + $0xa4] ss:$0 sps:$4 sm:$0x11]   ;;  %v1537_v62 = vrot.slane %v4884_v5, 1  ;;  %v1572_v55 = vrot.slane %v4112_v26, 1  ;;  %1474 = vrot.lane.b32.xlu0 %v1403_v22, %s4941_s9 }
  0xc1   : > { %v2014_v6 = vrot.slane %v6777_v28, 1  ;;  %3198 = vmatprep.mubr.bf16.mxu1 %v2608_v13  ;;  %v4885_v28 = vld [vmem:[#allocation2 + $0xa4] ss:$0 sps:$4 sm:$0x11]   ;;  %v2307_v20 = vrot.slane %v2305_v60, 1  ;;  %v6778_v19 = vshrl.u32 %v5646_v11, 16 }
  0xc2   : > { %v1573_v29 = vrot.slane %v4885_v28, 1  ;;  %v2319_v46 = vrot.slane %v2317_v49, 1  ;;  %3199 = vmatmul.mubr.bf16.vlgmr.msra.gmra.mrb[0].mxu1 %v2547_v56  ;;  %v1666_v51 = vpop.permute.xlu0 %1665  ;;  %v5785_v15 = vld [vmem:[#allocation2 + $0xb4] sm:$0xe]  ;;  %v2322_v41 = vshrl.u32 %v5708_v38, 16  ;;  %v1538_v13 = vsel %vm1532_vm5, %v1536_v53, %v1537_v62  ;;  %v4840_v60 = vld [vmem:[%s6688_s4 + $0x88] sm:$0xff]   ;;  %4661 = vmatpush3.bf16.msra.mxu0 %v4867_v2 }
  0xc3   : > { %v2315_v27 = vor.u32 %v2314_v24, %v6778_v19  ;;  %v2016_v7 = vsel %vm1532_vm5, %v2014_v6, %v2015_v32  ;;  %4523 = vmatpush3.bf16.msra.mxu1 %v4835_v17  ;;  %v6779_v24 = vcombine.low %v5629_v34, %v5666_v35  ;;  %v2303_v49 = vor.u32 %v2302_v54, %v2298_v4  ;;  %v4841_v32 = vld [vmem:[%s6688_s4 + $0xd0] sm:$0xff]   ;;  %v5805_v34 = vld [vmem:[#allocation2 + $0xb8] sm:$0xf] }
  0xc4   : > { %v1574_v26 = vsel %vm1532_vm5, %v1572_v55, %v1573_v29  ;;  %4524 = vmatprep.subr.bf16.mxu1 %v4836_v48  ;;  %v2329_v17 = vshll.u32 %v5769_v10, 16  ;;  %v2564_v6 = vsel %vm2509_vm6, %v1538_v13, %v5650_v30  ;;  %v1093_v53 = vld [vmem:[#allocation2 + $0xb4] sm:$0xf]  ;;  %v2326_v35 = vrot.slane %v2324_v47, 1  ;;  %2051 = vrot.lane.b32.xlu1 %v2016_v7, %s4941_s9  ;;  %v4887_v30 = vld [vmem:[#allocation2 + $0xb8] sm:$0xf]  ;;  %v1690_v54 = vpop.permute.xlu1 %1689 }
  0xc5   : > { %v2017_v56 = vrot.slane %v6779_v24, 1  ;;  %v2612_v29 = vsel %vm2509_vm6, %v1574_v26, %v5731_v44  ;;  %3110 = vmatprep.mubr.bf16.mxu0 %v2564_v6  ;;  %v2018_v2 = vrot.slane %v5780_v59, 1  ;;  %v1539_v4 = vrot.slane %v4101_v14, 1  ;;  %v4886_v48 = vld [vmem:[#allocation2 + $0x20] ss:$0 sps:$4 sm:$0x11]   ;;  %2397 = vrot.lane.b32.xlu0 %v5725_v37, %s4941_s9 }
  0xc6   : > { %v1540_v10 = vrot.slane %v4886_v48, 1  ;;  %v4161_v22 = vcombine.low %v5785_v15, %v4887_v30  ;;  %3206 = vmatprep.mubr.bf16.mxu1 %v2612_v29  ;;  %3111 = vmatmul.mubr.bf16.gmra.mrb[4].mxu0 %v5741_v16  ;;  %v2550_v44 = vsel %vm2509_vm6, %v5125_v40, %v1479_v0  ;;  %v1575_v5 = vrot.slane %v4113_v12, 1  ;;  %v4888_v47 = vld [vmem:[#allocation2 + $0xb0] ss:$0 sps:$4 sm:$0x11]   ;;  %v1457_v7 = vpop.permute.xlu0 %1456 }
  0xc7   : > { %v1576_v62 = vrot.slane %v4888_v47, 1  ;;  %v5813_v55 = vld [vmem:[#allocation2 + $0xb0] ss:$0 sps:$4 sm:$0x11]   ;;  %v5816_v28 = vsel %vm1259_vm2, %v2315_v27, %v2319_v46  ;;  %4525 = vmatpush3.bf16.msra.mxu1 %v4840_v60  ;;  %v2019_v16 = vsel %vm1532_vm5, %v2017_v56, %v2018_v2  ;;  %v5826_v12 = vcombine.low %v1093_v53, %v5805_v34  ;;  %v989_v0 = vld [vmem:[#allocation2 + $0x24] sm:$0xe] }
  0xc8   : > { %v4842_v15 = vld [vmem:[%s6688_s4 + $0x90] sm:$0xff]   ;;  %v1541_v40 = vsel %vm1532_vm5, %v1539_v4, %v1540_v10  ;;  %v1754_v19 = vshrl.u32 %v5128_v42, 16  ;;  %v2308_v27 = vsel %vm1259_vm2, %v2303_v49, %v2307_v20  ;;  %4526 = vmatprep.subr.bf16.mxu1 %v4841_v32  ;;  %v4843_v46 = vld [vmem:[%s6688_s4 + $0xd8] sm:$0xff]   ;;  %v1095_v60 = vld [vmem:[#allocation2 + $0xc0] sm:$0xf]  ;;  %v2327_v56 = vor.u32 %v2326_v35, %v2322_v41  ;;  %2053 = vrot.lane.b32.xlu1 %v2019_v16, %s4941_s9 }
  0xc9   : > { %v5821_v14 = vld [vmem:[#allocation2 + $0xb0] ss:$0 sps:$4 sm:$0x11]   ;;  %v2568_v13 = vsel %vm2509_vm6, %v1541_v40, %v1666_v51  ;;  %v1577_v26 = vsel %vm1532_vm5, %v1575_v5, %v1576_v62  ;;  %v5837_v24 = vld [vmem:[#allocation2 + $0xc4] sm:$0xf]  ;;  %v2331_v6 = vrot.slane %v2329_v17, 1  ;;  %v6780_v41 = vcombine.low %v5633_v8, %v5670_v23  ;;  %2399 = vrot.lane.b32.xlu0 %v2308_v27, %s4941_s9  ;;  %v1481_v8 = vpop.permute.xlu1 %1480 }
  0xca   : > { %v2336_v29 = vshll.u32 %v5749_v1, 16  ;;  %3118 = vmatprep.mubr.bf16.mxu0 %v2568_v13  ;;  %v2616_v20 = vsel %vm2509_vm6, %v1577_v26, %v1690_v54  ;;  %v5842_v37 = vld [vmem:[#allocation2 + $0xbc] ss:$0 sps:$4 sm:$0x11]   ;;  %3207 = vmatmul.mubr.bf16.gmra.mrb[4].mxu1 %v2550_v44  ;;  %v2334_v49 = vshrl.u32 %v5749_v1, 16  ;;  %v2021_v32 = vrot.slane %v5813_v55, 1 }
  0xcb   : > { %v4847_v51 = vld [vmem:[%s6688_s4 + $0x98] sm:$0xff]   ;;  %v2020_v17 = vrot.slane %v6780_v41, 1  ;;  %v4889_v53 = vld [vmem:[#allocation2 + $0x28] sm:$0xf]  ;;  %4527 = vmatpush3.bf16.msra.mxu1 %v4842_v15  ;;  %3214 = vmatprep.mubr.bf16.mxu1 %v2616_v20  ;;  %v2517_v2 = vsel %vm2509_vm6, %v5169_v33, %v1457_v7  ;;  %v2348_v48 = vshll.u32 %v5826_v12, 16  ;;  %v703_v23 = vsel %vm5051_vm12, %v5279_v31, 0 }
  0xcc   : > { %v4102_v35 = vcombine.low %v989_v0, %v4889_v53  ;;  %v5854_v4 = vld [vmem:[#allocation2 + $0xbc] ss:$0 sps:$4 sm:$0x11]   ;;  %v4890_v10 = vld [vmem:[#allocation2 + $0x2c] ss:$0 sps:$4 sm:$0x11]   ;;  %4528 = vmatprep.subr.bf16.mxu1 %v4843_v46  ;;  %v4066_v5 = vcombine.low %v703_v23, %v703_v23  ;;  %v5866_v47 = vcombine.low %v1095_v60, %v5837_v24  ;;  %v2553_v13 = vsel %vm2509_vm6, %v5175_v39, %v1481_v8 }
  0xcd   : > { %v1543_v30 = vrot.slane %v4890_v10, 1  ;;  %v4848_v44 = vld [vmem:[%s6688_s4 + $0xe0] sm:$0xff]   ;;  %v2022_v33 = vsel %vm1532_vm5, %v2020_v17, %v2021_v32  ;;  %v2338_v62 = vrot.slane %v2336_v29, 1  ;;  %v2341_v15 = vshll.u32 %v5821_v14, 16  ;;  %v1097_v27 = vld [vmem:[#allocation2 + $0xcc] sm:$0xf]  ;;  %2401 = vrot.lane.b32.xlu0 %v5816_v28, %s4941_s9 }
  0xce   : > { %v1542_v54 = vrot.slane %v4102_v35, 1  ;;  %2055 = vrot.lane.b32.xlu1 %v2022_v33, %s4941_s9  ;;  %v2023_v31 = vrot.slane %v4161_v22, 1  ;;  %v2024_v16 = vrot.slane %v5842_v37, 1  ;;  %v1756_v40 = vshll.u32 %v5128_v42, 16  ;;  %3119 = vmatmul.mubr.bf16.gmra.mrb[8].mxu0 %v2517_v2  ;;  %930 = vst.msk [vmem:[#allocation2 + $0xc8] sm:$0x1] %vm884_vm1, %v4066_v5 }
  0xcf   : > { %v1900_v0 = vshll.u32 %v5164_v21, 16  ;;  %v5874_v46 = vld [vmem:[#allocation2 + $0xd0] sm:$0xf]  ;;  %v1065_v7 = vld [vmem:[#allocation2 + $0xc0] sm:$0xe]  ;;  %4529 = vmatpush3.bf16.msra.mxu1 %v4847_v51  ;;  %v2346_v26 = vshrl.u32 %v5826_v12, 16  ;;  %v2332_v53 = vsel %vm1259_vm2, %v2327_v56, %v2331_v6  ;;  %v2339_v35 = vor.u32 %v2338_v62, %v2334_v49 }
  0xd0   : > { %v4849_v22 = vld [vmem:[%s6688_s4 + $0xa0] sm:$0xff]   ;;  %v2353_v60 = vshll.u32 %v5854_v4, 16  ;;  %v2025_v29 = vsel %vm1532_vm5, %v2023_v31, %v2024_v16  ;;  %4530 = vmatprep.subr.bf16.mxu1 %v4848_v44  ;;  %v4850_v20 = vld [vmem:[%s6688_s4 + $0xe8] sm:$0xff]   ;;  %v2350_v51 = vrot.slane %v2348_v48, 1  ;;  %v1544_v39 = vsel %vm1532_vm5, %v1542_v54, %v1543_v30  ;;  %v4891_v41 = vld [vmem:[#allocation2 + $0xb8] sm:$0xf]  ;;  %v1668_v44 = vpop.permute.xlu0 %1667 }
  0xd1   : > { %v4114_v17 = vcombine.low %v1001_v61, %v4891_v41  ;;  %v2360_v32 = vshll.u32 %v5866_v47, 16  ;;  %v2343_v2 = vrot.slane %v2341_v15, 1  ;;  %v5894_v28 = vcombine.low %v1097_v27, %v5874_v46  ;;  %v4892_v30 = vld [vmem:[#allocation2 + $0xc4] sm:$0xf]  ;;  %v4854_v56 = vld [vmem:[%s6688_s4 + $0xa8] sm:$0xff]   ;;  %v4855_v62 = vld [vmem:[%s6688_s4 + $0xf0] sm:$0xff]   ;;  %2403 = vrot.lane.b32.xlu0 %v2332_v53, %s4941_s9 }
  0xd2   : > { %2057 = vrot.lane.b32.xlu1 %v2025_v29, %s4941_s9  ;;  %v5896_v10 = vrot.slane %v1756_v40, 1  ;;  %v1898_v23 = vshrl.u32 %v5164_v21, 16  ;;  %v5899_v48 = vrot.slane %v1900_v0, 1  ;;  %v4162_v8 = vcombine.low %v1065_v7, %v4892_v30  ;;  %3215 = vmatmul.mubr.bf16.gmra.mrb[8].mxu1 %v2553_v13  ;;  %v4893_v54 = vld [vmem:[#allocation2 + $0xbc] ss:$0 sps:$4 sm:$0x11]  }
  0xd3   : > { %v1816_v6 = vshll.u32 %v5468_v50, 16  ;;  %4531 = vmatpush3.bf16.msra.mxu1 %v4849_v22  ;;  %v2355_v49 = vrot.slane %v2353_v60, 1  ;;  %v2572_v33 = vsel %vm2509_vm6, %v1544_v39, %v1668_v44  ;;  %v1579_v5 = vrot.slane %v4893_v54, 1  ;;  %v990_v15 = vld [vmem:[#allocation2 + $0x30] sm:$0xe] }
  0xd4   : > { %4532 = vmatprep.subr.bf16.mxu1 %v4850_v20  ;;  %v2351_v61 = vor.u32 %v2350_v51, %v2346_v26  ;;  %v1578_v31 = vrot.slane %v4114_v17, 1  ;;  %v2358_v16 = vshrl.u32 %v5866_v47, 16  ;;  %v2362_v40 = vrot.slane %v2360_v32, 1  ;;  %v5911_v0 = vld [vmem:[#allocation2 + $0xd4] ss:$0 sps:$4 sm:$0x11]   ;;  %3126 = vmatprep.mubr.bf16.mxu0 %v2572_v33  ;;  %v1459_v22 = vpop.permute.xlu0 %1458 }
  0xd5   : > { %v2344_v27 = vsel %vm1259_vm2, %v2339_v35, %v2343_v2  ;;  %v5914_v7 = vld [vmem:[#allocation2 + $0xc8] ss:$0 sps:$4 sm:$0x11]   ;;  %v2372_v13 = vshll.u32 %v5894_v28, 16  ;;  %v2026_v29 = vrot.slane %v4162_v8, 1  ;;  %v1828_v20 = vshll.u32 %v5507_v18, 16 }
  0xd6   : > { %v5917_v60 = vld [vmem:[#allocation2 + $0xc8] ss:$0 sps:$4 sm:$0x11]   ;;  %v2520_v26 = vsel %vm2509_vm6, %v5241_v57, %v1459_v22  ;;  %v4857_v51 = vld [vmem:[%s6688_s4 + $0xb0] sm:$0xff]   ;;  %v2365_v39 = vshll.u32 %v5914_v7, 16  ;;  %2405 = vrot.lane.b32.xlu0 %v2344_v27, %s4941_s9  ;;  %v2356_v32 = vsel %vm1259_vm2, %v2351_v61, %v2355_v49  ;;  %v1580_v53 = vsel %vm1532_vm5, %v1578_v31, %v1579_v5  ;;  %v4858_v57 = vld [vmem:[%s6688_s4 + $0xf8] sm:$0xff]  }
  0xd7   : > { %4533 = vmatpush3.bf16.msra.mxu1 %v4854_v56  ;;  %v4894_v41 = vld [vmem:[#allocation2 + $0x34] sm:$0xf]  ;;  %3127 = vmatmul.mubr.bf16.gmra.mrb[12].mxu0 %v2520_v26  ;;  %v2377_v35 = vshll.u32 %v5911_v0, 16  ;;  %v2027_v2 = vrot.slane %v5917_v60, 1  ;;  %v2363_v30 = vor.u32 %v2362_v40, %v2358_v16  ;;  %v2370_v44 = vshrl.u32 %v5894_v28, 16 }
  0xd8   : > { %v4103_v17 = vcombine.low %v990_v15, %v4894_v41  ;;  %4534 = vmatprep.subr.bf16.mxu1 %v4855_v62  ;;  %v2367_v8 = vrot.slane %v2365_v39, 1  ;;  %v2374_v56 = vrot.slane %v2372_v13, 1  ;;  %v1814_v33 = vshrl.u32 %v5468_v50, 16  ;;  %v1692_v5 = vpop.permute.xlu1 %1691  ;;  %v995_v61 = vld [vmem:[#allocation2 + $0x6c] sm:$0xe]  ;;  %v4862_v13 = vld [vmem:[%s6688_s4 + $0xb8] sm:$0xff]  }
  0xd9   : > { %v1818_v49 = vrot.slane %v1816_v6, 1  ;;  %v1840_v54 = vshll.u32 %v5536_v43, 16  ;;  %v2028_v15 = vsel %vm1532_vm5, %v2026_v29, %v2027_v2  ;;  %v1826_v62 = vshrl.u32 %v5507_v18, 16  ;;  %v4895_v16 = vld [vmem:[#allocation2 + $0x38] ss:$0 sps:$4 sm:$0x11]  }
  0xda   : > { %v2620_v31 = vsel %vm2509_vm6, %v1580_v53, %v1692_v5  ;;  %v1545_v27 = vrot.slane %v4103_v17, 1  ;;  %v1546_v40 = vrot.slane %v4895_v16, 1  ;;  %2059 = vrot.lane.b32.xlu1 %v2028_v15, %s4941_s9  ;;  %v996_v50 = vld [vmem:[#allocation2 + $0x78] sm:$0xe]  ;;  %v1830_v6 = vrot.slane %v1828_v20, 1  ;;  %2407 = vrot.lane.b32.xlu0 %v2356_v32, %s4941_s9 }
  0xdb   : > { %4535 = vmatpush3.bf16.msra.mxu1 %v4857_v51  ;;  %v1838_v22 = vshrl.u32 %v5536_v43, 16  ;;  %3222 = vmatprep.mubr.bf16.mxu1 %v2620_v31  ;;  %v4896_v18 = vld [vmem:[#allocation2 + $0x14] ss:$0 sps:$4 sm:$0x11]   ;;  %v2379_v26 = vrot.slane %v2377_v35, 1  ;;  %v2368_v51 = vsel %vm1259_vm2, %v2363_v30, %v2367_v8  ;;  %v2375_v39 = vor.u32 %v2374_v56, %v2370_v44  ;;  %v6783_v8 = vld [vmem:[#allocation29_spill] sm:$0xff] }
  0xdc   : > { %v1749_v29 = vshll.u32 %v4896_v18, 16  ;;  %4536 = vmatprep.subr.bf16.mxu1 %v4858_v57  ;;  %v4108_v41 = vcombine.low %v995_v61, %v5540_v63  ;;  %v1561_v17 = vrot.slane %v5559_v45, 1  ;;  %v1842_v53 = vrot.slane %v1840_v54, 1  ;;  %v1483_v20 = vpop.permute.xlu1 %1482  ;;  %v997_v15 = vld [vmem:[#allocation2 + $0x84] sm:$0xe]  ;;  %v6782_v35 = vld [vmem:[#allocation6_spill] sm:$0xff] }
  0xdd   : > { %v1852_v2 = vshll.u32 %v5584_v25, 16  ;;  %v6781_v43 = vshrl.u32 %v5097_v58, 16  ;;  %v4109_v5 = vcombine.low %v996_v50, %v5587_v3  ;;  %v2556_v57 = vsel %vm2509_vm6, %v6782_v35, %v1483_v20  ;;  %v6784_v54 = vld [vmem:[#allocation24_spill] sm:$0xff]  ;;  %v6785_v31 = vld [vmem:[#allocation35_spill] sm:$0xff]  ;;  %v6787_v50 = vld [vmem:[#allocation34_spill] sm:$0xff] }
  0xde   : > { %v1547_v30 = vsel %vm1532_vm5, %v1545_v27, %v1546_v40  ;;  %v1560_v63 = vrot.slane %v4108_v41, 1  ;;  %v1564_v45 = vrot.slane %v6783_v8, 1  ;;  %3223 = vmatmul.mubr.bf16.gmra.mrb[12].mxu1 %v2556_v57  ;;  %2409 = vrot.lane.b32.xlu0 %v2368_v51, %s4941_s9  ;;  %v1751_v44 = vrot.slane %v1749_v29, 1  ;;  %v6786_v27 = vld [vmem:[#allocation33_spill] sm:$0xff]  ;;  %v991_v51 = vld [vmem:[#allocation2 + $0x3c] sm:$0xe] }
  0xdf   : > { %v1747_v32 = vor.u32 %v5581_v52, %v6781_v43  ;;  %4537 = vmatpush3.bf16.msra.mxu1 %v4862_v13  ;;  %v1563_v56 = vrot.slane %v4109_v5, 1  ;;  %v1819_v58 = vor.u32 %v1818_v49, %v1814_v33  ;;  %v1821_v52 = vshll.u32 %v6784_v54, 16  ;;  %v1670_v49 = vpop.permute.xlu0 %1669  ;;  %v6788_v20 = vld [vmem:[#allocation7_spill] sm:$0xff]  ;;  %v4897_v35 = vld [vmem:[#allocation2 + $0x20] ss:$0 sps:$4 sm:$0x11]  }
  0xe0   : > { %v2380_v3 = vsel %vm1259_vm2, %v2375_v39, %v2379_v26  ;;  %v5962_v61 = vsel %vm1532_vm5, %v1560_v63, %v1561_v17  ;;  %v4110_v16 = vcombine.low %v997_v15, %v6785_v31  ;;  %v1567_v40 = vrot.slane %v6786_v27, 1  ;;  %v2382_v41 = vpop.permute.xlu1 %2381  ;;  %v6789_v43 = vld [vmem:[#allocation27_spill] sm:$0xff]  ;;  %v6790_v54 = vld [vmem:[#allocation4_spill] sm:$0xff] }
  0xe1   : > { %v1850_v13 = vshrl.u32 %v5584_v25, 16  ;;  %v1864_v18 = vshll.u32 %v6787_v50, 16  ;;  %v5969_v29 = vsel %vm1532_vm5, %v1563_v56, %v1564_v45  ;;  %v1823_v33 = vrot.slane %v1821_v52, 1  ;;  %v4898_v45 = vld [vmem:[#allocation2 + $0x40] sm:$0xf] }
  0xe2   : > { %v2687_v26 = vsel %vm2509_vm6, %v6788_v20, %v2382_v41  ;;  %v1566_v39 = vrot.slane %v4110_v16, 1  ;;  %v1831_v17 = vor.u32 %v1830_v6, %v1826_v62  ;;  %v1833_v5 = vshll.u32 %v6789_v43, 16  ;;  %2411 = vrot.lane.b32.xlu0 %v2380_v3, %s4941_s9  ;;  %v6791_v3 = vld [vmem:[#allocation28_spill] sm:$0xff] }
  0xe3   : > { %v2576_v15 = vsel %vm2509_vm6, %v1547_v30, %v1670_v49  ;;  %3263 = vmatprep.mubr.bf16.mxu1 %v2687_v26  ;;  %v1752_v25 = vsel %vm1259_vm2, %v1747_v32, %v1751_v44  ;;  %v1761_v57 = vshll.u32 %v4897_v35, 16  ;;  %v5978_v63 = vsel %vm1259_vm2, %v1819_v58, %v1823_v33  ;;  %v1461_v27 = vpop.permute.xlu0 %1460  ;;  %v6793_v26 = vld [vmem:[#allocation32_spill] sm:$0xff] }
  0xe4   : > { %v1854_v8 = vrot.slane %v1852_v2, 1  ;;  %3134 = vmatprep.mubr.bf16.mxu0 %v2576_v15  ;;  %v4104_v56 = vcombine.low %v991_v51, %v4898_v45  ;;  %v5981_v62 = vsel %vm1532_vm5, %v1566_v39, %v1567_v40  ;;  %v1835_v6 = vrot.slane %v1833_v5, 1  ;;  %v2030_v32 = vpop.permute.xlu1 %2029  ;;  %v6792_v40 = vld [vmem:[#allocation9_spill] sm:$0xff] }
  0xe5   : > { %v1768_v30 = vshll.u32 %v6790_v54, 16  ;;  %v1876_v52 = vshll.u32 %v5675_v9, 16  ;;  %v1843_v44 = vor.u32 %v1842_v53, %v1838_v22  ;;  %v1845_v31 = vshll.u32 %v6791_v3, 16  ;;  %v6794_v5 = vld [vmem:[#allocation5_spill] sm:$0xff] }
  0xe6   : > { %v1862_v16 = vshrl.u32 %v6787_v50, 16  ;;  %v1866_v58 = vrot.slane %v1864_v18, 1  ;;  %v2624_v2 = vsel %vm2509_vm6, %v1752_v25, %v2030_v32  ;;  %v5989_v41 = vsel %vm1259_vm2, %v1831_v17, %v1835_v6  ;;  %v4899_v50 = vld [vmem:[#allocation2 + $0x44] ss:$0 sps:$4 sm:$0x11]  }
  0xe7   : > { %v2523_v51 = vsel %vm2509_vm6, %v6792_v40, %v1461_v27  ;;  %3264 = vmatmul.mubr.bf16.vlgmr.msra.gmra.mrb[16].mxu1 %v2624_v2  ;;  %v1759_v33 = vor.u32 %v5896_v10, %v1754_v19  ;;  %v1763_v22 = vrot.slane %v1761_v57, 1  ;;  %v1847_v53 = vrot.slane %v1845_v31, 1  ;;  %v6795_v19 = vld [vmem:[#allocation10_spill] sm:$0xff]  ;;  %v992_v57 = vld [vmem:[#allocation2 + $0x48] sm:$0xe]  ;;  %v6797_v2 = vld [vmem:[#allocation11_spill] sm:$0xff] }
  0xe8   : > { %3135 = vmatmul.mubr.bf16.gmra.mrb[16].mxu0 %v2523_v51  ;;  %v1548_v49 = vrot.slane %v4104_v56, 1  ;;  %v1549_v18 = vrot.slane %v4899_v50, 1  ;;  %v1855_v20 = vor.u32 %v1854_v8, %v1850_v13  ;;  %v1857_v39 = vshll.u32 %v6793_v26, 16  ;;  %v2384_v25 = vpop.permute.xlu1 %2383  ;;  %v4900_v45 = vld [vmem:[#allocation2 + $0x2c] ss:$0 sps:$4 sm:$0x11]  }
  0xe9   : > { %v1766_v17 = vshrl.u32 %v6790_v54, 16  ;;  %v1770_v43 = vrot.slane %v1768_v30, 1  ;;  %v1912_v15 = vshll.u32 %v6794_v5, 16  ;;  %v6000_v35 = vsel %vm1259_vm2, %v1843_v44, %v1847_v53  ;;  %v6796_v44 = vld [vmem:[#allocation8_spill] sm:$0xff]  ;;  %v4901_v51 = vld [vmem:[#allocation2 + $0x4c] sm:$0xf] }
  0xea   : > { %v1874_v42 = vshrl.u32 %v5675_v9, 16  ;;  %v2690_v10 = vsel %vm2509_vm6, %v6795_v19, %v2384_v25  ;;  %v1773_v56 = vshll.u32 %v4900_v45, 16  ;;  %v1859_v13 = vrot.slane %v1857_v39, 1  ;;  %v6798_v39 = vld [vmem:[#allocation41_spill] sm:$0xff] }
  0xeb   : > { %v1878_v8 = vrot.slane %v1876_v52, 1  ;;  %3271 = vmatprep.mubr.bf16.mxu1 %v2690_v10  ;;  %v1764_v6 = vsel %vm1259_vm2, %v1759_v33, %v1763_v22  ;;  %v1867_v54 = vor.u32 %v1866_v58, %v1862_v16  ;;  %v1869_v30 = vshll.u32 %v5737_v36, 16  ;;  %v1124_v16 = vld [vmem:[#allocation2 + $0x84] sm:$0xe]  ;;  %v1672_v58 = vpop.permute.xlu0 %1671  ;;  %v6799_v45 = vld [vmem:[#allocation37_spill] sm:$0xff] }
  0xec   : > { %v1910_v32 = vshrl.u32 %v6794_v5, 16  ;;  %v1780_v3 = vshll.u32 %v6796_v44, 16  ;;  %v1550_v9 = vsel %vm1532_vm5, %v1548_v49, %v1549_v18  ;;  %v6011_v31 = vsel %vm1259_vm2, %v1855_v20, %v1859_v13  ;;  %v2032_v52 = vpop.permute.xlu1 %2031  ;;  %v4902_v10 = vld [vmem:[#allocation2 + $0x38] ss:$0 sps:$4 sm:$0x11]  }
  0xed   : > { %v6013_v27 = vrot.slane %v1912_v15, 1  ;;  %v1924_v40 = vshll.u32 %v6797_v2, 16  ;;  %v4105_v53 = vcombine.low %v992_v57, %v4901_v51  ;;  %v1871_v33 = vrot.slane %v1869_v30, 1  ;;  %v6800_v30 = vld [vmem:[#allocation40_spill] sm:$0xff]  ;;  %v6804_v51 = vld [vmem:[#allocation31_spill] sm:$0xff] }
  0xee   : > { %v1778_v36 = vshrl.u32 %v6796_v44, 16  ;;  %v2628_v22 = vsel %vm2509_vm6, %v1764_v6, %v2032_v52  ;;  %v1771_v50 = vor.u32 %v1770_v43, %v1766_v17  ;;  %v1775_v26 = vrot.slane %v1773_v56, 1  ;;  %v6802_v52 = vld [vmem:[#allocation3_spill] sm:$0xff] }
  0xef   : > { %v2580_v49 = vsel %vm2509_vm6, %v1550_v9, %v1672_v58  ;;  %3272 = vmatmul.mubr.bf16.gmra.mrb[20].mxu1 %v2628_v22  ;;  %v6020_v18 = vsel %vm1259_vm2, %v1867_v54, %v1871_v33  ;;  %v1879_v20 = vor.u32 %v1878_v8, %v1874_v42  ;;  %v1881_v15 = vshll.u32 %v6798_v39, 16  ;;  %v1463_v9 = vpop.permute.xlu0 %1462  ;;  %v6801_v54 = vld [vmem:[#allocation12_spill] sm:$0xff]  ;;  %v6805_v22 = vld [vmem:[#allocation14_spill] sm:$0xff] }
  0xf0   : > { %v1782_v25 = vrot.slane %v1780_v3, 1  ;;  %v1922_v19 = vshrl.u32 %v6797_v2, 16  ;;  %3142 = vmatprep.mubr.bf16.mxu0 %v2580_v49  ;;  %v1785_v57 = vshll.u32 %v4902_v10, 16  ;;  %v4204_v13 = vcombine.low %v1124_v16, %v6799_v45  ;;  %v2386_v17 = vpop.permute.xlu1 %2385  ;;  %v6035_v39 = vld [vmem:[#allocation2 + $0x54] sm:$0xe] }
  0xf1   : > { %v1926_v6 = vrot.slane %v1924_v40, 1  ;;  %v1551_v43 = vrot.slane %v4105_v53, 1  ;;  %v1883_v56 = vrot.slane %v1881_v15, 1  ;;  %v2489_v44 = vrot.slane %v6800_v30, 1  ;;  %v1127_v10 = vld [vmem:[#allocation2 + $0xa8] sm:$0xe] }
  0xf2   : > { %v2693_v42 = vsel %vm2509_vm6, %v6801_v54, %v2386_v17  ;;  %v2488_v8 = vrot.slane %v4204_v13, 1  ;;  %v6803_v3 = vshrl.u32 %v6802_v52, 16  ;;  %v1893_v58 = vshll.u32 %v5780_v59, 16  ;;  %v4903_v40 = vld [vmem:[#allocation2 + $0x50] ss:$0 sps:$4 sm:$0x11]  }
  0xf3   : > { %v2526_v16 = vsel %vm2509_vm6, %v6805_v22, %v1463_v9  ;;  %v1552_v49 = vrot.slane %v4903_v40, 1  ;;  %3279 = vmatprep.mubr.bf16.mxu1 %v2693_v42  ;;  %v1776_v53 = vsel %vm1259_vm2, %v1771_v50, %v1775_v26  ;;  %v6038_v15 = vsel %vm1259_vm2, %v1879_v20, %v1883_v56  ;;  %v1128_v30 = vld [vmem:[#allocation2 + $0xb4] sm:$0xe]  ;;  %v6806_v9 = vld [vmem:[#allocation13_spill] sm:$0xff]  ;;  %v6807_v56 = vld [vmem:[#allocation39_spill] sm:$0xff] }
  0xf4   : > { %v1891_v33 = vor.u32 %v6804_v51, %v6803_v3  ;;  %3143 = vmatmul.mubr.bf16.gmra.mrb[20].mxu0 %v2526_v16  ;;  %v1783_v45 = vor.u32 %v1782_v25, %v1778_v36  ;;  %v1787_v13 = vrot.slane %v1785_v57, 1  ;;  %v6041_v17 = vsel %vm1532_vm5, %v2488_v8, %v2489_v44  ;;  %v2034_v52 = vpop.permute.xlu1 %2033  ;;  %v4904_v36 = vld [vmem:[#allocation2 + $0x58] sm:$0xf]  ;;  %v1129_v8 = vld [vmem:[#allocation2 + $0xc0] sm:$0xe] }
  0xf5   : > { %v1895_v59 = vrot.slane %v1893_v58, 1  ;;  %v1790_v54 = vshrl.u32 %v6806_v9, 16  ;;  %v1792_v42 = vshll.u32 %v6806_v9, 16  ;;  %v1903_v50 = vor.u32 %v5899_v48, %v1898_v23  ;;  %v4905_v9 = vld [vmem:[#allocation2 + $0x44] ss:$0 sps:$4 sm:$0x11]  }
  0xf6   : > { %v1905_v26 = vshll.u32 %v5813_v55, 16  ;;  %v2632_v20 = vsel %vm2509_vm6, %v1776_v53, %v2034_v52  ;;  %v4106_v25 = vcombine.low %v6035_v39, %v4904_v36  ;;  %v4207_v44 = vcombine.low %v1127_v10, %v6807_v56  ;;  %v1130_v55 = vld [vmem:[#allocation2 + $0xcc] sm:$0xe]  ;;  %v4906_v36 = vld [vmem:[#allocation2 + $0x5c] ss:$0 sps:$4 sm:$0x11]  }
  0xf7   : > { %v6052_v57 = vsel %vm1259_vm2, %v1891_v33, %v1895_v59  ;;  %v1553_v3 = vsel %vm1532_vm5, %v1551_v43, %v1552_v49  ;;  %3280 = vmatmul.mubr.bf16.gmra.mrb[24].mxu1 %v2632_v20  ;;  %v2498_v21 = vrot.slane %v5821_v14, 1  ;;  %v4208_v23 = vcombine.low %v1128_v30, %v5805_v34  ;;  %v6808_v34 = vld [vmem:[#allocation15_spill] sm:$0xff] }
  0xf8   : > { %v1907_v51 = vrot.slane %v1905_v26, 1  ;;  %v1788_v48 = vsel %vm1259_vm2, %v1783_v45, %v1787_v13  ;;  %v2497_v58 = vrot.slane %v4207_v44, 1  ;;  %v2501_v22 = vrot.slane %v5854_v4, 1  ;;  %v2388_v16 = vpop.permute.xlu1 %2387 }
  0xf9   : > { %v1915_v33 = vor.u32 %v6013_v27, %v1910_v32  ;;  %v2500_v43 = vrot.slane %v4208_v23, 1  ;;  %v1917_v49 = vshll.u32 %v5842_v37, 16  ;;  %v4209_v14 = vcombine.low %v1129_v8, %v5837_v24  ;;  %v1674_v32 = vpop.permute.xlu0 %1673 }
  0xfa   : > { %v6064_v40 = vsel %vm1259_vm2, %v1903_v50, %v1907_v51  ;;  %v2696_v53 = vsel %vm2509_vm6, %v6808_v34, %v2388_v16  ;;  %v6071_v39 = vsel %vm1532_vm5, %v2497_v58, %v2498_v21  ;;  %v2504_v4 = vrot.slane %v5914_v7, 1  ;;  %v994_v51 = vld [vmem:[#allocation2 + $0x60] sm:$0xe] }
  0xfb   : > { %v4210_v5 = vcombine.low %v1130_v55, %v5874_v46  ;;  %3287 = vmatprep.mubr.bf16.mxu1 %v2696_v53  ;;  %v6076_v27 = vsel %vm1532_vm5, %v2500_v43, %v2501_v22  ;;  %v1919_v10 = vrot.slane %v1917_v49, 1  ;;  %v2503_v45 = vrot.slane %v4209_v14, 1  ;;  %v6810_v55 = vld [vmem:[#allocation18_spill] sm:$0xff]  ;;  %v6811_v58 = vld [vmem:[#allocation16_spill] sm:$0xff] }
  0xfc   : > { %v2507_v37 = vrot.slane %v5911_v0, 1  ;;  %v2584_v24 = vsel %vm2509_vm6, %v1553_v3, %v1674_v32  ;;  %v1927_v59 = vor.u32 %v1926_v6, %v1922_v19  ;;  %v1929_v30 = vshll.u32 %v5917_v60, 16  ;;  %v2036_v46 = vpop.permute.xlu1 %2035  ;;  %v6809_v60 = vld [vmem:[#allocation17_spill] sm:$0xff] }
  0xfd   : > { %v2506_v13 = vrot.slane %v4210_v5, 1  ;;  %v1794_v7 = vrot.slane %v1792_v42, 1  ;;  %3150 = vmatprep.mubr.bf16.mxu0 %v2584_v24  ;;  %v1797_v52 = vshll.u32 %v4905_v9, 16  ;;  %v6084_v50 = vsel %vm1259_vm2, %v1915_v33, %v1919_v10  ;;  %v1465_v19 = vpop.permute.xlu0 %1464  ;;  %v4907_v33 = vld [vmem:[#allocation2 + $0x64] sm:$0xf]  ;;  %v6812_v24 = vld [vmem:[#allocation19_spill] sm:$0xff] }
  0xfe   : > { %v6087_v26 = vsel %vm1532_vm5, %v2503_v45, %v2504_v4  ;;  %v2636_v0 = vsel %vm2509_vm6, %v1788_v48, %v2036_v46  ;;  %v1931_v2 = vrot.slane %v1929_v30, 1  ;;  %v2529_v6 = vsel %vm2509_vm6, %v6809_v60, %v1465_v19  ;;  %v4908_v5 = vld [vmem:[#allocation2 + $0x68] ss:$0 sps:$4 sm:$0x11]  }
  0xff   : > { %v6091_v20 = vsel %vm1532_vm5, %v2506_v13, %v2507_v37  ;;  %3288 = vmatmul.mubr.bf16.gmra.mrb[28].mxu1 %v2636_v0  ;;  %v1554_v42 = vrot.slane %v4106_v25, 1  ;;  %v1555_v56 = vrot.slane %v4906_v36, 1  ;;  %3151 = vmatmul.mubr.bf16.gmra.mrb[24].mxu0 %v2529_v6  ;;  %v1795_v8 = vor.u32 %v1794_v7, %v1790_v54  ;;  %v4909_v10 = vld [vmem:[#allocation2 + $0x50] ss:$0 sps:$4 sm:$0x11]   ;;  %v6813_v0 = vld [vmem:[#allocation20_spill] sm:$0xff] }
 0x100   : > { %v6096_v44 = vsel %vm1259_vm2, %v1927_v59, %v1931_v2  ;;  %v1799_v3 = vrot.slane %v1797_v52, 1  ;;  %v2390_v21 = vpop.permute.xlu1 %2389  ;;  %v1804_v22 = vshll.u32 %v6811_v58, 16  ;;  %v4107_v16 = vcombine.low %v994_v51, %v4907_v33  ;;  %v6815_v51 = vld [vmem:[#allocation22_spill] sm:$0xff] }
 0x101   : > { %v1556_v23 = vsel %vm1532_vm5, %v1554_v42, %v1555_v56  ;;  %v2699_v48 = vsel %vm2509_vm6, %v6810_v55, %v2390_v21  ;;  %v1802_v54 = vshrl.u32 %v6811_v58, 16  ;;  %v1558_v32 = vrot.slane %v4908_v5, 1  ;;  %v6814_v42 = vld [vmem:[#allocation21_spill] sm:$0xff]  ;;  %v6818_v5 = vld [vmem:[#allocation26_spill] sm:$0xff] }
 0x102   : > { %3295 = vmatprep.mubr.bf16.mxu1 %v2699_v48  ;;  %v1800_v25 = vsel %vm1259_vm2, %v1795_v8, %v1799_v3  ;;  %v1676_v43 = vpop.permute.xlu0 %1675  ;;  %v1806_v53 = vrot.slane %v1804_v22, 1  ;;  %v1557_v4 = vrot.slane %v4107_v16, 1  ;;  %v1809_v45 = vshll.u32 %v4909_v10, 16  ;;  %v6816_v22 = vld [vmem:[#allocation23_spill] sm:$0xff] }
 0x103   : > { %v2588_v49 = vsel %vm2509_vm6, %v1556_v23, %v1676_v43 }
 0x104   : > { %v2038_v14 = vpop.permute.xlu1 %2037  ;;  %3158 = vmatprep.mubr.bf16.mxu0 %v2588_v49  ;;  %v1559_v59 = vsel %vm1532_vm5, %v1557_v4, %v1558_v32  ;;  %v1807_v30 = vor.u32 %v1806_v53, %v1802_v54  ;;  %v1811_v7 = vrot.slane %v1809_v45, 1  ;;  %v4910_v53 = vld [vmem:[#allocation2 + $0x1c] sm:$0xf] }
 0x105   : > { %v2640_v34 = vsel %vm2509_vm6, %v1800_v25, %v2038_v14  ;;  %v6817_v25 = vld [vmem:[#allocation25_spill] sm:$0xff] }
 0x106   : > { %v1467_v37 = vpop.permute.xlu0 %1466  ;;  %v1812_v19 = vsel %vm1259_vm2, %v1807_v30, %v1811_v7 }
 0x107   : > { %3296 = vmatmul.mubr.bf16.gmra.mrb[32].mxu1 %v2640_v34  ;;  %v2532_v13 = vsel %vm2509_vm6, %v6812_v24, %v1467_v37  ;;  %v4911_v37 = vld [vmem:[#allocation2 + $0x20] ss:$0 sps:$4 sm:$0x11]  }
 0x108   : > { %3159 = vmatmul.mubr.bf16.gmra.mrb[28].mxu0 %v2532_v13  ;;  %v2462_v24 = vrot.slane %v4911_v37, 1  ;;  %v1116_v13 = vld [vmem:[#allocation2 + $0x24] sm:$0xe]  ;;  %v1121_v37 = vld [vmem:[#allocation2 + $0x60] sm:$0xe] }
 0x109   : > { %v2392_v9 = vpop.permute.xlu1 %2391 }
 0x10a   : > { %v1678_v46 = vpop.permute.xlu0 %1677  ;;  %v2702_v2 = vsel %vm2509_vm6, %v6813_v0, %v2392_v9  ;;  %v4913_v9 = vld [vmem:[#allocation2 + $0x34] sm:$0xf]  ;;  %v6819_v0 = vld [vmem:[#allocation36_spill] sm:$0xff] }
 0x10b   : > { %v2592_v52 = vsel %vm2509_vm6, %v1559_v59, %v1678_v46  ;;  %3303 = vmatprep.mubr.bf16.mxu1 %v2702_v2  ;;  %v1117_v59 = vld [vmem:[#allocation2 + $0x30] sm:$0xe] }
 0x10c   : > { %3166 = vmatprep.mubr.bf16.mxu0 %v2592_v52  ;;  %v4197_v52 = vcombine.low %v1117_v59, %v4913_v9  ;;  %v4922_v9 = vld [vmem:[#allocation2 + $0x5c] ss:$0 sps:$4 sm:$0x11]  }
 0x10d   : > { %v2040_v6 = vpop.permute.xlu1 %2039 }
 0x10e   : > { %v1469_v60 = vpop.permute.xlu0 %1468  ;;  %v2644_v56 = vsel %vm2509_vm6, %v1812_v19, %v2040_v6 }
 0x10f   : > { %v2535_v36 = vsel %vm2509_vm6, %v6814_v42, %v1469_v60  ;;  %3304 = vmatmul.mubr.bf16.gmra.mrb[36].mxu1 %v2644_v56  ;;  %v4914_v60 = vld [vmem:[#allocation2 + $0x2c] ss:$0 sps:$4 sm:$0x11]   ;;  %v2467_v56 = vrot.slane %v4197_v52, 1 }
 0x110   : > { %3167 = vmatmul.mubr.bf16.gmra.mrb[32].mxu0 %v2535_v36  ;;  %v2465_v6 = vrot.slane %v4914_v60, 1  ;;  %v1122_v60 = vld [vmem:[#allocation2 + $0x6c] sm:$0xe] }
 0x113   : > { %v2394_v8 = vpop.permute.xlu1 %2393 }
 0x114   : > { %v2705_v21 = vsel %vm2509_vm6, %v6815_v51, %v2394_v8  ;;  %v4915_v8 = vld [vmem:[#allocation2 + $0x38] ss:$0 sps:$4 sm:$0x11]   ;;  %v1118_v51 = vld [vmem:[#allocation2 + $0x3c] sm:$0xe] }
 0x115   : > { %3311 = vmatprep.mubr.bf16.mxu1 %v2705_v21  ;;  %v6820_v21 = vld [vmem:[#allocation30_spill] sm:$0xff] }
 0x116   : > { %v1680_v3 = vpop.permute.xlu0 %1679 }
 0x117   : > { %v2596_v23 = vsel %vm2509_vm6, %v5962_v61, %v1680_v3  ;;  %v2042_v55 = vpop.permute.xlu1 %2041  ;;  %v2468_v3 = vrot.slane %v4915_v8, 1 }
 0x118   : > { %3174 = vmatprep.mubr.bf16.mxu0 %v2596_v23  ;;  %v2648_v58 = vsel %vm2509_vm6, %v5978_v63, %v2042_v55  ;;  %v1115_v63 = vld [vmem:[#allocation2 + $0x18] sm:$0xe]  ;;  %v1119_v55 = vld [vmem:[#allocation2 + $0x48] sm:$0xe] }
 0x119   : > { %3312 = vmatmul.mubr.bf16.gmra.mrb[40].mxu1 %v2648_v58  ;;  %v4195_v4 = vcombine.low %v1115_v63, %v4910_v53  ;;  %v4916_v58 = vld [vmem:[#allocation2 + $0x40] sm:$0xf] }
 0x11a   : > { %v1471_v48 = vpop.permute.xlu0 %1470 }
 0x11b   : > { %v2538_v33 = vsel %vm2509_vm6, %v6816_v22, %v1471_v48  ;;  %v2396_v16 = vpop.permute.xlu1 %2395  ;;  %v2461_v45 = vrot.slane %v4195_v4, 1  ;;  %v4198_v22 = vcombine.low %v1118_v51, %v4916_v58  ;;  %v4919_v4 = vld [vmem:[#allocation2 + $0x50] ss:$0 sps:$4 sm:$0x11]  }
 0x11c   : > { %3175 = vmatmul.mubr.bf16.gmra.mrb[36].mxu0 %v2538_v33  ;;  %v2708_v43 = vsel %vm2509_vm6, %v6817_v25, %v2396_v16  ;;  %v2469_v33 = vsel %vm1532_vm5, %v2467_v56, %v2468_v3  ;;  %v4917_v25 = vld [vmem:[#allocation2 + $0x4c] sm:$0xf]  ;;  %v4925_v3 = vld [vmem:[#allocation2 + $0x7c] sm:$0xf] }
 0x11d   : > { %3319 = vmatprep.mubr.bf16.mxu1 %v2708_v43  ;;  %v2463_v46 = vsel %vm1532_vm5, %v2461_v45, %v2462_v24  ;;  %v4199_v43 = vcombine.low %v1119_v55, %v4917_v25  ;;  %v4926_v55 = vld [vmem:[#allocation2 + $0x74] ss:$0 sps:$4 sm:$0x11]   ;;  %v1125_v25 = vld [vmem:[#allocation2 + $0x90] sm:$0xe] }
 0x11f   : > { %v2044_v49 = vpop.permute.xlu1 %2043  ;;  %v2473_v53 = vrot.slane %v4199_v43, 1 }
 0x120   : > { %v2652_v61 = vsel %vm2509_vm6, %v5989_v41, %v2044_v49  ;;  %v6821_v49 = vld [vmem:[#allocation38_spill] sm:$0xff] }
 0x121   : > { %3320 = vmatmul.mubr.bf16.gmra.mrb[44].mxu1 %v2652_v61 }
 0x123   : > { %v2046_v19 = vpop.permute.xlu1 %2045 }
 0x124   : > { %v2656_v36 = vsel %vm2509_vm6, %v6000_v35, %v2046_v19 }
 0x126   : > { %v1682_v14 = vpop.permute.xlu0 %1681 }
 0x127   : > { %v2600_v54 = vsel %vm2509_vm6, %v5969_v29, %v1682_v14  ;;  %v4912_v29 = vld [vmem:[#allocation2 + $0x28] sm:$0xf]  ;;  %v2048_v35 = vpop.permute.xlu1 %2047  ;;  %v2470_v14 = vrot.slane %v4198_v22, 1  ;;  %v4927_v22 = vld [vmem:[#allocation2 + $0x80] ss:$0 sps:$4 sm:$0x11]  }
 0x128   : > { %3182 = vmatprep.mubr.bf16.mxu0 %v2600_v54  ;;  %v4196_v30 = vcombine.low %v1116_v13, %v4912_v29  ;;  %v4918_v54 = vld [vmem:[#allocation2 + $0x44] ss:$0 sps:$4 sm:$0x11]   ;;  %v4920_v13 = vld [vmem:[#allocation2 + $0x58] sm:$0xf] }
 0x129   : > { %v2471_v63 = vrot.slane %v4918_v54, 1  ;;  %v4921_v29 = vld [vmem:[#allocation2 + $0x64] sm:$0xf] }
 0x12a   : > { %v1473_v34 = vpop.permute.xlu0 %1472  ;;  %v2464_v42 = vrot.slane %v4196_v30, 1  ;;  %v4201_v30 = vcombine.low %v1121_v37, %v4921_v29 }
 0x12b   : > { %v2541_v32 = vsel %vm2509_vm6, %v6818_v5, %v1473_v34  ;;  %v2660_v34 = vsel %vm2509_vm6, %v6011_v31, %v2048_v35  ;;  %v2474_v5 = vrot.slane %v4919_v4, 1  ;;  %v2472_v24 = vsel %vm1532_vm5, %v2470_v14, %v2471_v63 }
 0x12c   : > { %3183 = vmatmul.mubr.bf16.gmra.mrb[40].mxu0 %v2541_v32  ;;  %v2466_v48 = vsel %vm1532_vm5, %v2464_v42, %v2465_v6  ;;  %v1120_v32 = vld [vmem:[#allocation2 + $0x54] sm:$0xe]  ;;  %v1123_v42 = vld [vmem:[#allocation2 + $0x78] sm:$0xe] }
 0x12d   : > { %v2475_v59 = vsel %vm1532_vm5, %v2473_v53, %v2474_v5  ;;  %v4203_v51 = vcombine.low %v1123_v42, %v4925_v3  ;;  %v1126_v53 = vld [vmem:[#allocation2 + $0x9c] sm:$0xe]  ;;  %v4930_v5 = vld [vmem:[#allocation2 + $0xa0] sm:$0xf] }
 0x12e   : > { %v1684_v10 = vpop.permute.xlu0 %1683 }
 0x12f   : > { %v2604_v41 = vsel %vm2509_vm6, %v5981_v62, %v1684_v10  ;;  %v2485_v58 = vrot.slane %v4203_v51, 1 }
 0x130   : > { %3190 = vmatprep.mubr.bf16.mxu0 %v2604_v41  ;;  %v4200_v41 = vcombine.low %v1120_v32, %v4920_v13  ;;  %v4206_v32 = vcombine.low %v1126_v53, %v4930_v5 }
 0x131   : > { %v2050_v31 = vpop.permute.xlu1 %2049 }
 0x132   : > { %v1475_v7 = vpop.permute.xlu0 %1474  ;;  %v2664_v52 = vsel %vm2509_vm6, %v6020_v18, %v2050_v31 }
 0x133   : > { %v2544_v2 = vsel %vm2509_vm6, %v6819_v0, %v1475_v7  ;;  %v2479_v0 = vrot.slane %v4201_v30, 1 }
 0x134   : > { %3191 = vmatmul.mubr.bf16.gmra.mrb[44].mxu0 %v2544_v2  ;;  %v4923_v2 = vld [vmem:[#allocation2 + $0x68] ss:$0 sps:$4 sm:$0x11]  }
 0x135   : > { %4662 = vmatprep.mubr.msk.bf16.mxu0 %vm2509_vm6, %v2463_v46  ;;  %v2476_v46 = vrot.slane %v4200_v41, 1  ;;  %v2480_v19 = vrot.slane %v4923_v2, 1 }
 0x137   : > { %v2398_v62 = vpop.permute.xlu0 %2397  ;;  %v2481_v8 = vsel %vm1532_vm5, %v2479_v0, %v2480_v19 }
 0x138   : > { %v2711_v23 = vsel %vm2509_vm6, %v6820_v21, %v2398_v62  ;;  %v2052_v21 = vpop.permute.xlu1 %2051 }
 0x139   : > { %3327 = vmatprep.mubr.bf16.mxu1 %v2711_v23 }
 0x13a   : > { %3328 = vmatmul.mubr.bf16.gmra.mrb[48].mxu1 %v2656_v36  ;;  %v4924_v36 = vld [vmem:[#allocation2 + $0x70] sm:$0xf] }
 0x13b   : > { %v2400_v16 = vpop.permute.xlu0 %2399  ;;  %v4202_v56 = vcombine.low %v1122_v60, %v4924_v36 }
 0x13c   : > { %v2714_v61 = vsel %vm2509_vm6, %v6821_v49, %v2400_v16  ;;  %4663 = vmatmul.mubr.msk.bf16.vlgmr.msra.gmra.mrb[48].mxu0 %vm2509_vm6, %v2466_v48  ;;  %v2668_v48 = vsel %vm2509_vm6, %v6038_v15, %v2052_v21  ;;  %v4928_v49 = vld [vmem:[#allocation2 + $0x94] sm:$0xf]  ;;  %v2054_v14 = vpop.permute.xlu1 %2053 }
 0x13d   : > { %3335 = vmatprep.mubr.bf16.mxu1 %v2714_v61  ;;  %4666 = vmatprep.mubr.msk.bf16.mxu0 %vm2509_vm6, %v2469_v33  ;;  %v2482_v23 = vrot.slane %v4202_v56, 1  ;;  %v2486_v33 = vrot.slane %v4927_v22, 1  ;;  %v4205_v61 = vcombine.low %v1125_v25, %v4928_v49  ;;  %v2672_v15 = vsel %vm2509_vm6, %v6052_v57, %v2054_v14 }
 0x13e   : > { %v2494_v57 = vrot.slane %v4206_v32, 1 }
 0x13f   : > { %v2402_v10 = vpop.permute.xlu0 %2401  ;;  %v2487_v35 = vsel %vm1532_vm5, %v2485_v58, %v2486_v33  ;;  %v2491_v63 = vrot.slane %v4205_v61, 1 }
 0x140   : > { %v2717_v45 = vsel %vm2509_vm6, %v5646_v11, %v2402_v10  ;;  %v2477_v11 = vrot.slane %v4922_v9, 1 }
 0x142   : > { %3336 = vmatmul.mubr.bf16.gmra.mrb[52].mxu1 %v2660_v34  ;;  %v2478_v62 = vsel %vm1532_vm5, %v2476_v46, %v2477_v11 }
 0x143   : > { %3343 = vmatprep.mubr.bf16.mxu1 %v2717_v45  ;;  %v2404_v7 = vpop.permute.xlu0 %2403  ;;  %v2056_v45 = vpop.permute.xlu1 %2055 }
 0x144   : > { %4667 = vmatmul.mubr.msk.bf16.gmra.mrb[52].mxu0 %vm2509_vm6, %v2472_v24  ;;  %v2720_v6 = vsel %vm2509_vm6, %v5708_v38, %v2404_v7  ;;  %v2483_v38 = vrot.slane %v4926_v55, 1  ;;  %v4931_v24 = vld [vmem:[#allocation2 + $0xa4] ss:$0 sps:$4 sm:$0x11]   ;;  %v2676_v41 = vsel %vm2509_vm6, %v6064_v40, %v2056_v45 }
 0x145   : > { %4670 = vmatprep.mubr.msk.bf16.mxu0 %vm2509_vm6, %v2475_v59  ;;  %v2495_v13 = vrot.slane %v4931_v24, 1 }
 0x146   : > { %v2484_v43 = vsel %vm1532_vm5, %v2482_v23, %v2483_v38 }
 0x147   : > { %v2496_v59 = vsel %vm1532_vm5, %v2494_v57, %v2495_v13  ;;  %v2058_v29 = vpop.permute.xlu1 %2057 }
 0x148   : > { %v2406_v18 = vpop.permute.xlu0 %2405  ;;  %v2680_v30 = vsel %vm2509_vm6, %v6084_v50, %v2058_v29 }
 0x149   : > { %v2723_v16 = vsel %vm2509_vm6, %v5749_v1, %v2406_v18  ;;  %v4929_v1 = vld [vmem:[#allocation2 + $0x98] ss:$0 sps:$4 sm:$0x11]  }
 0x14a   : > { %3344 = vmatmul.mubr.bf16.gmra.mrb[56].mxu1 %v2664_v52  ;;  %v2492_v34 = vrot.slane %v4929_v1, 1 }
 0x14b   : > { %3351 = vmatprep.mubr.bf16.mxu1 %v2720_v6 }
 0x14c   : > { %4671 = vmatmul.mubr.msk.bf16.gmra.mrb[56].mxu0 %vm2509_vm6, %v2478_v62  ;;  %v2408_v54 = vpop.permute.xlu0 %2407  ;;  %v2493_v10 = vsel %vm1532_vm5, %v2491_v63, %v2492_v34 }
 0x14d   : > { %4674 = vmatprep.mubr.msk.bf16.mxu0 %vm2509_vm6, %v2481_v8  ;;  %v2726_v4 = vsel %vm2509_vm6, %v5826_v12, %v2408_v54 }
 0x150   : > { %v2410_v37 = vpop.permute.xlu0 %2409 }
 0x151   : > { %v2729_v12 = vsel %vm2509_vm6, %v5866_v47, %v2410_v37  ;;  %v2060_v47 = vpop.permute.xlu1 %2059 }
 0x152   : > { %3352 = vmatmul.mubr.bf16.gmra.mrb[60].mxu1 %v2668_v48  ;;  %v2684_v31 = vsel %vm2509_vm6, %v6096_v44, %v2060_v47 }
 0x153   : > { %3359 = vmatprep.mubr.bf16.mxu1 %v2723_v16 }
 0x154   : > { %4675 = vmatmul.mubr.msk.bf16.gmra.mrb[60].mxu0 %vm2509_vm6, %v2484_v43 }
 0x155   : > { %4678 = vmatprep.mubr.msk.bf16.mxu0 %vm2509_vm6, %v2487_v35 }
 0x15a   : > { %3360 = vmatmul.mubr.bf16.gmra.mrb[64].mxu1 %v2672_v15 }
 0x15b   : > { %3367 = vmatprep.mubr.bf16.mxu1 %v2726_v4 }
 0x15c   : > { %4679 = vmatmul.mubr.msk.bf16.gmra.mrb[64].mxu0 %vm2509_vm6, %v6041_v17  ;;  %v2412_v17 = vpop.permute.xlu0 %2411 }
 0x15d   : > { %4682 = vmatprep.mubr.msk.bf16.mxu0 %vm2509_vm6, %v2493_v10  ;;  %v2732_v40 = vsel %vm2509_vm6, %v5894_v28, %v2412_v17 }
 0x162   : > { %3368 = vmatmul.mubr.bf16.gmra.mrb[68].mxu1 %v2676_v41 }
 0x163   : > { %3375 = vmatprep.mubr.bf16.mxu1 %v2729_v12 }
 0x164   : > { %4683 = vmatmul.mubr.msk.bf16.gmra.mrb[68].mxu0 %vm2509_vm6, %v2496_v59 }
 0x165   : > { %4686 = vmatprep.mubr.msk.bf16.mxu0 %vm2509_vm6, %v6071_v39 }
 0x16a   : > { %3376 = vmatmul.mubr.bf16.gmra.mrb[72].mxu1 %v2680_v30 }
 0x16b   : > { %3383 = vmatprep.mubr.bf16.mxu1 %v2732_v40 }
 0x16c   : > { %4687 = vmatmul.mubr.msk.bf16.gmra.mrb[72].mxu0 %vm2509_vm6, %v6076_v27 }
 0x16d   : > { %4690 = vmatprep.mubr.msk.bf16.mxu0 %vm2509_vm6, %v6087_v26 }
 0x172   : > { %3384 = vmatmul.mubr.bf16.gmra.mrb[76].mxu1 %v2684_v31 }
 0x174   : > { %4691 = vmatmul.mubr.msk.bf16.gmra.mrb[76].mxu0 %vm2509_vm6, %v6091_v20 }
 0x185   : > { %v4426_v39 = vpop.f32.mrb[0].mxu0 }
 0x186   : > { %v4427_v50 = vpop.f32.mrb[1].mxu0 }
 0x187   : > { %v4428_v7 = vadd.f32 %v4427_v50, %v4426_v39  ;;  %v4429_v28 = vpop.f32.mrb[2].mxu0 }
 0x188   : > { %v4430_v46 = vpop.f32.mrb[3].mxu0 }
 0x189   : > { %v4431_v9 = vadd.f32 %v4430_v46, %v4429_v28 }
 0x195   : > { %v4498_v11 = vpop.f32.mrb[0].mxu1 }
 0x196   : > { %v4499_v52 = vpop.f32.mrb[1].mxu1 }
 0x197   : > { %v6200_v0 = vadd.f32 %v4499_v52, %v4498_v11  ;;  %v4501_v27 = vpop.f32.mrb[2].mxu1 }
 0x198   : > { %v4502_v2 = vpop.f32.mrb[3].mxu1 }
 0x199   : > { %v6202_v26 = vadd.f32 %v4502_v2, %v4501_v27  ;;  %v4432_v19 = vpop.f32.mrb[4].mxu0 }
 0x19a   : > { %v4433_v44 = vpop.f32.mrb[5].mxu0 }
 0x19b   : > { %v4434_v60 = vadd.f32 %v4433_v44, %v4432_v19  ;;  %v4435_v6 = vpop.f32.mrb[6].mxu0 }
 0x19c   : > { %v4436_v42 = vpop.f32.mrb[7].mxu0 }
 0x19d   : > { %v4437_v20 = vadd.f32 %v4436_v42, %v4435_v6  ;;  %v4504_v62 = vpop.f32.mrb[4].mxu1 }
 0x19e   : > { %v4505_v36 = vpop.f32.mrb[5].mxu1 }
 0x19f   : > { %v6204_v56 = vadd.f32 %v4505_v36, %v4504_v62  ;;  %v4507_v8 = vpop.f32.mrb[6].mxu1 }
 0x1a0   : > { %v4508_v3 = vpop.f32.mrb[7].mxu1 }
 0x1a1   : > { %v6206_v51 = vadd.f32 %v4508_v3, %v4507_v8  ;;  %v4438_v21 = vpop.f32.mrb[8].mxu0 }
 0x1a2   : > { %v4439_v18 = vpop.f32.mrb[9].mxu0 }
 0x1a3   : > { %v4440_v23 = vadd.f32 %v4439_v18, %v4438_v21  ;;  %v4441_v55 = vpop.f32.mrb[10].mxu0 }
 0x1a4   : > { %v4442_v38 = vpop.f32.mrb[11].mxu0 }
 0x1a5   : > { %v4443_v48 = vadd.f32 %v4442_v38, %v4441_v55  ;;  %v4510_v58 = vpop.f32.mrb[8].mxu1 }
 0x1a6   : > { %v4511_v22 = vpop.f32.mrb[9].mxu1 }
 0x1a7   : > { %v6208_v33 = vadd.f32 %v4511_v22, %v4510_v58  ;;  %v4513_v16 = vpop.f32.mrb[10].mxu1 }
 0x1a8   : > { %v4514_v25 = vpop.f32.mrb[11].mxu1 }
 0x1a9   : > { %v6210_v43 = vadd.f32 %v4514_v25, %v4513_v16 }
 0x1aa   : > { %v4444_v35 = vpop.f32.mrb[12].mxu0 }
 0x1ab   : > { %v4445_v49 = vpop.f32.mrb[13].mxu0 }
 0x1ac   : > { %v4446_v61 = vadd.f32 %v4445_v49, %v4444_v35  ;;  %v4447_v14 = vpop.f32.mrb[14].mxu0 }
 0x1ad   : > { %v4448_v54 = vpop.f32.mrb[15].mxu0 }
 0x1ae   : > { %v4449_v15 = vadd.f32 %v4448_v54, %v4447_v14 }
 0x1b1   : > { %v4516_v63 = vpop.f32.mrb[12].mxu1 }
 0x1b2   : > { %v4517_v1 = vpop.f32.mrb[13].mxu1 }
 0x1b3   : > { %v6212_v34 = vadd.f32 %v4517_v1, %v4516_v63  ;;  %v4519_v53 = vpop.f32.mrb[14].mxu1 }
 0x1b4   : > { %v4520_v4 = vpop.f32.mrb[15].mxu1 }
 0x1b5   : > { %v6214_v5 = vadd.f32 %v4520_v4, %v4519_v53 }
 0x1ba   : > { %v4538_v32 = vpop.f32.mrb[16].mxu1 }
 0x1bb   : > { %v4450_v10 = vpop.f32.mrb[16].mxu0  ;;  %v4539_v45 = vpop.f32.mrb[17].mxu1 }
 0x1bc   : > { %v4451_v37 = vpop.f32.mrb[17].mxu0  ;;  %v4540_v57 = vadd.f32 %v4539_v45, %v4538_v32  ;;  %v4541_v24 = vpop.f32.mrb[18].mxu1 }
 0x1bd   : > { %v4452_v13 = vadd.f32 %v4451_v37, %v4450_v10  ;;  %v4453_v41 = vpop.f32.mrb[18].mxu0  ;;  %v4542_v12 = vpop.f32.mrb[19].mxu1 }
 0x1be   : > { %v4454_v59 = vpop.f32.mrb[19].mxu0  ;;  %v4543_v29 = vadd.f32 %v4542_v12, %v4541_v24  ;;  %v6216_v17 = vadd.f32 %v4540_v57, %v4428_v7 }
 0x1bf   : > { %v4455_v30 = vadd.f32 %v4454_v59, %v4453_v41 }
 0x1c0   : > { %v6218_v40 = vadd.f32 %v4543_v29, %v4431_v9 }
 0x1c2   : > { %v4544_v47 = vpop.f32.mrb[20].mxu1 }
 0x1c3   : > { %v4545_v31 = vpop.f32.mrb[21].mxu1 }
 0x1c4   : > { %v4546_v39 = vadd.f32 %v4545_v31, %v4544_v47  ;;  %v4547_v50 = vpop.f32.mrb[22].mxu1 }
 0x1c5   : > { %v4548_v28 = vpop.f32.mrb[23].mxu1 }
 0x1c6   : > { %v4549_v46 = vadd.f32 %v4548_v28, %v4547_v50  ;;  %v6220_v11 = vadd.f32 %v4546_v39, %v4434_v60 }
 0x1c7   : > { %v4456_v52 = vpop.f32.mrb[20].mxu0 }
 0x1c8   : > { %v4457_v27 = vpop.f32.mrb[21].mxu0  ;;  %v6222_v2 = vadd.f32 %v4549_v46, %v4437_v20 }
 0x1c9   : > { %v4458_v19 = vadd.f32 %v4457_v27, %v4456_v52  ;;  %v4459_v44 = vpop.f32.mrb[22].mxu0 }
 0x1ca   : > { %v4460_v6 = vpop.f32.mrb[23].mxu0  ;;  %v4550_v7 = vpop.f32.mrb[24].mxu1 }
 0x1cb   : > { %v4461_v42 = vadd.f32 %v4460_v6, %v4459_v44  ;;  %v4551_v62 = vpop.f32.mrb[25].mxu1 }
 0x1cc   : > { %v4552_v9 = vadd.f32 %v4551_v62, %v4550_v7  ;;  %v4553_v36 = vpop.f32.mrb[26].mxu1 }
 0x1cd   : > { %v4554_v8 = vpop.f32.mrb[27].mxu1 }
 0x1ce   : > { %v4555_v3 = vadd.f32 %v4554_v8, %v4553_v36  ;;  %v6224_v21 = vadd.f32 %v4552_v9, %v4440_v23 }
 0x1d0   : > { %v6226_v18 = vadd.f32 %v4555_v3, %v4443_v48 }
 0x1d2   : > { %v4556_v60 = vpop.f32.mrb[28].mxu1  ;;  %v4462_v38 = vpop.f32.mrb[24].mxu0 }
 0x1d3   : > { %v4557_v55 = vpop.f32.mrb[29].mxu1  ;;  %v4463_v22 = vpop.f32.mrb[25].mxu0 }
 0x1d4   : > { %v4558_v58 = vadd.f32 %v4557_v55, %v4556_v60  ;;  %v4559_v20 = vpop.f32.mrb[30].mxu1  ;;  %v4464_v25 = vadd.f32 %v4463_v22, %v4462_v38  ;;  %v4465_v35 = vpop.f32.mrb[26].mxu0 }
 0x1d5   : > { %v4560_v16 = vpop.f32.mrb[31].mxu1  ;;  %v4466_v54 = vpop.f32.mrb[27].mxu0 }
 0x1d6   : > { %v4561_v49 = vadd.f32 %v4560_v16, %v4559_v20  ;;  %v6228_v14 = vadd.f32 %v4558_v58, %v4446_v61  ;;  %v4467_v63 = vadd.f32 %v4466_v54, %v4465_v35 }
 0x1d8   : > { %v6230_v1 = vadd.f32 %v4561_v49, %v4449_v15 }
 0x1da   : > { %v4562_v23 = vpop.f32.mrb[32].mxu1 }
 0x1db   : > { %v4563_v53 = vpop.f32.mrb[33].mxu1  ;;  %v4468_v32 = vpop.f32.mrb[28].mxu0 }
 0x1dc   : > { %v4564_v48 = vadd.f32 %v4563_v53, %v4562_v23  ;;  %v4565_v4 = vpop.f32.mrb[34].mxu1  ;;  %v4469_v45 = vpop.f32.mrb[29].mxu0 }
 0x1dd   : > { %v4566_v10 = vpop.f32.mrb[35].mxu1  ;;  %v4470_v24 = vadd.f32 %v4469_v45, %v4468_v32  ;;  %v4471_v41 = vpop.f32.mrb[30].mxu0 }
 0x1de   : > { %v4567_v37 = vadd.f32 %v4566_v10, %v4565_v4  ;;  %v6232_v57 = vadd.f32 %v4564_v48, %v4452_v13  ;;  %v4472_v12 = vpop.f32.mrb[31].mxu0 }
 0x1df   : > { %v4473_v61 = vadd.f32 %v4472_v12, %v4471_v41 }
 0x1e0   : > { %v6234_v59 = vadd.f32 %v4567_v37, %v4455_v30 }
 0x1e2   : > { %v4568_v47 = vpop.f32.mrb[36].mxu1 }
 0x1e3   : > { %v4474_v29 = vpop.f32.mrb[32].mxu0  ;;  %v4569_v31 = vpop.f32.mrb[37].mxu1 }
 0x1e4   : > { %v4475_v15 = vpop.f32.mrb[33].mxu0  ;;  %v4570_v28 = vadd.f32 %v4569_v31, %v4568_v47  ;;  %v4571_v46 = vpop.f32.mrb[38].mxu1 }
 0x1e5   : > { %v4476_v39 = vadd.f32 %v4475_v15, %v4474_v29  ;;  %v4477_v50 = vpop.f32.mrb[34].mxu0  ;;  %v4572_v27 = vpop.f32.mrb[39].mxu1 }
 0x1e6   : > { %v4478_v52 = vpop.f32.mrb[35].mxu0  ;;  %v4573_v6 = vadd.f32 %v4572_v27, %v4571_v46  ;;  %v6236_v13 = vadd.f32 %v4570_v28, %v4458_v19 }
 0x1e7   : > { %v4479_v44 = vadd.f32 %v4478_v52, %v4477_v50 }
 0x1e8   : > { %v6238_v7 = vadd.f32 %v4573_v6, %v4461_v42 }
 0x1ec   : > { %v4574_v62 = vpop.f32.mrb[40].mxu1 }
 0x1ed   : > { %v4575_v9 = vpop.f32.mrb[41].mxu1 }
 0x1ee   : > { %v4576_v8 = vadd.f32 %v4575_v9, %v4574_v62  ;;  %v4577_v3 = vpop.f32.mrb[42].mxu1 }
 0x1ef   : > { %v4480_v30 = vpop.f32.mrb[36].mxu0  ;;  %v4578_v38 = vpop.f32.mrb[43].mxu1 }
 0x1f0   : > { %v4481_v36 = vpop.f32.mrb[37].mxu0  ;;  %v4579_v20 = vadd.f32 %v4578_v38, %v4577_v3  ;;  %v6242_v22 = vadd.f32 %v4576_v8, %v4464_v25 }
 0x1f1   : > { %v6240_v60 = vadd.f32 %v4481_v36, %v4480_v30  ;;  %v4483_v55 = vpop.f32.mrb[38].mxu0 }
 0x1f2   : > { %v4484_v58 = vpop.f32.mrb[39].mxu0  ;;  %v6246_v19 = vadd.f32 %v4579_v20, %v4467_v63 }
 0x1f3   : > { %v6244_v16 = vadd.f32 %v4484_v58, %v4483_v55 }
 0x1f4   : > { %v4580_v42 = vpop.f32.mrb[44].mxu1 }
 0x1f5   : > { %v4581_v35 = vpop.f32.mrb[45].mxu1 }
 0x1f6   : > { %v4582_v49 = vadd.f32 %v4581_v35, %v4580_v42  ;;  %v4583_v54 = vpop.f32.mrb[46].mxu1 }
 0x1f7   : > { %v4584_v23 = vpop.f32.mrb[47].mxu1 }
 0x1f8   : > { %v4585_v53 = vadd.f32 %v4584_v23, %v4583_v54  ;;  %v6248_v48 = vadd.f32 %v4582_v49, %v4470_v24 }
 0x1fa   : > { %v6250_v4 = vadd.f32 %v4585_v53, %v4473_v61 }
 0x1ff   : > { %v4486_v32 = vpop.f32.mrb[40].mxu0 }
 0x200   : > { %v4487_v10 = vpop.f32.mrb[41].mxu0 }
 0x201   : > { %v6252_v45 = vadd.f32 %v4487_v10, %v4486_v32  ;;  %v4489_v25 = vpop.f32.mrb[42].mxu0 }
 0x202   : > { %v4490_v37 = vpop.f32.mrb[43].mxu0 }
 0x203   : > { %v6254_v41 = vadd.f32 %v4490_v37, %v4489_v25 }
 0x207   : > { %v4492_v63 = vpop.f32.mrb[44].mxu0 }
 0x208   : > { %v4493_v12 = vpop.f32.mrb[45].mxu0 }
 0x209   : > { %v6256_v29 = vadd.f32 %v4493_v12, %v4492_v63  ;;  %v4495_v47 = vpop.f32.mrb[46].mxu0 }
 0x20a   : > { %v4496_v15 = vpop.f32.mrb[47].mxu0 }
 0x20b   : > { %v6258_v31 = vadd.f32 %v4496_v15, %v4495_v47 }
 0x20d   : > { %v4586_v24 = vpop.f32.mrb[48].mxu1 }
 0x20e   : > { %v4587_v61 = vpop.f32.mrb[49].mxu1 }
 0x20f   : > { %v4588_v50 = vadd.f32 %v4587_v61, %v4586_v24  ;;  %v4589_v28 = vpop.f32.mrb[50].mxu1  ;;  %v4664_v46 = vpop.f32.mrb[48].mxu0 }
 0x210   : > { %v4590_v52 = vpop.f32.mrb[51].mxu1  ;;  %v6261_v27 = vadd.f32 %v4664_v46, %v6220_v11  ;;  %v3426_v6 = vpop.f32.mrb[49].mxu0 }
 0x211   : > { %v4591_v62 = vadd.f32 %v4590_v52, %v4589_v28  ;;  %v6263_v30 = vadd.f32 %v4588_v50, %v4476_v39  ;;  %v6273_v9 = vadd.f32 %v3426_v6, %v6216_v17  ;;  %v4665_v36 = vpop.f32.mrb[50].mxu0 }
 0x212   : > { %v4301_v11 = vpack.c.bf16 %v6261_v27, %v6261_v27  ;;  %v6278_v8 = vadd.f32 %v4665_v36, %v6222_v2  ;;  %v3429_v39 = vpop.f32.mrb[51].mxu0  ;;  %v3716_v54 = vsel %vm2509_vm6, %v6261_v27, 0.0 }
 0x213   : > { %v6280_v3 = vadd.f32 %v4591_v62, %v4479_v44  ;;  %v4299_v55 = vpack.c.bf16 %v6273_v9, %v6273_v9  ;;  %v6285_v38 = vadd.f32 %v3429_v39, %v6218_v40  ;;  %v3713_v2 = vsel %vm2509_vm6, %v6273_v9, 0.0 }
 0x214   : > { %3683 = vst.msk [vmem:[%s6270_s13 + $0x8] sm:$0xf] %vm881_vm0, %v4301_v11  ;;  %v4302_v17 = vpack.c.bf16 %v6278_v8, %v6278_v8  ;;  %v3718_v12 = vsel %vm2509_vm6, %v6278_v8, 0.0 }
 0x215   : > { %v4592_v58 = vpop.f32.mrb[52].mxu1  ;;  %3681 = vst.msk [vmem:[%s6270_s13] sm:$0xf] %vm881_vm0, %v4299_v55  ;;  %v4300_v44 = vpack.c.bf16 %v6285_v38, %v6285_v38  ;;  %v3714_v20 = vsel %vm2509_vm6, %v6285_v38, 0.0 }
 0x216   : > { %v4593_v42 = vpop.f32.mrb[53].mxu1  ;;  %3684 = vst.msk [vmem:[%s6270_s13 + $0xc] sm:$0xf] %vm881_vm0, %v4302_v17  ;;  %v3715_v40 = vadd.f32 %v3714_v20, %v3713_v2 }
 0x217   : > { %v4594_v35 = vadd.f32 %v4593_v42, %v4592_v58  ;;  %v4595_v49 = vpop.f32.mrb[54].mxu1  ;;  %3682 = vst.msk [vmem:[%s6270_s13 + $0x4] sm:$0xf] %vm881_vm0, %v4300_v44  ;;  %v4668_v23 = vpop.f32.mrb[52].mxu0 }
 0x218   : > { %v4596_v53 = vpop.f32.mrb[55].mxu1  ;;  %v3717_v32 = vadd.f32 %v3716_v54, %v3715_v40  ;;  %v6306_v10 = vadd.f32 %v4668_v23, %v6228_v14  ;;  %v3442_v25 = vpop.f32.mrb[53].mxu0 }
 0x219   : > { %v4597_v37 = vadd.f32 %v4596_v53, %v4595_v49  ;;  %v6309_v63 = vadd.f32 %v4594_v35, %v6240_v60  ;;  %v6314_v47 = vadd.f32 %v3442_v25, %v6224_v21  ;;  %v4669_v15 = vpop.f32.mrb[54].mxu0 }
 0x21a   : > { %v4305_v24 = vpack.c.bf16 %v6306_v10, %v6306_v10  ;;  %v3719_v61 = vadd.f32 %v3718_v12, %v3717_v32  ;;  %v6319_v14 = vadd.f32 %v4669_v15, %v6230_v1  ;;  %v3445_v50 = vpop.f32.mrb[55].mxu0  ;;  %v3724_v55 = vsel %vm2509_vm6, %v6306_v10, 0.0 }
 0x21b   : > { %v4303_v60 = vpack.c.bf16 %v6314_v47, %v6314_v47  ;;  %v3720_v28 = vsel %vm2509_vm6, %v6314_v47, 0.0  ;;  %v6326_v21 = vadd.f32 %v3445_v50, %v6226_v18  ;;  %v6329_v46 = vadd.f32 %v4597_v37, %v6244_v16 }
 0x21c   : > { %3687 = vst.msk [vmem:[%s6270_s13 + $0x18] sm:$0xf] %vm881_vm0, %v4305_v24  ;;  %v3721_v52 = vadd.f32 %v3720_v28, %v3719_v61  ;;  %v4306_v1 = vpack.c.bf16 %v6319_v14, %v6319_v14  ;;  %v3726_v35 = vsel %vm2509_vm6, %v6319_v14, 0.0 }
 0x21d   : > { %v4598_v6 = vpop.f32.mrb[56].mxu1  ;;  %3685 = vst.msk [vmem:[%s6270_s13 + $0x10] sm:$0xf] %vm881_vm0, %v4303_v60  ;;  %v4304_v62 = vpack.c.bf16 %v6326_v21, %v6326_v21  ;;  %v3722_v36 = vsel %vm2509_vm6, %v6326_v21, 0.0 }
 0x21e   : > { %v4599_v18 = vpop.f32.mrb[57].mxu1  ;;  %3688 = vst.msk [vmem:[%s6270_s13 + $0x1c] sm:$0xf] %vm881_vm0, %v4306_v1  ;;  %v3723_v16 = vadd.f32 %v3722_v36, %v3721_v52 }
 0x21f   : > { %v4600_v11 = vadd.f32 %v4599_v18, %v4598_v6  ;;  %v4601_v39 = vpop.f32.mrb[58].mxu1  ;;  %3686 = vst.msk [vmem:[%s6270_s13 + $0x14] sm:$0xf] %vm881_vm0, %v4304_v62  ;;  %v4672_v17 = vpop.f32.mrb[56].mxu0 }
 0x220   : > { %v4602_v58 = vpop.f32.mrb[59].mxu1  ;;  %v3725_v2 = vadd.f32 %v3724_v55, %v3723_v16  ;;  %v6348_v44 = vadd.f32 %v4672_v17, %v6236_v13  ;;  %v3458_v20 = vpop.f32.mrb[57].mxu0 }
 0x221   : > { %v4603_v42 = vadd.f32 %v4602_v58, %v4601_v39  ;;  %v6351_v40 = vadd.f32 %v4600_v11, %v6252_v45  ;;  %v6356_v49 = vadd.f32 %v3458_v20, %v6232_v57  ;;  %v4673_v54 = vpop.f32.mrb[58].mxu0 }
 0x222   : > { %v4309_v23 = vpack.c.bf16 %v6348_v44, %v6348_v44  ;;  %v3727_v53 = vadd.f32 %v3726_v35, %v3725_v2  ;;  %v6361_v13 = vadd.f32 %v4673_v54, %v6238_v7  ;;  %v3461_v32 = vpop.f32.mrb[59].mxu0  ;;  %v3732_v28 = vsel %vm2509_vm6, %v6348_v44, 0.0 }
 0x223   : > { %v4307_v45 = vpack.c.bf16 %v6356_v49, %v6356_v49  ;;  %v3728_v25 = vsel %vm2509_vm6, %v6356_v49, 0.0  ;;  %v6368_v57 = vadd.f32 %v3461_v32, %v6234_v59  ;;  %v6371_v37 = vadd.f32 %v4603_v42, %v6254_v41 }
 0x224   : > { %3691 = vst.msk [vmem:[%s6270_s13 + $0x28] sm:$0xf] %vm881_vm0, %v4309_v23  ;;  %v3729_v12 = vadd.f32 %v3728_v25, %v3727_v53  ;;  %v4310_v7 = vpack.c.bf16 %v6361_v13, %v6361_v13  ;;  %v3734_v11 = vsel %vm2509_vm6, %v6361_v13, 0.0 }
 0x225   : > { %v4604_v15 = vpop.f32.mrb[60].mxu1  ;;  %3689 = vst.msk [vmem:[%s6270_s13 + $0x20] sm:$0xf] %vm881_vm0, %v4307_v45  ;;  %v4308_v24 = vpack.c.bf16 %v6368_v57, %v6368_v57  ;;  %v3730_v61 = vsel %vm2509_vm6, %v6368_v57, 0.0 }
 0x226   : > { %v4605_v59 = vpop.f32.mrb[61].mxu1  ;;  %3692 = vst.msk [vmem:[%s6270_s13 + $0x2c] sm:$0xf] %vm881_vm0, %v4310_v7  ;;  %v3731_v41 = vadd.f32 %v3730_v61, %v3729_v12 }
 0x227   : > { %v4606_v50 = vadd.f32 %v4605_v59, %v4604_v15  ;;  %v4607_v60 = vpop.f32.mrb[62].mxu1  ;;  %3690 = vst.msk [vmem:[%s6270_s13 + $0x24] sm:$0xf] %vm881_vm0, %v4308_v24  ;;  %v4676_v52 = vpop.f32.mrb[60].mxu0 }
 0x228   : > { %v4608_v1 = vpop.f32.mrb[63].mxu1  ;;  %v3733_v6 = vadd.f32 %v3732_v28, %v3731_v41  ;;  %v6390_v62 = vadd.f32 %v4676_v52, %v6248_v48  ;;  %v3474_v36 = vpop.f32.mrb[61].mxu0 }
 0x229   : > { %v4609_v18 = vadd.f32 %v4608_v1, %v4607_v60  ;;  %v3354_v16 = vadd.f32 %v4606_v50, %v6256_v29  ;;  %v6396_v39 = vadd.f32 %v3474_v36, %v6242_v22  ;;  %v4677_v55 = vpop.f32.mrb[62].mxu0 }
 0x22a   : > { %v4313_v17 = vpack.c.bf16 %v6390_v62, %v6390_v62  ;;  %v3735_v58 = vadd.f32 %v3734_v11, %v3733_v6  ;;  %v6401_v48 = vadd.f32 %v4677_v55, %v6250_v4  ;;  %v3477_v2 = vpop.f32.mrb[63].mxu0  ;;  %v3740_v25 = vsel %vm2509_vm6, %v6390_v62, 0.0 }
 0x22b   : > { %v4311_v29 = vpack.c.bf16 %v6396_v39, %v6396_v39  ;;  %v3736_v20 = vsel %vm2509_vm6, %v6396_v39, 0.0  ;;  %v6408_v22 = vadd.f32 %v3477_v2, %v6246_v19  ;;  %v3357_v42 = vadd.f32 %v4609_v18, %v6258_v31 }
 0x22c   : > { %3695 = vst.msk [vmem:[%s6270_s13 + $0x38] sm:$0xf] %vm881_vm0, %v4313_v17  ;;  %v3737_v35 = vadd.f32 %v3736_v20, %v3735_v58  ;;  %v4314_v4 = vpack.c.bf16 %v6401_v48, %v6401_v48  ;;  %v3742_v50 = vsel %vm2509_vm6, %v6401_v48, 0.0 }
 0x22d   : > { %v4610_v54 = vpop.f32.mrb[64].mxu1  ;;  %3693 = vst.msk [vmem:[%s6270_s13 + $0x30] sm:$0xf] %vm881_vm0, %v4311_v29  ;;  %v4312_v23 = vpack.c.bf16 %v6408_v22, %v6408_v22  ;;  %v3738_v53 = vsel %vm2509_vm6, %v6408_v22, 0.0 }
 0x22e   : > { %v4611_v32 = vpop.f32.mrb[65].mxu1  ;;  %3696 = vst.msk [vmem:[%s6270_s13 + $0x3c] sm:$0xf] %vm881_vm0, %v4314_v4  ;;  %v3739_v19 = vadd.f32 %v3738_v53, %v3737_v35 }
 0x22f   : > { %v4612_v31 = vadd.f32 %v4611_v32, %v4610_v54  ;;  %v4613_v45 = vpop.f32.mrb[66].mxu1  ;;  %3694 = vst.msk [vmem:[%s6270_s13 + $0x34] sm:$0xf] %vm881_vm0, %v4312_v23  ;;  %v4680_v12 = vpop.f32.mrb[64].mxu0 }
 0x230   : > { %v4614_v7 = vpop.f32.mrb[67].mxu1  ;;  %v3741_v15 = vadd.f32 %v3740_v25, %v3739_v19  ;;  %v6428_v24 = vadd.f32 %v4680_v12, %v6309_v63  ;;  %v3490_v61 = vpop.f32.mrb[65].mxu0 }
 0x231   : > { %v4615_v59 = vadd.f32 %v4614_v7, %v4613_v45  ;;  %v6431_v41 = vadd.f32 %v4612_v31, %v6200_v0  ;;  %v6436_v60 = vadd.f32 %v3490_v61, %v6263_v30  ;;  %v4681_v28 = vpop.f32.mrb[66].mxu0 }
 0x232   : > { %v4317_v52 = vpack.c.bf16 %v6428_v24, %v6428_v24  ;;  %v3743_v1 = vadd.f32 %v3742_v50, %v3741_v15  ;;  %v6441_v63 = vadd.f32 %v4681_v28, %v6329_v46  ;;  %v3493_v6 = vpop.f32.mrb[67].mxu0  ;;  %v3748_v20 = vsel %vm2509_vm6, %v6428_v24, 0.0 }
 0x233   : > { %v4315_v0 = vpack.c.bf16 %v6436_v60, %v6436_v60  ;;  %v3744_v36 = vsel %vm2509_vm6, %v6436_v60, 0.0  ;;  %v6448_v30 = vadd.f32 %v3493_v6, %v6280_v3  ;;  %v6451_v18 = vadd.f32 %v4615_v59, %v6202_v26 }
 0x234   : > { %3699 = vst.msk [vmem:[%s6270_s13 + $0x48] sm:$0xf] %vm881_vm0, %v4317_v52  ;;  %v3745_v11 = vadd.f32 %v3744_v36, %v3743_v1  ;;  %v4318_v46 = vpack.c.bf16 %v6441_v63, %v6441_v63  ;;  %v3750_v31 = vsel %vm2509_vm6, %v6441_v63, 0.0 }
 0x235   : > { %v4616_v55 = vpop.f32.mrb[68].mxu1  ;;  %3697 = vst.msk [vmem:[%s6270_s13 + $0x40] sm:$0xf] %vm881_vm0, %v4315_v0  ;;  %v4316_v17 = vpack.c.bf16 %v6448_v30, %v6448_v30  ;;  %v3746_v58 = vsel %vm2509_vm6, %v6448_v30, 0.0 }
 0x236   : > { %v4617_v3 = vpop.f32.mrb[69].mxu1  ;;  %3700 = vst.msk [vmem:[%s6270_s13 + $0x4c] sm:$0xf] %vm881_vm0, %v4318_v46  ;;  %v3747_v26 = vadd.f32 %v3746_v58, %v3745_v11 }
 0x237   : > { %v4618_v2 = vadd.f32 %v4617_v3, %v4616_v55  ;;  %v4619_v29 = vpop.f32.mrb[70].mxu1  ;;  %3698 = vst.msk [vmem:[%s6270_s13 + $0x44] sm:$0xf] %vm881_vm0, %v4316_v17  ;;  %v4684_v35 = vpop.f32.mrb[68].mxu0 }
 0x238   : > { %v4620_v4 = vpop.f32.mrb[71].mxu1  ;;  %v3749_v54 = vadd.f32 %v3748_v20, %v3747_v26  ;;  %v6469_v23 = vadd.f32 %v4684_v35, %v3354_v16  ;;  %v3506_v53 = vpop.f32.mrb[69].mxu0 }
 0x239   : > { %v4621_v32 = vadd.f32 %v4620_v4, %v4619_v29  ;;  %v3370_v19 = vadd.f32 %v4618_v2, %v6204_v56  ;;  %v6475_v45 = vadd.f32 %v3506_v53, %v6351_v40  ;;  %v4685_v25 = vpop.f32.mrb[70].mxu0 }
 0x23a   : > { %v4321_v12 = vpack.c.bf16 %v6469_v23, %v6469_v23  ;;  %v3751_v7 = vadd.f32 %v3750_v31, %v3749_v54  ;;  %v6479_v15 = vadd.f32 %v4685_v25, %v3357_v42  ;;  %v3509_v16 = vpop.f32.mrb[71].mxu0  ;;  %v3756_v36 = vsel %vm2509_vm6, %v6469_v23, 0.0 }
 0x23b   : > { %v4319_v61 = vpack.c.bf16 %v6475_v45, %v6475_v45  ;;  %v3752_v56 = vsel %vm2509_vm6, %v6475_v45, 0.0  ;;  %v6486_v59 = vadd.f32 %v3509_v16, %v6371_v37  ;;  %v3373_v40 = vadd.f32 %v4621_v32, %v6206_v51 }
 0x23c   : > { %3703 = vst.msk [vmem:[%s6270_s13 + $0x58] sm:$0xf] %vm881_vm0, %v4321_v12  ;;  %v3753_v50 = vadd.f32 %v3752_v56, %v3751_v7  ;;  %v4322_v42 = vpack.c.bf16 %v6479_v15, %v6479_v15  ;;  %v3758_v2 = vsel %vm2509_vm6, %v6479_v15, 0.0 }
 0x23d   : > { %v4622_v28 = vpop.f32.mrb[72].mxu1  ;;  %3701 = vst.msk [vmem:[%s6270_s13 + $0x50] sm:$0xf] %vm881_vm0, %v4319_v61  ;;  %v4320_v52 = vpack.c.bf16 %v6486_v59, %v6486_v59  ;;  %v3754_v1 = vsel %vm2509_vm6, %v6486_v59, 0.0 }
 0x23e   : > { %v4623_v6 = vpop.f32.mrb[73].mxu1  ;;  %3704 = vst.msk [vmem:[%s6270_s13 + $0x5c] sm:$0xf] %vm881_vm0, %v4322_v42  ;;  %v3755_v37 = vadd.f32 %v3754_v1, %v3753_v50 }
 0x23f   : > { %v4624_v51 = vadd.f32 %v4623_v6, %v4622_v28  ;;  %v4625_v0 = vpop.f32.mrb[74].mxu1  ;;  %3702 = vst.msk [vmem:[%s6270_s13 + $0x54] sm:$0xf] %vm881_vm0, %v4320_v52  ;;  %v4688_v11 = vpop.f32.mrb[72].mxu0 }
 0x240   : > { %v4626_v46 = vpop.f32.mrb[75].mxu1  ;;  %v3757_v55 = vadd.f32 %v3756_v36, %v3755_v37  ;;  %v6505_v17 = vadd.f32 %v4688_v11, %v3370_v19  ;;  %v3522_v58 = vpop.f32.mrb[73].mxu0 }
 0x241   : > { %v4627_v3 = vadd.f32 %v4626_v46, %v4625_v0  ;;  %v3378_v26 = vadd.f32 %v4624_v51, %v6208_v33  ;;  %v6511_v29 = vadd.f32 %v3522_v58, %v6431_v41  ;;  %v4689_v20 = vpop.f32.mrb[74].mxu0 }
 0x242   : > { %v4325_v35 = vpack.c.bf16 %v6505_v17, %v6505_v17  ;;  %v3759_v4 = vadd.f32 %v3758_v2, %v3757_v55  ;;  %v6515_v54 = vadd.f32 %v4689_v20, %v3373_v40  ;;  %v3525_v53 = vpop.f32.mrb[75].mxu0  ;;  %v3764_v40 = vsel %vm2509_vm6, %v6505_v17, 0.0 }
 0x243   : > { %v4323_v32 = vpack.c.bf16 %v6511_v29, %v6511_v29  ;;  %v3760_v33 = vsel %vm2509_vm6, %v6511_v29, 0.0  ;;  %v6522_v19 = vadd.f32 %v3525_v53, %v6451_v18  ;;  %v3381_v41 = vadd.f32 %v4627_v3, %v6210_v43 }
 0x244   : > { %3707 = vst.msk [vmem:[%s6270_s13 + $0x68] sm:$0xf] %vm881_vm0, %v4325_v35  ;;  %v3761_v31 = vadd.f32 %v3760_v33, %v3759_v4  ;;  %v4326_v25 = vpack.c.bf16 %v6515_v54, %v6515_v54  ;;  %v3766_v37 = vsel %vm2509_vm6, %v6515_v54, 0.0 }
 0x245   : > { %v4628_v12 = vpop.f32.mrb[76].mxu1  ;;  %3705 = vst.msk [vmem:[%s6270_s13 + $0x60] sm:$0xf] %vm881_vm0, %v4323_v32  ;;  %v4324_v7 = vpack.c.bf16 %v6522_v19, %v6522_v19  ;;  %v3762_v16 = vsel %vm2509_vm6, %v6522_v19, 0.0 }
 0x246   : > { %v4629_v61 = vpop.f32.mrb[77].mxu1  ;;  %3708 = vst.msk [vmem:[%s6270_s13 + $0x6c] sm:$0xf] %vm881_vm0, %v4326_v25  ;;  %v3763_v18 = vadd.f32 %v3762_v16, %v3761_v31 }
 0x247   : > { %v4630_v43 = vadd.f32 %v4629_v61, %v4628_v12  ;;  %v4631_v56 = vpop.f32.mrb[78].mxu1  ;;  %3706 = vst.msk [vmem:[%s6270_s13 + $0x64] sm:$0xf] %vm881_vm0, %v4324_v7  ;;  %v4692_v50 = vpop.f32.mrb[76].mxu0 }
 0x248   : > { %v4632_v42 = vpop.f32.mrb[79].mxu1  ;;  %v3765_v28 = vadd.f32 %v3764_v40, %v3763_v18  ;;  %v3538_v52 = vpop.f32.mrb[77].mxu0 }
 0x249   : > { %v3386_v1 = vadd.f32 %v4630_v43, %v6212_v34  ;;  %v4633_v6 = vadd.f32 %v4632_v42, %v4631_v56  ;;  %v6544_v51 = vadd.f32 %v3538_v52, %v3378_v26  ;;  %v4693_v0 = vpop.f32.mrb[78].mxu0 }
 0x24a   : > { %v3767_v36 = vadd.f32 %v3766_v37, %v3765_v28  ;;  %v3541_v11 = vpop.f32.mrb[79].mxu0 }
 0x24b   : > { %v6546_v46 = vadd.f32 %v4692_v50, %v3386_v1  ;;  %v3389_v55 = vadd.f32 %v4633_v6, %v6214_v5  ;;  %v4327_v58 = vpack.c.bf16 %v6544_v51, %v6544_v51  ;;  %v3768_v34 = vsel %vm2509_vm6, %v6544_v51, 0.0 }
 0x24c   : > { %v6553_v3 = vadd.f32 %v3541_v11, %v3381_v41  ;;  %v3769_v26 = vadd.f32 %v3768_v34, %v3767_v36 }
 0x24d   : > { %v4329_v2 = vpack.c.bf16 %v6546_v46, %v6546_v46  ;;  %v6557_v20 = vadd.f32 %v4693_v0, %v3389_v55  ;;  %3709 = vst.msk [vmem:[%s6270_s13 + $0x70] sm:$0xf] %vm881_vm0, %v4327_v58  ;;  %v3772_v4 = vsel %vm2509_vm6, %v6546_v46, 0.0 }
 0x24e   : > { %v4328_v5 = vpack.c.bf16 %v6553_v3, %v6553_v3  ;;  %v3770_v35 = vsel %vm2509_vm6, %v6553_v3, 0.0 }
 0x24f   : > { %v3771_v53 = vadd.f32 %v3770_v35, %v3769_v26  ;;  %3711 = vst.msk [vmem:[%s6270_s13 + $0x78] sm:$0xf] %vm881_vm0, %v4329_v2  ;;  %v4330_v32 = vpack.c.bf16 %v6557_v20, %v6557_v20  ;;  %v3774_v33 = vsel %vm2509_vm6, %v6557_v20, 0.0 }
 0x250   : > { %3710 = vst.msk [vmem:[%s6270_s13 + $0x74] sm:$0xf] %vm881_vm0, %v4328_v5 }
 0x251   : > { %v3773_v41 = vadd.f32 %v3772_v4, %v3771_v53  ;;  %3712 = vst.msk [vmem:[%s6270_s13 + $0x7c] sm:$0xf] %vm881_vm0, %v4330_v32  ;;  %vm3918_vm0 = vcmask 517120  }
 0x253   : > { %v3775_v31 = vadd.f32 %v3774_v33, %v3773_v41 }
 0x255   : > { %v3776_v25 = vrot.slane %v3775_v31, 4 }
 0x257   : > { %v3777_v12 = vadd.f32 %v3776_v25, %v3775_v31 }
 0x259   : > { %v3778_v7 = vrot.slane %v3777_v12, 2 }
 0x25b   : > { %v3779_v16 = vadd.f32 %v3778_v7, %v3777_v12 }
 0x25d   : > { %v3780_v61 = vrot.slane %v3779_v16, 1 }
 0x25f   : > { %v3781_v18 = vadd.f32 %v3780_v61, %v3779_v16 }
 0x261   : > { %v6577_v43 = vmul.f32 0.00390625, %v3781_v18 }
 0x263   : > { %v3783_v56 = vsub.f32 %v6273_v9, %v6577_v43  ;;  %v3784_v40 = vsub.f32 %v6285_v38, %v6577_v43  ;;  %v3785_v50 = vsub.f32 %v6261_v27, %v6577_v43  ;;  %v3786_v42 = vsub.f32 %v6278_v8, %v6577_v43 }
 0x264   : > { %v3787_v1 = vsub.f32 %v6314_v47, %v6577_v43  ;;  %v3788_v37 = vsub.f32 %v6326_v21, %v6577_v43  ;;  %v3789_v27 = vsub.f32 %v6306_v10, %v6577_v43  ;;  %v3790_v47 = vsub.f32 %v6319_v14, %v6577_v43 }
 0x265   : > { %v3815_v28 = vmul.f32 %v3783_v56, %v3783_v56  ;;  %v3816_v52 = vmul.f32 %v3784_v40, %v3784_v40  ;;  %v3817_v6 = vmul.f32 %v3785_v50, %v3785_v50  ;;  %v3818_v0 = vmul.f32 %v3786_v42, %v3786_v42 }
 0x266   : > { %v3819_v11 = vmul.f32 %v3787_v1, %v3787_v1  ;;  %v3820_v58 = vmul.f32 %v3788_v37, %v3788_v37  ;;  %v3791_v26 = vsub.f32 %v6356_v49, %v6577_v43  ;;  %v3821_v2 = vmul.f32 %v3789_v27, %v3789_v27 }
 0x267   : > { %v3847_v9 = vsel %vm2509_vm6, %v3815_v28, 0.0  ;;  %v3848_v38 = vsel %vm2509_vm6, %v3816_v52, 0.0  ;;  %v3850_v8 = vsel %vm2509_vm6, %v3817_v6, 0.0  ;;  %v3852_v34 = vsel %vm2509_vm6, %v3818_v0, 0.0 }
 0x268   : > { %v3849_v36 = vadd.f32 %v3848_v38, %v3847_v9  ;;  %v3854_v5 = vsel %vm2509_vm6, %v3819_v11, 0.0  ;;  %v3792_v10 = vsub.f32 %v6368_v57, %v6577_v43  ;;  %v3822_v4 = vmul.f32 %v3790_v47, %v3790_v47 }
 0x269   : > { %v3856_v53 = vsel %vm2509_vm6, %v3820_v58, 0.0  ;;  %v3793_v14 = vsub.f32 %v6348_v44, %v6577_v43  ;;  %v3823_v33 = vmul.f32 %v3791_v26, %v3791_v26  ;;  %v3858_v41 = vsel %vm2509_vm6, %v3821_v2, 0.0 }
 0x26a   : > { %v3851_v55 = vadd.f32 %v3850_v8, %v3849_v36  ;;  %v3794_v49 = vsub.f32 %v6361_v13, %v6577_v43  ;;  %v3824_v25 = vmul.f32 %v3792_v10, %v3792_v10  ;;  %v3860_v12 = vsel %vm2509_vm6, %v3822_v4, 0.0 }
 0x26b   : > { %v3795_v57 = vsub.f32 %v6396_v39, %v6577_v43  ;;  %v3825_v16 = vmul.f32 %v3793_v14, %v3793_v14  ;;  %v3862_v61 = vsel %vm2509_vm6, %v3823_v33, 0.0  ;;  %v3796_v44 = vsub.f32 %v6408_v22, %v6577_v43 }
 0x26c   : > { %v3853_v21 = vadd.f32 %v3852_v34, %v3851_v55  ;;  %v3826_v56 = vmul.f32 %v3794_v49, %v3794_v49  ;;  %v3864_v40 = vsel %vm2509_vm6, %v3824_v25, 0.0  ;;  %v3797_v13 = vsub.f32 %v6390_v62, %v6577_v43 }
 0x26d   : > { %v3827_v42 = vmul.f32 %v3795_v57, %v3795_v57  ;;  %v3866_v28 = vsel %vm2509_vm6, %v3825_v16, 0.0  ;;  %v3798_v39 = vsub.f32 %v6401_v48, %v6577_v43  ;;  %v3828_v1 = vmul.f32 %v3796_v44, %v3796_v44 }
 0x26e   : > { %v3855_v35 = vadd.f32 %v3854_v5, %v3853_v21  ;;  %v3868_v6 = vsel %vm2509_vm6, %v3826_v56, 0.0  ;;  %v3799_v22 = vsub.f32 %v6436_v60, %v6577_v43  ;;  %v3829_v0 = vmul.f32 %v3797_v13, %v3797_v13 }
 0x26f   : > { %v3870_v9 = vsel %vm2509_vm6, %v3827_v42, 0.0  ;;  %v3800_v62 = vsub.f32 %v6448_v30, %v6577_v43  ;;  %v3830_v36 = vmul.f32 %v3798_v39, %v3798_v39  ;;  %v3872_v27 = vsel %vm2509_vm6, %v3828_v1, 0.0 }
 0x270   : > { %v3857_v32 = vadd.f32 %v3856_v53, %v3855_v35  ;;  %v3801_v48 = vsub.f32 %v6428_v24, %v6577_v43  ;;  %v3831_v8 = vmul.f32 %v3799_v22, %v3799_v22  ;;  %v3874_v55 = vsel %vm2509_vm6, %v3829_v0, 0.0 }
 0x271   : > { %v3802_v60 = vsub.f32 %v6441_v63, %v6577_v43  ;;  %v3832_v58 = vmul.f32 %v3800_v62, %v3800_v62  ;;  %v3876_v34 = vsel %vm2509_vm6, %v3830_v36, 0.0  ;;  %v3803_v30 = vsub.f32 %v6475_v45, %v6577_v43 }
 0x272   : > { %v3859_v31 = vadd.f32 %v3858_v41, %v3857_v32  ;;  %v3833_v26 = vmul.f32 %v3801_v48, %v3801_v48  ;;  %v3878_v2 = vsel %vm2509_vm6, %v3831_v8, 0.0  ;;  %v3804_v24 = vsub.f32 %v6486_v59, %v6577_v43 }
 0x273   : > { %v3834_v35 = vmul.f32 %v3802_v60, %v3802_v60  ;;  %v3880_v10 = vsel %vm2509_vm6, %v3832_v58, 0.0  ;;  %v3805_v63 = vsub.f32 %v6469_v23, %v6577_v43  ;;  %v3835_v53 = vmul.f32 %v3803_v30, %v3803_v30 }
 0x274   : > { %v3861_v7 = vadd.f32 %v3860_v12, %v3859_v31  ;;  %v3882_v32 = vsel %vm2509_vm6, %v3833_v26, 0.0  ;;  %v3806_v45 = vsub.f32 %v6479_v15, %v6577_v43  ;;  %v3836_v33 = vmul.f32 %v3804_v24, %v3804_v24 }
 0x275   : > { %v3884_v41 = vsel %vm2509_vm6, %v3834_v35, 0.0  ;;  %v3807_v59 = vsub.f32 %v6511_v29, %v6577_v43  ;;  %v3837_v49 = vmul.f32 %v3805_v63, %v3805_v63  ;;  %v3886_v25 = vsel %vm2509_vm6, %v3835_v53, 0.0 }
 0x276   : > { %v3863_v18 = vadd.f32 %v3862_v61, %v3861_v7  ;;  %v3808_v23 = vsub.f32 %v6522_v19, %v6577_v43  ;;  %v3838_v7 = vmul.f32 %v3806_v45, %v3806_v45  ;;  %v3888_v57 = vsel %vm2509_vm6, %v3836_v33, 0.0 }
 0x277   : > { %v3809_v15 = vsub.f32 %v6505_v17, %v6577_v43  ;;  %v3839_v61 = vmul.f32 %v3807_v59, %v3807_v59  ;;  %v3810_v29 = vsub.f32 %v6515_v54, %v6577_v43  ;;  %v3811_v19 = vsub.f32 %v6544_v51, %v6577_v43 }
 0x278   : > { %v3865_v50 = vadd.f32 %v3864_v40, %v3863_v18  ;;  %v3890_v18 = vsel %vm2509_vm6, %v3837_v49, 0.0  ;;  %v3840_v56 = vmul.f32 %v3808_v23, %v3808_v23  ;;  %v3892_v40 = vsel %vm2509_vm6, %v3838_v7, 0.0 }
 0x279   : > { %v3841_v13 = vmul.f32 %v3809_v15, %v3809_v15  ;;  %v3894_v42 = vsel %vm2509_vm6, %v3839_v61, 0.0  ;;  %v3812_v17 = vsub.f32 %v6553_v3, %v6577_v43  ;;  %v3813_v54 = vsub.f32 %v6546_v46, %v6577_v43 }
 0x27a   : > { %v3867_v52 = vadd.f32 %v3866_v28, %v3865_v50  ;;  %v3896_v39 = vsel %vm2509_vm6, %v3840_v56, 0.0  ;;  %v3814_v51 = vsub.f32 %v6557_v20, %v6577_v43 }
 0x27b   : > { %v3844_v0 = vmul.f32 %v3812_v17, %v3812_v17  ;;  %v3845_v3 = vmul.f32 %v3813_v54, %v3813_v54 }
 0x27c   : > { %v3869_v37 = vadd.f32 %v3868_v6, %v3867_v52  ;;  %v3842_v52 = vmul.f32 %v3810_v29, %v3810_v29  ;;  %v3843_v6 = vmul.f32 %v3811_v19, %v3811_v19 }
 0x27d   : > { %v3906_v48 = vsel %vm2509_vm6, %v3845_v3, 0.0 }
 0x27e   : > { %v3871_v38 = vadd.f32 %v3870_v9, %v3869_v37  ;;  %v3898_v37 = vsel %vm2509_vm6, %v3841_v13, 0.0  ;;  %v3900_v9 = vsel %vm2509_vm6, %v3842_v52, 0.0  ;;  %v3902_v62 = vsel %vm2509_vm6, %v3843_v6, 0.0 }
 0x280   : > { %v3873_v11 = vadd.f32 %v3872_v27, %v3871_v38  ;;  %v3846_v27 = vmul.f32 %v3814_v51, %v3814_v51 }
 0x282   : > { %v3875_v47 = vadd.f32 %v3874_v55, %v3873_v11  ;;  %v3904_v11 = vsel %vm2509_vm6, %v3844_v0, 0.0  ;;  %v3908_v55 = vsel %vm2509_vm6, %v3846_v27, 0.0 }
 0x284   : > { %v3877_v21 = vadd.f32 %v3876_v34, %v3875_v47 }
 0x286   : > { %v3879_v5 = vadd.f32 %v3878_v2, %v3877_v21 }
 0x288   : > { %v3881_v4 = vadd.f32 %v3880_v10, %v3879_v5 }
 0x28a   : > { %v3883_v14 = vadd.f32 %v3882_v32, %v3881_v4 }
 0x28c   : > { %v3885_v31 = vadd.f32 %v3884_v41, %v3883_v14 }
 0x28e   : > { %v3887_v12 = vadd.f32 %v3886_v25, %v3885_v31 }
 0x290   : > { %v3889_v16 = vadd.f32 %v3888_v57, %v3887_v12 }
 0x292   : > { %v3891_v44 = vadd.f32 %v3890_v18, %v3889_v16 }
 0x294   : > { %v3893_v50 = vadd.f32 %v3892_v40, %v3891_v44 }
 0x296   : > { %v3895_v28 = vadd.f32 %v3894_v42, %v3893_v50 }
 0x298   : > { %v3897_v1 = vadd.f32 %v3896_v39, %v3895_v28 }
 0x29a   : > { %v3899_v22 = vadd.f32 %v3898_v37, %v3897_v1 }
 0x29c   : > { %v3901_v38 = vadd.f32 %v3900_v9, %v3899_v22 }
 0x29e   : > { %v3903_v36 = vadd.f32 %v3902_v62, %v3901_v38 }
 0x2a0   : > { %v3905_v46 = vadd.f32 %v3904_v11, %v3903_v36 }
 0x2a2   : > { %v3907_v8 = vadd.f32 %v3906_v48, %v3905_v46 }
 0x2a4   : > { %v3909_v47 = vadd.f32 %v3908_v55, %v3907_v8 }
 0x2a6   : > { %v3910_v20 = vrot.slane %v3909_v47, 4 }
 0x2a8   : > { %v3911_v60 = vadd.f32 %v3910_v20, %v3909_v47 }
 0x2aa   : > { %v3912_v58 = vrot.slane %v3911_v60, 2 }
 0x2ac   : > { %v3913_v34 = vadd.f32 %v3912_v58, %v3911_v60 }
 0x2ae   : > { %v3914_v21 = vrot.slane %v3913_v34, 1 }
 0x2b0   : > { %v3915_v30 = vadd.f32 %v3914_v21, %v3913_v34 }
 0x2b2   : > { %v3917_v26 = vsel %vm669_vm3, %v6577_v43, %v3915_v30 }
 0x2b3   : > { %3919 = vst.msk [vmem:[%s262_s15] sm:$0x3] %vm3918_vm0, %v3917_v26 }
 0x2b4 PF: > { %s17_s21 = sadd.s32 1, %s4938_s21  }
 0x2b5   : > { %p14_p4 = scmp.ge.s32.totalorder %s17_s21, 4  }
 0x2b7   :  { %16 = sbr.rel (!%p14_p4) target bundleno = 1 (0x1), region = 85 }

</bundles_post_ra>
